<compile_context>
chip_gen: v5e
topology: v5e:2x2
jax: 0.10.0
libtpu: 0.0.40
codegen_flags: <defaults>
</compile_context>

<pallas_src>
import jax
import jax.numpy as jnp
from jax.experimental import pallas as pl
from jax.experimental.pallas import tpu as pltpu


_VM = pl.BlockSpec(memory_space=pltpu.MemorySpace.VMEM)


# ---------------------------------------------------------------------------
# The single fused kernel.
# Row layout convention for every conv(-transpose) activation:
#   row index = position * B + batch  (position-major, batch-minor), so a
#   "shifted by one position" window is a contiguous row slice offset by B.
# ---------------------------------------------------------------------------
def cbn_vae_kernel(px_ref, eps_ref,
                   w1_ref, w2_ref, s2_ref, t2_ref, w3_ref, s3_ref, t3_ref,
                   wfc_ref, bfc_ref, wmulv_ref, bmulv_ref,
                   wd1_ref, bd1_ref,
                   wd2_ref, bd2_ref, s0_ref, t0_ref,
                   wt1_ref, sc1_ref, sh1_ref,
                   wt2_ref, b2_ref,
                   wu_ref, b3_ref,
                   out_ref, mu_ref, sig_ref,
                   g0_ref, e1_ref, o1_ref, p2_ref, p3_ref):
    f32 = jnp.float32
    B = eps_ref.shape[0]
    lat = eps_ref.shape[1]
    nb = 20 * B

    def mm(a, b):
        return jnp.dot(a, b, preferred_element_type=f32)

    # ------------------------------ encoder -------------------------------
    # Conv1d(1->16, k=6, s=2) + ReLU: one batched matmul over the phase-major
    # im2col patch matrix built in the wrapper (rows = (phase r, pos w, b)).
    h1 = jnp.maximum(mm(px_ref[...], w1_ref[...]), 0.0)            # (80B, 16)
    a0 = h1[0:19 * B]                    # conv1 outputs at positions 4w
    a0s = h1[B:nb]                       # ... shifted by one phase position
    a1 = h1[nb:nb + 19 * B]              # positions 4w+1
    a1s = h1[nb + B:2 * nb]
    a2 = h1[2 * nb:2 * nb + 19 * B]      # positions 4w+2
    a3 = h1[3 * nb:3 * nb + 19 * B]      # positions 4w+3

    # Conv1d(16->32, k=4, s=2) + BN(32) + ReLU; even / odd output phases as
    # accumulated per-tap dots (no in-kernel concats).
    s2 = s2_ref[...]
    t2 = t2_ref[...]
    z2e = mm(a0, w2_ref[0]) + mm(a1, w2_ref[1]) + mm(a2, w2_ref[2]) + mm(a3, w2_ref[3])
    z2o = mm(a2, w2_ref[0]) + mm(a3, w2_ref[1]) + mm(a0s, w2_ref[2]) + mm(a1s, w2_ref[3])
    y2e = jnp.maximum(z2e * s2 + t2, 0.0)                          # (19B, 32)
    y2o = jnp.maximum(z2o * s2 + t2, 0.0)                          # (19B, 32)

    # Conv1d(32->64, k=4, s=2) + BN(64) + ReLU.
    z3 = (mm(y2e[0:18 * B], w3_ref[0]) + mm(y2o[0:18 * B], w3_ref[1])
          + mm(y2e[B:19 * B], w3_ref[2]) + mm(y2o[B:19 * B], w3_ref[3]))
    h3 = jnp.maximum(z3 * s3_ref[...] + t3_ref[...], 0.0)          # (18B, 64)

    # Flatten + Linear(1152->256) + ReLU: one (B,64)@(64,256) dot per conv
    # position accumulated in f32 (weights stored bf16).
    h3b = h3.astype(jnp.bfloat16)
    acc = jnp.zeros((B, 256), f32)
    for w in range(18):
        acc = acc + mm(h3b[w * B:(w + 1) * B], wfc_ref[w])
    fc1 = jnp.maximum(acc + bfc_ref[...], 0.0)                     # (B, 256)

    # Variational layer: fused mu / log-var heads, reparameterisation.
    # TODO(synk): VariationalLayer definition not provided; standard
    # z = mu + sigma * eps with sigma = exp(0.5 * log_var) assumed.
    ml = mm(fc1, wmulv_ref[...]) + bmulv_ref[...]                  # (B, 2*lat)
    mu = ml[:, 0:lat]
    sigma = jnp.exp(0.5 * ml[:, lat:2 * lat])
    mu_ref[...] = mu
    sig_ref[...] = sigma
    z = mu + sigma * eps_ref[...]

    # ------------------------------ decoder -------------------------------
    d1 = jnp.maximum(mm(z, wd1_ref[...]) + bd1_ref[...], 0.0)      # (B, 256)
    d1b = d1.astype(jnp.bfloat16)

    # Linear(256->1152) -> reshape(64,18) -> BN(64) -> ReLU, written straight
    # into the zero-padded, position-major conv-transpose input buffer g0.
    s0 = s0_ref[...]
    t0 = t0_ref[...]
    zero64 = jnp.zeros((B, 64), f32)
    g0_ref[0:B] = zero64
    g0_ref[19 * B:nb] = zero64
    for v in range(18):
        blk = mm(d1b, wd2_ref[v]) + bd2_ref[v:v + 1]
        g0_ref[(v + 1) * B:(v + 2) * B] = jnp.maximum(blk * s0 + t0, 0.0)

    # ConvTranspose1d(64->32, k=4, s=2) + bias + BN(32) + ReLU (bias folded
    # into the BN shift).  Even / odd output phases into padded buffers.
    gc = g0_ref[B:nb]                     # d2[s]
    gp = g0_ref[0:19 * B]                 # d2[s-1]   (incl. leading zero pad)
    sc1 = sc1_ref[...]
    sh1 = sh1_ref[...]
    y1e = jnp.maximum((mm(gc, wt1_ref[0]) + mm(gp, wt1_ref[2])) * sc1 + sh1, 0.0)
    y1o = jnp.maximum((mm(gc, wt1_ref[1]) + mm(gp, wt1_ref[3])) * sc1 + sh1, 0.0)
    zero32 = jnp.zeros((B, 32), f32)
    e1_ref[0:19 * B] = y1e
    e1_ref[19 * B:nb] = zero32            # y1[38] = 0 pad
    o1_ref[0:B] = zero32                  # y1[-1] = 0 pad
    o1_ref[B:nb] = y1o

    # ConvTranspose1d(32->16, k=4, s=2) + bias + ReLU, mod-4 output phases.
    e1f = e1_ref[...]
    o1f = o1_ref[...]
    b2 = b2_ref[...]
    q0 = jnp.maximum(mm(e1f, wt2_ref[0]) + mm(o1f, wt2_ref[2]) + b2, 0.0)  # (20B,16)
    q1 = jnp.maximum(mm(e1f, wt2_ref[1]) + mm(o1f, wt2_ref[3]) + b2, 0.0)  # (20B,16)
    oc = o1_ref[B:nb]
    ec = e1_ref[0:19 * B]
    q2 = jnp.maximum(mm(oc, wt2_ref[0]) + mm(ec, wt2_ref[2]) + b2, 0.0)    # (19B,16)
    q3 = jnp.maximum(mm(oc, wt2_ref[1]) + mm(ec, wt2_ref[3]) + b2, 0.0)    # (19B,16)
    zero16 = jnp.zeros((B, 16), f32)
    p2_ref[0:B] = zero16
    p2_ref[B:nb] = q2
    p2_ref[nb:21 * B] = zero16
    p3_ref[0:B] = zero16
    p3_ref[B:nb] = q3
    p3_ref[nb:21 * B] = zero16

    # ConvTranspose1d(16->1, k=6, s=2) + bias: 6 accumulated dots whose 8
    # output columns are the interleaved final positions 8t + u.
    out = (mm(q0, wu_ref[0]) + mm(q1, wu_ref[1])
           + mm(p2_ref[B:21 * B], wu_ref[2]) + mm(p3_ref[B:21 * B], wu_ref[3])
           + mm(p3_ref[0:nb], wu_ref[4]) + mm(p2_ref[0:nb], wu_ref[5])
           + b3_ref[...])                                          # (20B, 8)
    out_ref[...] = out


# ---------------------------------------------------------------------------
# Parameter preparation (PyTorch-style params -> matmul-ready matrices)
# ---------------------------------------------------------------------------
def _bn_scale_shift(gamma, beta, mean, var, eps=1e-5):
    scale = gamma * jax.lax.rsqrt(var + eps)
    return scale, beta - mean * scale


def _prepare(p):
    pa = {}
    # Encoder convs: per-tap (C_in, C_out) matmul matrices, stacked on tap.
    pa['w1'] = jnp.transpose(p['conv1_w'][:, 0, :], (1, 0))            # (6, 16)
    pa['w2'] = jnp.transpose(p['conv2_w'], (2, 1, 0))                  # (4, 16, 32)
    pa['w3'] = jnp.transpose(p['conv3_w'], (2, 1, 0))                  # (4, 32, 64)
    s2, t2 = _bn_scale_shift(p['bn2_gamma'], p['bn2_beta'], p['bn2_mean'], p['bn2_var'])
    s3, t3 = _bn_scale_shift(p['bn3_gamma'], p['bn3_beta'], p['bn3_mean'], p['bn3_var'])
    pa['s2'], pa['t2'] = s2[None, :], t2[None, :]
    pa['s3'], pa['t3'] = s3[None, :], t3[None, :]

    # Encoder FC (1152 -> 256): rows reordered from the PyTorch flatten order
    # (c*18 + w) to the kernel's position-major order (w, c); stored bf16.
    pa['wfc'] = (p['wfc'].reshape(64, 18, 256)
                 .transpose(1, 0, 2)).astype(jnp.bfloat16)             # (18, 64, 256)
    pa['bfc'] = p['bfc'][None, :]

    # Variational heads fused into one matmul.
    pa['wmulv'] = jnp.concatenate([p['wmu'], p['wlv']], axis=1)        # (256, 2*lat)
    pa['bmulv'] = jnp.concatenate([p['bmu'], p['blv']])[None, :]

    pa['wd1'] = p['wd1']
    pa['bd1'] = p['bd1'][None, :]

    # Decoder FC (256 -> 1152): columns reordered to (position, channel); bf16.
    pa['wd2'] = (p['wd2'].reshape(256, 64, 18)
                 .transpose(2, 0, 1)).astype(jnp.bfloat16)             # (18, 256, 64)
    pa['bd2'] = p['bd2'].reshape(64, 18).T                             # (18, 64)
    s0, t0 = _bn_scale_shift(p['bn0_gamma'], p['bn0_beta'], p['bn0_mean'], p['bn0_var'])
    pa['s0'], pa['t0'] = s0[None, :], t0[None, :]

    # ConvTranspose1d weights as per-tap (C_in, C_out) matrices.
    pa['wt1'] = jnp.transpose(p['convt1_w'], (2, 0, 1))                # (4, 64, 32)
    s1, t1 = _bn_scale_shift(p['bnt1_gamma'], p['bnt1_beta'],
                             p['bnt1_mean'], p['bnt1_var'])
    pa['sc1'] = s1[None, :]
    pa['sh1'] = (p['convt1_b'] * s1 + t1)[None, :]                     # bias folded into BN shift
    pa['wt2'] = jnp.transpose(p['convt2_w'], (2, 0, 1))                # (4, 32, 16)
    pa['b2'] = p['convt2_b'][None, :]

    # Final ConvTranspose1d(16 -> 1, k=6, s=2): six (16, 8) matrices, one per
    # input slice; the 8 columns are the interleaved output positions 8t + u.
    u = [p['convto_w'][:, 0, j] for j in range(6)]
    z = jnp.zeros_like(u[0])
    cols = lambda *c: jnp.stack(c, axis=1)
    pa['wu'] = jnp.stack([
        cols(u[0], u[1], u[2], u[3], u[4], u[5], z, z),     # y2d phase0[t]
        cols(z, z, u[0], u[1], u[2], u[3], u[4], u[5]),     # y2d phase1[t]
        cols(z, z, z, z, u[0], u[1], u[2], u[3]),           # y2d phase2[t]
        cols(z, z, z, z, z, z, u[0], u[1]),                 # y2d phase3[t]
        cols(u[2], u[3], u[4], u[5], z, z, z, z),           # y2d phase3[t-1]
        cols(u[4], u[5], z, z, z, z, z, z),                 # y2d phase2[t-1]
    ], axis=0)                                                          # (6, 16, 8)
    pa['b3'] = jnp.full((1, 8), p['convto_b'][0], jnp.float32)
    return pa


# ---------------------------------------------------------------------------
# Full forward: returns (reconstruction, mu, sigma) like CBN_VAE.forward
# ---------------------------------------------------------------------------
def cbn_vae_forward(x, eps, params):
    pa = _prepare(params)
    B = x.shape[0]
    lat = eps.shape[1]

    # Conv1 im2col patches (mod-4 output-phase major, batch minor), built once
    # from the raw input.  Every later intermediate stays in VMEM inside the
    # single fused kernel.  Rows for invalid (padded) positions are never read.
    xp = jnp.pad(x, ((0, 0), (0, 8)))
    idx = (2 * jnp.arange(4)[:, None, None]
           + 8 * jnp.arange(20)[None, :, None]
           + jnp.arange(6)[None, None, :])                             # (4, 20, 6)
    px = jnp.transpose(xp[:, idx], (1, 2, 0, 3)).reshape(80 * B, 6)

    args = (px, eps,
            pa['w1'], pa['w2'], pa['s2'], pa['t2'], pa['w3'], pa['s3'], pa['t3'],
            pa['wfc'], pa['bfc'], pa['wmulv'], pa['bmulv'],
            pa['wd1'], pa['bd1'],
            pa['wd2'], pa['bd2'], pa['s0'], pa['t0'],
            pa['wt1'], pa['sc1'], pa['sh1'],
            pa['wt2'], pa['b2'],
            pa['wu'], pa['b3'])

    out, mu, sigma = pl.pallas_call(
        cbn_vae_kernel,
        out_shape=(jax.ShapeDtypeStruct((20 * B, 8), jnp.float32),
                   jax.ShapeDtypeStruct((B, lat), jnp.float32),
                   jax.ShapeDtypeStruct((B, lat), jnp.float32)),
        in_specs=[_VM] * len(args),
        out_specs=(_VM, _VM, _VM),
        scratch_shapes=[pltpu.VMEM((20 * B, 64), jnp.float32),   # padded decoder FC out
                        pltpu.VMEM((20 * B, 32), jnp.float32),   # y1 even phase (padded)
                        pltpu.VMEM((20 * B, 32), jnp.float32),   # y1 odd phase  (padded)
                        pltpu.VMEM((21 * B, 16), jnp.float32),   # y2d phase2    (padded)
                        pltpu.VMEM((21 * B, 16), jnp.float32)],  # y2d phase3    (padded)
    )(*args)

    # Tiny final interleave of the 8 phase columns back to (B, 160) (2.5 KB).
    recon = out.reshape(20, B, 8).transpose(1, 0, 2).reshape(B, 160)
    # TODO(synk): ConvTransposeDecoderOutput definition not provided; modeled
    # as ConvTranspose1d(16 -> 1, k=6, s=2) + flatten (no extra activation).
    return recon, mu, sigma


# ---------------------------------------------------------------------------
# Deterministic parameter init (shapes follow the PyTorch module)
# ---------------------------------------------------------------------------
def _uniform(key, shape, scale):
    return jax.random.uniform(key, shape, jnp.float32, minval=-scale, maxval=scale)


def make_params(key, latent_dim=16):
    ks = iter(jax.random.split(key, 32))
    p = {}
    # Encoder convs (PyTorch Conv1d layout: (C_out, C_in, K), no bias).
    p['conv1_w'] = _uniform(next(ks), (16, 1, 6), (1 * 6) ** -0.5)
    p['conv2_w'] = _uniform(next(ks), (32, 16, 4), (16 * 4) ** -0.5)
    p['conv3_w'] = _uniform(next(ks), (64, 32, 4), (32 * 4) ** -0.5)
    # BatchNorm params (fresh module, inference mode).
    for name, c in (('bn2', 32), ('bn3', 64), ('bn0', 64), ('bnt1', 32)):
        p[f'{name}_gamma'] = jnp.ones((c,), jnp.float32)
        p[f'{name}_beta'] = jnp.zeros((c,), jnp.float32)
        p[f'{name}_mean'] = jnp.zeros((c,), jnp.float32)
        p[f'{name}_var'] = jnp.ones((c,), jnp.float32)
    # Encoder FC + variational heads, stored (in, out); the 1152 index follows
    # PyTorch's flatten order (channel*18 + position) and is permuted in
    # _prepare() to the kernel layout.
    p['wfc'] = _uniform(next(ks), (1152, 256), 1152 ** -0.5)
    p['bfc'] = _uniform(next(ks), (256,), 1152 ** -0.5)
    p['wmu'] = _uniform(next(ks), (256, latent_dim), 256 ** -0.5)
    p['bmu'] = _uniform(next(ks), (latent_dim,), 256 ** -0.5)
    p['wlv'] = _uniform(next(ks), (256, latent_dim), 256 ** -0.5)
    p['blv'] = _uniform(next(ks), (latent_dim,), 256 ** -0.5)
    # Decoder FCs.
    p['wd1'] = _uniform(next(ks), (latent_dim, 256), latent_dim ** -0.5)
    p['bd1'] = _uniform(next(ks), (256,), latent_dim ** -0.5)
    p['wd2'] = _uniform(next(ks), (256, 1152), 256 ** -0.5)
    p['bd2'] = _uniform(next(ks), (1152,), 256 ** -0.5)
    # Decoder conv-transposes (PyTorch ConvTranspose1d layout: (C_in, C_out, K)).
    p['convt1_w'] = _uniform(next(ks), (64, 32, 4), (64 * 4) ** -0.5)
    p['convt1_b'] = _uniform(next(ks), (32,), (64 * 4) ** -0.5)
    p['convt2_w'] = _uniform(next(ks), (32, 16, 4), (32 * 4) ** -0.5)
    p['convt2_b'] = _uniform(next(ks), (16,), (32 * 4) ** -0.5)
    p['convto_w'] = _uniform(next(ks), (16, 1, 6), (16 * 6) ** -0.5)
    p['convto_b'] = _uniform(next(ks), (1,), (16 * 6) ** -0.5)
    return p


if __name__ == "__main__":
    # original_dim = 160 is fixed by the architecture (Flatten(out_features=64*18)).
    ORIGINAL_DIM, LATENT_DIM, BATCH = 160, 16, 4
    key = jax.random.PRNGKey(0)
    kx, kp, ke = jax.random.split(key, 3)
    x = jax.random.normal(kx, (BATCH, ORIGINAL_DIM), jnp.float32)
    eps = jax.random.normal(ke, (BATCH, LATENT_DIM), jnp.float32)
    params = make_params(kp, LATENT_DIM)

    recon, mu, sigma = jax.jit(cbn_vae_forward)(x, eps, params)
    jax.block_until_ready((recon, mu, sigma))
    assert recon.shape == (BATCH, ORIGINAL_DIM) and recon.dtype == jnp.float32
    assert mu.shape == (BATCH, LATENT_DIM)
    assert sigma.shape == (BATCH, LATENT_DIM)
    assert bool(jnp.all(jnp.isfinite(recon)))
    print("KERNEL_OK")
</pallas_src>

<mosaic_0001>
module attributes {stable_mosaic.version = 11 : i64} {
  func.func @cbn_vae_kernel(%arg0: memref<320x6xf32, #tpu.memory_space<vmem>>, %arg1: memref<4x16xf32, #tpu.memory_space<vmem>>, %arg2: memref<6x16xf32, #tpu.memory_space<vmem>>, %arg3: memref<4x16x32xf32, #tpu.memory_space<vmem>>, %arg4: memref<1x32xf32, #tpu.memory_space<vmem>>, %arg5: memref<1x32xf32, #tpu.memory_space<vmem>>, %arg6: memref<4x32x64xf32, #tpu.memory_space<vmem>>, %arg7: memref<1x64xf32, #tpu.memory_space<vmem>>, %arg8: memref<1x64xf32, #tpu.memory_space<vmem>>, %arg9: memref<18x64x256xbf16, #tpu.memory_space<vmem>>, %arg10: memref<1x256xf32, #tpu.memory_space<vmem>>, %arg11: memref<256x32xf32, #tpu.memory_space<vmem>>, %arg12: memref<1x32xf32, #tpu.memory_space<vmem>>, %arg13: memref<16x256xf32, #tpu.memory_space<vmem>>, %arg14: memref<1x256xf32, #tpu.memory_space<vmem>>, %arg15: memref<18x256x64xbf16, #tpu.memory_space<vmem>>, %arg16: memref<18x64xf32, #tpu.memory_space<vmem>>, %arg17: memref<1x64xf32, #tpu.memory_space<vmem>>, %arg18: memref<1x64xf32, #tpu.memory_space<vmem>>, %arg19: memref<4x64x32xf32, #tpu.memory_space<vmem>>, %arg20: memref<1x32xf32, #tpu.memory_space<vmem>>, %arg21: memref<1x32xf32, #tpu.memory_space<vmem>>, %arg22: memref<4x32x16xf32, #tpu.memory_space<vmem>>, %arg23: memref<1x16xf32, #tpu.memory_space<vmem>>, %arg24: memref<6x16x8xf32, #tpu.memory_space<vmem>>, %arg25: memref<1x8xf32, #tpu.memory_space<vmem>>, %arg26: memref<80x8xf32, #tpu.memory_space<vmem>>, %arg27: memref<4x16xf32, #tpu.memory_space<vmem>>, %arg28: memref<4x16xf32, #tpu.memory_space<vmem>>, %arg29: memref<80x64xf32, #tpu.memory_space<vmem>>, %arg30: memref<80x32xf32, #tpu.memory_space<vmem>>, %arg31: memref<80x32xf32, #tpu.memory_space<vmem>>, %arg32: memref<84x16xf32, #tpu.memory_space<vmem>>, %arg33: memref<84x16xf32, #tpu.memory_space<vmem>>) attributes {dimension_semantics = [], scalar_prefetch = 0 : i64, scratch_operands = 5 : i64, tpu.core_type = #tpu.core_type<tc>} {
    %c0 = arith.constant 0 : index
    %c0_0 = arith.constant 0 : index
    %0 = vector.load %arg0[%c0, %c0_0] : memref<320x6xf32, #tpu.memory_space<vmem>>, vector<320x6xf32>
    %c0_1 = arith.constant 0 : index
    %c0_2 = arith.constant 0 : index
    %1 = vector.load %arg2[%c0_1, %c0_2] : memref<6x16xf32, #tpu.memory_space<vmem>>, vector<6x16xf32>
    %cst = arith.constant dense<0.000000e+00> : vector<320x16xf32>
    %2 = tpu.matmul %0, %1, %cst {dimension_numbers = #tpu.dot_dimension_numbers<[1], [0], [0], [1], [0, 0, 1, 1], [], []>} : vector<320x6xf32>, vector<6x16xf32>, vector<320x16xf32> -> vector<320x16xf32>
    %cst_3 = arith.constant 0.000000e+00 : f32
    %3 = vector.broadcast %cst_3 : f32 to vector<320x16xf32>
    %4 = arith.maximumf %2, %3 : vector<320x16xf32>
    %5 = vector.extract_strided_slice %4 {offsets = [0, 0], sizes = [76, 16], strides = [1, 1]} : vector<320x16xf32> to vector<76x16xf32>
    %6 = vector.extract_strided_slice %4 {offsets = [4, 0], sizes = [76, 16], strides = [1, 1]} : vector<320x16xf32> to vector<76x16xf32>
    %7 = vector.extract_strided_slice %4 {offsets = [80, 0], sizes = [76, 16], strides = [1, 1]} : vector<320x16xf32> to vector<76x16xf32>
    %8 = vector.extract_strided_slice %4 {offsets = [84, 0], sizes = [76, 16], strides = [1, 1]} : vector<320x16xf32> to vector<76x16xf32>
    %9 = vector.extract_strided_slice %4 {offsets = [160, 0], sizes = [76, 16], strides = [1, 1]} : vector<320x16xf32> to vector<76x16xf32>
    %10 = vector.extract_strided_slice %4 {offsets = [240, 0], sizes = [76, 16], strides = [1, 1]} : vector<320x16xf32> to vector<76x16xf32>
    %c0_4 = arith.constant 0 : index
    %c0_5 = arith.constant 0 : index
    %11 = vector.load %arg4[%c0_4, %c0_5] : memref<1x32xf32, #tpu.memory_space<vmem>>, vector<1x32xf32>
    %c0_6 = arith.constant 0 : index
    %c0_7 = arith.constant 0 : index
    %12 = vector.load %arg5[%c0_6, %c0_7] : memref<1x32xf32, #tpu.memory_space<vmem>>, vector<1x32xf32>
    %c0_8 = arith.constant 0 : index
    %c0_9 = arith.constant 0 : index
    %c0_10 = arith.constant 0 : index
    %13 = vector.load %arg3[%c0_8, %c0_9, %c0_10] : memref<4x16x32xf32, #tpu.memory_space<vmem>>, vector<1x16x32xf32>
    %14 = vector.shape_cast %13 : vector<1x16x32xf32> to vector<16x32xf32>
    %cst_11 = arith.constant dense<0.000000e+00> : vector<76x32xf32>
    %15 = tpu.matmul %5, %14, %cst_11 {dimension_numbers = #tpu.dot_dimension_numbers<[1], [0], [0], [1], [0, 0, 1, 1], [], []>} : vector<76x16xf32>, vector<16x32xf32>, vector<76x32xf32> -> vector<76x32xf32>
    %c1 = arith.constant 1 : index
    %c0_12 = arith.constant 0 : index
    %c0_13 = arith.constant 0 : index
    %16 = vector.load %arg3[%c1, %c0_12, %c0_13] : memref<4x16x32xf32, #tpu.memory_space<vmem>>, vector<1x16x32xf32>
    %17 = vector.shape_cast %16 : vector<1x16x32xf32> to vector<16x32xf32>
    %cst_14 = arith.constant dense<0.000000e+00> : vector<76x32xf32>
    %18 = tpu.matmul %7, %17, %cst_14 {dimension_numbers = #tpu.dot_dimension_numbers<[1], [0], [0], [1], [0, 0, 1, 1], [], []>} : vector<76x16xf32>, vector<16x32xf32>, vector<76x32xf32> -> vector<76x32xf32>
    %19 = arith.addf %15, %18 : vector<76x32xf32>
    %c2 = arith.constant 2 : index
    %c0_15 = arith.constant 0 : index
    %c0_16 = arith.constant 0 : index
    %20 = vector.load %arg3[%c2, %c0_15, %c0_16] : memref<4x16x32xf32, #tpu.memory_space<vmem>>, vector<1x16x32xf32>
    %21 = vector.shape_cast %20 : vector<1x16x32xf32> to vector<16x32xf32>
    %cst_17 = arith.constant dense<0.000000e+00> : vector<76x32xf32>
    %22 = tpu.matmul %9, %21, %cst_17 {dimension_numbers = #tpu.dot_dimension_numbers<[1], [0], [0], [1], [0, 0, 1, 1], [], []>} : vector<76x16xf32>, vector<16x32xf32>, vector<76x32xf32> -> vector<76x32xf32>
    %23 = arith.addf %19, %22 : vector<76x32xf32>
    %c3 = arith.constant 3 : index
    %c0_18 = arith.constant 0 : index
    %c0_19 = arith.constant 0 : index
    %24 = vector.load %arg3[%c3, %c0_18, %c0_19] : memref<4x16x32xf32, #tpu.memory_space<vmem>>, vector<1x16x32xf32>
    %25 = vector.shape_cast %24 : vector<1x16x32xf32> to vector<16x32xf32>
    %cst_20 = arith.constant dense<0.000000e+00> : vector<76x32xf32>
    %26 = tpu.matmul %10, %25, %cst_20 {dimension_numbers = #tpu.dot_dimension_numbers<[1], [0], [0], [1], [0, 0, 1, 1], [], []>} : vector<76x16xf32>, vector<16x32xf32>, vector<76x32xf32> -> vector<76x32xf32>
    %27 = arith.addf %23, %26 : vector<76x32xf32>
    %c0_21 = arith.constant 0 : index
    %c0_22 = arith.constant 0 : index
    %c0_23 = arith.constant 0 : index
    %28 = vector.load %arg3[%c0_21, %c0_22, %c0_23] : memref<4x16x32xf32, #tpu.memory_space<vmem>>, vector<1x16x32xf32>
    %29 = vector.shape_cast %28 : vector<1x16x32xf32> to vector<16x32xf32>
    %cst_24 = arith.constant dense<0.000000e+00> : vector<76x32xf32>
    %30 = tpu.matmul %9, %29, %cst_24 {dimension_numbers = #tpu.dot_dimension_numbers<[1], [0], [0], [1], [0, 0, 1, 1], [], []>} : vector<76x16xf32>, vector<16x32xf32>, vector<76x32xf32> -> vector<76x32xf32>
    %c1_25 = arith.constant 1 : index
    %c0_26 = arith.constant 0 : index
    %c0_27 = arith.constant 0 : index
    %31 = vector.load %arg3[%c1_25, %c0_26, %c0_27] : memref<4x16x32xf32, #tpu.memory_space<vmem>>, vector<1x16x32xf32>
    %32 = vector.shape_cast %31 : vector<1x16x32xf32> to vector<16x32xf32>
    %cst_28 = arith.constant dense<0.000000e+00> : vector<76x32xf32>
    %33 = tpu.matmul %10, %32, %cst_28 {dimension_numbers = #tpu.dot_dimension_numbers<[1], [0], [0], [1], [0, 0, 1, 1], [], []>} : vector<76x16xf32>, vector<16x32xf32>, vector<76x32xf32> -> vector<76x32xf32>
    %34 = arith.addf %30, %33 : vector<76x32xf32>
    %c2_29 = arith.constant 2 : index
    %c0_30 = arith.constant 0 : index
    %c0_31 = arith.constant 0 : index
    %35 = vector.load %arg3[%c2_29, %c0_30, %c0_31] : memref<4x16x32xf32, #tpu.memory_space<vmem>>, vector<1x16x32xf32>
    %36 = vector.shape_cast %35 : vector<1x16x32xf32> to vector<16x32xf32>
    %cst_32 = arith.constant dense<0.000000e+00> : vector<76x32xf32>
    %37 = tpu.matmul %6, %36, %cst_32 {dimension_numbers = #tpu.dot_dimension_numbers<[1], [0], [0], [1], [0, 0, 1, 1], [], []>} : vector<76x16xf32>, vector<16x32xf32>, vector<76x32xf32> -> vector<76x32xf32>
    %38 = arith.addf %34, %37 : vector<76x32xf32>
    %c3_33 = arith.constant 3 : index
    %c0_34 = arith.constant 0 : index
    %c0_35 = arith.constant 0 : index
    %39 = vector.load %arg3[%c3_33, %c0_34, %c0_35] : memref<4x16x32xf32, #tpu.memory_space<vmem>>, vector<1x16x32xf32>
    %40 = vector.shape_cast %39 : vector<1x16x32xf32> to vector<16x32xf32>
    %cst_36 = arith.constant dense<0.000000e+00> : vector<76x32xf32>
    %41 = tpu.matmul %8, %40, %cst_36 {dimension_numbers = #tpu.dot_dimension_numbers<[1], [0], [0], [1], [0, 0, 1, 1], [], []>} : vector<76x16xf32>, vector<16x32xf32>, vector<76x32xf32> -> vector<76x32xf32>
    %42 = arith.addf %38, %41 : vector<76x32xf32>
    %43 = vector.broadcast %11 : vector<1x32xf32> to vector<76x32xf32>
    %44 = arith.mulf %27, %43 : vector<76x32xf32>
    %45 = vector.broadcast %12 : vector<1x32xf32> to vector<76x32xf32>
    %46 = arith.addf %44, %45 : vector<76x32xf32>
    %cst_37 = arith.constant 0.000000e+00 : f32
    %47 = vector.broadcast %cst_37 : f32 to vector<76x32xf32>
    %48 = arith.maximumf %46, %47 : vector<76x32xf32>
    %49 = vector.broadcast %11 : vector<1x32xf32> to vector<76x32xf32>
    %50 = arith.mulf %42, %49 : vector<76x32xf32>
    %51 = vector.broadcast %12 : vector<1x32xf32> to vector<76x32xf32>
    %52 = arith.addf %50, %51 : vector<76x32xf32>
    %cst_38 = arith.constant 0.000000e+00 : f32
    %53 = vector.broadcast %cst_38 : f32 to vector<76x32xf32>
    %54 = arith.maximumf %52, %53 : vector<76x32xf32>
    %55 = vector.extract_strided_slice %48 {offsets = [0, 0], sizes = [72, 32], strides = [1, 1]} : vector<76x32xf32> to vector<72x32xf32>
    %c0_39 = arith.constant 0 : index
    %c0_40 = arith.constant 0 : index
    %c0_41 = arith.constant 0 : index
    %56 = vector.load %arg6[%c0_39, %c0_40, %c0_41] : memref<4x32x64xf32, #tpu.memory_space<vmem>>, vector<1x32x64xf32>
    %57 = vector.shape_cast %56 : vector<1x32x64xf32> to vector<32x64xf32>
    %cst_42 = arith.constant dense<0.000000e+00> : vector<72x64xf32>
    %58 = tpu.matmul %55, %57, %cst_42 {dimension_numbers = #tpu.dot_dimension_numbers<[1], [0], [0], [1], [0, 0, 1, 1], [], []>} : vector<72x32xf32>, vector<32x64xf32>, vector<72x64xf32> -> vector<72x64xf32>
    %59 = vector.extract_strided_slice %54 {offsets = [0, 0], sizes = [72, 32], strides = [1, 1]} : vector<76x32xf32> to vector<72x32xf32>
    %c1_43 = arith.constant 1 : index
    %c0_44 = arith.constant 0 : index
    %c0_45 = arith.constant 0 : index
    %60 = vector.load %arg6[%c1_43, %c0_44, %c0_45] : memref<4x32x64xf32, #tpu.memory_space<vmem>>, vector<1x32x64xf32>
    %61 = vector.shape_cast %60 : vector<1x32x64xf32> to vector<32x64xf32>
    %cst_46 = arith.constant dense<0.000000e+00> : vector<72x64xf32>
    %62 = tpu.matmul %59, %61, %cst_46 {dimension_numbers = #tpu.dot_dimension_numbers<[1], [0], [0], [1], [0, 0, 1, 1], [], []>} : vector<72x32xf32>, vector<32x64xf32>, vector<72x64xf32> -> vector<72x64xf32>
    %63 = arith.addf %58, %62 : vector<72x64xf32>
    %64 = vector.extract_strided_slice %48 {offsets = [4, 0], sizes = [72, 32], strides = [1, 1]} : vector<76x32xf32> to vector<72x32xf32>
    %c2_47 = arith.constant 2 : index
    %c0_48 = arith.constant 0 : index
    %c0_49 = arith.constant 0 : index
    %65 = vector.load %arg6[%c2_47, %c0_48, %c0_49] : memref<4x32x64xf32, #tpu.memory_space<vmem>>, vector<1x32x64xf32>
    %66 = vector.shape_cast %65 : vector<1x32x64xf32> to vector<32x64xf32>
    %cst_50 = arith.constant dense<0.000000e+00> : vector<72x64xf32>
    %67 = tpu.matmul %64, %66, %cst_50 {dimension_numbers = #tpu.dot_dimension_numbers<[1], [0], [0], [1], [0, 0, 1, 1], [], []>} : vector<72x32xf32>, vector<32x64xf32>, vector<72x64xf32> -> vector<72x64xf32>
    %68 = arith.addf %63, %67 : vector<72x64xf32>
    %69 = vector.extract_strided_slice %54 {offsets = [4, 0], sizes = [72, 32], strides = [1, 1]} : vector<76x32xf32> to vector<72x32xf32>
    %c3_51 = arith.constant 3 : index
    %c0_52 = arith.constant 0 : index
    %c0_53 = arith.constant 0 : index
    %70 = vector.load %arg6[%c3_51, %c0_52, %c0_53] : memref<4x32x64xf32, #tpu.memory_space<vmem>>, vector<1x32x64xf32>
    %71 = vector.shape_cast %70 : vector<1x32x64xf32> to vector<32x64xf32>
    %cst_54 = arith.constant dense<0.000000e+00> : vector<72x64xf32>
    %72 = tpu.matmul %69, %71, %cst_54 {dimension_numbers = #tpu.dot_dimension_numbers<[1], [0], [0], [1], [0, 0, 1, 1], [], []>} : vector<72x32xf32>, vector<32x64xf32>, vector<72x64xf32> -> vector<72x64xf32>
    %73 = arith.addf %68, %72 : vector<72x64xf32>
    %c0_55 = arith.constant 0 : index
    %c0_56 = arith.constant 0 : index
    %74 = vector.load %arg7[%c0_55, %c0_56] : memref<1x64xf32, #tpu.memory_space<vmem>>, vector<1x64xf32>
    %75 = vector.broadcast %74 : vector<1x64xf32> to vector<72x64xf32>
    %76 = arith.mulf %73, %75 : vector<72x64xf32>
    %c0_57 = arith.constant 0 : index
    %c0_58 = arith.constant 0 : index
    %77 = vector.load %arg8[%c0_57, %c0_58] : memref<1x64xf32, #tpu.memory_space<vmem>>, vector<1x64xf32>
    %78 = vector.broadcast %77 : vector<1x64xf32> to vector<72x64xf32>
    %79 = arith.addf %76, %78 : vector<72x64xf32>
    %cst_59 = arith.constant 0.000000e+00 : f32
    %80 = vector.broadcast %cst_59 : f32 to vector<72x64xf32>
    %81 = arith.maximumf %79, %80 : vector<72x64xf32>
    %82 = arith.truncf %81 : vector<72x64xf32> to vector<72x64xbf16>
    %cst_60 = arith.constant 0.000000e+00 : f32
    %83 = vector.broadcast %cst_60 : f32 to vector<4x256xf32>
    %84 = vector.extract_strided_slice %82 {offsets = [0, 0], sizes = [4, 64], strides = [1, 1]} : vector<72x64xbf16> to vector<4x64xbf16>
    %c0_61 = arith.constant 0 : index
    %c0_62 = arith.constant 0 : index
    %c0_63 = arith.constant 0 : index
    %85 = vector.load %arg9[%c0_61, %c0_62, %c0_63] : memref<18x64x256xbf16, #tpu.memory_space<vmem>>, vector<1x64x256xbf16>
    %86 = vector.shape_cast %85 : vector<1x64x256xbf16> to vector<64x256xbf16>
    %cst_64 = arith.constant dense<0.000000e+00> : vector<4x256xf32>
    %87 = tpu.matmul %84, %86, %cst_64 {dimension_numbers = #tpu.dot_dimension_numbers<[1], [0], [0], [1], [0, 0, 1, 1], [], []>} : vector<4x64xbf16>, vector<64x256xbf16>, vector<4x256xf32> -> vector<4x256xf32>
    %88 = arith.addf %83, %87 : vector<4x256xf32>
    %89 = vector.extract_strided_slice %82 {offsets = [4, 0], sizes = [4, 64], strides = [1, 1]} : vector<72x64xbf16> to vector<4x64xbf16>
    %c1_65 = arith.constant 1 : index
    %c0_66 = arith.constant 0 : index
    %c0_67 = arith.constant 0 : index
    %90 = vector.load %arg9[%c1_65, %c0_66, %c0_67] : memref<18x64x256xbf16, #tpu.memory_space<vmem>>, vector<1x64x256xbf16>
    %91 = vector.shape_cast %90 : vector<1x64x256xbf16> to vector<64x256xbf16>
    %cst_68 = arith.constant dense<0.000000e+00> : vector<4x256xf32>
    %92 = tpu.matmul %89, %91, %cst_68 {dimension_numbers = #tpu.dot_dimension_numbers<[1], [0], [0], [1], [0, 0, 1, 1], [], []>} : vector<4x64xbf16>, vector<64x256xbf16>, vector<4x256xf32> -> vector<4x256xf32>
    %93 = arith.addf %88, %92 : vector<4x256xf32>
    %94 = vector.extract_strided_slice %82 {offsets = [8, 0], sizes = [4, 64], strides = [1, 1]} : vector<72x64xbf16> to vector<4x64xbf16>
    %c2_69 = arith.constant 2 : index
    %c0_70 = arith.constant 0 : index
    %c0_71 = arith.constant 0 : index
    %95 = vector.load %arg9[%c2_69, %c0_70, %c0_71] : memref<18x64x256xbf16, #tpu.memory_space<vmem>>, vector<1x64x256xbf16>
    %96 = vector.shape_cast %95 : vector<1x64x256xbf16> to vector<64x256xbf16>
    %cst_72 = arith.constant dense<0.000000e+00> : vector<4x256xf32>
    %97 = tpu.matmul %94, %96, %cst_72 {dimension_numbers = #tpu.dot_dimension_numbers<[1], [0], [0], [1], [0, 0, 1, 1], [], []>} : vector<4x64xbf16>, vector<64x256xbf16>, vector<4x256xf32> -> vector<4x256xf32>
    %98 = arith.addf %93, %97 : vector<4x256xf32>
    %99 = vector.extract_strided_slice %82 {offsets = [12, 0], sizes = [4, 64], strides = [1, 1]} : vector<72x64xbf16> to vector<4x64xbf16>
    %c3_73 = arith.constant 3 : index
    %c0_74 = arith.constant 0 : index
    %c0_75 = arith.constant 0 : index
    %100 = vector.load %arg9[%c3_73, %c0_74, %c0_75] : memref<18x64x256xbf16, #tpu.memory_space<vmem>>, vector<1x64x256xbf16>
    %101 = vector.shape_cast %100 : vector<1x64x256xbf16> to vector<64x256xbf16>
    %cst_76 = arith.constant dense<0.000000e+00> : vector<4x256xf32>
    %102 = tpu.matmul %99, %101, %cst_76 {dimension_numbers = #tpu.dot_dimension_numbers<[1], [0], [0], [1], [0, 0, 1, 1], [], []>} : vector<4x64xbf16>, vector<64x256xbf16>, vector<4x256xf32> -> vector<4x256xf32>
    %103 = arith.addf %98, %102 : vector<4x256xf32>
    %104 = vector.extract_strided_slice %82 {offsets = [16, 0], sizes = [4, 64], strides = [1, 1]} : vector<72x64xbf16> to vector<4x64xbf16>
    %c4 = arith.constant 4 : index
    %c0_77 = arith.constant 0 : index
    %c0_78 = arith.constant 0 : index
    %105 = vector.load %arg9[%c4, %c0_77, %c0_78] : memref<18x64x256xbf16, #tpu.memory_space<vmem>>, vector<1x64x256xbf16>
    %106 = vector.shape_cast %105 : vector<1x64x256xbf16> to vector<64x256xbf16>
    %cst_79 = arith.constant dense<0.000000e+00> : vector<4x256xf32>
    %107 = tpu.matmul %104, %106, %cst_79 {dimension_numbers = #tpu.dot_dimension_numbers<[1], [0], [0], [1], [0, 0, 1, 1], [], []>} : vector<4x64xbf16>, vector<64x256xbf16>, vector<4x256xf32> -> vector<4x256xf32>
    %108 = arith.addf %103, %107 : vector<4x256xf32>
    %109 = vector.extract_strided_slice %82 {offsets = [20, 0], sizes = [4, 64], strides = [1, 1]} : vector<72x64xbf16> to vector<4x64xbf16>
    %c5 = arith.constant 5 : index
    %c0_80 = arith.constant 0 : index
    %c0_81 = arith.constant 0 : index
    %110 = vector.load %arg9[%c5, %c0_80, %c0_81] : memref<18x64x256xbf16, #tpu.memory_space<vmem>>, vector<1x64x256xbf16>
    %111 = vector.shape_cast %110 : vector<1x64x256xbf16> to vector<64x256xbf16>
    %cst_82 = arith.constant dense<0.000000e+00> : vector<4x256xf32>
    %112 = tpu.matmul %109, %111, %cst_82 {dimension_numbers = #tpu.dot_dimension_numbers<[1], [0], [0], [1], [0, 0, 1, 1], [], []>} : vector<4x64xbf16>, vector<64x256xbf16>, vector<4x256xf32> -> vector<4x256xf32>
    %113 = arith.addf %108, %112 : vector<4x256xf32>
    %114 = vector.extract_strided_slice %82 {offsets = [24, 0], sizes = [4, 64], strides = [1, 1]} : vector<72x64xbf16> to vector<4x64xbf16>
    %c6 = arith.constant 6 : index
    %c0_83 = arith.constant 0 : index
    %c0_84 = arith.constant 0 : index
    %115 = vector.load %arg9[%c6, %c0_83, %c0_84] : memref<18x64x256xbf16, #tpu.memory_space<vmem>>, vector<1x64x256xbf16>
    %116 = vector.shape_cast %115 : vector<1x64x256xbf16> to vector<64x256xbf16>
    %cst_85 = arith.constant dense<0.000000e+00> : vector<4x256xf32>
    %117 = tpu.matmul %114, %116, %cst_85 {dimension_numbers = #tpu.dot_dimension_numbers<[1], [0], [0], [1], [0, 0, 1, 1], [], []>} : vector<4x64xbf16>, vector<64x256xbf16>, vector<4x256xf32> -> vector<4x256xf32>
    %118 = arith.addf %113, %117 : vector<4x256xf32>
    %119 = vector.extract_strided_slice %82 {offsets = [28, 0], sizes = [4, 64], strides = [1, 1]} : vector<72x64xbf16> to vector<4x64xbf16>
    %c7 = arith.constant 7 : index
    %c0_86 = arith.constant 0 : index
    %c0_87 = arith.constant 0 : index
    %120 = vector.load %arg9[%c7, %c0_86, %c0_87] : memref<18x64x256xbf16, #tpu.memory_space<vmem>>, vector<1x64x256xbf16>
    %121 = vector.shape_cast %120 : vector<1x64x256xbf16> to vector<64x256xbf16>
    %cst_88 = arith.constant dense<0.000000e+00> : vector<4x256xf32>
    %122 = tpu.matmul %119, %121, %cst_88 {dimension_numbers = #tpu.dot_dimension_numbers<[1], [0], [0], [1], [0, 0, 1, 1], [], []>} : vector<4x64xbf16>, vector<64x256xbf16>, vector<4x256xf32> -> vector<4x256xf32>
    %123 = arith.addf %118, %122 : vector<4x256xf32>
    %124 = vector.extract_strided_slice %82 {offsets = [32, 0], sizes = [4, 64], strides = [1, 1]} : vector<72x64xbf16> to vector<4x64xbf16>
    %c8 = arith.constant 8 : index
    %c0_89 = arith.constant 0 : index
    %c0_90 = arith.constant 0 : index
    %125 = vector.load %arg9[%c8, %c0_89, %c0_90] : memref<18x64x256xbf16, #tpu.memory_space<vmem>>, vector<1x64x256xbf16>
    %126 = vector.shape_cast %125 : vector<1x64x256xbf16> to vector<64x256xbf16>
    %cst_91 = arith.constant dense<0.000000e+00> : vector<4x256xf32>
    %127 = tpu.matmul %124, %126, %cst_91 {dimension_numbers = #tpu.dot_dimension_numbers<[1], [0], [0], [1], [0, 0, 1, 1], [], []>} : vector<4x64xbf16>, vector<64x256xbf16>, vector<4x256xf32> -> vector<4x256xf32>
    %128 = arith.addf %123, %127 : vector<4x256xf32>
    %129 = vector.extract_strided_slice %82 {offsets = [36, 0], sizes = [4, 64], strides = [1, 1]} : vector<72x64xbf16> to vector<4x64xbf16>
    %c9 = arith.constant 9 : index
    %c0_92 = arith.constant 0 : index
    %c0_93 = arith.constant 0 : index
    %130 = vector.load %arg9[%c9, %c0_92, %c0_93] : memref<18x64x256xbf16, #tpu.memory_space<vmem>>, vector<1x64x256xbf16>
    %131 = vector.shape_cast %130 : vector<1x64x256xbf16> to vector<64x256xbf16>
    %cst_94 = arith.constant dense<0.000000e+00> : vector<4x256xf32>
    %132 = tpu.matmul %129, %131, %cst_94 {dimension_numbers = #tpu.dot_dimension_numbers<[1], [0], [0], [1], [0, 0, 1, 1], [], []>} : vector<4x64xbf16>, vector<64x256xbf16>, vector<4x256xf32> -> vector<4x256xf32>
    %133 = arith.addf %128, %132 : vector<4x256xf32>
    %134 = vector.extract_strided_slice %82 {offsets = [40, 0], sizes = [4, 64], strides = [1, 1]} : vector<72x64xbf16> to vector<4x64xbf16>
    %c10 = arith.constant 10 : index
    %c0_95 = arith.constant 0 : index
    %c0_96 = arith.constant 0 : index
    %135 = vector.load %arg9[%c10, %c0_95, %c0_96] : memref<18x64x256xbf16, #tpu.memory_space<vmem>>, vector<1x64x256xbf16>
    %136 = vector.shape_cast %135 : vector<1x64x256xbf16> to vector<64x256xbf16>
    %cst_97 = arith.constant dense<0.000000e+00> : vector<4x256xf32>
    %137 = tpu.matmul %134, %136, %cst_97 {dimension_numbers = #tpu.dot_dimension_numbers<[1], [0], [0], [1], [0, 0, 1, 1], [], []>} : vector<4x64xbf16>, vector<64x256xbf16>, vector<4x256xf32> -> vector<4x256xf32>
    %138 = arith.addf %133, %137 : vector<4x256xf32>
    %139 = vector.extract_strided_slice %82 {offsets = [44, 0], sizes = [4, 64], strides = [1, 1]} : vector<72x64xbf16> to vector<4x64xbf16>
    %c11 = arith.constant 11 : index
    %c0_98 = arith.constant 0 : index
    %c0_99 = arith.constant 0 : index
    %140 = vector.load %arg9[%c11, %c0_98, %c0_99] : memref<18x64x256xbf16, #tpu.memory_space<vmem>>, vector<1x64x256xbf16>
    %141 = vector.shape_cast %140 : vector<1x64x256xbf16> to vector<64x256xbf16>
    %cst_100 = arith.constant dense<0.000000e+00> : vector<4x256xf32>
    %142 = tpu.matmul %139, %141, %cst_100 {dimension_numbers = #tpu.dot_dimension_numbers<[1], [0], [0], [1], [0, 0, 1, 1], [], []>} : vector<4x64xbf16>, vector<64x256xbf16>, vector<4x256xf32> -> vector<4x256xf32>
    %143 = arith.addf %138, %142 : vector<4x256xf32>
    %144 = vector.extract_strided_slice %82 {offsets = [48, 0], sizes = [4, 64], strides = [1, 1]} : vector<72x64xbf16> to vector<4x64xbf16>
    %c12 = arith.constant 12 : index
    %c0_101 = arith.constant 0 : index
    %c0_102 = arith.constant 0 : index
    %145 = vector.load %arg9[%c12, %c0_101, %c0_102] : memref<18x64x256xbf16, #tpu.memory_space<vmem>>, vector<1x64x256xbf16>
    %146 = vector.shape_cast %145 : vector<1x64x256xbf16> to vector<64x256xbf16>
    %cst_103 = arith.constant dense<0.000000e+00> : vector<4x256xf32>
    %147 = tpu.matmul %144, %146, %cst_103 {dimension_numbers = #tpu.dot_dimension_numbers<[1], [0], [0], [1], [0, 0, 1, 1], [], []>} : vector<4x64xbf16>, vector<64x256xbf16>, vector<4x256xf32> -> vector<4x256xf32>
    %148 = arith.addf %143, %147 : vector<4x256xf32>
    %149 = vector.extract_strided_slice %82 {offsets = [52, 0], sizes = [4, 64], strides = [1, 1]} : vector<72x64xbf16> to vector<4x64xbf16>
    %c13 = arith.constant 13 : index
    %c0_104 = arith.constant 0 : index
    %c0_105 = arith.constant 0 : index
    %150 = vector.load %arg9[%c13, %c0_104, %c0_105] : memref<18x64x256xbf16, #tpu.memory_space<vmem>>, vector<1x64x256xbf16>
    %151 = vector.shape_cast %150 : vector<1x64x256xbf16> to vector<64x256xbf16>
    %cst_106 = arith.constant dense<0.000000e+00> : vector<4x256xf32>
    %152 = tpu.matmul %149, %151, %cst_106 {dimension_numbers = #tpu.dot_dimension_numbers<[1], [0], [0], [1], [0, 0, 1, 1], [], []>} : vector<4x64xbf16>, vector<64x256xbf16>, vector<4x256xf32> -> vector<4x256xf32>
    %153 = arith.addf %148, %152 : vector<4x256xf32>
    %154 = vector.extract_strided_slice %82 {offsets = [56, 0], sizes = [4, 64], strides = [1, 1]} : vector<72x64xbf16> to vector<4x64xbf16>
    %c14 = arith.constant 14 : index
    %c0_107 = arith.constant 0 : index
    %c0_108 = arith.constant 0 : index
    %155 = vector.load %arg9[%c14, %c0_107, %c0_108] : memref<18x64x256xbf16, #tpu.memory_space<vmem>>, vector<1x64x256xbf16>
    %156 = vector.shape_cast %155 : vector<1x64x256xbf16> to vector<64x256xbf16>
    %cst_109 = arith.constant dense<0.000000e+00> : vector<4x256xf32>
    %157 = tpu.matmul %154, %156, %cst_109 {dimension_numbers = #tpu.dot_dimension_numbers<[1], [0], [0], [1], [0, 0, 1, 1], [], []>} : vector<4x64xbf16>, vector<64x256xbf16>, vector<4x256xf32> -> vector<4x256xf32>
    %158 = arith.addf %153, %157 : vector<4x256xf32>
    %159 = vector.extract_strided_slice %82 {offsets = [60, 0], sizes = [4, 64], strides = [1, 1]} : vector<72x64xbf16> to vector<4x64xbf16>
    %c15 = arith.constant 15 : index
    %c0_110 = arith.constant 0 : index
    %c0_111 = arith.constant 0 : index
    %160 = vector.load %arg9[%c15, %c0_110, %c0_111] : memref<18x64x256xbf16, #tpu.memory_space<vmem>>, vector<1x64x256xbf16>
    %161 = vector.shape_cast %160 : vector<1x64x256xbf16> to vector<64x256xbf16>
    %cst_112 = arith.constant dense<0.000000e+00> : vector<4x256xf32>
    %162 = tpu.matmul %159, %161, %cst_112 {dimension_numbers = #tpu.dot_dimension_numbers<[1], [0], [0], [1], [0, 0, 1, 1], [], []>} : vector<4x64xbf16>, vector<64x256xbf16>, vector<4x256xf32> -> vector<4x256xf32>
    %163 = arith.addf %158, %162 : vector<4x256xf32>
    %164 = vector.extract_strided_slice %82 {offsets = [64, 0], sizes = [4, 64], strides = [1, 1]} : vector<72x64xbf16> to vector<4x64xbf16>
    %c16 = arith.constant 16 : index
    %c0_113 = arith.constant 0 : index
    %c0_114 = arith.constant 0 : index
    %165 = vector.load %arg9[%c16, %c0_113, %c0_114] : memref<18x64x256xbf16, #tpu.memory_space<vmem>>, vector<1x64x256xbf16>
    %166 = vector.shape_cast %165 : vector<1x64x256xbf16> to vector<64x256xbf16>
    %cst_115 = arith.constant dense<0.000000e+00> : vector<4x256xf32>
    %167 = tpu.matmul %164, %166, %cst_115 {dimension_numbers = #tpu.dot_dimension_numbers<[1], [0], [0], [1], [0, 0, 1, 1], [], []>} : vector<4x64xbf16>, vector<64x256xbf16>, vector<4x256xf32> -> vector<4x256xf32>
    %168 = arith.addf %163, %167 : vector<4x256xf32>
    %169 = vector.extract_strided_slice %82 {offsets = [68, 0], sizes = [4, 64], strides = [1, 1]} : vector<72x64xbf16> to vector<4x64xbf16>
    %c17 = arith.constant 17 : index
    %c0_116 = arith.constant 0 : index
    %c0_117 = arith.constant 0 : index
    %170 = vector.load %arg9[%c17, %c0_116, %c0_117] : memref<18x64x256xbf16, #tpu.memory_space<vmem>>, vector<1x64x256xbf16>
    %171 = vector.shape_cast %170 : vector<1x64x256xbf16> to vector<64x256xbf16>
    %cst_118 = arith.constant dense<0.000000e+00> : vector<4x256xf32>
    %172 = tpu.matmul %169, %171, %cst_118 {dimension_numbers = #tpu.dot_dimension_numbers<[1], [0], [0], [1], [0, 0, 1, 1], [], []>} : vector<4x64xbf16>, vector<64x256xbf16>, vector<4x256xf32> -> vector<4x256xf32>
    %173 = arith.addf %168, %172 : vector<4x256xf32>
    %c0_119 = arith.constant 0 : index
    %c0_120 = arith.constant 0 : index
    %174 = vector.load %arg10[%c0_119, %c0_120] : memref<1x256xf32, #tpu.memory_space<vmem>>, vector<1x256xf32>
    %175 = vector.broadcast %174 : vector<1x256xf32> to vector<4x256xf32>
    %176 = arith.addf %173, %175 : vector<4x256xf32>
    %cst_121 = arith.constant 0.000000e+00 : f32
    %177 = vector.broadcast %cst_121 : f32 to vector<4x256xf32>
    %178 = arith.maximumf %176, %177 : vector<4x256xf32>
    %c0_122 = arith.constant 0 : index
    %c0_123 = arith.constant 0 : index
    %179 = vector.load %arg11[%c0_122, %c0_123] : memref<256x32xf32, #tpu.memory_space<vmem>>, vector<256x32xf32>
    %cst_124 = arith.constant dense<0.000000e+00> : vector<4x32xf32>
    %180 = tpu.matmul %178, %179, %cst_124 {dimension_numbers = #tpu.dot_dimension_numbers<[1], [0], [0], [1], [0, 0, 1, 1], [], []>} : vector<4x256xf32>, vector<256x32xf32>, vector<4x32xf32> -> vector<4x32xf32>
    %c0_125 = arith.constant 0 : index
    %c0_126 = arith.constant 0 : index
    %181 = vector.load %arg12[%c0_125, %c0_126] : memref<1x32xf32, #tpu.memory_space<vmem>>, vector<1x32xf32>
    %182 = vector.broadcast %181 : vector<1x32xf32> to vector<4x32xf32>
    %183 = arith.addf %180, %182 : vector<4x32xf32>
    %184 = vector.extract_strided_slice %183 {offsets = [0, 0], sizes = [4, 16], strides = [1, 1]} : vector<4x32xf32> to vector<4x16xf32>
    %185 = vector.extract_strided_slice %183 {offsets = [0, 16], sizes = [4, 16], strides = [1, 1]} : vector<4x32xf32> to vector<4x16xf32>
    %cst_127 = arith.constant 5.000000e-01 : f32
    %186 = vector.broadcast %cst_127 : f32 to vector<4x16xf32>
    %187 = arith.mulf %186, %185 : vector<4x16xf32>
    %188 = math.exp %187 : vector<4x16xf32>
    %c0_128 = arith.constant 0 : index
    %c0_129 = arith.constant 0 : index
    %189 = vector.load %arg27[%c0_128, %c0_129] : memref<4x16xf32, #tpu.memory_space<vmem>>, vector<4x16xf32>
    tpu.vector_store %arg27[%c0_128, %c0_129], %184 {strides = array<i32>} : memref<4x16xf32, #tpu.memory_space<vmem>>, vector<4x16xf32>,
    %c0_130 = arith.constant 0 : index
    %c0_131 = arith.constant 0 : index
    %190 = vector.load %arg28[%c0_130, %c0_131] : memref<4x16xf32, #tpu.memory_space<vmem>>, vector<4x16xf32>
    tpu.vector_store %arg28[%c0_130, %c0_131], %188 {strides = array<i32>} : memref<4x16xf32, #tpu.memory_space<vmem>>, vector<4x16xf32>,
    %c0_132 = arith.constant 0 : index
    %c0_133 = arith.constant 0 : index
    %191 = vector.load %arg1[%c0_132, %c0_133] : memref<4x16xf32, #tpu.memory_space<vmem>>, vector<4x16xf32>
    %192 = arith.mulf %188, %191 : vector<4x16xf32>
    %193 = arith.addf %184, %192 : vector<4x16xf32>
    %c0_134 = arith.constant 0 : index
    %c0_135 = arith.constant 0 : index
    %194 = vector.load %arg13[%c0_134, %c0_135] : memref<16x256xf32, #tpu.memory_space<vmem>>, vector<16x256xf32>
    %cst_136 = arith.constant dense<0.000000e+00> : vector<4x256xf32>
    %195 = tpu.matmul %193, %194, %cst_136 {dimension_numbers = #tpu.dot_dimension_numbers<[1], [0], [0], [1], [0, 0, 1, 1], [], []>} : vector<4x16xf32>, vector<16x256xf32>, vector<4x256xf32> -> vector<4x256xf32>
    %c0_137 = arith.constant 0 : index
    %c0_138 = arith.constant 0 : index
    %196 = vector.load %arg14[%c0_137, %c0_138] : memref<1x256xf32, #tpu.memory_space<vmem>>, vector<1x256xf32>
    %197 = vector.broadcast %196 : vector<1x256xf32> to vector<4x256xf32>
    %198 = arith.addf %195, %197 : vector<4x256xf32>
    %cst_139 = arith.constant 0.000000e+00 : f32
    %199 = vector.broadcast %cst_139 : f32 to vector<4x256xf32>
    %200 = arith.maximumf %198, %199 : vector<4x256xf32>
    %201 = arith.truncf %200 : vector<4x256xf32> to vector<4x256xbf16>
    %c0_140 = arith.constant 0 : index
    %c0_141 = arith.constant 0 : index
    %202 = vector.load %arg17[%c0_140, %c0_141] : memref<1x64xf32, #tpu.memory_space<vmem>>, vector<1x64xf32>
    %c0_142 = arith.constant 0 : index
    %c0_143 = arith.constant 0 : index
    %203 = vector.load %arg18[%c0_142, %c0_143] : memref<1x64xf32, #tpu.memory_space<vmem>>, vector<1x64xf32>
    %cst_144 = arith.constant 0.000000e+00 : f32
    %204 = vector.broadcast %cst_144 : f32 to vector<4x64xf32>
    %c0_145 = arith.constant 0 : index
    %c0_146 = arith.constant 0 : index
    %205 = vector.load %arg29[%c0_145, %c0_146] : memref<80x64xf32, #tpu.memory_space<vmem>>, vector<4x64xf32>
    tpu.vector_store %arg29[%c0_145, %c0_146], %204 {strides = array<i32>} : memref<80x64xf32, #tpu.memory_space<vmem>>, vector<4x64xf32>,
    %c76 = arith.constant 76 : index
    %c0_147 = arith.constant 0 : index
    %206 = vector.load %arg29[%c76, %c0_147] : memref<80x64xf32, #tpu.memory_space<vmem>>, vector<4x64xf32>
    tpu.vector_store %arg29[%c76, %c0_147], %204 {strides = array<i32>} : memref<80x64xf32, #tpu.memory_space<vmem>>, vector<4x64xf32>,
    %c0_148 = arith.constant 0 : index
    %c0_149 = arith.constant 0 : index
    %c0_150 = arith.constant 0 : index
    %207 = vector.load %arg15[%c0_148, %c0_149, %c0_150] : memref<18x256x64xbf16, #tpu.memory_space<vmem>>, vector<1x256x64xbf16>
    %208 = vector.shape_cast %207 : vector<1x256x64xbf16> to vector<256x64xbf16>
    %cst_151 = arith.constant dense<0.000000e+00> : vector<4x64xf32>
    %209 = tpu.matmul %201, %208, %cst_151 {dimension_numbers = #tpu.dot_dimension_numbers<[1], [0], [0], [1], [0, 0, 1, 1], [], []>} : vector<4x256xbf16>, vector<256x64xbf16>, vector<4x64xf32> -> vector<4x64xf32>
    %c0_152 = arith.constant 0 : index
    %c0_153 = arith.constant 0 : index
    %210 = vector.load %arg16[%c0_152, %c0_153] : memref<18x64xf32, #tpu.memory_space<vmem>>, vector<1x64xf32>
    %211 = vector.broadcast %210 : vector<1x64xf32> to vector<4x64xf32>
    %212 = arith.addf %209, %211 : vector<4x64xf32>
    %213 = vector.broadcast %202 : vector<1x64xf32> to vector<4x64xf32>
    %214 = arith.mulf %212, %213 : vector<4x64xf32>
    %215 = vector.broadcast %203 : vector<1x64xf32> to vector<4x64xf32>
    %216 = arith.addf %214, %215 : vector<4x64xf32>
    %cst_154 = arith.constant 0.000000e+00 : f32
    %217 = vector.broadcast %cst_154 : f32 to vector<4x64xf32>
    %218 = arith.maximumf %216, %217 : vector<4x64xf32>
    %c4_155 = arith.constant 4 : index
    %c0_156 = arith.constant 0 : index
    %219 = vector.load %arg29[%c4_155, %c0_156] : memref<80x64xf32, #tpu.memory_space<vmem>>, vector<4x64xf32>
    tpu.vector_store %arg29[%c4_155, %c0_156], %218 {strides = array<i32>} : memref<80x64xf32, #tpu.memory_space<vmem>>, vector<4x64xf32>,
    %c1_157 = arith.constant 1 : index
    %c0_158 = arith.constant 0 : index
    %c0_159 = arith.constant 0 : index
    %220 = vector.load %arg15[%c1_157, %c0_158, %c0_159] : memref<18x256x64xbf16, #tpu.memory_space<vmem>>, vector<1x256x64xbf16>
    %221 = vector.shape_cast %220 : vector<1x256x64xbf16> to vector<256x64xbf16>
    %cst_160 = arith.constant dense<0.000000e+00> : vector<4x64xf32>
    %222 = tpu.matmul %201, %221, %cst_160 {dimension_numbers = #tpu.dot_dimension_numbers<[1], [0], [0], [1], [0, 0, 1, 1], [], []>} : vector<4x256xbf16>, vector<256x64xbf16>, vector<4x64xf32> -> vector<4x64xf32>
    %c1_161 = arith.constant 1 : index
    %c0_162 = arith.constant 0 : index
    %223 = vector.load %arg16[%c1_161, %c0_162] : memref<18x64xf32, #tpu.memory_space<vmem>>, vector<1x64xf32>
    %224 = vector.broadcast %223 : vector<1x64xf32> to vector<4x64xf32>
    %225 = arith.addf %222, %224 : vector<4x64xf32>
    %226 = vector.broadcast %202 : vector<1x64xf32> to vector<4x64xf32>
    %227 = arith.mulf %225, %226 : vector<4x64xf32>
    %228 = vector.broadcast %203 : vector<1x64xf32> to vector<4x64xf32>
    %229 = arith.addf %227, %228 : vector<4x64xf32>
    %cst_163 = arith.constant 0.000000e+00 : f32
    %230 = vector.broadcast %cst_163 : f32 to vector<4x64xf32>
    %231 = arith.maximumf %229, %230 : vector<4x64xf32>
    %c8_164 = arith.constant 8 : index
    %c0_165 = arith.constant 0 : index
    %232 = vector.load %arg29[%c8_164, %c0_165] : memref<80x64xf32, #tpu.memory_space<vmem>>, vector<4x64xf32>
    tpu.vector_store %arg29[%c8_164, %c0_165], %231 {strides = array<i32>} : memref<80x64xf32, #tpu.memory_space<vmem>>, vector<4x64xf32>,
    %c2_166 = arith.constant 2 : index
    %c0_167 = arith.constant 0 : index
    %c0_168 = arith.constant 0 : index
    %233 = vector.load %arg15[%c2_166, %c0_167, %c0_168] : memref<18x256x64xbf16, #tpu.memory_space<vmem>>, vector<1x256x64xbf16>
    %234 = vector.shape_cast %233 : vector<1x256x64xbf16> to vector<256x64xbf16>
    %cst_169 = arith.constant dense<0.000000e+00> : vector<4x64xf32>
    %235 = tpu.matmul %201, %234, %cst_169 {dimension_numbers = #tpu.dot_dimension_numbers<[1], [0], [0], [1], [0, 0, 1, 1], [], []>} : vector<4x256xbf16>, vector<256x64xbf16>, vector<4x64xf32> -> vector<4x64xf32>
    %c2_170 = arith.constant 2 : index
    %c0_171 = arith.constant 0 : index
    %236 = vector.load %arg16[%c2_170, %c0_171] : memref<18x64xf32, #tpu.memory_space<vmem>>, vector<1x64xf32>
    %237 = vector.broadcast %236 : vector<1x64xf32> to vector<4x64xf32>
    %238 = arith.addf %235, %237 : vector<4x64xf32>
    %239 = vector.broadcast %202 : vector<1x64xf32> to vector<4x64xf32>
    %240 = arith.mulf %238, %239 : vector<4x64xf32>
    %241 = vector.broadcast %203 : vector<1x64xf32> to vector<4x64xf32>
    %242 = arith.addf %240, %241 : vector<4x64xf32>
    %cst_172 = arith.constant 0.000000e+00 : f32
    %243 = vector.broadcast %cst_172 : f32 to vector<4x64xf32>
    %244 = arith.maximumf %242, %243 : vector<4x64xf32>
    %c12_173 = arith.constant 12 : index
    %c0_174 = arith.constant 0 : index
    %245 = vector.load %arg29[%c12_173, %c0_174] : memref<80x64xf32, #tpu.memory_space<vmem>>, vector<4x64xf32>
    tpu.vector_store %arg29[%c12_173, %c0_174], %244 {strides = array<i32>} : memref<80x64xf32, #tpu.memory_space<vmem>>, vector<4x64xf32>,
    %c3_175 = arith.constant 3 : index
    %c0_176 = arith.constant 0 : index
    %c0_177 = arith.constant 0 : index
    %246 = vector.load %arg15[%c3_175, %c0_176, %c0_177] : memref<18x256x64xbf16, #tpu.memory_space<vmem>>, vector<1x256x64xbf16>
    %247 = vector.shape_cast %246 : vector<1x256x64xbf16> to vector<256x64xbf16>
    %cst_178 = arith.constant dense<0.000000e+00> : vector<4x64xf32>
    %248 = tpu.matmul %201, %247, %cst_178 {dimension_numbers = #tpu.dot_dimension_numbers<[1], [0], [0], [1], [0, 0, 1, 1], [], []>} : vector<4x256xbf16>, vector<256x64xbf16>, vector<4x64xf32> -> vector<4x64xf32>
    %c3_179 = arith.constant 3 : index
    %c0_180 = arith.constant 0 : index
    %249 = vector.load %arg16[%c3_179, %c0_180] : memref<18x64xf32, #tpu.memory_space<vmem>>, vector<1x64xf32>
    %250 = vector.broadcast %249 : vector<1x64xf32> to vector<4x64xf32>
    %251 = arith.addf %248, %250 : vector<4x64xf32>
    %252 = vector.broadcast %202 : vector<1x64xf32> to vector<4x64xf32>
    %253 = arith.mulf %251, %252 : vector<4x64xf32>
    %254 = vector.broadcast %203 : vector<1x64xf32> to vector<4x64xf32>
    %255 = arith.addf %253, %254 : vector<4x64xf32>
    %cst_181 = arith.constant 0.000000e+00 : f32
    %256 = vector.broadcast %cst_181 : f32 to vector<4x64xf32>
    %257 = arith.maximumf %255, %256 : vector<4x64xf32>
    %c16_182 = arith.constant 16 : index
    %c0_183 = arith.constant 0 : index
    %258 = vector.load %arg29[%c16_182, %c0_183] : memref<80x64xf32, #tpu.memory_space<vmem>>, vector<4x64xf32>
    tpu.vector_store %arg29[%c16_182, %c0_183], %257 {strides = array<i32>} : memref<80x64xf32, #tpu.memory_space<vmem>>, vector<4x64xf32>,
    %c4_184 = arith.constant 4 : index
    %c0_185 = arith.constant 0 : index
    %c0_186 = arith.constant 0 : index
    %259 = vector.load %arg15[%c4_184, %c0_185, %c0_186] : memref<18x256x64xbf16, #tpu.memory_space<vmem>>, vector<1x256x64xbf16>
    %260 = vector.shape_cast %259 : vector<1x256x64xbf16> to vector<256x64xbf16>
    %cst_187 = arith.constant dense<0.000000e+00> : vector<4x64xf32>
    %261 = tpu.matmul %201, %260, %cst_187 {dimension_numbers = #tpu.dot_dimension_numbers<[1], [0], [0], [1], [0, 0, 1, 1], [], []>} : vector<4x256xbf16>, vector<256x64xbf16>, vector<4x64xf32> -> vector<4x64xf32>
    %c4_188 = arith.constant 4 : index
    %c0_189 = arith.constant 0 : index
    %262 = vector.load %arg16[%c4_188, %c0_189] : memref<18x64xf32, #tpu.memory_space<vmem>>, vector<1x64xf32>
    %263 = vector.broadcast %262 : vector<1x64xf32> to vector<4x64xf32>
    %264 = arith.addf %261, %263 : vector<4x64xf32>
    %265 = vector.broadcast %202 : vector<1x64xf32> to vector<4x64xf32>
    %266 = arith.mulf %264, %265 : vector<4x64xf32>
    %267 = vector.broadcast %203 : vector<1x64xf32> to vector<4x64xf32>
    %268 = arith.addf %266, %267 : vector<4x64xf32>
    %cst_190 = arith.constant 0.000000e+00 : f32
    %269 = vector.broadcast %cst_190 : f32 to vector<4x64xf32>
    %270 = arith.maximumf %268, %269 : vector<4x64xf32>
    %c20 = arith.constant 20 : index
    %c0_191 = arith.constant 0 : index
    %271 = vector.load %arg29[%c20, %c0_191] : memref<80x64xf32, #tpu.memory_space<vmem>>, vector<4x64xf32>
    tpu.vector_store %arg29[%c20, %c0_191], %270 {strides = array<i32>} : memref<80x64xf32, #tpu.memory_space<vmem>>, vector<4x64xf32>,
    %c5_192 = arith.constant 5 : index
    %c0_193 = arith.constant 0 : index
    %c0_194 = arith.constant 0 : index
    %272 = vector.load %arg15[%c5_192, %c0_193, %c0_194] : memref<18x256x64xbf16, #tpu.memory_space<vmem>>, vector<1x256x64xbf16>
    %273 = vector.shape_cast %272 : vector<1x256x64xbf16> to vector<256x64xbf16>
    %cst_195 = arith.constant dense<0.000000e+00> : vector<4x64xf32>
    %274 = tpu.matmul %201, %273, %cst_195 {dimension_numbers = #tpu.dot_dimension_numbers<[1], [0], [0], [1], [0, 0, 1, 1], [], []>} : vector<4x256xbf16>, vector<256x64xbf16>, vector<4x64xf32> -> vector<4x64xf32>
    %c5_196 = arith.constant 5 : index
    %c0_197 = arith.constant 0 : index
    %275 = vector.load %arg16[%c5_196, %c0_197] : memref<18x64xf32, #tpu.memory_space<vmem>>, vector<1x64xf32>
    %276 = vector.broadcast %275 : vector<1x64xf32> to vector<4x64xf32>
    %277 = arith.addf %274, %276 : vector<4x64xf32>
    %278 = vector.broadcast %202 : vector<1x64xf32> to vector<4x64xf32>
    %279 = arith.mulf %277, %278 : vector<4x64xf32>
    %280 = vector.broadcast %203 : vector<1x64xf32> to vector<4x64xf32>
    %281 = arith.addf %279, %280 : vector<4x64xf32>
    %cst_198 = arith.constant 0.000000e+00 : f32
    %282 = vector.broadcast %cst_198 : f32 to vector<4x64xf32>
    %283 = arith.maximumf %281, %282 : vector<4x64xf32>
    %c24 = arith.constant 24 : index
    %c0_199 = arith.constant 0 : index
    %284 = vector.load %arg29[%c24, %c0_199] : memref<80x64xf32, #tpu.memory_space<vmem>>, vector<4x64xf32>
    tpu.vector_store %arg29[%c24, %c0_199], %283 {strides = array<i32>} : memref<80x64xf32, #tpu.memory_space<vmem>>, vector<4x64xf32>,
    %c6_200 = arith.constant 6 : index
    %c0_201 = arith.constant 0 : index
    %c0_202 = arith.constant 0 : index
    %285 = vector.load %arg15[%c6_200, %c0_201, %c0_202] : memref<18x256x64xbf16, #tpu.memory_space<vmem>>, vector<1x256x64xbf16>
    %286 = vector.shape_cast %285 : vector<1x256x64xbf16> to vector<256x64xbf16>
    %cst_203 = arith.constant dense<0.000000e+00> : vector<4x64xf32>
    %287 = tpu.matmul %201, %286, %cst_203 {dimension_numbers = #tpu.dot_dimension_numbers<[1], [0], [0], [1], [0, 0, 1, 1], [], []>} : vector<4x256xbf16>, vector<256x64xbf16>, vector<4x64xf32> -> vector<4x64xf32>
    %c6_204 = arith.constant 6 : index
    %c0_205 = arith.constant 0 : index
    %288 = vector.load %arg16[%c6_204, %c0_205] : memref<18x64xf32, #tpu.memory_space<vmem>>, vector<1x64xf32>
    %289 = vector.broadcast %288 : vector<1x64xf32> to vector<4x64xf32>
    %290 = arith.addf %287, %289 : vector<4x64xf32>
    %291 = vector.broadcast %202 : vector<1x64xf32> to vector<4x64xf32>
    %292 = arith.mulf %290, %291 : vector<4x64xf32>
    %293 = vector.broadcast %203 : vector<1x64xf32> to vector<4x64xf32>
    %294 = arith.addf %292, %293 : vector<4x64xf32>
    %cst_206 = arith.constant 0.000000e+00 : f32
    %295 = vector.broadcast %cst_206 : f32 to vector<4x64xf32>
    %296 = arith.maximumf %294, %295 : vector<4x64xf32>
    %c28 = arith.constant 28 : index
    %c0_207 = arith.constant 0 : index
    %297 = vector.load %arg29[%c28, %c0_207] : memref<80x64xf32, #tpu.memory_space<vmem>>, vector<4x64xf32>
    tpu.vector_store %arg29[%c28, %c0_207], %296 {strides = array<i32>} : memref<80x64xf32, #tpu.memory_space<vmem>>, vector<4x64xf32>,
    %c7_208 = arith.constant 7 : index
    %c0_209 = arith.constant 0 : index
    %c0_210 = arith.constant 0 : index
    %298 = vector.load %arg15[%c7_208, %c0_209, %c0_210] : memref<18x256x64xbf16, #tpu.memory_space<vmem>>, vector<1x256x64xbf16>
    %299 = vector.shape_cast %298 : vector<1x256x64xbf16> to vector<256x64xbf16>
    %cst_211 = arith.constant dense<0.000000e+00> : vector<4x64xf32>
    %300 = tpu.matmul %201, %299, %cst_211 {dimension_numbers = #tpu.dot_dimension_numbers<[1], [0], [0], [1], [0, 0, 1, 1], [], []>} : vector<4x256xbf16>, vector<256x64xbf16>, vector<4x64xf32> -> vector<4x64xf32>
    %c7_212 = arith.constant 7 : index
    %c0_213 = arith.constant 0 : index
    %301 = vector.load %arg16[%c7_212, %c0_213] : memref<18x64xf32, #tpu.memory_space<vmem>>, vector<1x64xf32>
    %302 = vector.broadcast %301 : vector<1x64xf32> to vector<4x64xf32>
    %303 = arith.addf %300, %302 : vector<4x64xf32>
    %304 = vector.broadcast %202 : vector<1x64xf32> to vector<4x64xf32>
    %305 = arith.mulf %303, %304 : vector<4x64xf32>
    %306 = vector.broadcast %203 : vector<1x64xf32> to vector<4x64xf32>
    %307 = arith.addf %305, %306 : vector<4x64xf32>
    %cst_214 = arith.constant 0.000000e+00 : f32
    %308 = vector.broadcast %cst_214 : f32 to vector<4x64xf32>
    %309 = arith.maximumf %307, %308 : vector<4x64xf32>
    %c32 = arith.constant 32 : index
    %c0_215 = arith.constant 0 : index
    %310 = vector.load %arg29[%c32, %c0_215] : memref<80x64xf32, #tpu.memory_space<vmem>>, vector<4x64xf32>
    tpu.vector_store %arg29[%c32, %c0_215], %309 {strides = array<i32>} : memref<80x64xf32, #tpu.memory_space<vmem>>, vector<4x64xf32>,
    %c8_216 = arith.constant 8 : index
    %c0_217 = arith.constant 0 : index
    %c0_218 = arith.constant 0 : index
    %311 = vector.load %arg15[%c8_216, %c0_217, %c0_218] : memref<18x256x64xbf16, #tpu.memory_space<vmem>>, vector<1x256x64xbf16>
    %312 = vector.shape_cast %311 : vector<1x256x64xbf16> to vector<256x64xbf16>
    %cst_219 = arith.constant dense<0.000000e+00> : vector<4x64xf32>
    %313 = tpu.matmul %201, %312, %cst_219 {dimension_numbers = #tpu.dot_dimension_numbers<[1], [0], [0], [1], [0, 0, 1, 1], [], []>} : vector<4x256xbf16>, vector<256x64xbf16>, vector<4x64xf32> -> vector<4x64xf32>
    %c8_220 = arith.constant 8 : index
    %c0_221 = arith.constant 0 : index
    %314 = vector.load %arg16[%c8_220, %c0_221] : memref<18x64xf32, #tpu.memory_space<vmem>>, vector<1x64xf32>
    %315 = vector.broadcast %314 : vector<1x64xf32> to vector<4x64xf32>
    %316 = arith.addf %313, %315 : vector<4x64xf32>
    %317 = vector.broadcast %202 : vector<1x64xf32> to vector<4x64xf32>
    %318 = arith.mulf %316, %317 : vector<4x64xf32>
    %319 = vector.broadcast %203 : vector<1x64xf32> to vector<4x64xf32>
    %320 = arith.addf %318, %319 : vector<4x64xf32>
    %cst_222 = arith.constant 0.000000e+00 : f32
    %321 = vector.broadcast %cst_222 : f32 to vector<4x64xf32>
    %322 = arith.maximumf %320, %321 : vector<4x64xf32>
    %c36 = arith.constant 36 : index
    %c0_223 = arith.constant 0 : index
    %323 = vector.load %arg29[%c36, %c0_223] : memref<80x64xf32, #tpu.memory_space<vmem>>, vector<4x64xf32>
    tpu.vector_store %arg29[%c36, %c0_223], %322 {strides = array<i32>} : memref<80x64xf32, #tpu.memory_space<vmem>>, vector<4x64xf32>,
    %c9_224 = arith.constant 9 : index
    %c0_225 = arith.constant 0 : index
    %c0_226 = arith.constant 0 : index
    %324 = vector.load %arg15[%c9_224, %c0_225, %c0_226] : memref<18x256x64xbf16, #tpu.memory_space<vmem>>, vector<1x256x64xbf16>
    %325 = vector.shape_cast %324 : vector<1x256x64xbf16> to vector<256x64xbf16>
    %cst_227 = arith.constant dense<0.000000e+00> : vector<4x64xf32>
    %326 = tpu.matmul %201, %325, %cst_227 {dimension_numbers = #tpu.dot_dimension_numbers<[1], [0], [0], [1], [0, 0, 1, 1], [], []>} : vector<4x256xbf16>, vector<256x64xbf16>, vector<4x64xf32> -> vector<4x64xf32>
    %c9_228 = arith.constant 9 : index
    %c0_229 = arith.constant 0 : index
    %327 = vector.load %arg16[%c9_228, %c0_229] : memref<18x64xf32, #tpu.memory_space<vmem>>, vector<1x64xf32>
    %328 = vector.broadcast %327 : vector<1x64xf32> to vector<4x64xf32>
    %329 = arith.addf %326, %328 : vector<4x64xf32>
    %330 = vector.broadcast %202 : vector<1x64xf32> to vector<4x64xf32>
    %331 = arith.mulf %329, %330 : vector<4x64xf32>
    %332 = vector.broadcast %203 : vector<1x64xf32> to vector<4x64xf32>
    %333 = arith.addf %331, %332 : vector<4x64xf32>
    %cst_230 = arith.constant 0.000000e+00 : f32
    %334 = vector.broadcast %cst_230 : f32 to vector<4x64xf32>
    %335 = arith.maximumf %333, %334 : vector<4x64xf32>
    %c40 = arith.constant 40 : index
    %c0_231 = arith.constant 0 : index
    %336 = vector.load %arg29[%c40, %c0_231] : memref<80x64xf32, #tpu.memory_space<vmem>>, vector<4x64xf32>
    tpu.vector_store %arg29[%c40, %c0_231], %335 {strides = array<i32>} : memref<80x64xf32, #tpu.memory_space<vmem>>, vector<4x64xf32>,
    %c10_232 = arith.constant 10 : index
    %c0_233 = arith.constant 0 : index
    %c0_234 = arith.constant 0 : index
    %337 = vector.load %arg15[%c10_232, %c0_233, %c0_234] : memref<18x256x64xbf16, #tpu.memory_space<vmem>>, vector<1x256x64xbf16>
    %338 = vector.shape_cast %337 : vector<1x256x64xbf16> to vector<256x64xbf16>
    %cst_235 = arith.constant dense<0.000000e+00> : vector<4x64xf32>
    %339 = tpu.matmul %201, %338, %cst_235 {dimension_numbers = #tpu.dot_dimension_numbers<[1], [0], [0], [1], [0, 0, 1, 1], [], []>} : vector<4x256xbf16>, vector<256x64xbf16>, vector<4x64xf32> -> vector<4x64xf32>
    %c10_236 = arith.constant 10 : index
    %c0_237 = arith.constant 0 : index
    %340 = vector.load %arg16[%c10_236, %c0_237] : memref<18x64xf32, #tpu.memory_space<vmem>>, vector<1x64xf32>
    %341 = vector.broadcast %340 : vector<1x64xf32> to vector<4x64xf32>
    %342 = arith.addf %339, %341 : vector<4x64xf32>
    %343 = vector.broadcast %202 : vector<1x64xf32> to vector<4x64xf32>
    %344 = arith.mulf %342, %343 : vector<4x64xf32>
    %345 = vector.broadcast %203 : vector<1x64xf32> to vector<4x64xf32>
    %346 = arith.addf %344, %345 : vector<4x64xf32>
    %cst_238 = arith.constant 0.000000e+00 : f32
    %347 = vector.broadcast %cst_238 : f32 to vector<4x64xf32>
    %348 = arith.maximumf %346, %347 : vector<4x64xf32>
    %c44 = arith.constant 44 : index
    %c0_239 = arith.constant 0 : index
    %349 = vector.load %arg29[%c44, %c0_239] : memref<80x64xf32, #tpu.memory_space<vmem>>, vector<4x64xf32>
    tpu.vector_store %arg29[%c44, %c0_239], %348 {strides = array<i32>} : memref<80x64xf32, #tpu.memory_space<vmem>>, vector<4x64xf32>,
    %c11_240 = arith.constant 11 : index
    %c0_241 = arith.constant 0 : index
    %c0_242 = arith.constant 0 : index
    %350 = vector.load %arg15[%c11_240, %c0_241, %c0_242] : memref<18x256x64xbf16, #tpu.memory_space<vmem>>, vector<1x256x64xbf16>
    %351 = vector.shape_cast %350 : vector<1x256x64xbf16> to vector<256x64xbf16>
    %cst_243 = arith.constant dense<0.000000e+00> : vector<4x64xf32>
    %352 = tpu.matmul %201, %351, %cst_243 {dimension_numbers = #tpu.dot_dimension_numbers<[1], [0], [0], [1], [0, 0, 1, 1], [], []>} : vector<4x256xbf16>, vector<256x64xbf16>, vector<4x64xf32> -> vector<4x64xf32>
    %c11_244 = arith.constant 11 : index
    %c0_245 = arith.constant 0 : index
    %353 = vector.load %arg16[%c11_244, %c0_245] : memref<18x64xf32, #tpu.memory_space<vmem>>, vector<1x64xf32>
    %354 = vector.broadcast %353 : vector<1x64xf32> to vector<4x64xf32>
    %355 = arith.addf %352, %354 : vector<4x64xf32>
    %356 = vector.broadcast %202 : vector<1x64xf32> to vector<4x64xf32>
    %357 = arith.mulf %355, %356 : vector<4x64xf32>
    %358 = vector.broadcast %203 : vector<1x64xf32> to vector<4x64xf32>
    %359 = arith.addf %357, %358 : vector<4x64xf32>
    %cst_246 = arith.constant 0.000000e+00 : f32
    %360 = vector.broadcast %cst_246 : f32 to vector<4x64xf32>
    %361 = arith.maximumf %359, %360 : vector<4x64xf32>
    %c48 = arith.constant 48 : index
    %c0_247 = arith.constant 0 : index
    %362 = vector.load %arg29[%c48, %c0_247] : memref<80x64xf32, #tpu.memory_space<vmem>>, vector<4x64xf32>
    tpu.vector_store %arg29[%c48, %c0_247], %361 {strides = array<i32>} : memref<80x64xf32, #tpu.memory_space<vmem>>, vector<4x64xf32>,
    %c12_248 = arith.constant 12 : index
    %c0_249 = arith.constant 0 : index
    %c0_250 = arith.constant 0 : index
    %363 = vector.load %arg15[%c12_248, %c0_249, %c0_250] : memref<18x256x64xbf16, #tpu.memory_space<vmem>>, vector<1x256x64xbf16>
    %364 = vector.shape_cast %363 : vector<1x256x64xbf16> to vector<256x64xbf16>
    %cst_251 = arith.constant dense<0.000000e+00> : vector<4x64xf32>
    %365 = tpu.matmul %201, %364, %cst_251 {dimension_numbers = #tpu.dot_dimension_numbers<[1], [0], [0], [1], [0, 0, 1, 1], [], []>} : vector<4x256xbf16>, vector<256x64xbf16>, vector<4x64xf32> -> vector<4x64xf32>
    %c12_252 = arith.constant 12 : index
    %c0_253 = arith.constant 0 : index
    %366 = vector.load %arg16[%c12_252, %c0_253] : memref<18x64xf32, #tpu.memory_space<vmem>>, vector<1x64xf32>
    %367 = vector.broadcast %366 : vector<1x64xf32> to vector<4x64xf32>
    %368 = arith.addf %365, %367 : vector<4x64xf32>
    %369 = vector.broadcast %202 : vector<1x64xf32> to vector<4x64xf32>
    %370 = arith.mulf %368, %369 : vector<4x64xf32>
    %371 = vector.broadcast %203 : vector<1x64xf32> to vector<4x64xf32>
    %372 = arith.addf %370, %371 : vector<4x64xf32>
    %cst_254 = arith.constant 0.000000e+00 : f32
    %373 = vector.broadcast %cst_254 : f32 to vector<4x64xf32>
    %374 = arith.maximumf %372, %373 : vector<4x64xf32>
    %c52 = arith.constant 52 : index
    %c0_255 = arith.constant 0 : index
    %375 = vector.load %arg29[%c52, %c0_255] : memref<80x64xf32, #tpu.memory_space<vmem>>, vector<4x64xf32>
    tpu.vector_store %arg29[%c52, %c0_255], %374 {strides = array<i32>} : memref<80x64xf32, #tpu.memory_space<vmem>>, vector<4x64xf32>,
    %c13_256 = arith.constant 13 : index
    %c0_257 = arith.constant 0 : index
    %c0_258 = arith.constant 0 : index
    %376 = vector.load %arg15[%c13_256, %c0_257, %c0_258] : memref<18x256x64xbf16, #tpu.memory_space<vmem>>, vector<1x256x64xbf16>
    %377 = vector.shape_cast %376 : vector<1x256x64xbf16> to vector<256x64xbf16>
    %cst_259 = arith.constant dense<0.000000e+00> : vector<4x64xf32>
    %378 = tpu.matmul %201, %377, %cst_259 {dimension_numbers = #tpu.dot_dimension_numbers<[1], [0], [0], [1], [0, 0, 1, 1], [], []>} : vector<4x256xbf16>, vector<256x64xbf16>, vector<4x64xf32> -> vector<4x64xf32>
    %c13_260 = arith.constant 13 : index
    %c0_261 = arith.constant 0 : index
    %379 = vector.load %arg16[%c13_260, %c0_261] : memref<18x64xf32, #tpu.memory_space<vmem>>, vector<1x64xf32>
    %380 = vector.broadcast %379 : vector<1x64xf32> to vector<4x64xf32>
    %381 = arith.addf %378, %380 : vector<4x64xf32>
    %382 = vector.broadcast %202 : vector<1x64xf32> to vector<4x64xf32>
    %383 = arith.mulf %381, %382 : vector<4x64xf32>
    %384 = vector.broadcast %203 : vector<1x64xf32> to vector<4x64xf32>
    %385 = arith.addf %383, %384 : vector<4x64xf32>
    %cst_262 = arith.constant 0.000000e+00 : f32
    %386 = vector.broadcast %cst_262 : f32 to vector<4x64xf32>
    %387 = arith.maximumf %385, %386 : vector<4x64xf32>
    %c56 = arith.constant 56 : index
    %c0_263 = arith.constant 0 : index
    %388 = vector.load %arg29[%c56, %c0_263] : memref<80x64xf32, #tpu.memory_space<vmem>>, vector<4x64xf32>
    tpu.vector_store %arg29[%c56, %c0_263], %387 {strides = array<i32>} : memref<80x64xf32, #tpu.memory_space<vmem>>, vector<4x64xf32>,
    %c14_264 = arith.constant 14 : index
    %c0_265 = arith.constant 0 : index
    %c0_266 = arith.constant 0 : index
    %389 = vector.load %arg15[%c14_264, %c0_265, %c0_266] : memref<18x256x64xbf16, #tpu.memory_space<vmem>>, vector<1x256x64xbf16>
    %390 = vector.shape_cast %389 : vector<1x256x64xbf16> to vector<256x64xbf16>
    %cst_267 = arith.constant dense<0.000000e+00> : vector<4x64xf32>
    %391 = tpu.matmul %201, %390, %cst_267 {dimension_numbers = #tpu.dot_dimension_numbers<[1], [0], [0], [1], [0, 0, 1, 1], [], []>} : vector<4x256xbf16>, vector<256x64xbf16>, vector<4x64xf32> -> vector<4x64xf32>
    %c14_268 = arith.constant 14 : index
    %c0_269 = arith.constant 0 : index
    %392 = vector.load %arg16[%c14_268, %c0_269] : memref<18x64xf32, #tpu.memory_space<vmem>>, vector<1x64xf32>
    %393 = vector.broadcast %392 : vector<1x64xf32> to vector<4x64xf32>
    %394 = arith.addf %391, %393 : vector<4x64xf32>
    %395 = vector.broadcast %202 : vector<1x64xf32> to vector<4x64xf32>
    %396 = arith.mulf %394, %395 : vector<4x64xf32>
    %397 = vector.broadcast %203 : vector<1x64xf32> to vector<4x64xf32>
    %398 = arith.addf %396, %397 : vector<4x64xf32>
    %cst_270 = arith.constant 0.000000e+00 : f32
    %399 = vector.broadcast %cst_270 : f32 to vector<4x64xf32>
    %400 = arith.maximumf %398, %399 : vector<4x64xf32>
    %c60 = arith.constant 60 : index
    %c0_271 = arith.constant 0 : index
    %401 = vector.load %arg29[%c60, %c0_271] : memref<80x64xf32, #tpu.memory_space<vmem>>, vector<4x64xf32>
    tpu.vector_store %arg29[%c60, %c0_271], %400 {strides = array<i32>} : memref<80x64xf32, #tpu.memory_space<vmem>>, vector<4x64xf32>,
    %c15_272 = arith.constant 15 : index
    %c0_273 = arith.constant 0 : index
    %c0_274 = arith.constant 0 : index
    %402 = vector.load %arg15[%c15_272, %c0_273, %c0_274] : memref<18x256x64xbf16, #tpu.memory_space<vmem>>, vector<1x256x64xbf16>
    %403 = vector.shape_cast %402 : vector<1x256x64xbf16> to vector<256x64xbf16>
    %cst_275 = arith.constant dense<0.000000e+00> : vector<4x64xf32>
    %404 = tpu.matmul %201, %403, %cst_275 {dimension_numbers = #tpu.dot_dimension_numbers<[1], [0], [0], [1], [0, 0, 1, 1], [], []>} : vector<4x256xbf16>, vector<256x64xbf16>, vector<4x64xf32> -> vector<4x64xf32>
    %c15_276 = arith.constant 15 : index
    %c0_277 = arith.constant 0 : index
    %405 = vector.load %arg16[%c15_276, %c0_277] : memref<18x64xf32, #tpu.memory_space<vmem>>, vector<1x64xf32>
    %406 = vector.broadcast %405 : vector<1x64xf32> to vector<4x64xf32>
    %407 = arith.addf %404, %406 : vector<4x64xf32>
    %408 = vector.broadcast %202 : vector<1x64xf32> to vector<4x64xf32>
    %409 = arith.mulf %407, %408 : vector<4x64xf32>
    %410 = vector.broadcast %203 : vector<1x64xf32> to vector<4x64xf32>
    %411 = arith.addf %409, %410 : vector<4x64xf32>
    %cst_278 = arith.constant 0.000000e+00 : f32
    %412 = vector.broadcast %cst_278 : f32 to vector<4x64xf32>
    %413 = arith.maximumf %411, %412 : vector<4x64xf32>
    %c64 = arith.constant 64 : index
    %c0_279 = arith.constant 0 : index
    %414 = vector.load %arg29[%c64, %c0_279] : memref<80x64xf32, #tpu.memory_space<vmem>>, vector<4x64xf32>
    tpu.vector_store %arg29[%c64, %c0_279], %413 {strides = array<i32>} : memref<80x64xf32, #tpu.memory_space<vmem>>, vector<4x64xf32>,
    %c16_280 = arith.constant 16 : index
    %c0_281 = arith.constant 0 : index
    %c0_282 = arith.constant 0 : index
    %415 = vector.load %arg15[%c16_280, %c0_281, %c0_282] : memref<18x256x64xbf16, #tpu.memory_space<vmem>>, vector<1x256x64xbf16>
    %416 = vector.shape_cast %415 : vector<1x256x64xbf16> to vector<256x64xbf16>
    %cst_283 = arith.constant dense<0.000000e+00> : vector<4x64xf32>
    %417 = tpu.matmul %201, %416, %cst_283 {dimension_numbers = #tpu.dot_dimension_numbers<[1], [0], [0], [1], [0, 0, 1, 1], [], []>} : vector<4x256xbf16>, vector<256x64xbf16>, vector<4x64xf32> -> vector<4x64xf32>
    %c16_284 = arith.constant 16 : index
    %c0_285 = arith.constant 0 : index
    %418 = vector.load %arg16[%c16_284, %c0_285] : memref<18x64xf32, #tpu.memory_space<vmem>>, vector<1x64xf32>
    %419 = vector.broadcast %418 : vector<1x64xf32> to vector<4x64xf32>
    %420 = arith.addf %417, %419 : vector<4x64xf32>
    %421 = vector.broadcast %202 : vector<1x64xf32> to vector<4x64xf32>
    %422 = arith.mulf %420, %421 : vector<4x64xf32>
    %423 = vector.broadcast %203 : vector<1x64xf32> to vector<4x64xf32>
    %424 = arith.addf %422, %423 : vector<4x64xf32>
    %cst_286 = arith.constant 0.000000e+00 : f32
    %425 = vector.broadcast %cst_286 : f32 to vector<4x64xf32>
    %426 = arith.maximumf %424, %425 : vector<4x64xf32>
    %c68 = arith.constant 68 : index
    %c0_287 = arith.constant 0 : index
    %427 = vector.load %arg29[%c68, %c0_287] : memref<80x64xf32, #tpu.memory_space<vmem>>, vector<4x64xf32>
    tpu.vector_store %arg29[%c68, %c0_287], %426 {strides = array<i32>} : memref<80x64xf32, #tpu.memory_space<vmem>>, vector<4x64xf32>,
    %c17_288 = arith.constant 17 : index
    %c0_289 = arith.constant 0 : index
    %c0_290 = arith.constant 0 : index
    %428 = vector.load %arg15[%c17_288, %c0_289, %c0_290] : memref<18x256x64xbf16, #tpu.memory_space<vmem>>, vector<1x256x64xbf16>
    %429 = vector.shape_cast %428 : vector<1x256x64xbf16> to vector<256x64xbf16>
    %cst_291 = arith.constant dense<0.000000e+00> : vector<4x64xf32>
    %430 = tpu.matmul %201, %429, %cst_291 {dimension_numbers = #tpu.dot_dimension_numbers<[1], [0], [0], [1], [0, 0, 1, 1], [], []>} : vector<4x256xbf16>, vector<256x64xbf16>, vector<4x64xf32> -> vector<4x64xf32>
    %c17_292 = arith.constant 17 : index
    %c0_293 = arith.constant 0 : index
    %431 = vector.load %arg16[%c17_292, %c0_293] : memref<18x64xf32, #tpu.memory_space<vmem>>, vector<1x64xf32>
    %432 = vector.broadcast %431 : vector<1x64xf32> to vector<4x64xf32>
    %433 = arith.addf %430, %432 : vector<4x64xf32>
    %434 = vector.broadcast %202 : vector<1x64xf32> to vector<4x64xf32>
    %435 = arith.mulf %433, %434 : vector<4x64xf32>
    %436 = vector.broadcast %203 : vector<1x64xf32> to vector<4x64xf32>
    %437 = arith.addf %435, %436 : vector<4x64xf32>
    %cst_294 = arith.constant 0.000000e+00 : f32
    %438 = vector.broadcast %cst_294 : f32 to vector<4x64xf32>
    %439 = arith.maximumf %437, %438 : vector<4x64xf32>
    %c72 = arith.constant 72 : index
    %c0_295 = arith.constant 0 : index
    %440 = vector.load %arg29[%c72, %c0_295] : memref<80x64xf32, #tpu.memory_space<vmem>>, vector<4x64xf32>
    tpu.vector_store %arg29[%c72, %c0_295], %439 {strides = array<i32>} : memref<80x64xf32, #tpu.memory_space<vmem>>, vector<4x64xf32>,
    %c4_296 = arith.constant 4 : index
    %c0_297 = arith.constant 0 : index
    %441 = vector.load %arg29[%c4_296, %c0_297] : memref<80x64xf32, #tpu.memory_space<vmem>>, vector<76x64xf32>
    %c0_298 = arith.constant 0 : index
    %c0_299 = arith.constant 0 : index
    %442 = vector.load %arg29[%c0_298, %c0_299] : memref<80x64xf32, #tpu.memory_space<vmem>>, vector<76x64xf32>
    %c0_300 = arith.constant 0 : index
    %c0_301 = arith.constant 0 : index
    %443 = vector.load %arg20[%c0_300, %c0_301] : memref<1x32xf32, #tpu.memory_space<vmem>>, vector<1x32xf32>
    %c0_302 = arith.constant 0 : index
    %c0_303 = arith.constant 0 : index
    %444 = vector.load %arg21[%c0_302, %c0_303] : memref<1x32xf32, #tpu.memory_space<vmem>>, vector<1x32xf32>
    %c0_304 = arith.constant 0 : index
    %c0_305 = arith.constant 0 : index
    %c0_306 = arith.constant 0 : index
    %445 = vector.load %arg19[%c0_304, %c0_305, %c0_306] : memref<4x64x32xf32, #tpu.memory_space<vmem>>, vector<1x64x32xf32>
    %446 = vector.shape_cast %445 : vector<1x64x32xf32> to vector<64x32xf32>
    %cst_307 = arith.constant dense<0.000000e+00> : vector<76x32xf32>
    %447 = tpu.matmul %441, %446, %cst_307 {dimension_numbers = #tpu.dot_dimension_numbers<[1], [0], [0], [1], [0, 0, 1, 1], [], []>} : vector<76x64xf32>, vector<64x32xf32>, vector<76x32xf32> -> vector<76x32xf32>
    %c2_308 = arith.constant 2 : index
    %c0_309 = arith.constant 0 : index
    %c0_310 = arith.constant 0 : index
    %448 = vector.load %arg19[%c2_308, %c0_309, %c0_310] : memref<4x64x32xf32, #tpu.memory_space<vmem>>, vector<1x64x32xf32>
    %449 = vector.shape_cast %448 : vector<1x64x32xf32> to vector<64x32xf32>
    %cst_311 = arith.constant dense<0.000000e+00> : vector<76x32xf32>
    %450 = tpu.matmul %442, %449, %cst_311 {dimension_numbers = #tpu.dot_dimension_numbers<[1], [0], [0], [1], [0, 0, 1, 1], [], []>} : vector<76x64xf32>, vector<64x32xf32>, vector<76x32xf32> -> vector<76x32xf32>
    %451 = arith.addf %447, %450 : vector<76x32xf32>
    %452 = vector.broadcast %443 : vector<1x32xf32> to vector<76x32xf32>
    %453 = arith.mulf %451, %452 : vector<76x32xf32>
    %454 = vector.broadcast %444 : vector<1x32xf32> to vector<76x32xf32>
    %455 = arith.addf %453, %454 : vector<76x32xf32>
    %cst_312 = arith.constant 0.000000e+00 : f32
    %456 = vector.broadcast %cst_312 : f32 to vector<76x32xf32>
    %457 = arith.maximumf %455, %456 : vector<76x32xf32>
    %c1_313 = arith.constant 1 : index
    %c0_314 = arith.constant 0 : index
    %c0_315 = arith.constant 0 : index
    %458 = vector.load %arg19[%c1_313, %c0_314, %c0_315] : memref<4x64x32xf32, #tpu.memory_space<vmem>>, vector<1x64x32xf32>
    %459 = vector.shape_cast %458 : vector<1x64x32xf32> to vector<64x32xf32>
    %cst_316 = arith.constant dense<0.000000e+00> : vector<76x32xf32>
    %460 = tpu.matmul %441, %459, %cst_316 {dimension_numbers = #tpu.dot_dimension_numbers<[1], [0], [0], [1], [0, 0, 1, 1], [], []>} : vector<76x64xf32>, vector<64x32xf32>, vector<76x32xf32> -> vector<76x32xf32>
    %c3_317 = arith.constant 3 : index
    %c0_318 = arith.constant 0 : index
    %c0_319 = arith.constant 0 : index
    %461 = vector.load %arg19[%c3_317, %c0_318, %c0_319] : memref<4x64x32xf32, #tpu.memory_space<vmem>>, vector<1x64x32xf32>
    %462 = vector.shape_cast %461 : vector<1x64x32xf32> to vector<64x32xf32>
    %cst_320 = arith.constant dense<0.000000e+00> : vector<76x32xf32>
    %463 = tpu.matmul %442, %462, %cst_320 {dimension_numbers = #tpu.dot_dimension_numbers<[1], [0], [0], [1], [0, 0, 1, 1], [], []>} : vector<76x64xf32>, vector<64x32xf32>, vector<76x32xf32> -> vector<76x32xf32>
    %464 = arith.addf %460, %463 : vector<76x32xf32>
    %465 = vector.broadcast %443 : vector<1x32xf32> to vector<76x32xf32>
    %466 = arith.mulf %464, %465 : vector<76x32xf32>
    %467 = vector.broadcast %444 : vector<1x32xf32> to vector<76x32xf32>
    %468 = arith.addf %466, %467 : vector<76x32xf32>
    %cst_321 = arith.constant 0.000000e+00 : f32
    %469 = vector.broadcast %cst_321 : f32 to vector<76x32xf32>
    %470 = arith.maximumf %468, %469 : vector<76x32xf32>
    %cst_322 = arith.constant 0.000000e+00 : f32
    %471 = vector.broadcast %cst_322 : f32 to vector<4x32xf32>
    %c0_323 = arith.constant 0 : index
    %c0_324 = arith.constant 0 : index
    %472 = vector.load %arg30[%c0_323, %c0_324] : memref<80x32xf32, #tpu.memory_space<vmem>>, vector<76x32xf32>
    tpu.vector_store %arg30[%c0_323, %c0_324], %457 {strides = array<i32>} : memref<80x32xf32, #tpu.memory_space<vmem>>, vector<76x32xf32>,
    %c76_325 = arith.constant 76 : index
    %c0_326 = arith.constant 0 : index
    %473 = vector.load %arg30[%c76_325, %c0_326] : memref<80x32xf32, #tpu.memory_space<vmem>>, vector<4x32xf32>
    tpu.vector_store %arg30[%c76_325, %c0_326], %471 {strides = array<i32>} : memref<80x32xf32, #tpu.memory_space<vmem>>, vector<4x32xf32>,
    %c0_327 = arith.constant 0 : index
    %c0_328 = arith.constant 0 : index
    %474 = vector.load %arg31[%c0_327, %c0_328] : memref<80x32xf32, #tpu.memory_space<vmem>>, vector<4x32xf32>
    tpu.vector_store %arg31[%c0_327, %c0_328], %471 {strides = array<i32>} : memref<80x32xf32, #tpu.memory_space<vmem>>, vector<4x32xf32>,
    %c4_329 = arith.constant 4 : index
    %c0_330 = arith.constant 0 : index
    %475 = vector.load %arg31[%c4_329, %c0_330] : memref<80x32xf32, #tpu.memory_space<vmem>>, vector<76x32xf32>
    tpu.vector_store %arg31[%c4_329, %c0_330], %470 {strides = array<i32>} : memref<80x32xf32, #tpu.memory_space<vmem>>, vector<76x32xf32>,
    %c0_331 = arith.constant 0 : index
    %c0_332 = arith.constant 0 : index
    %476 = vector.load %arg30[%c0_331, %c0_332] : memref<80x32xf32, #tpu.memory_space<vmem>>, vector<80x32xf32>
    %c0_333 = arith.constant 0 : index
    %c0_334 = arith.constant 0 : index
    %477 = vector.load %arg31[%c0_333, %c0_334] : memref<80x32xf32, #tpu.memory_space<vmem>>, vector<80x32xf32>
    %c0_335 = arith.constant 0 : index
    %c0_336 = arith.constant 0 : index
    %478 = vector.load %arg23[%c0_335, %c0_336] : memref<1x16xf32, #tpu.memory_space<vmem>>, vector<1x16xf32>
    %c0_337 = arith.constant 0 : index
    %c0_338 = arith.constant 0 : index
    %c0_339 = arith.constant 0 : index
    %479 = vector.load %arg22[%c0_337, %c0_338, %c0_339] : memref<4x32x16xf32, #tpu.memory_space<vmem>>, vector<1x32x16xf32>
    %480 = vector.shape_cast %479 : vector<1x32x16xf32> to vector<32x16xf32>
    %cst_340 = arith.constant dense<0.000000e+00> : vector<80x16xf32>
    %481 = tpu.matmul %476, %480, %cst_340 {dimension_numbers = #tpu.dot_dimension_numbers<[1], [0], [0], [1], [0, 0, 1, 1], [], []>} : vector<80x32xf32>, vector<32x16xf32>, vector<80x16xf32> -> vector<80x16xf32>
    %c2_341 = arith.constant 2 : index
    %c0_342 = arith.constant 0 : index
    %c0_343 = arith.constant 0 : index
    %482 = vector.load %arg22[%c2_341, %c0_342, %c0_343] : memref<4x32x16xf32, #tpu.memory_space<vmem>>, vector<1x32x16xf32>
    %483 = vector.shape_cast %482 : vector<1x32x16xf32> to vector<32x16xf32>
    %cst_344 = arith.constant dense<0.000000e+00> : vector<80x16xf32>
    %484 = tpu.matmul %477, %483, %cst_344 {dimension_numbers = #tpu.dot_dimension_numbers<[1], [0], [0], [1], [0, 0, 1, 1], [], []>} : vector<80x32xf32>, vector<32x16xf32>, vector<80x16xf32> -> vector<80x16xf32>
    %485 = arith.addf %481, %484 : vector<80x16xf32>
    %486 = vector.broadcast %478 : vector<1x16xf32> to vector<80x16xf32>
    %487 = arith.addf %485, %486 : vector<80x16xf32>
    %cst_345 = arith.constant 0.000000e+00 : f32
    %488 = vector.broadcast %cst_345 : f32 to vector<80x16xf32>
    %489 = arith.maximumf %487, %488 : vector<80x16xf32>
    %c1_346 = arith.constant 1 : index
    %c0_347 = arith.constant 0 : index
    %c0_348 = arith.constant 0 : index
    %490 = vector.load %arg22[%c1_346, %c0_347, %c0_348] : memref<4x32x16xf32, #tpu.memory_space<vmem>>, vector<1x32x16xf32>
    %491 = vector.shape_cast %490 : vector<1x32x16xf32> to vector<32x16xf32>
    %cst_349 = arith.constant dense<0.000000e+00> : vector<80x16xf32>
    %492 = tpu.matmul %476, %491, %cst_349 {dimension_numbers = #tpu.dot_dimension_numbers<[1], [0], [0], [1], [0, 0, 1, 1], [], []>} : vector<80x32xf32>, vector<32x16xf32>, vector<80x16xf32> -> vector<80x16xf32>
    %c3_350 = arith.constant 3 : index
    %c0_351 = arith.constant 0 : index
    %c0_352 = arith.constant 0 : index
    %493 = vector.load %arg22[%c3_350, %c0_351, %c0_352] : memref<4x32x16xf32, #tpu.memory_space<vmem>>, vector<1x32x16xf32>
    %494 = vector.shape_cast %493 : vector<1x32x16xf32> to vector<32x16xf32>
    %cst_353 = arith.constant dense<0.000000e+00> : vector<80x16xf32>
    %495 = tpu.matmul %477, %494, %cst_353 {dimension_numbers = #tpu.dot_dimension_numbers<[1], [0], [0], [1], [0, 0, 1, 1], [], []>} : vector<80x32xf32>, vector<32x16xf32>, vector<80x16xf32> -> vector<80x16xf32>
    %496 = arith.addf %492, %495 : vector<80x16xf32>
    %497 = vector.broadcast %478 : vector<1x16xf32> to vector<80x16xf32>
    %498 = arith.addf %496, %497 : vector<80x16xf32>
    %cst_354 = arith.constant 0.000000e+00 : f32
    %499 = vector.broadcast %cst_354 : f32 to vector<80x16xf32>
    %500 = arith.maximumf %498, %499 : vector<80x16xf32>
    %c4_355 = arith.constant 4 : index
    %c0_356 = arith.constant 0 : index
    %501 = vector.load %arg31[%c4_355, %c0_356] : memref<80x32xf32, #tpu.memory_space<vmem>>, vector<76x32xf32>
    %c0_357 = arith.constant 0 : index
    %c0_358 = arith.constant 0 : index
    %502 = vector.load %arg30[%c0_357, %c0_358] : memref<80x32xf32, #tpu.memory_space<vmem>>, vector<76x32xf32>
    %c0_359 = arith.constant 0 : index
    %c0_360 = arith.constant 0 : index
    %c0_361 = arith.constant 0 : index
    %503 = vector.load %arg22[%c0_359, %c0_360, %c0_361] : memref<4x32x16xf32, #tpu.memory_space<vmem>>, vector<1x32x16xf32>
    %504 = vector.shape_cast %503 : vector<1x32x16xf32> to vector<32x16xf32>
    %cst_362 = arith.constant dense<0.000000e+00> : vector<76x16xf32>
    %505 = tpu.matmul %501, %504, %cst_362 {dimension_numbers = #tpu.dot_dimension_numbers<[1], [0], [0], [1], [0, 0, 1, 1], [], []>} : vector<76x32xf32>, vector<32x16xf32>, vector<76x16xf32> -> vector<76x16xf32>
    %c2_363 = arith.constant 2 : index
    %c0_364 = arith.constant 0 : index
    %c0_365 = arith.constant 0 : index
    %506 = vector.load %arg22[%c2_363, %c0_364, %c0_365] : memref<4x32x16xf32, #tpu.memory_space<vmem>>, vector<1x32x16xf32>
    %507 = vector.shape_cast %506 : vector<1x32x16xf32> to vector<32x16xf32>
    %cst_366 = arith.constant dense<0.000000e+00> : vector<76x16xf32>
    %508 = tpu.matmul %502, %507, %cst_366 {dimension_numbers = #tpu.dot_dimension_numbers<[1], [0], [0], [1], [0, 0, 1, 1], [], []>} : vector<76x32xf32>, vector<32x16xf32>, vector<76x16xf32> -> vector<76x16xf32>
    %509 = arith.addf %505, %508 : vector<76x16xf32>
    %510 = vector.broadcast %478 : vector<1x16xf32> to vector<76x16xf32>
    %511 = arith.addf %509, %510 : vector<76x16xf32>
    %cst_367 = arith.constant 0.000000e+00 : f32
    %512 = vector.broadcast %cst_367 : f32 to vector<76x16xf32>
    %513 = arith.maximumf %511, %512 : vector<76x16xf32>
    %c1_368 = arith.constant 1 : index
    %c0_369 = arith.constant 0 : index
    %c0_370 = arith.constant 0 : index
    %514 = vector.load %arg22[%c1_368, %c0_369, %c0_370] : memref<4x32x16xf32, #tpu.memory_space<vmem>>, vector<1x32x16xf32>
    %515 = vector.shape_cast %514 : vector<1x32x16xf32> to vector<32x16xf32>
    %cst_371 = arith.constant dense<0.000000e+00> : vector<76x16xf32>
    %516 = tpu.matmul %501, %515, %cst_371 {dimension_numbers = #tpu.dot_dimension_numbers<[1], [0], [0], [1], [0, 0, 1, 1], [], []>} : vector<76x32xf32>, vector<32x16xf32>, vector<76x16xf32> -> vector<76x16xf32>
    %c3_372 = arith.constant 3 : index
    %c0_373 = arith.constant 0 : index
    %c0_374 = arith.constant 0 : index
    %517 = vector.load %arg22[%c3_372, %c0_373, %c0_374] : memref<4x32x16xf32, #tpu.memory_space<vmem>>, vector<1x32x16xf32>
    %518 = vector.shape_cast %517 : vector<1x32x16xf32> to vector<32x16xf32>
    %cst_375 = arith.constant dense<0.000000e+00> : vector<76x16xf32>
    %519 = tpu.matmul %502, %518, %cst_375 {dimension_numbers = #tpu.dot_dimension_numbers<[1], [0], [0], [1], [0, 0, 1, 1], [], []>} : vector<76x32xf32>, vector<32x16xf32>, vector<76x16xf32> -> vector<76x16xf32>
    %520 = arith.addf %516, %519 : vector<76x16xf32>
    %521 = vector.broadcast %478 : vector<1x16xf32> to vector<76x16xf32>
    %522 = arith.addf %520, %521 : vector<76x16xf32>
    %cst_376 = arith.constant 0.000000e+00 : f32
    %523 = vector.broadcast %cst_376 : f32 to vector<76x16xf32>
    %524 = arith.maximumf %522, %523 : vector<76x16xf32>
    %cst_377 = arith.constant 0.000000e+00 : f32
    %525 = vector.broadcast %cst_377 : f32 to vector<4x16xf32>
    %c0_378 = arith.constant 0 : index
    %c0_379 = arith.constant 0 : index
    %526 = vector.load %arg32[%c0_378, %c0_379] : memref<84x16xf32, #tpu.memory_space<vmem>>, vector<4x16xf32>
    tpu.vector_store %arg32[%c0_378, %c0_379], %525 {strides = array<i32>} : memref<84x16xf32, #tpu.memory_space<vmem>>, vector<4x16xf32>,
    %c4_380 = arith.constant 4 : index
    %c0_381 = arith.constant 0 : index
    %527 = vector.load %arg32[%c4_380, %c0_381] : memref<84x16xf32, #tpu.memory_space<vmem>>, vector<76x16xf32>
    tpu.vector_store %arg32[%c4_380, %c0_381], %513 {strides = array<i32>} : memref<84x16xf32, #tpu.memory_space<vmem>>, vector<76x16xf32>,
    %c80 = arith.constant 80 : index
    %c0_382 = arith.constant 0 : index
    %528 = vector.load %arg32[%c80, %c0_382] : memref<84x16xf32, #tpu.memory_space<vmem>>, vector<4x16xf32>
    tpu.vector_store %arg32[%c80, %c0_382], %525 {strides = array<i32>} : memref<84x16xf32, #tpu.memory_space<vmem>>, vector<4x16xf32>,
    %c0_383 = arith.constant 0 : index
    %c0_384 = arith.constant 0 : index
    %529 = vector.load %arg33[%c0_383, %c0_384] : memref<84x16xf32, #tpu.memory_space<vmem>>, vector<4x16xf32>
    tpu.vector_store %arg33[%c0_383, %c0_384], %525 {strides = array<i32>} : memref<84x16xf32, #tpu.memory_space<vmem>>, vector<4x16xf32>,
    %c4_385 = arith.constant 4 : index
    %c0_386 = arith.constant 0 : index
    %530 = vector.load %arg33[%c4_385, %c0_386] : memref<84x16xf32, #tpu.memory_space<vmem>>, vector<76x16xf32>
    tpu.vector_store %arg33[%c4_385, %c0_386], %524 {strides = array<i32>} : memref<84x16xf32, #tpu.memory_space<vmem>>, vector<76x16xf32>,
    %c80_387 = arith.constant 80 : index
    %c0_388 = arith.constant 0 : index
    %531 = vector.load %arg33[%c80_387, %c0_388] : memref<84x16xf32, #tpu.memory_space<vmem>>, vector<4x16xf32>
    tpu.vector_store %arg33[%c80_387, %c0_388], %525 {strides = array<i32>} : memref<84x16xf32, #tpu.memory_space<vmem>>, vector<4x16xf32>,
    %c0_389 = arith.constant 0 : index
    %c0_390 = arith.constant 0 : index
    %c0_391 = arith.constant 0 : index
    %532 = vector.load %arg24[%c0_389, %c0_390, %c0_391] : memref<6x16x8xf32, #tpu.memory_space<vmem>>, vector<1x16x8xf32>
    %533 = vector.shape_cast %532 : vector<1x16x8xf32> to vector<16x8xf32>
    %cst_392 = arith.constant dense<0.000000e+00> : vector<80x8xf32>
    %534 = tpu.matmul %489, %533, %cst_392 {dimension_numbers = #tpu.dot_dimension_numbers<[1], [0], [0], [1], [0, 0, 1, 1], [], []>} : vector<80x16xf32>, vector<16x8xf32>, vector<80x8xf32> -> vector<80x8xf32>
    %c1_393 = arith.constant 1 : index
    %c0_394 = arith.constant 0 : index
    %c0_395 = arith.constant 0 : index
    %535 = vector.load %arg24[%c1_393, %c0_394, %c0_395] : memref<6x16x8xf32, #tpu.memory_space<vmem>>, vector<1x16x8xf32>
    %536 = vector.shape_cast %535 : vector<1x16x8xf32> to vector<16x8xf32>
    %cst_396 = arith.constant dense<0.000000e+00> : vector<80x8xf32>
    %537 = tpu.matmul %500, %536, %cst_396 {dimension_numbers = #tpu.dot_dimension_numbers<[1], [0], [0], [1], [0, 0, 1, 1], [], []>} : vector<80x16xf32>, vector<16x8xf32>, vector<80x8xf32> -> vector<80x8xf32>
    %538 = arith.addf %534, %537 : vector<80x8xf32>
    %c4_397 = arith.constant 4 : index
    %c0_398 = arith.constant 0 : index
    %539 = vector.load %arg32[%c4_397, %c0_398] : memref<84x16xf32, #tpu.memory_space<vmem>>, vector<80x16xf32>
    %c2_399 = arith.constant 2 : index
    %c0_400 = arith.constant 0 : index
    %c0_401 = arith.constant 0 : index
    %540 = vector.load %arg24[%c2_399, %c0_400, %c0_401] : memref<6x16x8xf32, #tpu.memory_space<vmem>>, vector<1x16x8xf32>
    %541 = vector.shape_cast %540 : vector<1x16x8xf32> to vector<16x8xf32>
    %cst_402 = arith.constant dense<0.000000e+00> : vector<80x8xf32>
    %542 = tpu.matmul %539, %541, %cst_402 {dimension_numbers = #tpu.dot_dimension_numbers<[1], [0], [0], [1], [0, 0, 1, 1], [], []>} : vector<80x16xf32>, vector<16x8xf32>, vector<80x8xf32> -> vector<80x8xf32>
    %543 = arith.addf %538, %542 : vector<80x8xf32>
    %c4_403 = arith.constant 4 : index
    %c0_404 = arith.constant 0 : index
    %544 = vector.load %arg33[%c4_403, %c0_404] : memref<84x16xf32, #tpu.memory_space<vmem>>, vector<80x16xf32>
    %c3_405 = arith.constant 3 : index
    %c0_406 = arith.constant 0 : index
    %c0_407 = arith.constant 0 : index
    %545 = vector.load %arg24[%c3_405, %c0_406, %c0_407] : memref<6x16x8xf32, #tpu.memory_space<vmem>>, vector<1x16x8xf32>
    %546 = vector.shape_cast %545 : vector<1x16x8xf32> to vector<16x8xf32>
    %cst_408 = arith.constant dense<0.000000e+00> : vector<80x8xf32>
    %547 = tpu.matmul %544, %546, %cst_408 {dimension_numbers = #tpu.dot_dimension_numbers<[1], [0], [0], [1], [0, 0, 1, 1], [], []>} : vector<80x16xf32>, vector<16x8xf32>, vector<80x8xf32> -> vector<80x8xf32>
    %548 = arith.addf %543, %547 : vector<80x8xf32>
    %c0_409 = arith.constant 0 : index
    %c0_410 = arith.constant 0 : index
    %549 = vector.load %arg33[%c0_409, %c0_410] : memref<84x16xf32, #tpu.memory_space<vmem>>, vector<80x16xf32>
    %c4_411 = arith.constant 4 : index
    %c0_412 = arith.constant 0 : index
    %c0_413 = arith.constant 0 : index
    %550 = vector.load %arg24[%c4_411, %c0_412, %c0_413] : memref<6x16x8xf32, #tpu.memory_space<vmem>>, vector<1x16x8xf32>
    %551 = vector.shape_cast %550 : vector<1x16x8xf32> to vector<16x8xf32>
    %cst_414 = arith.constant dense<0.000000e+00> : vector<80x8xf32>
    %552 = tpu.matmul %549, %551, %cst_414 {dimension_numbers = #tpu.dot_dimension_numbers<[1], [0], [0], [1], [0, 0, 1, 1], [], []>} : vector<80x16xf32>, vector<16x8xf32>, vector<80x8xf32> -> vector<80x8xf32>
    %553 = arith.addf %548, %552 : vector<80x8xf32>
    %c0_415 = arith.constant 0 : index
    %c0_416 = arith.constant 0 : index
    %554 = vector.load %arg32[%c0_415, %c0_416] : memref<84x16xf32, #tpu.memory_space<vmem>>, vector<80x16xf32>
    %c5_417 = arith.constant 5 : index
    %c0_418 = arith.constant 0 : index
    %c0_419 = arith.constant 0 : index
    %555 = vector.load %arg24[%c5_417, %c0_418, %c0_419] : memref<6x16x8xf32, #tpu.memory_space<vmem>>, vector<1x16x8xf32>
    %556 = vector.shape_cast %555 : vector<1x16x8xf32> to vector<16x8xf32>
    %cst_420 = arith.constant dense<0.000000e+00> : vector<80x8xf32>
    %557 = tpu.matmul %554, %556, %cst_420 {dimension_numbers = #tpu.dot_dimension_numbers<[1], [0], [0], [1], [0, 0, 1, 1], [], []>} : vector<80x16xf32>, vector<16x8xf32>, vector<80x8xf32> -> vector<80x8xf32>
    %558 = arith.addf %553, %557 : vector<80x8xf32>
    %c0_421 = arith.constant 0 : index
    %c0_422 = arith.constant 0 : index
    %559 = vector.load %arg25[%c0_421, %c0_422] : memref<1x8xf32, #tpu.memory_space<vmem>>, vector<1x8xf32>
    %560 = vector.broadcast %559 : vector<1x8xf32> to vector<80x8xf32>
    %561 = arith.addf %558, %560 : vector<80x8xf32>
    %c0_423 = arith.constant 0 : index
    %c0_424 = arith.constant 0 : index
    %562 = vector.load %arg26[%c0_423, %c0_424] : memref<80x8xf32, #tpu.memory_space<vmem>>, vector<80x8xf32>
    tpu.vector_store %arg26[%c0_423, %c0_424], %561 {strides = array<i32>} : memref<80x8xf32, #tpu.memory_space<vmem>>, vector<80x8xf32>,
    return
  }
}

</mosaic_0001>

<bundles_post_ra>
// kernel: cbn_vae_forward.1
= control target key start
LH: loop header
LB: loop body
LE: loop exit
PB: predicated region body
PF: predicated region fallthrough
CT: control target
= control target key end

     0   :  { %s14786_s0 = inlined_call_operand.vmem [shape: f32[320,6], index: 0, kind: input, shape index: {}]   ;;  %s14787_s1 = inlined_call_operand.vmem [shape: f32[4,16], index: 1, kind: input, shape index: {}]   ;;  %s14788_s2 = inlined_call_operand.vmem [shape: f32[6,16], index: 2, kind: input, shape index: {}]   ;;  %s14789_s3 = inlined_call_operand.vmem [shape: f32[4,16,32], index: 3, kind: input, shape index: {}]   ;;  %s14790_s4 = inlined_call_operand.vmem [shape: f32[1,32], index: 4, kind: input, shape index: {}]   ;;  %s14791_s5 = inlined_call_operand.vmem [shape: f32[1,32], index: 5, kind: input, shape index: {}]   ;;  %s14792_s6 = inlined_call_operand.vmem [shape: f32[4,32,64], index: 6, kind: input, shape index: {}]   ;;  %s14793_s7 = inlined_call_operand.vmem [shape: f32[1,64], index: 7, kind: input, shape index: {}]   ;;  %s14794_s8 = inlined_call_operand.vmem [shape: f32[1,64], index: 8, kind: input, shape index: {}]   ;;  %s14795_s9 = inlined_call_operand.vmem [shape: bf16[18,64,256], index: 9, kind: input, shape index: {}]   ;;  %s14796_s10 = inlined_call_operand.vmem [shape: f32[1,256], index: 10, kind: input, shape index: {}]   ;;  %s14797_s11 = inlined_call_operand.vmem [shape: f32[256,32], index: 11, kind: input, shape index: {}]   ;;  %s14798_s12 = inlined_call_operand.vmem [shape: f32[1,32], index: 12, kind: input, shape index: {}]   ;;  %s14799_s13 = inlined_call_operand.vmem [shape: f32[16,256], index: 13, kind: input, shape index: {}]   ;;  %s14800_s14 = inlined_call_operand.vmem [shape: f32[1,256], index: 14, kind: input, shape index: {}]   ;;  %s14801_s15 = inlined_call_operand.vmem [shape: bf16[18,256,64], index: 15, kind: input, shape index: {}]   ;;  %s14802_s16 = inlined_call_operand.vmem [shape: f32[18,64], index: 16, kind: input, shape index: {}]   ;;  %s14803_s17 = inlined_call_operand.vmem [shape: f32[1,64], index: 17, kind: input, shape index: {}]   ;;  %s14804_s18 = inlined_call_operand.vmem [shape: f32[1,64], index: 18, kind: input, shape index: {}]   ;;  %s14805_s19 = inlined_call_operand.vmem [shape: f32[4,64,32], index: 19, kind: input, shape index: {}]   ;;  %s14806_s20 = inlined_call_operand.vmem [shape: f32[1,32], index: 20, kind: input, shape index: {}]   ;;  %s14807_s21 = inlined_call_operand.vmem [shape: f32[1,32], index: 21, kind: input, shape index: {}]   ;;  %s14808_s22 = inlined_call_operand.vmem [shape: f32[4,32,16], index: 22, kind: input, shape index: {}]   ;;  %s14809_s23 = inlined_call_operand.vmem [shape: f32[1,16], index: 23, kind: input, shape index: {}]   ;;  %s14810_s24 = inlined_call_operand.vmem [shape: f32[6,16,8], index: 24, kind: input, shape index: {}]   ;;  %s14811_s25 = inlined_call_operand.vmem [shape: f32[1,8], index: 25, kind: input, shape index: {}]   ;;  %s14812_s26 = inlined_call_operand.vmem [shape: f32[80,8], index: 26, kind: output, shape index: {0}]   ;;  %s14813_s27 = inlined_call_operand.hbm [shape: f32[4,16], index: 27, kind: output, shape index: {1}]   ;;  %s14814_s28 = inlined_call_operand.hbm [shape: f32[4,16], index: 28, kind: output, shape index: {2}]  }
   0x1   :  { %14820 = sst [smem:[#allocation13_spill]] %s14786_s0 }
   0x2   :  { %14821 = sst [smem:[#allocation14_spill]] %s14787_s1 }
   0x3   :  { %14822 = sst [smem:[#allocation15_spill]] %s14788_s2 }
   0x4   :  { %14823 = sst [smem:[#allocation16_spill]] %s14789_s3 }
   0x5   :  { %14824 = sst [smem:[#allocation17_spill]] %s14790_s4 }
   0x6   :  { %14825 = sst [smem:[#allocation18_spill]] %s14791_s5 }
   0x7   :  { %14826 = sst [smem:[#allocation19_spill]] %s14792_s6 }
   0x8   :  { %14827 = sst [smem:[#allocation20_spill]] %s14793_s7 }
   0x9   :  { %14828 = sst [smem:[#allocation21_spill]] %s14794_s8 }
   0xa   :  { %14829 = sst [smem:[#allocation22_spill]] %s14795_s9 }
   0xb   :  { %14830 = sst [smem:[#allocation23_spill]] %s14796_s10 }
   0xc   :  { %14831 = sst [smem:[#allocation24_spill]] %s14797_s11 }
   0xd   :  { %14832 = sst [smem:[#allocation25_spill]] %s14798_s12 }
   0xe   :  { %34 = vsyncpa [#allocation8], 0  ;;  %s14833_s9 = sld [smem:[#allocation15_spill]]  ;;  %vm251_vm0 = vcmask 1045504   ;;  %vm130_vm1 = vcmask 48128  }
   0xf   :  { %s14834_s6 = sld [smem:[#allocation13_spill]] }
  0x14   :  { %v129_v0 = vld [vmem:[%s14833_s9] sm:$0x3f] }
  0x15   :  { %v89_v1 = vld [vmem:[%s14834_s6] sm:$0xff]  ;;  %7736 = vmatpush.msk.msra.mxu0 %vm251_vm0, %v129_v0  ;;  %11015 = vmatpush.msk.msra.mxu3 %vm251_vm0, %v129_v0  ;;  %v90_v2 = vld [vmem:[%s14834_s6 + $0x8] sm:$0xff] }
  0x16   :  { %7737 = vmatmul.msk.f32.vlgmr.msra.gmra.mxu0 %vm130_vm1, %v89_v1 }
  0x1e   :  { %7738 = vmatmul.msk.f32.gmra.mxu0 %vm130_vm1, %v90_v2 }
  0x1f   :  { %35 = vsyncpa [#allocation10], 0  ;;  %v91_v3 = vld [vmem:[%s14834_s6 + $0x10] sm:$0xff]  ;;  %v92_v4 = vld [vmem:[%s14834_s6 + $0x18] sm:$0xff]  ;;  %s14835_s2 = sld [smem:[#allocation16_spill]]  ;;  %vm439_vm2 = vcmask 130048  }
  0x20   :  { %v93_v5 = vld [vmem:[%s14834_s6 + $0x20] sm:$0xff]  ;;  %v94_v6 = vld [vmem:[%s14834_s6 + $0x28] sm:$0xff]  ;;  %v95_v7 = vld [vmem:[%s14834_s6 + $0x30] sm:$0xff]  ;;  %vm868_vm3 = vcmask 1043456   ;;  %s14836_s0 = sld [smem:[#allocation19_spill]]  ;;  %vm1136_vm4 = vcmask 261120  }
  0x21   :  { %v96_v8 = vld [vmem:[%s14834_s6 + $0x38] sm:$0xff]  ;;  %v97_v9 = vld [vmem:[%s14834_s6 + $0x40] sm:$0xff]  ;;  %v98_v10 = vld [vmem:[%s14834_s6 + $0x48] sm:$0xff]  ;;  %s14838_s3 = sld [smem:[#allocation18_spill]]  ;;  %vm1576_vm5 = vcmask 523264   ;;  %s11106_s10 = smov 16  }
  0x22   :  { %v99_v11 = vld [vmem:[%s14834_s6 + $0x50] sm:$0xff]  ;;  %v100_v12 = vld [vmem:[%s14834_s6 + $0x58] sm:$0xff]  ;;  %v101_v13 = vld [vmem:[%s14834_s6 + $0x60] sm:$0xff]  ;;  %s14839_s7 = sld [smem:[#allocation22_spill]]  ;;  %vm3076_vm6 = vcmask 125952   ;;  %s11108_s8 = smov 112  }
  0x23   :  { %v102_v14 = vld [vmem:[%s14834_s6 + $0x68] sm:$0xff]  ;;  %v103_v15 = vld [vmem:[%s14834_s6 + $0x70] sm:$0xff]  ;;  %v104_v16 = vld [vmem:[%s14834_s6 + $0x78] sm:$0xff]  ;;  %s14841_s29 = sld [smem:[#allocation21_spill]]  ;;  %vm3153_vm7 = vcmask 519168   ;;  %vm6439_vm8 = vcmask 257024  }
  0x24   :  { %v105_v19 = vld [vmem:[%s14834_s6 + $0x80] sm:$0xff]  ;;  %v106_v22 = vld [vmem:[%s14834_s6 + $0x88] sm:$0xff]  ;;  %v107_v24 = vld [vmem:[%s14834_s6 + $0x90] sm:$0xff]  ;;  %s14842_s1 = sld [smem:[#allocation24_spill]]  ;;  %vm7689_vm9 = vcmask 64512  }
  0x25   :  { %v11326_v17 = vld [vmem:[%s14835_s2 + $0x8] sm:$0xff]  ;;  %v11337_v20 = vld [vmem:[%s14835_s2] sm:$0xff]  ;;  %v108_v26 = vld [vmem:[%s14834_s6 + $0x98] sm:$0xff]  ;;  %s14845_s4 = sld [smem:[#allocation25_spill]] }
  0x26   :  { %7739 = vmatmul.msk.f32.gmra.mxu0 %vm130_vm1, %v91_v3  ;;  %11016 = vmatpush.msra.mxu2 %v11326_v17  ;;  %v109_v28 = vld [vmem:[%s14834_s6 + $0xa0] sm:$0xff]  ;;  %v110_v31 = vld [vmem:[%s14834_s6 + $0xa8] sm:$0xff]  ;;  %v7778_v36 = vld [vmem:[%s14835_s2 + $0x18] sm:$0xff] }
  0x27   :  { %v111_v38 = vld [vmem:[%s14834_s6 + $0xb0] sm:$0xff]  ;;  %484 = vmatpush.msra.mxu1 %v7778_v36  ;;  %v112_v44 = vld [vmem:[%s14834_s6 + $0xb8] sm:$0xff]  ;;  %v113_v49 = vld [vmem:[%s14834_s6 + $0xc0] sm:$0xff] }
  0x28   :  { %11017 = vmatpush.msra.mxu2 %v11337_v20  ;;  %v7777_v40 = vld [vmem:[%s14835_s2 + $0x10] sm:$0xff]  ;;  %v114_v54 = vld [vmem:[%s14834_s6 + $0xc8] sm:$0xff]  ;;  %v116_v62 = vld [vmem:[%s14834_s6 + $0xd8] sm:$0xff] }
  0x29   :  { %485 = vmatpush.msra.mxu1 %v7777_v40  ;;  %v115_v59 = vld [vmem:[%s14834_s6 + $0xd0] sm:$0xff] }
  0x2a   :  { %788 = vmatpush.msrb.mxu2 %v7778_v36 }
  0x2b   :  { %561 = vmatpush.msrb.mxu1 %v11326_v17 }
  0x2c   :  { %789 = vmatpush.msrb.mxu2 %v7777_v40 }
  0x2d   :  { %562 = vmatpush.msrb.mxu1 %v11337_v20 }
  0x2e   :  { %7740 = vmatmul.msk.f32.gmra.mxu0 %vm130_vm1, %v92_v4  ;;  %v117_v4 = vld [vmem:[%s14834_s6 + $0xe0] sm:$0xff] }
  0x36   :  { %7741 = vmatmul.msk.f32.gmra.mxu0 %vm130_vm1, %v93_v5 }
  0x3e   :  { %7742 = vmatmul.msk.f32.gmra.mxu0 %vm130_vm1, %v94_v6  ;;  %v125_v6 = vld [vmem:[%s14834_s6 + $0x120] sm:$0xff] }
  0x3f   :  { %7773 = vmatmul.msk.f32.vlgmr.msra.gmra.mxu3 %vm130_vm1, %v125_v6 }
  0x46   :  { %7743 = vmatmul.msk.f32.gmra.mxu0 %vm130_vm1, %v95_v7 }
  0x4e   :  { %7744 = vmatmul.msk.f32.gmra.mxu0 %vm130_vm1, %v96_v8 }
  0x56   :  { %7745 = vmatmul.msk.f32.gmra.mxu0 %vm130_vm1, %v97_v9 }
  0x5e   :  { %7746 = vmatmul.msk.f32.gmra.mxu0 %vm130_vm1, %v98_v10  ;;  %v118_v10 = vld [vmem:[%s14834_s6 + $0xe8] sm:$0xff] }
  0x66   :  { %7747 = vmatmul.msk.f32.gmra.mxu0 %vm130_vm1, %v99_v11 }
  0x6e   :  { %7748 = vmatmul.msk.f32.gmra.mxu0 %vm130_vm1, %v100_v12  ;;  %v126_v12 = vld [vmem:[%s14834_s6 + $0x128] sm:$0xff] }
  0x6f   :  { %7774 = vmatmul.msk.f32.gmra.mxu3 %vm130_vm1, %v126_v12 }
  0x76   :  { %7749 = vmatmul.msk.f32.gmra.mxu0 %vm130_vm1, %v101_v13 }
  0x7e   :  { %7750 = vmatmul.msk.f32.gmra.mxu0 %vm130_vm1, %v102_v14 }
  0x86   :  { %7751 = vmatmul.msk.f32.gmra.mxu0 %vm130_vm1, %v103_v15 }
  0x8e   :  { %7752 = vmatmul.msk.f32.gmra.mxu0 %vm130_vm1, %v104_v16  ;;  %v119_v16 = vld [vmem:[%s14834_s6 + $0xf0] sm:$0xff] }
  0x93   :  { %v11328_v18 = vpop.f32.mrf.mxu0 }
  0x96   :  { %7753 = vmatmul.msk.f32.gmra.mxu0 %vm130_vm1, %v105_v19 }
  0x9b   :  { %v11341_v21 = vpop.f32.mrf.mxu0 }
  0x9e   :  { %7754 = vmatmul.msk.f32.gmra.mxu0 %vm130_vm1, %v106_v22  ;;  %v127_v22 = vld [vmem:[%s14834_s6 + $0x130] sm:$0xff] }
  0x9f   :  { %7775 = vmatmul.msk.f32.gmra.mxu3 %vm130_vm1, %v127_v22  ;;  %v7811_v22 = vld [vmem:[%s14835_s2 + $0x30] sm:$0xff] }
  0xa3   :  { %v11347_v23 = vpop.f32.mrf.mxu0 }
  0xa6   :  { %7755 = vmatmul.msk.f32.gmra.mxu0 %vm130_vm1, %v107_v24 }
  0xab   :  { %v11353_v25 = vpop.f32.mrf.mxu0 }
  0xae   :  { %7756 = vmatmul.msk.f32.gmra.mxu0 %vm130_vm1, %v108_v26 }
  0xb3   :  { %v284_v27 = vpop.f32.mrf.mxu0 }
  0xb4   :  { %v396_v29 = vmax.f32 %v284_v27, 0.0 }
  0xb6   :  { %7757 = vmatmul.msk.f32.gmra.mxu0 %vm130_vm1, %v109_v28  ;;  %7793 = vmatmul.msk.f32.vlgmr.msra.gmra.mxu2 %vm439_vm2, %v396_v29  ;;  %v11367_v33 = vrot.slane %v396_v29, 4  ;;  %v120_v28 = vld [vmem:[%s14834_s6 + $0xf8] sm:$0xff] }
  0xbb   :  { %v287_v30 = vpop.f32.mrf.mxu0 }
  0xbc   :  { %v397_v32 = vmax.f32 %v287_v30, 0.0  ;;  %v128_v30 = vld [vmem:[%s14834_s6 + $0x138] sm:$0xff] }
  0xbd   :  { %7776 = vmatmul.msk.f32.gmra.mxu3 %vm130_vm1, %v128_v30 }
  0xbe   :  { %v878_v34 = vrot.slane %v397_v32, 4  ;;  %7758 = vmatmul.msk.f32.gmra.mxu0 %vm130_vm1, %v110_v31  ;;  %7794 = vmatmul.msk.f32.gmra.mxu2 %vm439_vm2, %v397_v32 }
  0xc0   :  { %v11373_v35 = vsel %vm868_vm3, %v11367_v33, %v878_v34 }
  0xc3   :  { %v290_v37 = vpop.f32.mrf.mxu0 }
  0xc4   :  { %v398_v39 = vmax.f32 %v290_v37, 0.0  ;;  %v121_v37 = vld [vmem:[%s14834_s6 + $0x100] sm:$0xff] }
  0xc6   :  { %v880_v41 = vrot.slane %v398_v39, 4  ;;  %7759 = vmatmul.msk.f32.gmra.mxu0 %vm130_vm1, %v111_v38  ;;  %7795 = vmatmul.msk.f32.gmra.mxu2 %vm439_vm2, %v398_v39  ;;  %v11491_v39 = vld [vmem:[%s14835_s2 + $0x20] sm:$0xff] }
  0xc8   :  { %v11388_v42 = vsel %vm868_vm3, %v878_v34, %v880_v41  ;;  %v11482_v34 = vld [vmem:[%s14835_s2 + $0x28] sm:$0xff] }
  0xc9   :  { %641 = vmatpush.msrb.mxu3 %v11482_v34 }
  0xcb   :  { %v293_v43 = vpop.f32.mrf.mxu0  ;;  %642 = vmatpush.msrb.mxu3 %v11491_v39 }
  0xcc   :  { %v399_v45 = vmax.f32 %v293_v43, 0.0 }
  0xcd   :  { %835 = vmatpush.msra.mxu3 %v11326_v17 }
  0xce   :  { %v882_v46 = vrot.slane %v399_v45, 4  ;;  %7760 = vmatmul.msk.f32.gmra.mxu0 %vm130_vm1, %v112_v44  ;;  %7796 = vmatmul.msk.f32.gmra.mxu2 %vm439_vm2, %v399_v45  ;;  %v122_v44 = vld [vmem:[%s14834_s6 + $0x108] sm:$0xff] }
  0xcf   :  { %836 = vmatpush.msra.mxu3 %v11337_v20 }
  0xd0   :  { %v11397_v47 = vsel %vm868_vm3, %v880_v41, %v882_v46 }
  0xd3   :  { %v296_v48 = vpop.f32.mrf.mxu0 }
  0xd4   :  { %v400_v50 = vmax.f32 %v296_v48, 0.0 }
  0xd6   :  { %v884_v51 = vrot.slane %v400_v50, 4  ;;  %7761 = vmatmul.msk.f32.gmra.mxu0 %vm130_vm1, %v113_v49  ;;  %7797 = vmatmul.msk.f32.gmra.mxu2 %vm439_vm2, %v400_v50  ;;  %v123_v49 = vld [vmem:[%s14834_s6 + $0x110] sm:$0xff] }
  0xd8   :  { %v11405_v52 = vsel %vm868_vm3, %v882_v46, %v884_v51 }
  0xdb   :  { %v299_v53 = vpop.f32.mrf.mxu0 }
  0xdc   :  { %v401_v55 = vmax.f32 %v299_v53, 0.0 }
  0xde   :  { %v11410_v56 = vrot.slane %v401_v55, 4  ;;  %7762 = vmatmul.msk.f32.gmra.mxu0 %vm130_vm1, %v114_v54  ;;  %7798 = vmatmul.msk.f32.gmra.mxu2 %vm439_vm2, %v401_v55  ;;  %v124_v54 = vld [vmem:[%s14834_s6 + $0x118] sm:$0xff]  ;;  %s14837_s6 = sld [smem:[#allocation17_spill]] }
  0xe0   :  { %v11416_v57 = vsel %vm868_vm3, %v884_v51, %v11410_v56 }
  0xe3   :  { %v302_v58 = vpop.f32.mrf.mxu0 }
  0xe4   :  { %v402_v60 = vmax.f32 %v302_v58, 0.0 }
  0xe6   :  { %7763 = vmatmul.msk.f32.gmra.mxu0 %vm130_vm1, %v115_v59  ;;  %7779 = vmatmul.msk.f32.vlgmr.msra.gmra.mxu1 %vm439_vm2, %v402_v60  ;;  %v965_v0 = vrot.slane %v402_v60, 4 }
  0xeb   :  { %v305_v61 = vpop.f32.mrf.mxu0 }
  0xec   :  { %v403_v63 = vmax.f32 %v305_v61, 0.0  ;;  %v392_v61 = vmax.f32 %v11328_v18, 0.0 }
  0xee   :  { %v966_v1 = vrot.slane %v403_v63, 4  ;;  %7764 = vmatmul.msk.f32.gmra.mxu0 %vm130_vm1, %v116_v62  ;;  %7780 = vmatmul.msk.f32.gmra.mxu1 %vm439_vm2, %v403_v63 }
  0xf0   :  { %v11429_v2 = vsel %vm868_vm3, %v965_v0, %v966_v1  ;;  %v393_v0 = vmax.f32 %v11341_v21, 0.0 }
  0xf3   :  { %v308_v3 = vpop.f32.mrf.mxu0 }
  0xf4   :  { %v404_v5 = vmax.f32 %v308_v3, 0.0 }
  0xf6   :  { %v968_v7 = vrot.slane %v404_v5, 4  ;;  %7765 = vmatmul.msk.f32.gmra.mxu0 %vm130_vm1, %v117_v4  ;;  %7781 = vmatmul.msk.f32.gmra.mxu1 %vm439_vm2, %v404_v5  ;;  %v394_v4 = vmax.f32 %v11347_v23, 0.0 }
  0xf8   :  { %v11441_v8 = vsel %vm868_vm3, %v966_v1, %v968_v7 }
  0xfb   :  { %v311_v9 = vpop.f32.mrf.mxu0 }
  0xfc   :  { %v405_v11 = vmax.f32 %v311_v9, 0.0 }
  0xfe   :  { %v970_v13 = vrot.slane %v405_v11, 4  ;;  %7766 = vmatmul.msk.f32.gmra.mxu0 %vm130_vm1, %v118_v10  ;;  %7782 = vmatmul.msk.f32.gmra.mxu1 %vm439_vm2, %v405_v11 }
 0x100   :  { %v11453_v14 = vsel %vm868_vm3, %v968_v7, %v970_v13  ;;  %v395_v7 = vmax.f32 %v11353_v25, 0.0 }
 0x102   :  { %v874_v18 = vrot.slane %v395_v7, 4 }
 0x103   :  { %v314_v15 = vpop.f32.mrf.mxu0 }
 0x104   :  { %v406_v19 = vmax.f32 %v314_v15, 0.0  ;;  %v7812_v15 = vld [vmem:[%s14835_s2 + $0x38] sm:$0xff] }
 0x105   :  { %731 = vmatpush.msra.mxu1 %v7812_v15  ;;  %1018 = vmatpush.msra.mxu2 %v7812_v15 }
 0x106   :  { %v972_v24 = vrot.slane %v406_v19, 4  ;;  %7767 = vmatmul.msk.f32.gmra.mxu0 %vm130_vm1, %v119_v16  ;;  %7783 = vmatmul.msk.f32.gmra.mxu1 %vm439_vm2, %v406_v19 }
 0x107   :  { %732 = vmatpush.msra.mxu1 %v7811_v22  ;;  %1019 = vmatpush.msra.mxu2 %v7811_v22 }
 0x108   :  { %v11465_v26 = vsel %vm868_vm3, %v970_v13, %v972_v24 }
 0x10b   :  { %v317_v27 = vpop.f32.mrf.mxu0 }
 0x10c   :  { %v407_v29 = vmax.f32 %v317_v27, 0.0 }
 0x10e   :  { %v974_v31 = vrot.slane %v407_v29, 4  ;;  %7768 = vmatmul.msk.f32.gmra.mxu0 %vm130_vm1, %v120_v28  ;;  %7784 = vmatmul.msk.f32.gmra.mxu1 %vm439_vm2, %v407_v29 }
 0x110   :  { %v11477_v32 = vsel %vm868_vm3, %v972_v24, %v974_v31 }
 0x113   :  { %v320_v36 = vpop.f32.mrf.mxu0 }
 0x114   :  { %v408_v38 = vmax.f32 %v320_v36, 0.0 }
 0x116   :  { %v976_v40 = vrot.slane %v408_v38, 4  ;;  %7769 = vmatmul.msk.f32.gmra.mxu0 %vm130_vm1, %v121_v37  ;;  %7785 = vmatmul.msk.f32.gmra.mxu1 %vm439_vm2, %v408_v38 }
 0x118   :  { %v11498_v41 = vsel %vm868_vm3, %v974_v31, %v976_v40 }
 0x11b   :  { %v323_v43 = vpop.f32.mrf.mxu0 }
 0x11c   :  { %v409_v45 = vmax.f32 %v323_v43, 0.0 }
 0x11e   :  { %v978_v46 = vrot.slane %v409_v45, 4  ;;  %7770 = vmatmul.msk.f32.gmra.mxu0 %vm130_vm1, %v122_v44  ;;  %7786 = vmatmul.msk.f32.gmra.mxu1 %vm439_vm2, %v409_v45 }
 0x120   :  { %v11507_v48 = vsel %vm868_vm3, %v976_v40, %v978_v46 }
 0x123   :  { %v326_v17 = vpop.f32.mrf.mxu0 }
 0x124   :  { %v410_v20 = vmax.f32 %v326_v17, 0.0 }
 0x126   :  { %v980_v50 = vrot.slane %v410_v20, 4  ;;  %7771 = vmatmul.msk.f32.gmra.mxu0 %vm130_vm1, %v123_v49  ;;  %7787 = vmatmul.msk.f32.gmra.mxu1 %vm439_vm2, %v410_v20 }
 0x128   :  { %v11515_v51 = vsel %vm868_vm3, %v978_v46, %v980_v50 }
 0x12b   :  { %v329_v53 = vpop.f32.mrf.mxu0 }
 0x12c   :  { %v411_v55 = vmax.f32 %v329_v53, 0.0 }
 0x12e   :  { %v11520_v58 = vrot.slane %v411_v55, 4  ;;  %7772 = vmatmul.msk.f32.gmra.mxu0 %vm130_vm1, %v124_v54  ;;  %7788 = vmatmul.msk.f32.gmra.mxu1 %vm439_vm2, %v411_v55  ;;  %v380_v54 = vpop.f32.mrf.mxu3 }
 0x130   :  { %v11526_v59 = vsel %vm868_vm3, %v980_v50, %v11520_v58 }
 0x133   :  { %v332_v60 = vpop.f32.mrf.mxu0 }
 0x134   :  { %v412_v62 = vmax.f32 %v332_v60, 0.0 }
 0x136   :  { %7789 = vmatmul.msk.f32.vlgmr.msrb.gmra.mxu1 %vm439_vm2, %v392_v61  ;;  %7801 = vmatmul.msk.f32.vlgmr.msrb.gmra.mxu3 %vm439_vm2, %v412_v62 }
 0x137   :  { %922 = vmatpush.msrb.mxu1 %v11482_v34 }
 0x139   :  { %923 = vmatpush.msrb.mxu1 %v11491_v39  ;;  %v11609_v15 = vpop.f32.mrf.mxu2 }
 0x13b   :  { %v335_v63 = vpop.f32.mrf.mxu0 }
 0x13c   :  { %v413_v1 = vmax.f32 %v335_v63, 0.0  ;;  %v428_v63 = vmax.f32 %v380_v54, 0.0  ;;  %v11686_v54 = vld [vmem:[%s14837_s6] ss:$0 sm:$0xff]  ;;  %s7720_s6 = sshll.u32 %s14814_s28, 4  ;;  %s7721_s6 = int_to_ptr.hbm [resolvable:$true] %s7720_s6 }
 0x13e   :  { %7790 = vmatmul.msk.f32.gmra.mxu1 %vm439_vm2, %v393_v0  ;;  %7802 = vmatmul.msk.f32.gmra.mxu3 %vm439_vm2, %v413_v1 }
 0x143   :  { %v338_v3 = vpop.f32.mrf.mxu0 }
 0x144   :  { %v414_v5 = vmax.f32 %v338_v3, 0.0  ;;  %v383_v3 = vpop.f32.mrf.mxu3 }
 0x146   :  { %7791 = vmatmul.msk.f32.gmra.mxu1 %vm439_vm2, %v394_v4  ;;  %7803 = vmatmul.msk.f32.gmra.mxu3 %vm439_vm2, %v414_v5 }
 0x14b   :  { %v341_v6 = vpop.f32.mrf.mxu0 }
 0x14c   :  { %v415_v9 = vmax.f32 %v341_v6, 0.0 }
 0x14e   :  { %7792 = vmatmul.msk.f32.gmra.mxu1 %vm439_vm2, %v395_v7  ;;  %7804 = vmatmul.msk.f32.gmra.mxu3 %vm439_vm2, %v415_v9 }
 0x153   :  { %v344_v10 = vpop.f32.mrf.mxu0 }
 0x154   :  { %v416_v11 = vmax.f32 %v344_v10, 0.0 }
 0x156   :  { %7805 = vmatmul.msk.f32.gmra.mxu3 %vm439_vm2, %v416_v11 }
 0x15b   :  { %v347_v12 = vpop.f32.mrf.mxu0 }
 0x15c   :  { %v417_v13 = vmax.f32 %v347_v12, 0.0 }
 0x15e   :  { %7806 = vmatmul.msk.f32.gmra.mxu3 %vm439_vm2, %v417_v13 }
 0x163   :  { %v350_v16 = vpop.f32.mrf.mxu0  ;;  %v11561_v30 = vpop.f32.mrf.mxu1 }
 0x164   :  { %v418_v19 = vmax.f32 %v350_v16, 0.0  ;;  %v870_v16 = vrot.slane %v393_v0, 4 }
 0x166   :  { %7807 = vmatmul.msk.f32.gmra.mxu3 %vm439_vm2, %v418_v19 }
 0x16b   :  { %v353_v24 = vpop.f32.mrf.mxu0  ;;  %v11564_v37 = vpop.f32.mrf.mxu1 }
 0x16c   :  { %v419_v27 = vmax.f32 %v353_v24, 0.0 }
 0x16e   :  { %7808 = vmatmul.msk.f32.gmra.mxu3 %vm439_vm2, %v419_v27 }
 0x173   :  { %v356_v28 = vpop.f32.mrf.mxu0  ;;  %v11569_v43 = vpop.f32.mrf.mxu1 }
 0x174   :  { %v420_v29 = vmax.f32 %v356_v28, 0.0  ;;  %v11624_v28 = vpop.f32.mrf.mxu2 }
 0x176   :  { %7809 = vmatmul.msk.f32.gmra.mxu3 %vm439_vm2, %v420_v29 }
 0x17b   :  { %v359_v31 = vpop.f32.mrf.mxu0  ;;  %v11576_v46 = vpop.f32.mrf.mxu1 }
 0x17c   :  { %v421_v36 = vmax.f32 %v359_v31, 0.0 }
 0x17e   :  { %7810 = vmatmul.msk.f32.gmra.mxu3 %vm439_vm2, %v421_v36 }
 0x183   :  { %v362_v38 = vpop.f32.mrf.mxu0  ;;  %v11582_v20 = vpop.f32.mrf.mxu1 }
 0x184   :  { %v422_v34 = vmax.f32 %v362_v38, 0.0 }
 0x186   :  { %7813 = vmatmul.msk.f32.vlgmr.msra.gmra.mxu1 %vm439_vm2, %v422_v34  ;;  %7823 = vmatmul.msk.f32.vlgmr.msrb.gmra.mxu2 %vm439_vm2, %v422_v34 }
 0x187   :  { %7833 = vmatmul.msk.f32.vlgmr.msra.gmra.mxu3 %vm439_vm2, %v412_v62 }
 0x18b   :  { %v365_v39 = vpop.f32.mrf.mxu0  ;;  %v11587_v55 = vpop.f32.mrf.mxu1 }
 0x18c   :  { %v423_v40 = vmax.f32 %v365_v39, 0.0 }
 0x18e   :  { %7814 = vmatmul.msk.f32.gmra.mxu1 %vm439_vm2, %v423_v40  ;;  %7824 = vmatmul.msk.f32.gmra.mxu2 %vm439_vm2, %v423_v40 }
 0x18f   :  { %7834 = vmatmul.msk.f32.gmra.mxu3 %vm439_vm2, %v413_v1 }
 0x193   :  { %v368_v44 = vpop.f32.mrf.mxu0  ;;  %v11592_v1 = vpop.f32.mrf.mxu1 }
 0x194   :  { %v424_v45 = vmax.f32 %v368_v44, 0.0 }
 0x196   :  { %7815 = vmatmul.msk.f32.gmra.mxu1 %vm439_vm2, %v424_v45  ;;  %7825 = vmatmul.msk.f32.gmra.mxu2 %vm439_vm2, %v424_v45 }
 0x197   :  { %7835 = vmatmul.msk.f32.gmra.mxu3 %vm439_vm2, %v414_v5  ;;  %v429_v5 = vmax.f32 %v383_v3, 0.0 }
 0x19b   :  { %v371_v17 = vpop.f32.mrf.mxu0  ;;  %v11599_v6 = vpop.f32.mrf.mxu1 }
 0x19c   :  { %v425_v49 = vmax.f32 %v371_v17, 0.0 }
 0x19e   :  { %7816 = vmatmul.msk.f32.gmra.mxu1 %vm439_vm2, %v425_v49  ;;  %7826 = vmatmul.msk.f32.gmra.mxu2 %vm439_vm2, %v425_v49 }
 0x19f   :  { %7836 = vmatmul.msk.f32.gmra.mxu3 %vm439_vm2, %v415_v9  ;;  %v386_v9 = vpop.f32.mrf.mxu3 }
 0x1a0   :  { %v430_v10 = vmax.f32 %v386_v9, 0.0 }
 0x1a3   :  { %v374_v50 = vpop.f32.mrf.mxu0 }
 0x1a4   :  { %v426_v53 = vmax.f32 %v374_v50, 0.0 }
 0x1a6   :  { %7817 = vmatmul.msk.f32.gmra.mxu1 %vm439_vm2, %v426_v53  ;;  %7827 = vmatmul.msk.f32.gmra.mxu2 %vm439_vm2, %v426_v53 }
 0x1a7   :  { %7837 = vmatmul.msk.f32.gmra.mxu3 %vm439_vm2, %v416_v11  ;;  %v11605_v11 = vpop.f32.mrf.mxu1  ;;  %v389_v12 = vpop.f32.mrf.mxu3 }
 0x1ab   :  { %v377_v60 = vpop.f32.mrf.mxu0 }
 0x1ac   :  { %v427_v62 = vmax.f32 %v377_v60, 0.0 }
 0x1ae   :  { %7818 = vmatmul.msk.f32.gmra.mxu1 %vm439_vm2, %v427_v62  ;;  %7828 = vmatmul.msk.f32.gmra.mxu2 %vm439_vm2, %v427_v62  ;;  %v11698_v62 = vld [vmem:[%s14838_s3] ss:$0 sm:$0xff] }
 0x1af   :  { %7838 = vmatmul.msk.f32.gmra.mxu3 %vm439_vm2, %v417_v13  ;;  %v431_v13 = vmax.f32 %v389_v12, 0.0  ;;  %v11616_v22 = vpop.f32.mrf.mxu1 }
 0x1b6   :  { %7819 = vmatmul.msk.f32.gmra.mxu1 %vm439_vm2, %v428_v63  ;;  %7829 = vmatmul.msk.f32.gmra.mxu2 %vm439_vm2, %v428_v63 }
 0x1b7   :  { %7839 = vmatmul.msk.f32.gmra.mxu3 %vm439_vm2, %v418_v19  ;;  %v869_v19 = vrot.slane %v392_v61, 4  ;;  %v11632_v61 = vpop.f32.mrf.mxu2 }
 0x1b9   :  { %v871_v24 = vsel %vm868_vm3, %v869_v19, %v870_v16  ;;  %v644_v21 = vpop.f32.mrf.mxu3 }
 0x1be   :  { %7820 = vmatmul.msk.f32.gmra.mxu1 %vm439_vm2, %v429_v5  ;;  %7830 = vmatmul.msk.f32.gmra.mxu2 %vm439_vm2, %v429_v5 }
 0x1bf   :  { %7840 = vmatmul.msk.f32.gmra.mxu3 %vm439_vm2, %v419_v27  ;;  %v872_v27 = vrot.slane %v394_v4, 4  ;;  %v11638_v31 = vpop.f32.mrf.mxu2 }
 0x1c1   :  { %v873_v0 = vsel %vm868_vm3, %v870_v16, %v872_v27  ;;  %v647_v4 = vpop.f32.mrf.mxu3 }
 0x1c6   :  { %7821 = vmatmul.msk.f32.gmra.mxu1 %vm439_vm2, %v430_v10  ;;  %7831 = vmatmul.msk.f32.gmra.mxu2 %vm439_vm2, %v430_v10 }
 0x1c7   :  { %7841 = vmatmul.msk.f32.gmra.mxu3 %vm439_vm2, %v420_v29  ;;  %v564_v29 = vpop.f32.mrf.mxu1 }
 0x1c8   :  { %v565_v45 = vadd.f32 %v564_v29, %v11561_v30 }
 0x1ce   :  { %7822 = vmatmul.msk.f32.gmra.mxu1 %vm439_vm2, %v431_v13  ;;  %7832 = vmatmul.msk.f32.gmra.mxu2 %vm439_vm2, %v431_v13 }
 0x1cf   :  { %7842 = vmatmul.msk.f32.gmra.mxu3 %vm439_vm2, %v421_v36  ;;  %v567_v23 = vpop.f32.mrf.mxu1  ;;  %v877_v36 = vsel %vm868_vm3, %v874_v18, %v11367_v33  ;;  %v7888_v33 = vld [vmem:[%s14836_s0 + $0x58] sm:$0xff] }
 0x1d0   :  { %1334 = vmatpush.msra.mxu1 %v7888_v33  ;;  %v568_v44 = vadd.f32 %v567_v23, %v11564_v37 }
 0x1d2   :  { %v675_v17 = vadd.f32 %v647_v4, %v568_v44 }
 0x1d6   :  { %7843 = vmatmul.msk.f32.vlgmr.msrb.gmra.mxu1 %vm439_vm2, %v871_v24  ;;  %7853 = vmatmul.msk.f32.vlgmr.msra.gmra.mxu2 %vm439_vm2, %v11429_v2  ;;  %v875_v2 = vsel %vm868_vm3, %v872_v27, %v874_v18 }
 0x1d7   :  { %v570_v25 = vpop.f32.mrf.mxu1 }
 0x1de   :  { %7844 = vmatmul.msk.f32.gmra.mxu1 %vm439_vm2, %v873_v0  ;;  %7854 = vmatmul.msk.f32.gmra.mxu2 %vm439_vm2, %v11441_v8  ;;  %v650_v8 = vpop.f32.mrf.mxu3 }
 0x1df   :  { %v573_v7 = vpop.f32.mrf.mxu1 }
 0x1e6   :  { %7845 = vmatmul.msk.f32.gmra.mxu1 %vm439_vm2, %v875_v2  ;;  %7855 = vmatmul.msk.f32.gmra.mxu2 %vm439_vm2, %v11453_v14  ;;  %v11649_v14 = vpop.f32.mrf.mxu2  ;;  %v653_v38 = vpop.f32.mrf.mxu3 }
 0x1ee   :  { %7846 = vmatmul.msk.f32.gmra.mxu1 %vm439_vm2, %v877_v36  ;;  %7856 = vmatmul.msk.f32.gmra.mxu2 %vm439_vm2, %v11465_v26  ;;  %v11658_v26 = vpop.f32.mrf.mxu2  ;;  %v656_v34 = vpop.f32.mrf.mxu3 }
 0x1f6   :  { %7847 = vmatmul.msk.f32.gmra.mxu1 %vm439_vm2, %v11373_v35  ;;  %7857 = vmatmul.msk.f32.gmra.mxu2 %vm439_vm2, %v11477_v32  ;;  %v7887_v35 = vld [vmem:[%s14836_s0 + $0x50] sm:$0xff]  ;;  %v659_v49 = vpop.f32.mrf.mxu3 }
 0x1f7   :  { %1335 = vmatpush.msra.mxu1 %v7887_v35 }
 0x1fe   :  { %7848 = vmatmul.msk.f32.gmra.mxu1 %vm439_vm2, %v11388_v42  ;;  %7858 = vmatmul.msk.f32.gmra.mxu2 %vm439_vm2, %v11498_v41  ;;  %v7886_v42 = vld [vmem:[%s14836_s0 + $0x48] sm:$0xff]  ;;  %v7885_v41 = vld [vmem:[%s14836_s0 + $0x40] sm:$0xff]  ;;  %v662_v63 = vpop.f32.mrf.mxu3 }
 0x1ff   :  { %1336 = vmatpush.msra.mxu1 %v7886_v42 }
 0x201   :  { %1337 = vmatpush.msra.mxu1 %v7885_v41 }
 0x203   :  { %v734_v32 = vpop.f32.mrf.mxu1 }
 0x206   :  { %7849 = vmatmul.msk.f32.gmra.mxu1 %vm439_vm2, %v11397_v47  ;;  %7859 = vmatmul.msk.f32.gmra.mxu2 %vm439_vm2, %v11507_v48  ;;  %v674_v47 = vadd.f32 %v644_v21, %v565_v45  ;;  %v665_v29 = vpop.f32.mrf.mxu3 }
 0x208   :  { %v764_v48 = vadd.f32 %v734_v32, %v674_v47 }
 0x209   :  { %v11673_v39 = vpop.f32.mrf.mxu2 }
 0x20a   :  { %v1064_v30 = vmul.f32 %v11686_v54, %v764_v48 }
 0x20b   :  { %v737_v40 = vpop.f32.mrf.mxu1 }
 0x20c   :  { %v765_v50 = vadd.f32 %v737_v40, %v675_v17 }
 0x20e   :  { %7850 = vmatmul.msk.f32.gmra.mxu1 %vm439_vm2, %v11405_v52  ;;  %7860 = vmatmul.msk.f32.gmra.mxu2 %vm439_vm2, %v11515_v51  ;;  %v571_v52 = vadd.f32 %v570_v25, %v11569_v43  ;;  %v1065_v60 = vmul.f32 %v11686_v54, %v765_v50 }
 0x210   :  { %v676_v51 = vadd.f32 %v650_v8, %v571_v52  ;;  %v11701_v3 = vadd.f32 %v11698_v62, %v1065_v60  ;;  %v586_v60 = vadd.f32 %v11638_v31, %v11599_v6 }
 0x211   :  { %v11681_v53 = vpop.f32.mrf.mxu2 }
 0x212   :  { %v1088_v10 = vmax.f32 %v11701_v3, 0.0  ;;  %v10585_v3 = vld [vmem:[%s14839_s7 + $0x14] sm:$0xf] }
 0x213   :  { %v740_v37 = vpop.f32.mrf.mxu1 }
 0x214   :  { %v766_v43 = vadd.f32 %v740_v37, %v676_v51  ;;  %v1286_v19 = vrot.slane %v1088_v10, 4 }
 0x216   :  { %7851 = vmatmul.msk.f32.gmra.mxu1 %vm439_vm2, %v11416_v57  ;;  %7861 = vmatmul.msk.f32.gmra.mxu2 %vm439_vm2, %v11526_v59  ;;  %v11706_v57 = vadd.f32 %v11698_v62, %v1064_v30  ;;  %v574_v59 = vadd.f32 %v573_v7, %v11576_v46  ;;  %v1066_v12 = vmul.f32 %v11686_v54, %v766_v43  ;;  %v7865_v43 = vld [vmem:[%s14836_s0 + $0x30] sm:$0xff] }
 0x218   :  { %v677_v13 = vadd.f32 %v653_v38, %v574_v59  ;;  %v1087_v16 = vmax.f32 %v11706_v57, 0.0  ;;  %v11719_v24 = vadd.f32 %v11698_v62, %v1066_v12  ;;  %v7864_v59 = vld [vmem:[%s14836_s0 + $0x28] sm:$0xff]  ;;  %v7965_v57 = vld [vmem:[%s14839_s7 + $0x18] sm:$0xf0] }
 0x219   :  { %v11703_v5 = vpop.f32.mrf.mxu2 }
 0x21a   :  { %v1285_v21 = vrot.slane %v1087_v16, 4  ;;  %v1089_v0 = vmax.f32 %v11719_v24, 0.0 }
 0x21b   :  { %v743_v9 = vpop.f32.mrf.mxu1 }
 0x21c   :  { %v767_v46 = vadd.f32 %v743_v9, %v677_v13  ;;  %v1287_v2 = vsel %vm868_vm3, %v1285_v21, %v1286_v19  ;;  %v1288_v8 = vrot.slane %v1089_v0, 4  ;;  %v681_v9 = vadd.f32 %v665_v29, %v586_v60 }
 0x21d   :  { %v589_v21 = vadd.f32 %v11649_v14, %v11605_v11 }
 0x21e   :  { %7852 = vmatmul.msk.f32.gmra.mxu1 %vm439_vm2, %v11410_v56  ;;  %7862 = vmatmul.msk.f32.gmra.mxu2 %vm439_vm2, %v11520_v58  ;;  %v577_v58 = vadd.f32 %v11609_v15, %v11582_v20  ;;  %v1067_v18 = vmul.f32 %v11686_v54, %v767_v46  ;;  %v580_v20 = vadd.f32 %v11624_v28, %v11587_v55  ;;  %v668_v15 = vpop.f32.mrf.mxu3  ;;  %v7863_v46 = vld [vmem:[%s14836_s0 + $0x20] sm:$0xff] }
 0x21f   :  { %v1289_v35 = vsel %vm868_vm3, %v1286_v19, %v1288_v8  ;;  %v583_v28 = vadd.f32 %v11632_v61, %v11592_v1  ;;  %v7866_v61 = vld [vmem:[%s14836_s0 + $0x38] sm:$0xff] }
 0x220   :  { %v678_v23 = vadd.f32 %v656_v34, %v577_v58  ;;  %v11732_v4 = vadd.f32 %v11698_v62, %v1067_v18  ;;  %v679_v32 = vadd.f32 %v659_v49, %v580_v20  ;;  %1176 = vmatpush.msrb.mxu3 %v7866_v61  ;;  %v7899_v20 = vld [vmem:[%s14836_s0 + $0x68] sm:$0xff] }
 0x221   :  { %v11721_v27 = vpop.f32.mrf.mxu2  ;;  %v680_v49 = vadd.f32 %v662_v63, %v583_v28 }
 0x222   :  { %v1090_v38 = vmax.f32 %v11732_v4, 0.0  ;;  %1177 = vmatpush.msrb.mxu3 %v7865_v43  ;;  %v7979_v4 = vld [vmem:[%s14839_s7 + $0x30] sm:$0xf] }
 0x223   :  { %v746_v56 = vpop.f32.mrf.mxu1 }
 0x224   :  { %v768_v36 = vadd.f32 %v746_v56, %v678_v23  ;;  %v1290_v40 = vrot.slane %v1090_v38, 4  ;;  %1178 = vmatpush.msrb.mxu3 %v7864_v59  ;;  %v682_v23 = vadd.f32 %v668_v15, %v589_v21 }
 0x226   :  { %7889 = vmatmul.msk.f32.vlgmr.msra.gmra.mxu1 %vm1136_vm4, %v1287_v2  ;;  %v1068_v33 = vmul.f32 %v11686_v54, %v768_v36  ;;  %v1291_v17 = vsel %vm868_vm3, %v1288_v8, %v1290_v40  ;;  %v671_v47 = vpop.f32.mrf.mxu3  ;;  %1179 = vmatpush.msrb.mxu3 %v7863_v46  ;;  %v7901_v2 = vld [vmem:[%s14836_s0 + $0x78] sm:$0xff]  ;;  %v7900_v36 = vld [vmem:[%s14836_s0 + $0x70] sm:$0xff] }
 0x227   :  { %1430 = vmatpush.msrb.mxu2 %v7901_v2  ;;  %v7981_v2 = vld [vmem:[%s14839_s7 + $0x38] sm:$0xf0] }
 0x228   :  { %v11745_v42 = vadd.f32 %v11698_v62, %v1068_v33 }
 0x229   :  { %v11734_v25 = vpop.f32.mrf.mxu2  ;;  %1431 = vmatpush.msrb.mxu2 %v7900_v36 }
 0x22a   :  { %v1091_v44 = vmax.f32 %v11745_v42, 0.0 }
 0x22b   :  { %v749_v7 = vpop.f32.mrf.mxu1  ;;  %1432 = vmatpush.msrb.mxu2 %v7899_v20 }
 0x22c   :  { %v769_v34 = vadd.f32 %v749_v7, %v679_v32  ;;  %v1292_v52 = vrot.slane %v1091_v44, 4  ;;  %v592_v32 = vadd.f32 %v11658_v26, %v11616_v22 }
 0x22e   :  { %7890 = vmatmul.msk.f32.gmra.mxu1 %vm1136_vm4, %v1289_v35  ;;  %v1069_v45 = vmul.f32 %v11686_v54, %v769_v34  ;;  %v1293_v63 = vsel %vm868_vm3, %v1290_v40, %v1292_v52  ;;  %v838_v6 = vpop.f32.mrf.mxu3  ;;  %v7898_v35 = vld [vmem:[%s14836_s0 + $0x60] sm:$0xff]  ;;  %v683_v28 = vadd.f32 %v671_v47, %v592_v32 }
 0x22f   :  { %1433 = vmatpush.msrb.mxu2 %v7898_v35  ;;  %v839_v60 = vadd.f32 %v838_v6, %v11673_v39 }
 0x230   :  { %v11758_v50 = vadd.f32 %v11698_v62, %v1069_v45 }
 0x231   :  { %v11747_v41 = vpop.f32.mrf.mxu2 }
 0x232   :  { %v1092_v51 = vmax.f32 %v11758_v50, 0.0  ;;  %v7971_v50 = vld [vmem:[%s14839_s7 + $0x20] sm:$0xf] }
 0x233   :  { %v752_v55 = vpop.f32.mrf.mxu1 }
 0x234   :  { %v770_v48 = vadd.f32 %v752_v55, %v680_v49  ;;  %v1294_v31 = vrot.slane %v1092_v51, 4 }
 0x236   :  { %7891 = vmatmul.msk.f32.gmra.mxu1 %vm1136_vm4, %v1291_v17  ;;  %v1070_v30 = vmul.f32 %v11686_v54, %v770_v48  ;;  %v1295_v18 = vsel %vm868_vm3, %v1292_v52, %v1294_v31  ;;  %v841_v15 = vpop.f32.mrf.mxu3 }
 0x238   :  { %v11782_v12 = vadd.f32 %v11698_v62, %v1070_v30 }
 0x239   :  { %v11760_v37 = vpop.f32.mrf.mxu2 }
 0x23a   :  { %v1093_v56 = vmax.f32 %v11782_v12, 0.0 }
 0x23b   :  { %v755_v1 = vpop.f32.mrf.mxu1 }
 0x23c   :  { %v771_v13 = vadd.f32 %v755_v1, %v681_v9  ;;  %v1296_v7 = vrot.slane %v1093_v56, 4 }
 0x23e   :  { %7892 = vmatmul.msk.f32.gmra.mxu1 %vm1136_vm4, %v1293_v63  ;;  %v1071_v58 = vmul.f32 %v11686_v54, %v771_v13  ;;  %v1297_v55 = vsel %vm868_vm3, %v1294_v31, %v1296_v7  ;;  %v844_v26 = vpop.f32.mrf.mxu3 }
 0x240   :  { %v11802_v11 = vadd.f32 %v11698_v62, %v1071_v58 }
 0x241   :  { %v11784_v19 = vpop.f32.mrf.mxu2 }
 0x242   :  { %v1094_v34 = vmax.f32 %v11802_v11, 0.0  ;;  %v10598_v11 = vld [vmem:[%s14839_s7 + $0x74] sm:$0xf0] }
 0x243   :  { %v758_v29 = vpop.f32.mrf.mxu1 }
 0x244   :  { %v772_v14 = vadd.f32 %v758_v29, %v682_v23  ;;  %v1298_v45 = vrot.slane %v1094_v34, 4  ;;  %v842_v29 = vadd.f32 %v841_v15, %v11681_v53 }
 0x246   :  { %7893 = vmatmul.msk.f32.gmra.mxu1 %vm1136_vm4, %v1295_v18  ;;  %v1072_v40 = vmul.f32 %v11686_v54, %v772_v14  ;;  %v1299_v61 = vsel %vm868_vm3, %v1296_v7, %v1298_v45  ;;  %v847_v6 = vpop.f32.mrf.mxu3  ;;  %v10589_v18 = vld [vmem:[%s14839_s7 + $0x34] sm:$0xf] }
 0x247   :  { %v7984_v14 = vor.u32 %v10589_v18, %v7981_v2 }
 0x248   :  { %v11823_v17 = vadd.f32 %v11698_v62, %v1072_v40 }
 0x249   :  { %v11804_v8 = vpop.f32.mrf.mxu2  ;;  %1666 = vmatpush.bf16.msrb.mxu0 %v7984_v14 }
 0x24a   :  { %v1095_v52 = vmax.f32 %v11823_v17, 0.0 }
 0x24b   :  { %v761_v33 = vpop.f32.mrf.mxu1 }
 0x24c   :  { %v773_v49 = vadd.f32 %v761_v33, %v683_v28  ;;  %v1300_v43 = vrot.slane %v1095_v52, 4  ;;  %v845_v33 = vadd.f32 %v844_v26, %v11703_v5  ;;  %v848_v5 = vadd.f32 %v847_v6, %v11721_v27 }
 0x24e   :  { %7894 = vmatmul.msk.f32.gmra.mxu1 %vm1136_vm4, %v1297_v55  ;;  %v1073_v1 = vmul.f32 %v11686_v54, %v773_v49  ;;  %v1301_v46 = vsel %vm868_vm3, %v1298_v45, %v1300_v43  ;;  %v850_v55 = vpop.f32.mrf.mxu3 }
 0x250   :  { %v1086_v30 = vadd.f32 %v11698_v62, %v1073_v1 }
 0x251   :  { %v11825_v48 = vpop.f32.mrf.mxu2 }
 0x252   :  { %v1096_v13 = vmax.f32 %v1086_v30, 0.0 }
 0x253   :  { %v925_v22 = vpop.f32.mrf.mxu1 }
 0x254   :  { %v955_v47 = vadd.f32 %v925_v22, %v839_v60  ;;  %v1302_v23 = vrot.slane %v1096_v13, 4 }
 0x256   :  { %7895 = vmatmul.msk.f32.gmra.mxu1 %vm1136_vm4, %v1299_v61  ;;  %v1303_v15 = vsel %vm868_vm3, %v1300_v43, %v1302_v23 }
 0x259   :  { %v1021_v63 = vpop.f32.mrf.mxu2 }
 0x25a   :  { %v1051_v9 = vadd.f32 %v1021_v63, %v955_v47 }
 0x25b   :  { %v928_v59 = vpop.f32.mrf.mxu1 }
 0x25c   :  { %v1097_v31 = vmul.f32 %v11686_v54, %v1051_v9  ;;  %v956_v58 = vadd.f32 %v928_v59, %v842_v29  ;;  %v853_v59 = vpop.f32.mrf.mxu3  ;;  %v851_v29 = vadd.f32 %v850_v55, %v11734_v25 }
 0x25e   :  { %v1107_v39 = vadd.f32 %v11698_v62, %v1097_v31  ;;  %7896 = vmatmul.msk.f32.gmra.mxu1 %vm1136_vm4, %v1301_v46 }
 0x260   :  { %v1117_v21 = vmax.f32 %v1107_v39, 0.0 }
 0x261   :  { %v1024_v36 = vpop.f32.mrf.mxu2 }
 0x262   :  { %v1052_v7 = vadd.f32 %v1024_v36, %v956_v58  ;;  %7867 = vmatmul.msk.f32.vlgmr.msrb.gmra.mxu3 %vm1136_vm4, %v1117_v21  ;;  %v1381_v45 = vrot.slane %v1117_v21, 4 }
 0x263   :  { %v931_v53 = vpop.f32.mrf.mxu1 }
 0x264   :  { %v1098_v20 = vmul.f32 %v11686_v54, %v1052_v7  ;;  %v957_v40 = vadd.f32 %v931_v53, %v845_v33  ;;  %v856_v14 = vpop.f32.mrf.mxu3  ;;  %v854_v7 = vadd.f32 %v853_v59, %v11747_v41  ;;  %v1129_v41 = vld [vmem:[%s14836_s0 + $0x10] sm:$0xff] }
 0x266   :  { %v1108_v35 = vadd.f32 %v11698_v62, %v1098_v20  ;;  %7897 = vmatmul.msk.f32.gmra.mxu1 %vm1136_vm4, %v1303_v15 }
 0x268   :  { %v1118_v32 = vmax.f32 %v1108_v35, 0.0 }
 0x269   :  { %v1027_v28 = vpop.f32.mrf.mxu2 }
 0x26a   :  { %v1382_v49 = vrot.slane %v1118_v32, 4  ;;  %v1053_v22 = vadd.f32 %v1027_v28, %v957_v40  ;;  %7868 = vmatmul.msk.f32.gmra.mxu3 %vm1136_vm4, %v1118_v32  ;;  %v1130_v40 = vld [vmem:[%s14836_s0 + $0x18] sm:$0xff] }
 0x26b   :  { %v934_v1 = vpop.f32.mrf.mxu1  ;;  %1247 = vmatpush.msra.mxu3 %v1130_v40 }
 0x26c   :  { %v1099_v61 = vmul.f32 %v11686_v54, %v1053_v22  ;;  %v1383_v60 = vsel %vm868_vm3, %v1381_v45, %v1382_v49  ;;  %v958_v30 = vadd.f32 %v934_v1, %v848_v5  ;;  %v857_v45 = vadd.f32 %v856_v14, %v11760_v37  ;;  %v859_v22 = vpop.f32.mrf.mxu3  ;;  %v1128_v1 = vld [vmem:[%s14836_s0 + $0x8] sm:$0xff] }
 0x26d   :  { %7902 = vmatmul.msk.f32.vlgmr.msrb.gmra.mxu2 %vm1136_vm4, %v1383_v60  ;;  %1248 = vmatpush.msra.mxu3 %v1129_v41  ;;  %v10587_v41 = vld [vmem:[%s14839_s7 + $0x24] sm:$0xf] }
 0x26e   :  { %v1109_v26 = vadd.f32 %v11698_v62, %v1099_v61 }
 0x26f   :  { %1249 = vmatpush.msra.mxu3 %v1128_v1 }
 0x270   :  { %v1119_v47 = vmax.f32 %v1109_v26, 0.0  ;;  %v1127_v26 = vld [vmem:[%s14836_s0] sm:$0xff]  ;;  %s14840_s0 = sld [smem:[#allocation20_spill]] }
 0x271   :  { %v1030_v63 = vpop.f32.mrf.mxu2  ;;  %1250 = vmatpush.msra.mxu3 %v1127_v26 }
 0x272   :  { %v1054_v43 = vadd.f32 %v1030_v63, %v958_v30  ;;  %7869 = vmatmul.msk.f32.gmra.mxu3 %vm1136_vm4, %v1119_v47  ;;  %v1384_v9 = vrot.slane %v1119_v47, 4 }
 0x273   :  { %v937_v31 = vpop.f32.mrf.mxu1 }
 0x274   :  { %v1100_v13 = vmul.f32 %v11686_v54, %v1054_v43  ;;  %v1385_v46 = vsel %vm868_vm3, %v1382_v49, %v1384_v9  ;;  %v959_v6 = vadd.f32 %v937_v31, %v851_v29 }
 0x275   :  { %7903 = vmatmul.msk.f32.gmra.mxu2 %vm1136_vm4, %v1385_v46  ;;  %v862_v46 = vpop.f32.mrf.mxu3 }
 0x276   :  { %v1110_v27 = vadd.f32 %v11698_v62, %v1100_v13 }
 0x278   :  { %v1120_v39 = vmax.f32 %v1110_v27, 0.0 }
 0x279   :  { %v1033_v21 = vpop.f32.mrf.mxu2 }
 0x27a   :  { %v1386_v58 = vrot.slane %v1120_v39, 4  ;;  %v1055_v18 = vadd.f32 %v1033_v21, %v959_v6  ;;  %7870 = vmatmul.msk.f32.gmra.mxu3 %vm1136_vm4, %v1120_v39 }
 0x27b   :  { %v940_v2 = vpop.f32.mrf.mxu1 }
 0x27c   :  { %v1101_v23 = vmul.f32 %v11686_v54, %v1055_v18  ;;  %v1387_v36 = vsel %vm868_vm3, %v1384_v9, %v1386_v58  ;;  %v960_v20 = vadd.f32 %v940_v2, %v854_v7  ;;  %v860_v9 = vadd.f32 %v859_v22, %v11784_v19 }
 0x27d   :  { %7904 = vmatmul.msk.f32.gmra.mxu2 %vm1136_vm4, %v1387_v36  ;;  %v863_v18 = vadd.f32 %v862_v46, %v11804_v8 }
 0x27e   :  { %v1111_v25 = vadd.f32 %v11698_v62, %v1101_v23 }
 0x280   :  { %v1121_v53 = vmax.f32 %v1111_v25, 0.0  ;;  %v865_v25 = vpop.f32.mrf.mxu3 }
 0x281   :  { %v1036_v15 = vpop.f32.mrf.mxu2 }
 0x282   :  { %v1056_v33 = vadd.f32 %v1036_v15, %v960_v20  ;;  %7871 = vmatmul.msk.f32.gmra.mxu3 %vm1136_vm4, %v1121_v53  ;;  %v1388_v35 = vrot.slane %v1121_v53, 4 }
 0x283   :  { %v943_v32 = vpop.f32.mrf.mxu1 }
 0x284   :  { %v1102_v55 = vmul.f32 %v11686_v54, %v1056_v33  ;;  %v1389_v28 = vsel %vm868_vm3, %v1386_v58, %v1388_v35  ;;  %v961_v60 = vadd.f32 %v943_v32, %v857_v45  ;;  %v866_v33 = vadd.f32 %v865_v25, %v11825_v48  ;;  %v7973_v45 = vld [vmem:[%s14839_s7 + $0x28] sm:$0xf0]  ;;  %v10614_v25 = vld [vmem:[%s14839_s7 + $0xf4] sm:$0xf0] }
 0x285   :  { %7905 = vmatmul.msk.f32.gmra.mxu2 %vm1136_vm4, %v1389_v28  ;;  %v7976_v22 = vor.u32 %v10587_v41, %v7973_v45 }
 0x286   :  { %v1112_v49 = vadd.f32 %v11698_v62, %v1102_v55 }
 0x287   :  { %1667 = vmatpush.bf16.msrb.mxu0 %v7976_v22  ;;  %v10611_v22 = vld [vmem:[%s14839_s7 + $0xe4] sm:$0xf] }
 0x288   :  { %v1122_v61 = vmax.f32 %v1112_v49, 0.0 }
 0x289   :  { %v1039_v5 = vpop.f32.mrf.mxu2 }
 0x28a   :  { %v1390_v47 = vrot.slane %v1122_v61, 4  ;;  %v1057_v30 = vadd.f32 %v1039_v5, %v961_v60  ;;  %7872 = vmatmul.msk.f32.gmra.mxu3 %vm1136_vm4, %v1122_v61 }
 0x28b   :  { %v946_v37 = vpop.f32.mrf.mxu1 }
 0x28c   :  { %v1103_v63 = vmul.f32 %v11686_v54, %v1057_v30  ;;  %v1391_v43 = vsel %vm868_vm3, %v1388_v35, %v1390_v47  ;;  %v962_v13 = vadd.f32 %v946_v37, %v860_v9  ;;  %v10586_v30 = vld [vmem:[%s14839_s7 + $0x14] sm:$0xf0]  ;;  %v10596_v9 = vld [vmem:[%s14839_s7 + $0x64] sm:$0xf0] }
 0x28d   :  { %7906 = vmatmul.msk.f32.gmra.mxu2 %vm1136_vm4, %v1391_v43  ;;  %v7937_v43 = vld [vmem:[%s14839_s7 + $0x60] sm:$0xf] }
 0x28e   :  { %v1113_v59 = vadd.f32 %v11698_v62, %v1103_v63 }
 0x290   :  { %v1123_v31 = vmax.f32 %v1113_v59, 0.0  ;;  %v10595_v59 = vld [vmem:[%s14839_s7 + $0x64] sm:$0xf] }
 0x291   :  { %v1042_v29 = vpop.f32.mrf.mxu2 }
 0x292   :  { %v1058_v27 = vadd.f32 %v1042_v29, %v962_v13  ;;  %7873 = vmatmul.msk.f32.gmra.mxu3 %vm1136_vm4, %v1123_v31  ;;  %v1392_v39 = vrot.slane %v1123_v31, 4  ;;  %v7938_v31 = vor.u32 %v10596_v9, %v7937_v43  ;;  %v7939_v13 = vld [vmem:[%s14839_s7 + $0x68] sm:$0xf0]  ;;  %v7955_v29 = vld [vmem:[%s14839_s7] sm:$0xf] }
 0x293   :  { %v949_v6 = vpop.f32.mrf.mxu1  ;;  %v7942_v46 = vor.u32 %v10595_v59, %v7939_v13  ;;  %v8039_v9 = vld [vmem:[%s14839_s7 + $0xc0] sm:$0xf]  ;;  %v10608_v59 = vld [vmem:[%s14839_s7 + $0xc4] sm:$0xf0] }
 0x294   :  { %v1104_v21 = vmul.f32 %v11686_v54, %v1058_v27  ;;  %v1393_v58 = vsel %vm868_vm3, %v1390_v47, %v1392_v39  ;;  %v963_v23 = vadd.f32 %v949_v6, %v863_v18  ;;  %v7963_v47 = vld [vmem:[%s14839_s7 + $0x10] sm:$0xf]  ;;  %v10584_v27 = vld [vmem:[%s14839_s7 + $0x4] sm:$0xf0]  ;;  %v8040_v13 = vor.u32 %v10608_v59, %v8039_v9 }
 0x295   :  { %7907 = vmatmul.msk.f32.gmra.mxu2 %vm1136_vm4, %v1393_v58  ;;  %v7964_v37 = vor.u32 %v10586_v30, %v7963_v47  ;;  %v7956_v6 = vor.u32 %v10584_v27, %v7955_v29  ;;  %v7929_v18 = vld [vmem:[%s14839_s7 + $0x50] sm:$0xf]  ;;  %v10603_v47 = vld [vmem:[%s14839_s7 + $0xa4] sm:$0xf] }
 0x296   :  { %v1114_v19 = vadd.f32 %v11698_v62, %v1104_v21  ;;  %v7957_v21 = vld [vmem:[%s14839_s7 + $0x8] sm:$0xf0] }
 0x298   :  { %v1124_v2 = vmax.f32 %v1114_v19, 0.0  ;;  %v10594_v19 = vld [vmem:[%s14839_s7 + $0x54] sm:$0xf0] }
 0x299   :  { %v1045_v36 = vpop.f32.mrf.mxu2 }
 0x29a   :  { %v1394_v14 = vrot.slane %v1124_v2, 4  ;;  %v1059_v7 = vadd.f32 %v1045_v36, %v963_v23  ;;  %7874 = vmatmul.msk.f32.gmra.mxu3 %vm1136_vm4, %v1124_v2  ;;  %v10593_v2 = vld [vmem:[%s14839_s7 + $0x54] sm:$0xf]  ;;  %v7930_v23 = vor.u32 %v10594_v19, %v7929_v18  ;;  %v7931_v36 = vld [vmem:[%s14839_s7 + $0x58] sm:$0xf0] }
 0x29b   :  { %v952_v15 = vpop.f32.mrf.mxu1  ;;  %v8007_v18 = vld [vmem:[%s14839_s7 + $0x98] sm:$0xf0] }
 0x29c   :  { %v1105_v53 = vmul.f32 %v11686_v54, %v1059_v7  ;;  %v1395_v20 = vsel %vm868_vm3, %v1392_v39, %v1394_v14  ;;  %v964_v32 = vadd.f32 %v952_v15, %v866_v33  ;;  %v10583_v39 = vld [vmem:[%s14839_s7 + $0x4] sm:$0xf]  ;;  %v8063_v7 = vld [vmem:[%s14839_s7 + $0xf0] sm:$0xf]  ;;  %v8065_v15 = vld [vmem:[%s14839_s7 + $0xf8] sm:$0xf0] }
 0x29d   :  { %7908 = vmatmul.msk.f32.gmra.mxu2 %vm1136_vm4, %v1395_v20  ;;  %v7960_v58 = vor.u32 %v10583_v39, %v7957_v21  ;;  %v8064_v20 = vor.u32 %v10614_v25, %v8063_v7  ;;  %v8005_v39 = vld [vmem:[%s14839_s7 + $0x90] sm:$0xf]  ;;  %v10601_v21 = vld [vmem:[%s14839_s7 + $0x94] sm:$0xf]  ;;  %v10599_v7 = vld [vmem:[%s14839_s7 + $0x84] sm:$0xf] }
 0x29e   :  { %v1115_v8 = vadd.f32 %v11698_v62, %v1105_v53  ;;  %v10613_v53 = vld [vmem:[%s14839_s7 + $0xf4] sm:$0xf] }
 0x2a0   :  { %v1125_v35 = vmax.f32 %v1115_v8, 0.0  ;;  %v8068_v8 = vor.u32 %v10613_v53, %v8065_v15 }
 0x2a1   :  { %v1048_v40 = vpop.f32.mrf.mxu2 }
 0x2a2   :  { %v1060_v55 = vadd.f32 %v1048_v40, %v964_v32  ;;  %7875 = vmatmul.msk.f32.gmra.mxu3 %vm1136_vm4, %v1125_v35  ;;  %v1396_v28 = vrot.slane %v1125_v35, 4  ;;  %v7921_v35 = vld [vmem:[%s14839_s7 + $0x40] sm:$0xf]  ;;  %v10592_v32 = vld [vmem:[%s14839_s7 + $0x44] sm:$0xf0] }
 0x2a3   :  { %v10591_v40 = vld [vmem:[%s14839_s7 + $0x44] sm:$0xf]  ;;  %v12058_v41 = vpop.f32.mrf.mxu1 }
 0x2a4   :  { %v1106_v49 = vmul.f32 %v11686_v54, %v1060_v55  ;;  %v1397_v48 = vsel %vm868_vm3, %v1394_v14, %v1396_v28  ;;  %v7934_v14 = vor.u32 %v10593_v2, %v7931_v36  ;;  %v7922_v55 = vor.u32 %v10592_v32, %v7921_v35  ;;  %v7997_v36 = vld [vmem:[%s14839_s7 + $0x80] sm:$0xf] }
 0x2a5   :  { %7909 = vmatmul.msk.f32.gmra.mxu2 %vm1136_vm4, %v1397_v48  ;;  %v10612_v48 = vld [vmem:[%s14839_s7 + $0xe4] sm:$0xf0]  ;;  %v8010_v2 = vor.u32 %v10601_v21, %v8007_v18  ;;  %v12151_v35 = vld [vmem:[%s14840_s0] ss:$0 sm:$0xff]  ;;  %s14843_s0 = sld [smem:[#allocation14_spill]] }
 0x2a6   :  { %v1116_v1 = vadd.f32 %v11698_v62, %v1106_v49  ;;  %v8055_v49 = vld [vmem:[%s14839_s7 + $0xe0] sm:$0xf]  ;;  %v10620_v21 = vld [vmem:[%s14839_s7 + $0x124] sm:$0xf0] }
 0x2a8   :  { %v1126_v61 = vmax.f32 %v1116_v1, 0.0  ;;  %v8056_v1 = vor.u32 %v10612_v48, %v8055_v49 }
 0x2aa   :  { %v1398_v60 = vrot.slane %v1126_v61, 4  ;;  %7876 = vmatmul.msk.f32.vlgmr.msra.gmra.mxu3 %vm1136_vm4, %v1087_v16  ;;  %v8057_v61 = vld [vmem:[%s14839_s7 + $0xe8] sm:$0xf0] }
 0x2ab   :  { %v1342_v29 = vpop.f32.mrf.mxu1 }
 0x2ac   :  { %v1399_v5 = vsel %vm868_vm3, %v1396_v28, %v1398_v60  ;;  %v7923_v28 = vld [vmem:[%s14839_s7 + $0x48] sm:$0xf0] }
 0x2ad   :  { %7910 = vmatmul.msk.f32.gmra.mxu2 %vm1136_vm4, %v1399_v5  ;;  %v7926_v45 = vor.u32 %v10591_v40, %v7923_v28  ;;  %v8060_v5 = vor.u32 %v10611_v22, %v8057_v61  ;;  %v10630_v22 = vld [vmem:[%s14839_s7 + $0x174] sm:$0xf0]  ;;  %v8149_v61 = vld [vmem:[%s14839_s7 + $0x178] sm:$0xf0] }
 0x2b2   :  { %7877 = vmatmul.msk.f32.gmra.mxu3 %vm1136_vm4, %v1088_v10  ;;  %v7968_v10 = vor.u32 %v10585_v3, %v7965_v57  ;;  %v8021_v3 = vld [vmem:[%s14839_s7 + $0xb0] sm:$0xf]  ;;  %v10606_v57 = vld [vmem:[%s14839_s7 + $0xb4] sm:$0xf0] }
 0x2b3   :  { %v1345_v40 = vpop.f32.mrf.mxu1 }
 0x2b4   :  { %1668 = vmatpush.bf16.msrb.mxu0 %v7968_v10  ;;  %v10605_v10 = vld [vmem:[%s14839_s7 + $0xb4] sm:$0xf] }
 0x2b8   :  { %1669 = vmatpush.bf16.msrb.mxu0 %v7960_v58 }
 0x2ba   :  { %7878 = vmatmul.msk.f32.gmra.mxu3 %vm1136_vm4, %v1089_v0 }
 0x2bc   :  { %1828 = vmatpush.bf16.msra.mxu0 %v8068_v8 }
 0x2c0   :  { %1829 = vmatpush.bf16.msra.mxu0 %v8060_v5 }
 0x2c2   :  { %7879 = vmatmul.msk.f32.gmra.mxu3 %vm1136_vm4, %v1090_v38  ;;  %v10590_v38 = vld [vmem:[%s14839_s7 + $0x34] sm:$0xf0] }
 0x2c3   :  { %v7980_v42 = vor.u32 %v10590_v38, %v7979_v4  ;;  %v8022_v4 = vor.u32 %v10606_v57, %v8021_v3  ;;  %v8023_v38 = vld [vmem:[%s14839_s7 + $0xb8] sm:$0xf0] }
 0x2c5   :  { %1653 = vmatpush.bf16.msra.mxu2 %v7980_v42  ;;  %v8026_v42 = vor.u32 %v10605_v10, %v8023_v38  ;;  %v10628_v38 = vld [vmem:[%s14839_s7 + $0x164] sm:$0xf0] }
 0x2ca   :  { %7880 = vmatmul.msk.f32.gmra.mxu3 %vm1136_vm4, %v1091_v44 }
 0x2d2   :  { %7881 = vmatmul.msk.f32.gmra.mxu3 %vm1136_vm4, %v1092_v51  ;;  %v10588_v51 = vld [vmem:[%s14839_s7 + $0x24] sm:$0xf0] }
 0x2d3   :  { %v7972_v12 = vor.u32 %v10588_v51, %v7971_v50  ;;  %v8047_v50 = vld [vmem:[%s14839_s7 + $0xd0] sm:$0xf]  ;;  %v10610_v51 = vld [vmem:[%s14839_s7 + $0xd4] sm:$0xf0] }
 0x2d5   :  { %1654 = vmatpush.bf16.msra.mxu2 %v7972_v12  ;;  %v10609_v12 = vld [vmem:[%s14839_s7 + $0xd4] sm:$0xf] }
 0x2d9   :  { %1655 = vmatpush.bf16.msra.mxu2 %v7964_v37  ;;  %v8015_v37 = vld [vmem:[%s14839_s7 + $0xa8] sm:$0xf0] }
 0x2da   :  { %7882 = vmatmul.msk.f32.gmra.mxu3 %vm1136_vm4, %v1093_v56  ;;  %v7945_v56 = vld [vmem:[%s14839_s7 + $0x70] sm:$0xf]  ;;  %v8018_v43 = vor.u32 %v10603_v47, %v8015_v37 }
 0x2db   :  { %v7946_v17 = vor.u32 %v10598_v11, %v7945_v56  ;;  %v8048_v56 = vor.u32 %v10610_v51, %v8047_v50  ;;  %v8049_v11 = vld [vmem:[%s14839_s7 + $0xd8] sm:$0xf0]  ;;  %v8141_v50 = vld [vmem:[%s14839_s7 + $0x168] sm:$0xf0]  ;;  %v8105_v51 = vld [vmem:[%s14839_s7 + $0x130] sm:$0xf] }
 0x2dd   :  { %1584 = vmatpush.bf16.msrb.mxu3 %v7946_v17  ;;  %1656 = vmatpush.bf16.msra.mxu2 %v7956_v6  ;;  %v8052_v17 = vor.u32 %v10609_v12, %v8049_v11  ;;  %v10602_v6 = vld [vmem:[%s14839_s7 + $0x94] sm:$0xf0] }
 0x2de   :  { %v8006_v58 = vor.u32 %v10602_v6, %v8005_v39  ;;  %v10622_v11 = vld [vmem:[%s14839_s7 + $0x134] sm:$0xf0] }
 0x2df   :  { %1830 = vmatpush.bf16.msra.mxu0 %v8052_v17  ;;  %v10621_v17 = vld [vmem:[%s14839_s7 + $0x134] sm:$0xf]  ;;  %v8106_v39 = vor.u32 %v10622_v11, %v8105_v51  ;;  %v8083_v11 = vld [vmem:[%s14839_s7 + $0x108] sm:$0xf0] }
 0x2e1   :  { %1585 = vmatpush.bf16.msrb.mxu3 %v7938_v31  ;;  %1815 = vmatpush.bf16.msrb.mxu2 %v8064_v20  ;;  %v10607_v31 = vld [vmem:[%s14839_s7 + $0xc4] sm:$0xf]  ;;  %v7999_v20 = vld [vmem:[%s14839_s7 + $0x88] sm:$0xf0] }
 0x2e2   :  { %7883 = vmatmul.msk.f32.gmra.mxu3 %vm1136_vm4, %v1094_v34  ;;  %v10597_v34 = vld [vmem:[%s14839_s7 + $0x74] sm:$0xf]  ;;  %v8002_v15 = vor.u32 %v10599_v7, %v7999_v20  ;;  %v8123_v7 = vld [vmem:[%s14839_s7 + $0x140] sm:$0xf]  ;;  %v10624_v20 = vld [vmem:[%s14839_s7 + $0x144] sm:$0xf0] }
 0x2e5   :  { %v11943_v54 = vpop.f32.mrf.mxu3  ;;  %1586 = vmatpush.bf16.msrb.mxu3 %v7930_v23  ;;  %1816 = vmatpush.bf16.msrb.mxu2 %v8056_v1  ;;  %v10629_v1 = vld [vmem:[%s14839_s7 + $0x174] sm:$0xf] }
 0x2e6   :  { %v8152_v57 = vor.u32 %v10629_v1, %v8149_v61  ;;  %v8124_v1 = vor.u32 %v10624_v20, %v8123_v7 }
 0x2e9   :  { %1587 = vmatpush.bf16.msrb.mxu3 %v7922_v55  ;;  %1817 = vmatpush.bf16.msrb.mxu2 %v8048_v56 }
 0x2ea   :  { %7884 = vmatmul.msk.f32.gmra.mxu3 %vm1136_vm4, %v1095_v52  ;;  %v7947_v52 = vld [vmem:[%s14839_s7 + $0x78] sm:$0xf0] }
 0x2eb   :  { %v7950_v26 = vor.u32 %v10597_v34, %v7947_v52  ;;  %v8013_v52 = vld [vmem:[%s14839_s7 + $0xa0] sm:$0xf] }
 0x2ed   :  { %v11948_v62 = vpop.f32.mrf.mxu3  ;;  %1597 = vmatpush.bf16.msrb.mxu1 %v7950_v26  ;;  %1731 = vmatpush.bf16.msra.mxu3 %v8022_v4  ;;  %v10604_v26 = vld [vmem:[%s14839_s7 + $0xa4] sm:$0xf0] }
 0x2ee   :  { %v8014_v30 = vor.u32 %v10604_v26, %v8013_v52  ;;  %1818 = vmatpush.bf16.msrb.mxu2 %v8040_v13  ;;  %v8107_v52 = vld [vmem:[%s14839_s7 + $0x138] sm:$0xf0]  ;;  %v12200_v26 = vpop.f32.mrf.mxu1  ;;  %v10626_v13 = vld [vmem:[%s14839_s7 + $0x154] sm:$0xf0] }
 0x2ef   :  { %v8110_v6 = vor.u32 %v10621_v17, %v8107_v52 }
 0x2f0   :  { %v1435_v60 = vpop.f32.mrf.mxu2 }
 0x2f1   :  { %1598 = vmatpush.bf16.msrb.mxu1 %v7942_v46  ;;  %1732 = vmatpush.bf16.msra.mxu3 %v8014_v30  ;;  %v8041_v46 = vld [vmem:[%s14839_s7 + $0xc8] sm:$0xf0] }
 0x2f2   :  { %v8044_v27 = vor.u32 %v10607_v31, %v8041_v46  ;;  %v10625_v46 = vld [vmem:[%s14839_s7 + $0x154] sm:$0xf] }
 0x2f4   :  { %1831 = vmatpush.bf16.msra.mxu0 %v8044_v27 }
 0x2f5   :  { %v11956_v16 = vpop.f32.mrf.mxu3  ;;  %1599 = vmatpush.bf16.msrb.mxu1 %v7934_v14  ;;  %1733 = vmatpush.bf16.msra.mxu3 %v8006_v58  ;;  %v10600_v14 = vld [vmem:[%s14839_s7 + $0x84] sm:$0xf0] }
 0x2f6   :  { %v7998_v53 = vor.u32 %v10600_v14, %v7997_v36 }
 0x2f8   :  { %v1438_v19 = vpop.f32.mrf.mxu2 }
 0x2f9   :  { %1600 = vmatpush.bf16.msrb.mxu1 %v7926_v45  ;;  %1734 = vmatpush.bf16.msra.mxu3 %v7998_v53 }
 0x2fd   :  { %v11958_v24 = vpop.f32.mrf.mxu3  ;;  %1744 = vmatpush.bf16.msra.mxu1 %v8026_v42  ;;  %v10627_v42 = vld [vmem:[%s14839_s7 + $0x164] sm:$0xf] }
 0x2fe   :  { %v8144_v37 = vor.u32 %v10627_v42, %v8141_v50 }
 0x300   :  { %v1441_v28 = vpop.f32.mrf.mxu2 }
 0x301   :  { %1745 = vmatpush.bf16.msra.mxu1 %v8018_v43  ;;  %v8131_v43 = vld [vmem:[%s14839_s7 + $0x150] sm:$0xf] }
 0x302   :  { %v8132_v36 = vor.u32 %v10626_v13, %v8131_v43 }
 0x305   :  { %v11960_v0 = vpop.f32.mrf.mxu3  ;;  %1746 = vmatpush.bf16.msra.mxu1 %v8010_v2  ;;  %v10619_v2 = vld [vmem:[%s14839_s7 + $0x124] sm:$0xf] }
 0x308   :  { %v12216_v27 = vpop.f32.mrf.mxu2 }
 0x309   :  { %1747 = vmatpush.bf16.msra.mxu1 %v8002_v15  ;;  %v10623_v15 = vld [vmem:[%s14839_s7 + $0x144] sm:$0xf] }
 0x30d   :  { %v11968_v44 = vpop.f32.mrf.mxu3 }
 0x310   :  { %v12289_v17 = vpop.f32.mrf.mxu2 }
 0x315   :  { %v11994_v63 = vpop.f32.mrf.mxu3 }
 0x31d   :  { %v12044_v33 = vpop.f32.mrf.mxu3 }
 0x325   :  { %v12096_v34 = vpop.f32.mrf.mxu3 }
 0x32d   :  { %v1252_v23 = vpop.f32.mrf.mxu3 }
 0x32e   :  { %v1253_v25 = vadd.f32 %v1252_v23, %v11943_v54  ;;  %v12156_v54 = vld [vmem:[%s14841_s29] ss:$0 sm:$0xff]  ;;  %v8099_v23 = vld [vmem:[%s14839_s7 + $0x128] sm:$0xf0]  ;;  %s14844_s29 = sld [smem:[#allocation23_spill]] }
 0x330   :  { %v1366_v8 = vadd.f32 %v12058_v41, %v1253_v25  ;;  %v8147_v41 = vld [vmem:[%s14839_s7 + $0x170] sm:$0xf] }
 0x331   :  { %v8148_v3 = vor.u32 %v10630_v22, %v8147_v41  ;;  %v10618_v41 = vld [vmem:[%s14839_s7 + $0x114] sm:$0xf0] }
 0x332   :  { %v1462_v32 = vadd.f32 %v1435_v60, %v1366_v8  ;;  %v8125_v8 = vld [vmem:[%s14839_s7 + $0x148] sm:$0xf0] }
 0x333   :  { %v8128_v61 = vor.u32 %v10623_v15, %v8125_v8  ;;  %v10636_v15 = vld [vmem:[%s14839_s7 + $0x1a4] sm:$0xf0]  ;;  %v10635_v8 = vld [vmem:[%s14839_s7 + $0x1a4] sm:$0xf] }
 0x334   :  { %v1475_v55 = vmul.f32 %v12151_v35, %v1462_v32 }
 0x335   :  { %v1255_v45 = vpop.f32.mrf.mxu3 }
 0x336   :  { %v1488_v49 = vadd.f32 %v12156_v54, %v1475_v55  ;;  %v1256_v48 = vadd.f32 %v1255_v45, %v11948_v62  ;;  %v8139_v62 = vld [vmem:[%s14839_s7 + $0x160] sm:$0xf]  ;;  %v8089_v55 = vld [vmem:[%s14839_s7 + $0x110] sm:$0xf] }
 0x337   :  { %v8140_v30 = vor.u32 %v10628_v38, %v8139_v62  ;;  %v10646_v62 = vld [vmem:[%s14839_s7 + $0x1f4] sm:$0xf0]  ;;  %v12274_v38 = vpop.f32.mrf.mxu1  ;;  %v8090_v42 = vor.u32 %v10618_v41, %v8089_v55 }
 0x338   :  { %v1497_v60 = vmax.f32 %v1488_v49, 0.0  ;;  %v1367_v5 = vadd.f32 %v1342_v29, %v1256_v48  ;;  %v8133_v29 = vld [vmem:[%s14839_s7 + $0x158] sm:$0xf0]  ;;  %v10617_v49 = vld [vmem:[%s14839_s7 + $0x114] sm:$0xf] }
 0x339   :  { %v8136_v14 = vor.u32 %v10625_v46, %v8133_v29  ;;  %v8091_v48 = vld [vmem:[%s14839_s7 + $0x118] sm:$0xf0]  ;;  %v8189_v46 = vld [vmem:[%s14839_s7 + $0x1b0] sm:$0xf] }
 0x33a   :  { %v1506_v10 = vpack.c.bf16 %v1497_v60, %v1497_v60  ;;  %v1463_v4 = vadd.f32 %v1438_v19, %v1367_v5  ;;  %v8231_v60 = vld [vmem:[%s14839_s7 + $0x1f0] sm:$0xf]  ;;  %v8094_v50 = vor.u32 %v10617_v49, %v8091_v48  ;;  %v10640_v49 = vld [vmem:[%s14839_s7 + $0x1c4] sm:$0xf0]  ;;  %v10639_v48 = vld [vmem:[%s14839_s7 + $0x1c4] sm:$0xf] }
 0x33b   :  { %v8232_v52 = vor.u32 %v10646_v62, %v8231_v60  ;;  %v8175_v62 = vld [vmem:[%s14839_s7 + $0x198] sm:$0xf0] }
 0x33c   :  { %v1533_v12 = vunpack.c.l.b16 %v1506_v10  ;;  %v1476_v56 = vmul.f32 %v12151_v35, %v1463_v4  ;;  %7985 = vmatmul.msk.bf16.vlgmr.msra.gmra.mxu2 %vm1576_vm5, %v1506_v10  ;;  %7986 = vmatmul.msk.bf16.vlgmr.msrb.gmra.mxu0 %vm1576_vm5, %v1506_v10  ;;  %v10645_v10 = vld [vmem:[%s14839_s7 + $0x1f4] sm:$0xf]  ;;  %v8233_v4 = vld [vmem:[%s14839_s7 + $0x1f8] sm:$0xf0] }
 0x33d   :  { %v1258_v47 = vpop.f32.mrf.mxu3  ;;  %1979 = vmatpush.bf16.msra.mxu2 %v8148_v3  ;;  %1992 = vmatpush.bf16.msrb.mxu0 %v8152_v57 }
 0x33e   :  { %v1534_v9 = vpack.c.b16 %v1533_v12, %v1533_v12  ;;  %v1489_v59 = vadd.f32 %v12156_v54, %v1476_v56  ;;  %v1259_v31 = vadd.f32 %v1258_v47, %v11956_v16  ;;  %v8097_v16 = vld [vmem:[%s14839_s7 + $0x120] sm:$0xf]  ;;  %v10616_v12 = vld [vmem:[%s14839_s7 + $0x104] sm:$0xf0]  ;;  %v10615_v56 = vld [vmem:[%s14839_s7 + $0x104] sm:$0xf]  ;;  %v8236_v47 = vor.u32 %v10645_v10, %v8233_v4 }
 0x33f   :  { %v8098_v32 = vor.u32 %v10620_v21, %v8097_v16  ;;  %v8086_v13 = vor.u32 %v10615_v56, %v8083_v11  ;;  %v8191_v16 = vld [vmem:[%s14839_s7 + $0x1b8] sm:$0xf0]  ;;  %v10662_v56 = vld [vmem:[%s14839_s7 + $0x274] sm:$0xf0] }
 0x340   :  { %v1535_v58 = vrot.slane %v1534_v9, 2  ;;  %v1498_v18 = vmax.f32 %v1489_v59, 0.0  ;;  %v1368_v19 = vadd.f32 %v1345_v40, %v1259_v31  ;;  %v8102_v40 = vor.u32 %v10619_v2, %v8099_v23  ;;  %v10643_v9 = vld [vmem:[%s14839_s7 + $0x1e4] sm:$0xf]  ;;  %v8225_v59 = vld [vmem:[%s14839_s7 + $0x1e8] sm:$0xf0] }
 0x341   :  { %1980 = vmatpush.bf16.msra.mxu2 %v8140_v30  ;;  %1993 = vmatpush.bf16.msrb.mxu0 %v8144_v37  ;;  %v10644_v30 = vld [vmem:[%s14839_s7 + $0x1e4] sm:$0xf0]  ;;  %v10642_v2 = vld [vmem:[%s14839_s7 + $0x1d4] sm:$0xf0]  ;;  %v10641_v23 = vld [vmem:[%s14839_s7 + $0x1d4] sm:$0xf] }
 0x342   :  { %v12233_v25 = vpack.c.bf16 %v1498_v18, %v1498_v18  ;;  %v1464_v53 = vadd.f32 %v1441_v28, %v1368_v19  ;;  %7951 = vmatmul.msk.bf16.vlgmr.msrb.gmra.mxu3 %vm1576_vm5, %v1535_v58  ;;  %7952 = vmatmul.msk.bf16.vlgmr.msrb.gmra.mxu1 %vm1576_vm5, %v1535_v58  ;;  %v8228_v58 = vor.u32 %v10643_v9, %v8225_v59  ;;  %v8215_v18 = vld [vmem:[%s14839_s7 + $0x1d0] sm:$0xf]  ;;  %v8317_v11 = vld [vmem:[%s14839_s7 + $0x278] sm:$0xf0]  ;;  %v8167_v9 = vld [vmem:[%s14839_s7 + $0x188] sm:$0xf0] }
 0x343   :  { %1895 = vmatpush.bf16.msrb.mxu3 %v8106_v39  ;;  %1908 = vmatpush.bf16.msrb.mxu1 %v8110_v6  ;;  %v10638_v39 = vld [vmem:[%s14839_s7 + $0x1b4] sm:$0xf0]  ;;  %v10637_v6 = vld [vmem:[%s14839_s7 + $0x1b4] sm:$0xf]  ;;  %v8216_v55 = vor.u32 %v10642_v2, %v8215_v18  ;;  %v8273_v18 = vld [vmem:[%s14839_s7 + $0x230] sm:$0xf] }
 0x344   :  { %v1765_v28 = vunpack.c.l.b16 %v12233_v25  ;;  %v1477_v45 = vmul.f32 %v12151_v35, %v1464_v53  ;;  %v8194_v7 = vor.u32 %v10637_v6, %v8191_v16  ;;  %v8181_v53 = vld [vmem:[%s14839_s7 + $0x1a0] sm:$0xf]  ;;  %v10659_v16 = vld [vmem:[%s14839_s7 + $0x264] sm:$0xf] }
 0x345   :  { %v1261_v22 = vpop.f32.mrf.mxu3  ;;  %1981 = vmatpush.bf16.msra.mxu2 %v8132_v36  ;;  %1994 = vmatpush.bf16.msrb.mxu0 %v8136_v14  ;;  %v8217_v36 = vld [vmem:[%s14839_s7 + $0x1d8] sm:$0xf0]  ;;  %v8190_v14 = vor.u32 %v10638_v39, %v8189_v46  ;;  %v8307_v46 = vld [vmem:[%s14839_s7 + $0x260] sm:$0xf] }
 0x346   :  { %v1766_v5 = vpack.c.b16 %v1765_v28, %v1765_v28  ;;  %v1490_v3 = vadd.f32 %v12156_v54, %v1477_v45  ;;  %v1262_v57 = vadd.f32 %v1261_v22, %v11958_v24  ;;  %v8081_v24 = vld [vmem:[%s14839_s7 + $0x100] sm:$0xf]  ;;  %v8220_v28 = vor.u32 %v10641_v23, %v8217_v36  ;;  %v8209_v22 = vld [vmem:[%s14839_s7 + $0x1c8] sm:$0xf0]  ;;  %v10654_v36 = vld [vmem:[%s14839_s7 + $0x234] sm:$0xf0] }
 0x347   :  { %1896 = vmatpush.bf16.msrb.mxu3 %v8098_v32  ;;  %1909 = vmatpush.bf16.msrb.mxu1 %v8102_v40  ;;  %v8082_v31 = vor.u32 %v10616_v12, %v8081_v24  ;;  %v8183_v32 = vld [vmem:[%s14839_s7 + $0x1a8] sm:$0xf0]  ;;  %v1354_v40 = vpop.f32.mrf.mxu1  ;;  %v8207_v45 = vld [vmem:[%s14839_s7 + $0x1c0] sm:$0xf]  ;;  %v8315_v24 = vld [vmem:[%s14839_s7 + $0x270] sm:$0xf] }
 0x348   :  { %v1369_v51 = vadd.f32 %v12200_v26, %v1262_v57  ;;  %v8223_v26 = vld [vmem:[%s14839_s7 + $0x1e0] sm:$0xf]  ;;  %v1767_v37 = vrot.slane %v1766_v5, 2  ;;  %v1499_v43 = vmax.f32 %v1490_v3, 0.0  ;;  %v8186_v60 = vor.u32 %v10635_v8, %v8183_v32  ;;  %v10634_v3 = vld [vmem:[%s14839_s7 + $0x194] sm:$0xf0] }
 0x349   :  { %1982 = vmatpush.bf16.msra.mxu2 %v8124_v1  ;;  %1995 = vmatpush.bf16.msrb.mxu0 %v8128_v61  ;;  %v1450_v1 = vpop.f32.mrf.mxu2  ;;  %v8182_v61 = vor.u32 %v10636_v15, %v8181_v53  ;;  %v10633_v57 = vld [vmem:[%s14839_s7 + $0x194] sm:$0xf] }
 0x34a   :  { %v1465_v29 = vadd.f32 %v12216_v27, %v1369_v51  ;;  %v8224_v27 = vor.u32 %v10644_v30, %v8223_v26  ;;  %v12321_v19 = vpack.c.bf16 %v1499_v43, %v1499_v43  ;;  %v10632_v26 = vld [vmem:[%s14839_s7 + $0x184] sm:$0xf0]  ;;  %v10631_v43 = vld [vmem:[%s14839_s7 + $0x184] sm:$0xf] }
 0x34b   :  { %1897 = vmatpush.bf16.msrb.mxu3 %v8090_v42  ;;  %1910 = vmatpush.bf16.msrb.mxu1 %v8094_v50  ;;  %v8208_v42 = vor.u32 %v10640_v49, %v8207_v45  ;;  %v8212_v50 = vor.u32 %v10639_v48, %v8209_v22  ;;  %v10658_v45 = vld [vmem:[%s14839_s7 + $0x254] sm:$0xf0]  ;;  %v8274_v49 = vor.u32 %v10654_v36, %v8273_v18 }
 0x34c   :  { %8069 = vmatmul.msk.bf16.vlgmr.msrb.gmra.mxu2 %vm1576_vm5, %v1767_v37  ;;  %8070 = vmatmul.msk.bf16.vlgmr.msra.gmra.mxu0 %vm1576_vm5, %v1767_v37  ;;  %v1478_v20 = vmul.f32 %v12151_v35, %v1465_v29  ;;  %v1929_v41 = vunpack.c.l.b16 %v12321_v19  ;;  %v10660_v29 = vld [vmem:[%s14839_s7 + $0x264] sm:$0xf0] }
 0x34d   :  { %v1264_v21 = vpop.f32.mrf.mxu3  ;;  %2143 = vmatpush.bf16.msrb.mxu2 %v8232_v52  ;;  %2156 = vmatpush.bf16.msra.mxu0 %v8236_v47  ;;  %v8178_v47 = vor.u32 %v10633_v57, %v8175_v62  ;;  %v8308_v8 = vor.u32 %v10660_v29, %v8307_v46  ;;  %v8291_v62 = vld [vmem:[%s14839_s7 + $0x240] sm:$0xf]  ;;  %v8401_v46 = vld [vmem:[%s14839_s7 + $0x2f8] sm:$0xf0] }
 0x34e   :  { %v1491_v5 = vadd.f32 %v12156_v54, %v1478_v20  ;;  %v1265_v10 = vadd.f32 %v1264_v21, %v11960_v0  ;;  %v1930_v51 = vpack.c.b16 %v1929_v41, %v1929_v41  ;;  %v10661_v0 = vld [vmem:[%s14839_s7 + $0x274] sm:$0xf]  ;;  %v8301_v41 = vld [vmem:[%s14839_s7 + $0x258] sm:$0xf0] }
 0x34f   :  { %1898 = vmatpush.bf16.msrb.mxu3 %v8082_v31  ;;  %1911 = vmatpush.bf16.msrb.mxu1 %v8086_v13  ;;  %v8316_v31 = vor.u32 %v10662_v56, %v8315_v24  ;;  %v8320_v13 = vor.u32 %v10661_v0, %v8317_v11  ;;  %v1357_v21 = vpop.f32.mrf.mxu1  ;;  %v10650_v0 = vld [vmem:[%s14839_s7 + $0x214] sm:$0xf0]  ;;  %v10649_v11 = vld [vmem:[%s14839_s7 + $0x214] sm:$0xf] }
 0x350   :  { %v1500_v30 = vmax.f32 %v1491_v5, 0.0  ;;  %v1370_v59 = vadd.f32 %v12274_v38, %v1265_v10  ;;  %v1931_v39 = vrot.slane %v1930_v51, 2  ;;  %v8309_v38 = vld [vmem:[%s14839_s7 + $0x268] sm:$0xf0] }
 0x351   :  { %2144 = vmatpush.bf16.msrb.mxu2 %v8224_v27  ;;  %2157 = vmatpush.bf16.msra.mxu0 %v8228_v58  ;;  %v8170_v58 = vor.u32 %v10631_v43, %v8167_v9  ;;  %v1453_v53 = vpop.f32.mrf.mxu2  ;;  %v8312_v32 = vor.u32 %v10659_v16, %v8309_v38  ;;  %v8399_v43 = vld [vmem:[%s14839_s7 + $0x2f0] sm:$0xf]  ;;  %v10648_v38 = vld [vmem:[%s14839_s7 + $0x204] sm:$0xf0] }
 0x352   :  { %8027 = vmatmul.msk.bf16.vlgmr.msra.gmra.mxu3 %vm1576_vm5, %v12233_v25  ;;  %8028 = vmatmul.msk.bf16.vlgmr.msra.gmra.mxu1 %vm1576_vm5, %v12233_v25  ;;  %v8173_v25 = vld [vmem:[%s14839_s7 + $0x190] sm:$0xf]  ;;  %v12417_v2 = vpack.c.bf16 %v1500_v30, %v1500_v30  ;;  %v1466_v20 = vadd.f32 %v12289_v17, %v1370_v59  ;;  %v10657_v17 = vld [vmem:[%s14839_s7 + $0x254] sm:$0xf] }
 0x353   :  { %2059 = vmatpush.bf16.msra.mxu3 %v8190_v14  ;;  %2072 = vmatpush.bf16.msra.mxu1 %v8194_v7  ;;  %v8174_v52 = vor.u32 %v10634_v3, %v8173_v25  ;;  %v10653_v14 = vld [vmem:[%s14839_s7 + $0x234] sm:$0xf]  ;;  %v8275_v7 = vld [vmem:[%s14839_s7 + $0x238] sm:$0xf0]  ;;  %v8267_v25 = vld [vmem:[%s14839_s7 + $0x228] sm:$0xf0]  ;;  %v8304_v57 = vor.u32 %v10657_v17, %v8301_v41 }
 0x354   :  { %v8278_v48 = vor.u32 %v10653_v14, %v8275_v7  ;;  %v2093_v22 = vunpack.c.l.b16 %v12417_v2  ;;  %v1479_v5 = vmul.f32 %v12151_v35, %v1466_v20  ;;  %v8391_v14 = vld [vmem:[%s14839_s7 + $0x2e0] sm:$0xf]  ;;  %v10675_v20 = vld [vmem:[%s14839_s7 + $0x2e4] sm:$0xf]  ;;  %v10669_v17 = vld [vmem:[%s14839_s7 + $0x2b4] sm:$0xf] }
 0x355   :  { %v1267_v4 = vpop.f32.mrf.mxu3  ;;  %2145 = vmatpush.bf16.msrb.mxu2 %v8216_v55  ;;  %2158 = vmatpush.bf16.msra.mxu0 %v8220_v28  ;;  %v8359_v41 = vld [vmem:[%s14839_s7 + $0x2b8] sm:$0xf0] }
 0x356   :  { %v1268_v12 = vadd.f32 %v1267_v4, %v11968_v44  ;;  %v8165_v44 = vld [vmem:[%s14839_s7 + $0x180] sm:$0xf]  ;;  %v10656_v4 = vld [vmem:[%s14839_s7 + $0x244] sm:$0xf0] }
 0x357   :  { %2060 = vmatpush.bf16.msra.mxu3 %v8182_v61  ;;  %2073 = vmatpush.bf16.msra.mxu1 %v8186_v60  ;;  %v8166_v27 = vor.u32 %v10632_v26, %v8165_v44  ;;  %v10652_v61 = vld [vmem:[%s14839_s7 + $0x224] sm:$0xf0]  ;;  %v10651_v60 = vld [vmem:[%s14839_s7 + $0x224] sm:$0xf]  ;;  %v1492_v44 = vadd.f32 %v12156_v54, %v1479_v5  ;;  %v8292_v30 = vor.u32 %v10656_v4, %v8291_v62  ;;  %v10673_v5 = vld [vmem:[%s14839_s7 + $0x2d4] sm:$0xf] }
 0x358   :  { %v1371_v37 = vadd.f32 %v1354_v40, %v1268_v12  ;;  %v8299_v40 = vld [vmem:[%s14839_s7 + $0x250] sm:$0xf]  ;;  %v8270_v51 = vor.u32 %v10651_v60, %v8267_v25  ;;  %v2094_v12 = vpack.c.b16 %v2093_v22, %v2093_v22  ;;  %v10674_v25 = vld [vmem:[%s14839_s7 + $0x2d4] sm:$0xf0] }
 0x359   :  { %2146 = vmatpush.bf16.msrb.mxu2 %v8208_v42  ;;  %2159 = vmatpush.bf16.msra.mxu0 %v8212_v50  ;;  %v8300_v3 = vor.u32 %v10658_v45, %v8299_v40  ;;  %v10655_v42 = vld [vmem:[%s14839_s7 + $0x244] sm:$0xf]  ;;  %v8293_v50 = vld [vmem:[%s14839_s7 + $0x248] sm:$0xf0]  ;;  %v1456_v29 = vpop.f32.mrf.mxu2  ;;  %v1501_v18 = vmax.f32 %v1492_v44, 0.0 }
 0x35a   :  { %v1467_v6 = vadd.f32 %v1450_v1, %v1371_v37  ;;  %v8296_v37 = vor.u32 %v10655_v42, %v8293_v50  ;;  %v8357_v40 = vld [vmem:[%s14839_s7 + $0x2b0] sm:$0xf]  ;;  %v10670_v45 = vld [vmem:[%s14839_s7 + $0x2b4] sm:$0xf0]  ;;  %v10668_v42 = vld [vmem:[%s14839_s7 + $0x2a4] sm:$0xf0] }
 0x35b   :  { %2061 = vmatpush.bf16.msra.mxu3 %v8174_v52  ;;  %2074 = vmatpush.bf16.msra.mxu1 %v8178_v47  ;;  %v8259_v52 = vld [vmem:[%s14839_s7 + $0x218] sm:$0xf0]  ;;  %v1360_v47 = vpop.f32.mrf.mxu1  ;;  %v8358_v62 = vor.u32 %v10670_v45, %v8357_v40  ;;  %v10667_v50 = vld [vmem:[%s14839_s7 + $0x2a4] sm:$0xf]  ;;  %v8377_v44 = vld [vmem:[%s14839_s7 + $0x2c8] sm:$0xf0] }
 0x35c   :  { %v1480_v23 = vmul.f32 %v12151_v35, %v1467_v6  ;;  %8153 = vmatmul.msk.bf16.vlgmr.msra.gmra.mxu2 %vm1576_vm5, %v1931_v39  ;;  %8154 = vmatmul.msk.bf16.vlgmr.msrb.gmra.mxu0 %vm1576_vm5, %v1931_v39  ;;  %v8262_v6 = vor.u32 %v10649_v11, %v8259_v52  ;;  %v10672_v52 = vld [vmem:[%s14839_s7 + $0x2c4] sm:$0xf0]  ;;  %v8441_v40 = vld [vmem:[%s14839_s7 + $0x330] sm:$0xf]  ;;  %v10685_v45 = vld [vmem:[%s14839_s7 + $0x334] sm:$0xf] }
 0x35d   :  { %v1270_v15 = vpop.f32.mrf.mxu3  ;;  %2307 = vmatpush.bf16.msra.mxu2 %v8316_v31  ;;  %2320 = vmatpush.bf16.msrb.mxu0 %v8320_v13  ;;  %v10678_v31 = vld [vmem:[%s14839_s7 + $0x2f4] sm:$0xf0]  ;;  %v10677_v13 = vld [vmem:[%s14839_s7 + $0x2f4] sm:$0xf] }
 0x35e   :  { %v12436_v55 = vadd.f32 %v12156_v54, %v1480_v23  ;;  %v1271_v28 = vadd.f32 %v1270_v15, %v11994_v63  ;;  %v8265_v63 = vld [vmem:[%s14839_s7 + $0x220] sm:$0xf]  ;;  %v8400_v23 = vor.u32 %v10678_v31, %v8399_v43  ;;  %v8404_v36 = vor.u32 %v10677_v13, %v8401_v46  ;;  %v8393_v15 = vld [vmem:[%s14839_s7 + $0x2e8] sm:$0xf0]  ;;  %v10666_v43 = vld [vmem:[%s14839_s7 + $0x294] sm:$0xf0] }
 0x35f   :  { %2062 = vmatpush.bf16.msra.mxu3 %v8166_v27  ;;  %2075 = vmatpush.bf16.msra.mxu1 %v8170_v58  ;;  %v8266_v24 = vor.u32 %v10652_v61, %v8265_v63  ;;  %v8251_v27 = vld [vmem:[%s14839_s7 + $0x208] sm:$0xf0]  ;;  %v2095_v58 = vrot.slane %v2094_v12, 2  ;;  %v8396_v22 = vor.u32 %v10675_v20, %v8393_v15  ;;  %v8343_v31 = vld [vmem:[%s14839_s7 + $0x298] sm:$0xf0] }
 0x360   :  { %v1372_v1 = vadd.f32 %v1357_v21, %v1271_v28  ;;  %v10647_v21 = vld [vmem:[%s14839_s7 + $0x204] sm:$0xf]  ;;  %v10692_v20 = vld [vmem:[%s14839_s7 + $0x364] sm:$0xf0] }
 0x361   :  { %2308 = vmatpush.bf16.msra.mxu2 %v8308_v8  ;;  %2321 = vmatpush.bf16.msrb.mxu0 %v8312_v32  ;;  %v8254_v32 = vor.u32 %v10647_v21, %v8251_v27  ;;  %v10664_v27 = vld [vmem:[%s14839_s7 + $0x284] sm:$0xf0]  ;;  %v10691_v15 = vld [vmem:[%s14839_s7 + $0x364] sm:$0xf] }
 0x362   :  { %v1468_v10 = vadd.f32 %v1453_v53, %v1372_v1  ;;  %8111 = vmatmul.msk.bf16.vlgmr.msrb.gmra.mxu3 %vm1576_vm5, %v12321_v19  ;;  %8112 = vmatmul.msk.bf16.vlgmr.msrb.gmra.mxu1 %vm1576_vm5, %v12321_v19  ;;  %v8257_v19 = vld [vmem:[%s14839_s7 + $0x210] sm:$0xf]  ;;  %v10676_v53 = vld [vmem:[%s14839_s7 + $0x2e4] sm:$0xf0] }
 0x363   :  { %2223 = vmatpush.bf16.msrb.mxu3 %v8274_v49  ;;  %2236 = vmatpush.bf16.msrb.mxu1 %v8278_v48  ;;  %v8258_v39 = vor.u32 %v10650_v0, %v8257_v19  ;;  %v12547_v49 = vpack.c.bf16 %v1501_v18, %v1501_v18  ;;  %v8392_v63 = vor.u32 %v10676_v53, %v8391_v14  ;;  %v8383_v1 = vld [vmem:[%s14839_s7 + $0x2d0] sm:$0xf]  ;;  %v8375_v0 = vld [vmem:[%s14839_s7 + $0x2c0] sm:$0xf]  ;;  %v8335_v18 = vld [vmem:[%s14839_s7 + $0x288] sm:$0xf0] }
 0x364   :  { %v1481_v56 = vmul.f32 %v12151_v35, %v1468_v10  ;;  %v8362_v10 = vor.u32 %v10669_v17, %v8359_v41  ;;  %v8384_v12 = vor.u32 %v10674_v25, %v8383_v1  ;;  %v8376_v46 = vor.u32 %v10672_v52, %v8375_v0  ;;  %v8475_v53 = vld [vmem:[%s14839_s7 + $0x360] sm:$0xf]  ;;  %v8443_v17 = vld [vmem:[%s14839_s7 + $0x338] sm:$0xf0]  ;;  %v10690_v1 = vld [vmem:[%s14839_s7 + $0x354] sm:$0xf0] }
 0x365   :  { %v1273_v26 = vpop.f32.mrf.mxu3  ;;  %2309 = vmatpush.bf16.msra.mxu2 %v8300_v3  ;;  %2322 = vmatpush.bf16.msrb.mxu0 %v8304_v57  ;;  %v8385_v3 = vld [vmem:[%s14839_s7 + $0x2d8] sm:$0xf0]  ;;  %v1363_v57 = vpop.f32.mrf.mxu1  ;;  %v2257_v19 = vunpack.c.l.b16 %v12547_v49  ;;  %v10681_v52 = vld [vmem:[%s14839_s7 + $0x314] sm:$0xf] }
 0x366   :  { %v12496_v9 = vadd.f32 %v12156_v54, %v1481_v56  ;;  %v1274_v59 = vadd.f32 %v1273_v26, %v12044_v33  ;;  %v8249_v33 = vld [vmem:[%s14839_s7 + $0x200] sm:$0xf]  ;;  %v8388_v56 = vor.u32 %v10673_v5, %v8385_v3  ;;  %v8469_v25 = vld [vmem:[%s14839_s7 + $0x358] sm:$0xf0]  ;;  %v8446_v3 = vor.u32 %v10685_v45, %v8443_v17 }
 0x367   :  { %2224 = vmatpush.bf16.msrb.mxu3 %v8266_v24  ;;  %2237 = vmatpush.bf16.msrb.mxu1 %v8270_v51  ;;  %v8250_v8 = vor.u32 %v10648_v38, %v8249_v33  ;;  %v8351_v24 = vld [vmem:[%s14839_s7 + $0x2a8] sm:$0xf0]  ;;  %v1459_v51 = vpop.f32.mrf.mxu2  ;;  %v2258_v13 = vpack.c.b16 %v2257_v19, %v2257_v19  ;;  %v10693_v33 = vld [vmem:[%s14839_s7 + $0x374] sm:$0xf]  ;;  %v10687_v19 = vld [vmem:[%s14839_s7 + $0x344] sm:$0xf] }
 0x368   :  { %v1373_v16 = vadd.f32 %v1360_v47, %v1274_v59  ;;  %v10671_v47 = vld [vmem:[%s14839_s7 + $0x2c4] sm:$0xf]  ;;  %v10665_v59 = vld [vmem:[%s14839_s7 + $0x294] sm:$0xf] }
 0x369   :  { %2310 = vmatpush.bf16.msra.mxu2 %v8292_v30  ;;  %2323 = vmatpush.bf16.msrb.mxu0 %v8296_v37  ;;  %v8354_v30 = vor.u32 %v10667_v50, %v8351_v24  ;;  %v8346_v21 = vor.u32 %v10665_v59, %v8343_v31  ;;  %v8459_v24 = vld [vmem:[%s14839_s7 + $0x340] sm:$0xf]  ;;  %v8569_v59 = vld [vmem:[%s14839_s7 + $0x3f8] sm:$0xf0] }
 0x36a   :  { %v1469_v7 = vadd.f32 %v1456_v29, %v1373_v16  ;;  %v8380_v29 = vor.u32 %v10671_v47, %v8377_v44  ;;  %v8485_v16 = vld [vmem:[%s14839_s7 + $0x378] sm:$0xf0] }
 0x36b   :  { %2225 = vmatpush.bf16.msrb.mxu3 %v8258_v39  ;;  %2238 = vmatpush.bf16.msrb.mxu1 %v8262_v6  ;;  %v10694_v6 = vld [vmem:[%s14839_s7 + $0x374] sm:$0xf0]  ;;  %v8427_v47 = vld [vmem:[%s14839_s7 + $0x318] sm:$0xf0] }
 0x36c   :  { %v1482_v28 = vmul.f32 %v12151_v35, %v1469_v7  ;;  %8237 = vmatmul.msk.bf16.vlgmr.msrb.gmra.mxu2 %vm1576_vm5, %v2095_v58  ;;  %8238 = vmatmul.msk.bf16.vlgmr.msra.gmra.mxu0 %vm1576_vm5, %v2095_v58  ;;  %v10663_v58 = vld [vmem:[%s14839_s7 + $0x284] sm:$0xf]  ;;  %v8488_v7 = vor.u32 %v10693_v33, %v8485_v16  ;;  %v1503_v16 = vmax.f32 %v12496_v9, 0.0  ;;  %v8561_v9 = vld [vmem:[%s14839_s7 + $0x3e8] sm:$0xf0] }
 0x36d   :  { %v1276_v48 = vpop.f32.mrf.mxu3  ;;  %2471 = vmatpush.bf16.msrb.mxu2 %v8400_v23  ;;  %2484 = vmatpush.bf16.msra.mxu0 %v8404_v36  ;;  %v2259_v23 = vrot.slane %v2258_v13, 2  ;;  %v1502_v36 = vmax.f32 %v12436_v55, 0.0  ;;  %v8477_v55 = vld [vmem:[%s14839_s7 + $0x368] sm:$0xf0]  ;;  %v8430_v13 = vor.u32 %v10681_v52, %v8427_v47 }
 0x36e   :  { %v12553_v61 = vadd.f32 %v12156_v54, %v1482_v28  ;;  %v1277_v60 = vadd.f32 %v1276_v48, %v12096_v34  ;;  %v8349_v34 = vld [vmem:[%s14839_s7 + $0x2a0] sm:$0xf]  ;;  %v10686_v28 = vld [vmem:[%s14839_s7 + $0x334] sm:$0xf0]  ;;  %v8476_v48 = vor.u32 %v10692_v20, %v8475_v53  ;;  %v8527_v53 = vld [vmem:[%s14839_s7 + $0x3b8] sm:$0xf0]  ;;  %v12767_v20 = vpack.c.bf16 %v1503_v16, %v1503_v16 }
 0x36f   :  { %2226 = vmatpush.bf16.msrb.mxu3 %v8250_v8  ;;  %2239 = vmatpush.bf16.msrb.mxu1 %v8254_v32  ;;  %v8350_v26 = vor.u32 %v10668_v42, %v8349_v34  ;;  %v8338_v32 = vor.u32 %v10663_v58, %v8335_v18  ;;  %v12661_v41 = vpack.c.bf16 %v1502_v36, %v1502_v36  ;;  %v8435_v34 = vld [vmem:[%s14839_s7 + $0x328] sm:$0xf0]  ;;  %v10707_v58 = vld [vmem:[%s14839_s7 + $0x3e4] sm:$0xf]  ;;  %v8525_v36 = vld [vmem:[%s14839_s7 + $0x3b0] sm:$0xf] }
 0x370   :  { %v1374_v4 = vadd.f32 %v1363_v57, %v1277_v60  ;;  %v10689_v60 = vld [vmem:[%s14839_s7 + $0x354] sm:$0xf]  ;;  %v8442_v5 = vor.u32 %v10686_v28, %v8441_v40  ;;  %v8433_v57 = vld [vmem:[%s14839_s7 + $0x320] sm:$0xf]  ;;  %v8553_v28 = vld [vmem:[%s14839_s7 + $0x3d8] sm:$0xf0] }
 0x371   :  { %2472 = vmatpush.bf16.msrb.mxu2 %v8392_v63  ;;  %2485 = vmatpush.bf16.msra.mxu0 %v8396_v22  ;;  %v8480_v63 = vor.u32 %v10691_v15, %v8477_v55  ;;  %v8467_v22 = vld [vmem:[%s14839_s7 + $0x350] sm:$0xf]  ;;  %v8472_v50 = vor.u32 %v10689_v60, %v8469_v25  ;;  %v8564_v55 = vor.u32 %v10707_v58, %v8561_v9  ;;  %v10705_v40 = vld [vmem:[%s14839_s7 + $0x3d4] sm:$0xf]  ;;  %v2585_v60 = vunpack.c.l.b16 %v12767_v20  ;;  %v10718_v16 = vld [vmem:[%s14839_s7 + $0x434] sm:$0xf0] }
 0x372   :  { %v1470_v11 = vadd.f32 %v1459_v51, %v1374_v4  ;;  %8195 = vmatmul.msk.bf16.vlgmr.msra.gmra.mxu3 %vm1576_vm5, %v12417_v2  ;;  %8196 = vmatmul.msk.bf16.vlgmr.msra.gmra.mxu1 %vm1576_vm5, %v12417_v2  ;;  %v8341_v2 = vld [vmem:[%s14839_s7 + $0x290] sm:$0xf]  ;;  %v2421_v4 = vunpack.c.l.b16 %v12661_v41  ;;  %v8468_v42 = vor.u32 %v10690_v1, %v8467_v22  ;;  %v10688_v51 = vld [vmem:[%s14839_s7 + $0x344] sm:$0xf0]  ;;  %v10699_v22 = vld [vmem:[%s14839_s7 + $0x3a4] sm:$0xf] }
 0x373   :  { %2387 = vmatpush.bf16.msra.mxu3 %v8358_v62  ;;  %2400 = vmatpush.bf16.msra.mxu1 %v8362_v10  ;;  %v8342_v38 = vor.u32 %v10666_v43, %v8341_v2  ;;  %v10684_v62 = vld [vmem:[%s14839_s7 + $0x324] sm:$0xf0]  ;;  %v10683_v10 = vld [vmem:[%s14839_s7 + $0x324] sm:$0xf]  ;;  %v8567_v2 = vld [vmem:[%s14839_s7 + $0x3f0] sm:$0xf] }
 0x374   :  { %v1483_v37 = vmul.f32 %v12151_v35, %v1470_v11  ;;  %v8483_v35 = vld [vmem:[%s14839_s7 + $0x370] sm:$0xf]  ;;  %v8438_v0 = vor.u32 %v10683_v10, %v8435_v34  ;;  %v10682_v11 = vld [vmem:[%s14839_s7 + $0x314] sm:$0xf0]  ;;  %v2422_v44 = vpack.c.b16 %v2421_v4, %v2421_v4  ;;  %v10709_v43 = vld [vmem:[%s14839_s7 + $0x3f4] sm:$0xf] }
 0x375   :  { %2473 = vmatpush.bf16.msrb.mxu2 %v8384_v12  ;;  %2486 = vmatpush.bf16.msra.mxu0 %v8388_v56  ;;  %v8484_v14 = vor.u32 %v10694_v6, %v8483_v35  ;;  %v8461_v12 = vld [vmem:[%s14839_s7 + $0x348] sm:$0xf0]  ;;  %v8434_v56 = vor.u32 %v10684_v62, %v8433_v57  ;;  %v10679_v35 = vld [vmem:[%s14839_s7 + $0x304] sm:$0xf]  ;;  %v10704_v57 = vld [vmem:[%s14839_s7 + $0x3c4] sm:$0xf0] }
 0x376   :  { %v12611_v39 = vadd.f32 %v12156_v54, %v1483_v37  ;;  %v8333_v54 = vld [vmem:[%s14839_s7 + $0x280] sm:$0xf]  ;;  %v10710_v37 = vld [vmem:[%s14839_s7 + $0x3f4] sm:$0xf0]  ;;  %v8419_v6 = vld [vmem:[%s14839_s7 + $0x308] sm:$0xf0] }
 0x377   :  { %2388 = vmatpush.bf16.msra.mxu3 %v8350_v26  ;;  %2401 = vmatpush.bf16.msra.mxu1 %v8354_v30  ;;  %v8334_v8 = vor.u32 %v10664_v27, %v8333_v54  ;;  %v8460_v26 = vor.u32 %v10688_v51, %v8459_v24  ;;  %v8464_v30 = vor.u32 %v10687_v19, %v8461_v12  ;;  %v2423_v33 = vrot.slane %v2422_v44, 2  ;;  %v8559_v54 = vld [vmem:[%s14839_s7 + $0x3e0] sm:$0xf]  ;;  %v10708_v27 = vld [vmem:[%s14839_s7 + $0x3e4] sm:$0xf0] }
 0x378   :  { %v8560_v15 = vor.u32 %v10708_v27, %v8559_v54  ;;  %v8519_v1 = vld [vmem:[%s14839_s7 + $0x3a8] sm:$0xf0]  ;;  %v10703_v62 = vld [vmem:[%s14839_s7 + $0x3c4] sm:$0xf]  ;;  %v8511_v24 = vld [vmem:[%s14839_s7 + $0x398] sm:$0xf0]  ;;  %v2586_v51 = vpack.c.b16 %v2585_v60, %v2585_v60 }
 0x379   :  { %2474 = vmatpush.bf16.msrb.mxu2 %v8376_v46  ;;  %2487 = vmatpush.bf16.msra.mxu0 %v8380_v29  ;;  %v8417_v46 = vld [vmem:[%s14839_s7 + $0x300] sm:$0xf]  ;;  %v10680_v29 = vld [vmem:[%s14839_s7 + $0x304] sm:$0xf0]  ;;  %v8545_v10 = vld [vmem:[%s14839_s7 + $0x3c8] sm:$0xf0]  ;;  %v8522_v4 = vor.u32 %v10699_v22, %v8519_v1 }
 0x37a   :  { %v8418_v18 = vor.u32 %v10680_v29, %v8417_v46  ;;  %v8548_v12 = vor.u32 %v10703_v62, %v8545_v10  ;;  %v8501_v44 = vld [vmem:[%s14839_s7 + $0x380] sm:$0xf]  ;;  %v10724_v46 = vld [vmem:[%s14839_s7 + $0x464] sm:$0xf0]  ;;  %v10723_v29 = vld [vmem:[%s14839_s7 + $0x464] sm:$0xf] }
 0x37b   :  { %2389 = vmatpush.bf16.msra.mxu3 %v8342_v38  ;;  %2402 = vmatpush.bf16.msra.mxu1 %v8346_v21  ;;  %v8568_v38 = vor.u32 %v10710_v37, %v8567_v2  ;;  %v8572_v21 = vor.u32 %v10709_v43, %v8569_v59  ;;  %v8503_v2 = vld [vmem:[%s14839_s7 + $0x388] sm:$0xf0]  ;;  %v2587_v37 = vrot.slane %v2586_v51, 2  ;;  %v1504_v43 = vmax.f32 %v12553_v61, 0.0  ;;  %v8635_v58 = vld [vmem:[%s14839_s7 + $0x450] sm:$0xf] }
 0x37c   :  { %8321 = vmatmul.msk.bf16.vlgmr.msra.gmra.mxu2 %vm1576_vm5, %v2259_v23  ;;  %8322 = vmatmul.msk.bf16.vlgmr.msrb.gmra.mxu0 %vm1576_vm5, %v2259_v23  ;;  %v8422_v23 = vor.u32 %v10679_v35, %v8419_v6  ;;  %v8645_v61 = vld [vmem:[%s14839_s7 + $0x468] sm:$0xf0]  ;;  %v10714_v60 = vld [vmem:[%s14839_s7 + $0x414] sm:$0xf0]  ;;  %v1505_v51 = vmax.f32 %v12611_v39, 0.0 }
 0x37d   :  { %2635 = vmatpush.bf16.msra.mxu2 %v8484_v14  ;;  %2648 = vmatpush.bf16.msrb.mxu0 %v8488_v7  ;;  %v10702_v14 = vld [vmem:[%s14839_s7 + $0x3b4] sm:$0xf0]  ;;  %v10701_v7 = vld [vmem:[%s14839_s7 + $0x3b4] sm:$0xf]  ;;  %v8648_v27 = vor.u32 %v10723_v29, %v8645_v61  ;;  %v1513_v9 = vpack.c.bf16 %v1504_v43, %v1504_v43 }
 0x37e   :  { %v8526_v45 = vor.u32 %v10702_v14, %v8525_v36  ;;  %v8530_v17 = vor.u32 %v10701_v7, %v8527_v53  ;;  %v8637_v36 = vld [vmem:[%s14839_s7 + $0x458] sm:$0xf0]  ;;  %v8601_v53 = vld [vmem:[%s14839_s7 + $0x420] sm:$0xf] }
 0x37f   :  { %2390 = vmatpush.bf16.msra.mxu3 %v8334_v8  ;;  %2403 = vmatpush.bf16.msra.mxu1 %v8338_v32  ;;  %v8551_v8 = vld [vmem:[%s14839_s7 + $0x3d0] sm:$0xf]  ;;  %v10706_v32 = vld [vmem:[%s14839_s7 + $0x3d4] sm:$0xf0] }
 0x380   :  { %v8552_v25 = vor.u32 %v10706_v32, %v8551_v8  ;;  %v8603_v8 = vld [vmem:[%s14839_s7 + $0x428] sm:$0xf0] }
 0x381   :  { %2636 = vmatpush.bf16.msra.mxu2 %v8476_v48  ;;  %2649 = vmatpush.bf16.msrb.mxu0 %v8480_v63  ;;  %v8517_v48 = vld [vmem:[%s14839_s7 + $0x3a0] sm:$0xf]  ;;  %v10700_v63 = vld [vmem:[%s14839_s7 + $0x3a4] sm:$0xf0] }
 0x382   :  { %8279 = vmatmul.msk.bf16.vlgmr.msrb.gmra.mxu3 %vm1576_vm5, %v12547_v49  ;;  %8280 = vmatmul.msk.bf16.vlgmr.msrb.gmra.mxu1 %vm1576_vm5, %v12547_v49  ;;  %v8425_v49 = vld [vmem:[%s14839_s7 + $0x310] sm:$0xf]  ;;  %v8518_v34 = vor.u32 %v10700_v63, %v8517_v48  ;;  %v10719_v48 = vld [vmem:[%s14839_s7 + $0x444] sm:$0xf]  ;;  %v8629_v63 = vld [vmem:[%s14839_s7 + $0x448] sm:$0xf0] }
 0x383   :  { %2551 = vmatpush.bf16.msrb.mxu3 %v8442_v5  ;;  %2564 = vmatpush.bf16.msrb.mxu1 %v8446_v3  ;;  %v8426_v31 = vor.u32 %v10682_v11, %v8425_v49  ;;  %v8556_v5 = vor.u32 %v10705_v40, %v8553_v28  ;;  %v8543_v3 = vld [vmem:[%s14839_s7 + $0x3c0] sm:$0xf]  ;;  %v10725_v49 = vld [vmem:[%s14839_s7 + $0x474] sm:$0xf]  ;;  %v8653_v11 = vld [vmem:[%s14839_s7 + $0x478] sm:$0xf0] }
 0x384   :  { %v8544_v19 = vor.u32 %v10704_v57, %v8543_v3  ;;  %v8627_v28 = vld [vmem:[%s14839_s7 + $0x440] sm:$0xf]  ;;  %v8632_v57 = vor.u32 %v10719_v48, %v8629_v63 }
 0x385   :  { %2637 = vmatpush.bf16.msra.mxu2 %v8468_v42  ;;  %2650 = vmatpush.bf16.msrb.mxu0 %v8472_v50  ;;  %v10698_v42 = vld [vmem:[%s14839_s7 + $0x394] sm:$0xf0]  ;;  %v10697_v50 = vld [vmem:[%s14839_s7 + $0x394] sm:$0xf] }
 0x386   :  { %v8514_v47 = vor.u32 %v10697_v50, %v8511_v24  ;;  %v8587_v50 = vld [vmem:[%s14839_s7 + $0x408] sm:$0xf0] }
 0x387   :  { %2552 = vmatpush.bf16.msrb.mxu3 %v8434_v56  ;;  %2565 = vmatpush.bf16.msrb.mxu1 %v8438_v0  ;;  %v8651_v56 = vld [vmem:[%s14839_s7 + $0x470] sm:$0xf]  ;;  %v10726_v0 = vld [vmem:[%s14839_s7 + $0x474] sm:$0xf0] }
 0x388   :  { %v8652_v59 = vor.u32 %v10726_v0, %v8651_v56  ;;  %v1514_v56 = vpack.c.bf16 %v1505_v51, %v1505_v51  ;;  %v3012_v51 = vld [vmem:[%s14842_s1 + $0x78] sm:$0xff] }
 0x389   :  { %2638 = vmatpush.bf16.msra.mxu2 %v8460_v26  ;;  %2651 = vmatpush.bf16.msrb.mxu0 %v8464_v30  ;;  %v10696_v26 = vld [vmem:[%s14839_s7 + $0x384] sm:$0xf0]  ;;  %v10695_v30 = vld [vmem:[%s14839_s7 + $0x384] sm:$0xf] }
 0x38a   :  { %v8502_v35 = vor.u32 %v10696_v26, %v8501_v44  ;;  %v8506_v6 = vor.u32 %v10695_v30, %v8503_v2  ;;  %v2913_v0 = vunpack.c.l.b16 %v1514_v56 }
 0x38b   :  { %2553 = vmatpush.bf16.msrb.mxu3 %v8426_v31  ;;  %2566 = vmatpush.bf16.msrb.mxu1 %v8430_v13  ;;  %v8656_v31 = vor.u32 %v10725_v49, %v8653_v11  ;;  %v8643_v13 = vld [vmem:[%s14839_s7 + $0x460] sm:$0xf] }
 0x38c   :  { %8405 = vmatmul.msk.bf16.vlgmr.msrb.gmra.mxu2 %vm1576_vm5, %v2423_v33  ;;  %8406 = vmatmul.msk.bf16.vlgmr.msra.gmra.mxu0 %vm1576_vm5, %v2423_v33  ;;  %v8609_v33 = vld [vmem:[%s14839_s7 + $0x430] sm:$0xf]  ;;  %v8644_v54 = vor.u32 %v10724_v46, %v8643_v13  ;;  %v2914_v49 = vpack.c.b16 %v2913_v0, %v2913_v0  ;;  %v3024_v0 = vld [vmem:[%s14842_s1 + $0xd8] sm:$0xff] }
 0x38d   :  { %2799 = vmatpush.bf16.msrb.mxu2 %v8568_v38  ;;  %2812 = vmatpush.bf16.msra.mxu0 %v8572_v21  ;;  %v10717_v38 = vld [vmem:[%s14839_s7 + $0x434] sm:$0xf]  ;;  %v8611_v21 = vld [vmem:[%s14839_s7 + $0x438] sm:$0xf0]  ;;  %v8610_v14 = vor.u32 %v10718_v16, %v8609_v33 }
 0x38e   :  { %v8614_v7 = vor.u32 %v10717_v38, %v8611_v21 }
 0x38f   :  { %2554 = vmatpush.bf16.msrb.mxu3 %v8418_v18  ;;  %2567 = vmatpush.bf16.msrb.mxu1 %v8422_v23  ;;  %v10722_v18 = vld [vmem:[%s14839_s7 + $0x454] sm:$0xf0]  ;;  %v10721_v23 = vld [vmem:[%s14839_s7 + $0x454] sm:$0xf] }
 0x390   :  { %v8636_v32 = vor.u32 %v10722_v18, %v8635_v58  ;;  %v8640_v40 = vor.u32 %v10721_v23, %v8637_v36 }
 0x391   :  { %2800 = vmatpush.bf16.msrb.mxu2 %v8560_v15  ;;  %2813 = vmatpush.bf16.msra.mxu0 %v8564_v55  ;;  %v10716_v15 = vld [vmem:[%s14839_s7 + $0x424] sm:$0xf0]  ;;  %v10715_v55 = vld [vmem:[%s14839_s7 + $0x424] sm:$0xf] }
 0x392   :  { %8363 = vmatmul.msk.bf16.vlgmr.msra.gmra.mxu3 %vm1576_vm5, %v12661_v41  ;;  %8364 = vmatmul.msk.bf16.vlgmr.msra.gmra.mxu1 %vm1576_vm5, %v12661_v41  ;;  %v8509_v41 = vld [vmem:[%s14839_s7 + $0x390] sm:$0xf]  ;;  %v8602_v22 = vor.u32 %v10716_v15, %v8601_v53  ;;  %v8606_v1 = vor.u32 %v10715_v55, %v8603_v8 }
 0x393   :  { %2715 = vmatpush.bf16.msra.mxu3 %v8526_v45  ;;  %2728 = vmatpush.bf16.msra.mxu1 %v8530_v17  ;;  %v8510_v52 = vor.u32 %v10698_v42, %v8509_v41  ;;  %v2749_v45 = vunpack.c.l.b16 %v1513_v9  ;;  %v10720_v17 = vld [vmem:[%s14839_s7 + $0x444] sm:$0xf0]  ;;  %v10711_v42 = vld [vmem:[%s14839_s7 + $0x404] sm:$0xf] }
 0x394   :  { %v8628_v3 = vor.u32 %v10720_v17, %v8627_v28  ;;  %v10712_v41 = vld [vmem:[%s14839_s7 + $0x404] sm:$0xf0] }
 0x395   :  { %2801 = vmatpush.bf16.msrb.mxu2 %v8552_v25  ;;  %2814 = vmatpush.bf16.msra.mxu0 %v8556_v5  ;;  %v10713_v25 = vld [vmem:[%s14839_s7 + $0x414] sm:$0xf]  ;;  %v8595_v5 = vld [vmem:[%s14839_s7 + $0x418] sm:$0xf0]  ;;  %v2750_v62 = vpack.c.b16 %v2749_v45, %v2749_v45 }
 0x397   :  { %2716 = vmatpush.bf16.msra.mxu3 %v8518_v34  ;;  %2729 = vmatpush.bf16.msra.mxu1 %v8522_v4  ;;  %v8598_v34 = vor.u32 %v10713_v25, %v8595_v5  ;;  %v8585_v4 = vld [vmem:[%s14839_s7 + $0x400] sm:$0xf]  ;;  %v2751_v24 = vrot.slane %v2750_v62, 2 }
 0x399   :  { %2802 = vmatpush.bf16.msrb.mxu2 %v8544_v19  ;;  %2815 = vmatpush.bf16.msra.mxu0 %v8548_v12  ;;  %v8586_v19 = vor.u32 %v10712_v41, %v8585_v4  ;;  %v8590_v12 = vor.u32 %v10711_v42, %v8587_v50  ;;  %v3027_v4 = vld [vmem:[%s14842_s1 + $0xf0] sm:$0xff]  ;;  %v3026_v42 = vld [vmem:[%s14842_s1 + $0xe8] sm:$0xff] }
 0x39b   :  { %2717 = vmatpush.bf16.msra.mxu3 %v8510_v52  ;;  %2730 = vmatpush.bf16.msra.mxu1 %v8514_v47  ;;  %v2915_v52 = vrot.slane %v2914_v49, 2  ;;  %v3010_v49 = vld [vmem:[%s14842_s1 + $0x68] sm:$0xff] }
 0x39c   :  { %8489 = vmatmul.msk.bf16.vlgmr.msra.gmra.mxu2 %vm1576_vm5, %v2587_v37  ;;  %8490 = vmatmul.msk.bf16.vlgmr.msrb.gmra.mxu0 %vm1576_vm5, %v2587_v37 }
 0x39d   :  { %2963 = vmatpush.bf16.msra.mxu2 %v8652_v59  ;;  %2976 = vmatpush.bf16.msrb.mxu0 %v8656_v31 }
 0x39f   :  { %2718 = vmatpush.bf16.msra.mxu3 %v8502_v35  ;;  %2731 = vmatpush.bf16.msra.mxu1 %v8506_v6 }
 0x3a1   :  { %2964 = vmatpush.bf16.msra.mxu2 %v8644_v54  ;;  %2977 = vmatpush.bf16.msrb.mxu0 %v8648_v27 }
 0x3a2   :  { %8447 = vmatmul.msk.bf16.vlgmr.msrb.gmra.mxu3 %vm1576_vm5, %v12767_v20  ;;  %8448 = vmatmul.msk.bf16.vlgmr.msrb.gmra.mxu1 %vm1576_vm5, %v12767_v20  ;;  %v8593_v20 = vld [vmem:[%s14839_s7 + $0x410] sm:$0xf] }
 0x3a3   :  { %2879 = vmatpush.bf16.msrb.mxu3 %v8610_v14  ;;  %2892 = vmatpush.bf16.msrb.mxu1 %v8614_v7  ;;  %v8594_v10 = vor.u32 %v10714_v60, %v8593_v20 }
 0x3a5   :  { %2965 = vmatpush.bf16.msra.mxu2 %v8636_v32  ;;  %2978 = vmatpush.bf16.msrb.mxu0 %v8640_v40 }
 0x3a7   :  { %2880 = vmatpush.bf16.msrb.mxu3 %v8602_v22  ;;  %2893 = vmatpush.bf16.msrb.mxu1 %v8606_v1 }
 0x3a9   :  { %2966 = vmatpush.bf16.msra.mxu2 %v8628_v3  ;;  %2979 = vmatpush.bf16.msrb.mxu0 %v8632_v57 }
 0x3ab   :  { %2881 = vmatpush.bf16.msrb.mxu3 %v8594_v10  ;;  %2894 = vmatpush.bf16.msrb.mxu1 %v8598_v34  ;;  %v3028_v34 = vld [vmem:[%s14842_s1 + $0xf8] sm:$0xff] }
 0x3ac   :  { %8573 = vmatmul.msk.bf16.vlgmr.msrb.gmra.mxu2 %vm1576_vm5, %v2751_v24  ;;  %8574 = vmatmul.msk.bf16.vlgmr.msra.gmra.mxu0 %vm1576_vm5, %v2751_v24 }
 0x3af   :  { %2882 = vmatpush.bf16.msrb.mxu3 %v8586_v19  ;;  %2895 = vmatpush.bf16.msrb.mxu1 %v8590_v12  ;;  %v3025_v19 = vld [vmem:[%s14842_s1 + $0xe0] sm:$0xff] }
 0x3b2   :  { %8531 = vmatmul.msk.bf16.vlgmr.msra.gmra.mxu3 %vm1576_vm5, %v1513_v9  ;;  %8532 = vmatmul.msk.bf16.vlgmr.msra.gmra.mxu1 %vm1576_vm5, %v1513_v9 }
 0x3b3   :  { %3053 = vmatpush.msra.mxu1 %v3028_v34  ;;  %3033 = vmatpush.msra.mxu3 %v3012_v51 }
 0x3b5   :  { %3054 = vmatpush.msra.mxu1 %v3027_v4 }
 0x3b7   :  { %3055 = vmatpush.msra.mxu1 %v3026_v42 }
 0x3b9   :  { %v1671_v11 = vpop.f32.mrf.mxu0  ;;  %3056 = vmatpush.msra.mxu1 %v3025_v19 }
 0x3bb   :  { %3057 = vmatpush.msra.mxu1 %v3024_v0 }
 0x3bc   :  { %8657 = vmatmul.msk.bf16.vlgmr.msra.gmra.mxu2 %vm1576_vm5, %v2915_v52  ;;  %8658 = vmatmul.msk.bf16.vlgmr.msrb.gmra.mxu0 %vm1576_vm5, %v2915_v52 }
 0x3bf   :  { %v1602_v39 = vpop.f32.mrf.mxu1  ;;  %v1658_v47 = vpop.f32.mrf.mxu2 }
 0x3c0   :  { %v1672_v59 = vadd.f32 %v1671_v11, %v1602_v39  ;;  %v3023_v11 = vld [vmem:[%s14842_s1 + $0xd0] sm:$0xff]  ;;  %v3009_v39 = vld [vmem:[%s14842_s1 + $0x60] sm:$0xff] }
 0x3c1   :  { %v1673_v44 = vpop.f32.mrf.mxu0  ;;  %3058 = vmatpush.msra.mxu1 %v3023_v11 }
 0x3c2   :  { %8615 = vmatmul.msk.bf16.vlgmr.msrb.gmra.mxu3 %vm1576_vm5, %v1514_v56  ;;  %8616 = vmatmul.msk.bf16.vlgmr.msrb.gmra.mxu1 %vm1576_vm5, %v1514_v56  ;;  %v3011_v56 = vld [vmem:[%s14842_s1 + $0x70] sm:$0xff] }
 0x3c3   :  { %3034 = vmatpush.msra.mxu3 %v3011_v56 }
 0x3c5   :  { %v1589_v26 = vpop.f32.mrf.mxu3  ;;  %3035 = vmatpush.msra.mxu3 %v3010_v49 }
 0x3c6   :  { %v1659_v35 = vadd.f32 %v1658_v47, %v1589_v26  ;;  %v3022_v47 = vld [vmem:[%s14842_s1 + $0xc8] sm:$0xff] }
 0x3c7   :  { %v1604_v30 = vpop.f32.mrf.mxu1  ;;  %v1660_v2 = vpop.f32.mrf.mxu2  ;;  %3036 = vmatpush.msra.mxu3 %v3009_v39  ;;  %3059 = vmatpush.msra.mxu1 %v3022_v47 }
 0x3c8   :  { %v3008_v30 = vld [vmem:[%s14842_s1 + $0x58] sm:$0xff]  ;;  %v3021_v2 = vld [vmem:[%s14842_s1 + $0xc0] sm:$0xff] }
 0x3c9   :  { %v1833_v37 = vpop.f32.mrf.mxu0  ;;  %3037 = vmatpush.msra.mxu3 %v3008_v30  ;;  %3060 = vmatpush.msra.mxu1 %v3021_v2 }
 0x3cd   :  { %v1591_v43 = vpop.f32.mrf.mxu3 }
 0x3ce   :  { %v3007_v43 = vld [vmem:[%s14842_s1 + $0x50] sm:$0xff] }
 0x3cf   :  { %v1749_v31 = vpop.f32.mrf.mxu1  ;;  %v1820_v13 = vpop.f32.mrf.mxu2  ;;  %3038 = vmatpush.msra.mxu3 %v3007_v43 }
 0x3d0   :  { %v1754_v46 = vadd.f32 %v1749_v31, %v1672_v59  ;;  %v3020_v59 = vld [vmem:[%s14842_s1 + $0xb8] sm:$0xff]  ;;  %v3006_v31 = vld [vmem:[%s14842_s1 + $0x48] sm:$0xff] }
 0x3d1   :  { %v1835_v29 = vpop.f32.mrf.mxu0  ;;  %3061 = vmatpush.msra.mxu1 %v3020_v59  ;;  %3039 = vmatpush.msra.mxu3 %v3006_v31 }
 0x3d2   :  { %v1838_v61 = vadd.f32 %v1833_v37, %v1754_v46  ;;  %v3005_v29 = vld [vmem:[%s14842_s1 + $0x40] sm:$0xff] }
 0x3d3   :  { %3040 = vmatpush.msra.mxu3 %v3005_v29 }
 0x3d5   :  { %v1736_v6 = vpop.f32.mrf.mxu3 }
 0x3d6   :  { %v1753_v33 = vadd.f32 %v1736_v6, %v1659_v35 }
 0x3d7   :  { %v1751_v16 = vpop.f32.mrf.mxu1  ;;  %v1822_v38 = vpop.f32.mrf.mxu2 }
 0x3d8   :  { %v1837_v36 = vadd.f32 %v1820_v13, %v1753_v33  ;;  %v3019_v13 = vld [vmem:[%s14842_s1 + $0xb0] sm:$0xff]  ;;  %v3004_v33 = vld [vmem:[%s14842_s1 + $0x38] sm:$0xff]  ;;  %v3017_v16 = vld [vmem:[%s14842_s1 + $0xa0] sm:$0xff] }
 0x3d9   :  { %v1997_v21 = vpop.f32.mrf.mxu0  ;;  %3062 = vmatpush.msra.mxu1 %v3019_v13  ;;  %3041 = vmatpush.msra.mxu3 %v3004_v33 }
 0x3dd   :  { %v1738_v54 = vpop.f32.mrf.mxu3 }
 0x3de   :  { %v3016_v54 = vld [vmem:[%s14842_s1 + $0x98] sm:$0xff] }
 0x3df   :  { %v1913_v27 = vpop.f32.mrf.mxu1  ;;  %v12946_v58 = vpop.f32.mrf.mxu2 }
 0x3e0   :  { %v1918_v9 = vadd.f32 %v1913_v27, %v1838_v61  ;;  %v3018_v61 = vld [vmem:[%s14842_s1 + $0xa8] sm:$0xff] }
 0x3e1   :  { %v1999_v18 = vpop.f32.mrf.mxu0  ;;  %3063 = vmatpush.msra.mxu1 %v3018_v61  ;;  %v3002_v27 = vld [vmem:[%s14842_s1 + $0x28] sm:$0xff] }
 0x3e2   :  { %v2002_v23 = vadd.f32 %v1997_v21, %v1918_v9  ;;  %v3003_v21 = vld [vmem:[%s14842_s1 + $0x30] sm:$0xff] }
 0x3e3   :  { %3064 = vmatpush.msra.mxu1 %v3017_v16  ;;  %3042 = vmatpush.msra.mxu3 %v3003_v21  ;;  %v3015_v9 = vld [vmem:[%s14842_s1 + $0x90] sm:$0xff]  ;;  %v11107_v16 = vmov 0.0  }
 0x3e4   :  { %7092 = vst.msk [vmem:[#allocation5] sm:$0xf] %vm3076_vm6, %v11107_v16 }
 0x3e5   :  { %v1900_v14 = vpop.f32.mrf.mxu3  ;;  %3065 = vmatpush.msra.mxu1 %v3016_v54  ;;  %3043 = vmatpush.msra.mxu3 %v3002_v27  ;;  %7103 = vst.msk [vmem:[#allocation5 + $0x50] sm:$0xf] %vm3076_vm6, %v11107_v16 }
 0x3e6   :  { %v12948_v7 = vadd.f32 %v1900_v14, %v1837_v36  ;;  %v3014_v36 = vld [vmem:[%s14842_s1 + $0x88] sm:$0xff]  ;;  %7104 = vst.msk [vmem:[#allocation6] sm:$0xf] %vm3076_vm6, %v11107_v16 }
 0x3e7   :  { %v1915_v53 = vpop.f32.mrf.mxu1  ;;  %v1986_v15 = vpop.f32.mrf.mxu2  ;;  %3066 = vmatpush.msra.mxu1 %v3015_v9  ;;  %7115 = vst.msk [vmem:[#allocation6 + $0x50] sm:$0xf] %vm3076_vm6, %v11107_v16 }
 0x3e8   :  { %v2001_v14 = vadd.f32 %v12946_v58, %v12948_v7  ;;  %v2999_v7 = vld [vmem:[%s14842_s1 + $0x10] sm:$0xff]  ;;  %3154 = vst.msk [vmem:[#allocation2] sm:$0xf] %vm3153_vm7, %v11107_v16 }
 0x3e9   :  { %v2161_v55 = vpop.f32.mrf.mxu0  ;;  %3067 = vmatpush.msra.mxu1 %v3014_v36  ;;  %3155 = vst.msk [vmem:[#allocation2 + $0x4c] sm:$0xf] %vm3153_vm7, %v11107_v16 }
 0x3ea   :  { %6442 = vst.msk [vmem:[#allocation4] sm:$0xf] %vm6439_vm8, %v11107_v16 }
 0x3eb   :  { %6441 = vst.msk [vmem:[#allocation3 + $0x4c] sm:$0xf] %vm6439_vm8, %v11107_v16  ;;  %v10423_v16 = vld [vmem:[%s14808_s22 + $0x50] sm:$0xff] }
 0x3ed   :  { %v1902_v8 = vpop.f32.mrf.mxu3 }
 0x3ee   :  { %v3013_v8 = vld [vmem:[%s14842_s1 + $0x80] sm:$0xff] }
 0x3ef   :  { %v2077_v32 = vpop.f32.mrf.mxu1  ;;  %v12950_v40 = vpop.f32.mrf.mxu2  ;;  %3068 = vmatpush.msra.mxu1 %v3013_v8  ;;  %v3094_v8 = vld [vmem:[%s14799_s13] sm:$0xff] }
 0x3f0   :  { %v2082_v28 = vadd.f32 %v2077_v32, %v2002_v23  ;;  %v3001_v23 = vld [vmem:[%s14842_s1 + $0x20] sm:$0xff] }
 0x3f1   :  { %v2163_v45 = vpop.f32.mrf.mxu0  ;;  %3044 = vmatpush.msra.mxu3 %v3001_v23 }
 0x3f2   :  { %v12952_v17 = vadd.f32 %v2161_v55, %v2082_v28  ;;  %v3000_v55 = vld [vmem:[%s14842_s1 + $0x18] sm:$0xff]  ;;  %v2998_v45 = vld [vmem:[%s14842_s1 + $0x8] sm:$0xff] }
 0x3f3   :  { %3045 = vmatpush.msra.mxu3 %v3000_v55  ;;  %v3097_v55 = vld [vmem:[%s14799_s13 + $0x18] sm:$0xff] }
 0x3f5   :  { %v12954_v48 = vpop.f32.mrf.mxu3  ;;  %3046 = vmatpush.msra.mxu3 %v2999_v7  ;;  %v10750_v7 = vld [vmem:[%s14801_s15 + $0xb8] sm:$0xff] }
 0x3f6   :  { %v2081_v32 = vadd.f32 %v12954_v48, %v2001_v14 }
 0x3f7   :  { %v2079_v63 = vpop.f32.mrf.mxu1  ;;  %v2150_v22 = vpop.f32.mrf.mxu2  ;;  %3047 = vmatpush.msra.mxu3 %v2998_v45  ;;  %v10758_v45 = vld [vmem:[%s14801_s15 + $0xf8] sm:$0xff] }
 0x3f8   :  { %v2165_v63 = vadd.f32 %v12950_v40, %v2081_v32  ;;  %v3095_v32 = vld [vmem:[%s14799_s13 + $0x8] sm:$0xff]  ;;  %3466 = vmatpush.bf16.msrb.mxu1 %v10758_v45  ;;  %v10783_v45 = vld [vmem:[%s14801_s15 + $0x1c0] sm:$0xff] }
 0x3f9   :  { %v12956_v1 = vpop.f32.mrf.mxu0 }
 0x3fd   :  { %v2066_v20 = vpop.f32.mrf.mxu3 }
 0x3ff   :  { %v12958_v60 = vpop.f32.mrf.mxu1  ;;  %v12960_v25 = vpop.f32.mrf.mxu2 }
 0x400   :  { %v2246_v28 = vadd.f32 %v12958_v60, %v12952_v17  ;;  %v2997_v17 = vld [vmem:[%s14842_s1] sm:$0xff] }
 0x401   :  { %v2327_v5 = vpop.f32.mrf.mxu0  ;;  %3048 = vmatpush.msra.mxu3 %v2997_v17  ;;  %v10757_v17 = vld [vmem:[%s14801_s15 + $0xf0] sm:$0xff] }
 0x402   :  { %v2330_v22 = vadd.f32 %v12956_v1, %v2246_v28  ;;  %v3083_v5 = vld [vmem:[%s14843_s0] sm:$0xf]  ;;  %v10734_v28 = vld [vmem:[%s14801_s15 + $0x38] sm:$0xff]  ;;  %3467 = vmatpush.bf16.msrb.mxu1 %v10757_v17 }
 0x403   :  { %3085 = vrot.lane.b32.xlu0 %v3083_v5, %s11106_s10  ;;  %3141 = vmatpush.msrb.mxu3 %v3097_v55  ;;  %v10748_v5 = vld [vmem:[%s14801_s15 + $0xa8] sm:$0xff] }
 0x404   :  { %v10768_v55 = vld [vmem:[%s14801_s15 + $0x148] sm:$0xff] }
 0x405   :  { %v12962_v3 = vpop.f32.mrf.mxu3  ;;  %3142 = vmatpush.msrb.mxu3 %v3095_v32  ;;  %v10784_v32 = vld [vmem:[%s14801_s15 + $0x1c8] sm:$0xff] }
 0x406   :  { %v2245_v20 = vadd.f32 %v12962_v3, %v2165_v63  ;;  %v10733_v63 = vld [vmem:[%s14801_s15 + $0x30] sm:$0xff] }
 0x407   :  { %v2243_v57 = vpop.f32.mrf.mxu1  ;;  %v2314_v62 = vpop.f32.mrf.mxu2 }
 0x408   :  { %v2329_v1 = vadd.f32 %v12960_v25, %v2245_v20  ;;  %v2987_v25 = vld [vmem:[%s14844_s29] sm:$0x3]  ;;  %v10732_v20 = vld [vmem:[%s14801_s15 + $0x28] sm:$0xff] }
 0x409   :  { %v12964_v10 = vpop.f32.mrf.mxu0  ;;  %v2989_v13 = vperm.slane %v2987_v25, 0 }
 0x40d   :  { %v2230_v41 = vpop.f32.mrf.mxu3 }
 0x40f   :  { %v12975_v50 = vpop.f32.mrf.mxu1  ;;  %v12977_v24 = vpop.f32.mrf.mxu2 }
 0x410   :  { %v2410_v60 = vadd.f32 %v12975_v50, %v2330_v22  ;;  %v10741_v22 = vld [vmem:[%s14801_s15 + $0x70] sm:$0xff] }
 0x411   :  { %v2491_v12 = vpop.f32.mrf.mxu0 }
 0x412   :  { %v2494_v34 = vadd.f32 %v12964_v10, %v2410_v60  ;;  %v10740_v60 = vld [vmem:[%s14801_s15 + $0x68] sm:$0xff] }
 0x415   :  { %v12997_v52 = vpop.f32.mrf.mxu3 }
 0x416   :  { %v2409_v4 = vadd.f32 %v12997_v52, %v2329_v1  ;;  %v10747_v1 = vld [vmem:[%s14801_s15 + $0xa0] sm:$0xff] }
 0x417   :  { %v2407_v44 = vpop.f32.mrf.mxu1  ;;  %v2478_v26 = vpop.f32.mrf.mxu2 }
 0x418   :  { %v2493_v51 = vadd.f32 %v12977_v24, %v2409_v4  ;;  %v2990_v26 = vperm.slane %v2987_v25, 1  ;;  %v10730_v4 = vld [vmem:[%s14801_s15 + $0x18] sm:$0xff]  ;;  %v10752_v25 = vld [vmem:[%s14801_s15 + $0xc8] sm:$0xff] }
 0x419   :  { %v13011_v37 = vpop.f32.mrf.mxu0 }
 0x41d   :  { %v2394_v46 = vpop.f32.mrf.mxu3 }
 0x41f   :  { %v2569_v35 = vpop.f32.mrf.mxu1  ;;  %v2640_v6 = vpop.f32.mrf.mxu2 }
 0x420   :  { %v2574_v41 = vadd.f32 %v2569_v35, %v2494_v34  ;;  %v10755_v34 = vld [vmem:[%s14801_s15 + $0xe0] sm:$0xff] }
 0x421   :  { %v2655_v38 = vpop.f32.mrf.mxu0 }
 0x422   :  { %v2658_v19 = vadd.f32 %v13011_v37, %v2574_v41  ;;  %v11027_v38 = vld [vmem:[%s14845_s4] ss:$0 sm:$0xff]  ;;  %v10738_v41 = vld [vmem:[%s14801_s15 + $0x58] sm:$0xff] }
 0x425   :  { %v2556_v18 = vpop.f32.mrf.mxu3 }
 0x426   :  { %v2573_v56 = vadd.f32 %v2556_v18, %v2493_v51  ;;  %v10737_v51 = vld [vmem:[%s14801_s15 + $0x50] sm:$0xff] }
 0x427   :  { %v2571_v53 = vpop.f32.mrf.mxu1  ;;  %v2642_v15 = vpop.f32.mrf.mxu2 }
 0x428   :  { %v2657_v11 = vadd.f32 %v2640_v6, %v2573_v56  ;;  %v3096_v15 = vld [vmem:[%s14799_s13 + $0x10] sm:$0xff]  ;;  %v10728_v56 = vld [vmem:[%s14801_s15 + $0x8] sm:$0xff] }
 0x429   :  { %v2817_v58 = vpop.f32.mrf.mxu0  ;;  %3121 = vmatpush.msrb.mxu2 %v3096_v15  ;;  %v10760_v15 = vld [vmem:[%s14801_s15 + $0x108] sm:$0xff] }
 0x42b   :  { %3122 = vmatpush.msrb.mxu2 %v3094_v8  ;;  %v10776_v8 = vld [vmem:[%s14801_s15 + $0x188] sm:$0xff] }
 0x42d   :  { %v2558_v48 = vpop.f32.mrf.mxu3  ;;  %3286 = vmatpush.bf16.msra.mxu2 %v10734_v28  ;;  %v10759_v28 = vld [vmem:[%s14801_s15 + $0x100] sm:$0xff] }
 0x42e   :  { %v10749_v48 = vld [vmem:[%s14801_s15 + $0xb0] sm:$0xff] }
 0x42f   :  { %v2733_v57 = vpop.f32.mrf.mxu1  ;;  %v2804_v62 = vpop.f32.mrf.mxu2 }
 0x430   :  { %v2738_v0 = vadd.f32 %v2733_v57, %v2658_v19  ;;  %v10756_v57 = vld [vmem:[%s14801_s15 + $0xe8] sm:$0xff]  ;;  %v10745_v19 = vld [vmem:[%s14801_s15 + $0x90] sm:$0xff] }
 0x431   :  { %v2819_v40 = vpop.f32.mrf.mxu0  ;;  %3287 = vmatpush.bf16.msra.mxu2 %v10733_v63  ;;  %3468 = vmatpush.bf16.msrb.mxu1 %v10756_v57  ;;  %v3098_v63 = vld [vmem:[%s14800_s14] sm:$0x3]  ;;  %s7709_s14 = sshll.u32 %s14813_s27, 4  ;;  %s7710_s14 = int_to_ptr.hbm [resolvable:$true] %s7709_s14 }
 0x432   :  { %v2822_v10 = vadd.f32 %v2817_v58, %v2738_v0  ;;  %v10742_v58 = vld [vmem:[%s14801_s15 + $0x78] sm:$0xff]  ;;  %v10739_v40 = vld [vmem:[%s14801_s15 + $0x60] sm:$0xff]  ;;  %v10736_v0 = vld [vmem:[%s14801_s15 + $0x48] sm:$0xff] }
 0x433   :  { %3299 = vmatpush.bf16.msra.mxu0 %v10742_v58  ;;  %v10767_v58 = vld [vmem:[%s14801_s15 + $0x140] sm:$0xff] }
 0x435   :  { %v2720_v3 = vpop.f32.mrf.mxu3  ;;  %3288 = vmatpush.bf16.msra.mxu2 %v10732_v20  ;;  %3469 = vmatpush.bf16.msrb.mxu1 %v10755_v34  ;;  %v10798_v34 = vld [vmem:[%s14801_s15 + $0x238] sm:$0xff] }
 0x436   :  { %v2737_v47 = vadd.f32 %v2720_v3, %v2657_v11  ;;  %v10746_v3 = vld [vmem:[%s14801_s15 + $0x98] sm:$0xff]  ;;  %v10727_v11 = vld [vmem:[%s14801_s15] sm:$0xff] }
 0x437   :  { %v2735_v42 = vpop.f32.mrf.mxu1  ;;  %v2806_v50 = vpop.f32.mrf.mxu2  ;;  %3300 = vmatpush.bf16.msra.mxu0 %v10741_v22  ;;  %v3100_v22 = vperm.slane %v3098_v63, 0 }
 0x438   :  { %v2821_v43 = vadd.f32 %v2804_v62, %v2737_v47  ;;  %v10731_v62 = vld [vmem:[%s14801_s15 + $0x20] sm:$0xff]  ;;  %v10754_v42 = vld [vmem:[%s14801_s15 + $0xd8] sm:$0xff]  ;;  %v10729_v50 = vld [vmem:[%s14801_s15 + $0x10] sm:$0xff] }
 0x439   :  { %v2981_v12 = vpop.f32.mrf.mxu0  ;;  %3289 = vmatpush.bf16.msra.mxu2 %v10731_v62  ;;  %3470 = vmatpush.bf16.msrb.mxu1 %v10754_v42  ;;  %v10751_v47 = vld [vmem:[%s14801_s15 + $0xc0] sm:$0xff]  ;;  %v10797_v42 = vld [vmem:[%s14801_s15 + $0x230] sm:$0xff] }
 0x43b   :  { %3301 = vmatpush.bf16.msra.mxu0 %v10740_v60 }
 0x43d   :  { %v2722_v49 = vpop.f32.mrf.mxu3  ;;  %3290 = vmatpush.bf16.msra.mxu2 %v10730_v4  ;;  %v10806_v4 = vld [vmem:[%s14801_s15 + $0x278] sm:$0xff] }
 0x43e   :  { %v10744_v49 = vld [vmem:[%s14801_s15 + $0x88] sm:$0xff] }
 0x43f   :  { %v2897_v39 = vpop.f32.mrf.mxu1  ;;  %v2968_v52 = vpop.f32.mrf.mxu2  ;;  %3302 = vmatpush.bf16.msra.mxu0 %v10739_v40 }
 0x440   :  { %v2902_v44 = vadd.f32 %v2897_v39, %v2822_v10  ;;  %v10735_v10 = vld [vmem:[%s14801_s15 + $0x40] sm:$0xff] }
 0x441   :  { %v2983_v30 = vpop.f32.mrf.mxu0  ;;  %3291 = vmatpush.bf16.msra.mxu2 %v10729_v50  ;;  %v10805_v50 = vld [vmem:[%s14801_s15 + $0x270] sm:$0xff] }
 0x442   :  { %v2986_v2 = vadd.f32 %v2981_v12, %v2902_v44  ;;  %v10753_v12 = vld [vmem:[%s14801_s15 + $0xd0] sm:$0xff]  ;;  %v10774_v30 = vld [vmem:[%s14801_s15 + $0x178] sm:$0xff] }
 0x443   :  { %3303 = vmatpush.bf16.msra.mxu0 %v10738_v41  ;;  %3471 = vmatpush.bf16.msrb.mxu1 %v10753_v12  ;;  %v10814_v41 = vld [vmem:[%s14801_s15 + $0x2b8] sm:$0xff]  ;;  %v10796_v12 = vld [vmem:[%s14801_s15 + $0x228] sm:$0xff] }
 0x444   :  { %v2994_v24 = vadd.f32 %v2990_v26, %v2986_v2  ;;  %v10766_v26 = vld [vmem:[%s14801_s15 + $0x138] sm:$0xff] }
 0x445   :  { %v2884_v37 = vpop.f32.mrf.mxu3  ;;  %3292 = vmatpush.bf16.msra.mxu2 %v10728_v56  ;;  %v10804_v56 = vld [vmem:[%s14801_s15 + $0x268] sm:$0xff] }
 0x446   :  { %v2996_v59 = vmax.f32 %v2994_v24, 0.0  ;;  %v2901_v31 = vadd.f32 %v2884_v37, %v2821_v43  ;;  %v10782_v24 = vld [vmem:[%s14801_s15 + $0x1b8] sm:$0xff]  ;;  %v10765_v37 = vld [vmem:[%s14801_s15 + $0x130] sm:$0xff] }
 0x447   :  { %v2899_v46 = vpop.f32.mrf.mxu1  ;;  %v2970_v29 = vpop.f32.mrf.mxu2  ;;  %3304 = vmatpush.bf16.msra.mxu0 %v10737_v51  ;;  %3472 = vmatpush.bf16.msrb.mxu1 %v10752_v25  ;;  %v10790_v43 = vld [vmem:[%s14801_s15 + $0x1f8] sm:$0xff]  ;;  %v10813_v51 = vld [vmem:[%s14801_s15 + $0x2b0] sm:$0xff]  ;;  %v10795_v25 = vld [vmem:[%s14801_s15 + $0x220] sm:$0xff] }
 0x448   :  { %v2985_v61 = vadd.f32 %v2968_v52, %v2901_v31  ;;  %3069 = vmatmul.f32.vlgmr.msra.gmra.mxu1 %v2996_v59  ;;  %v10743_v52 = vld [vmem:[%s14801_s15 + $0x80] sm:$0xff]  ;;  %v10773_v59 = vld [vmem:[%s14801_s15 + $0x170] sm:$0xff]  ;;  %v10764_v46 = vld [vmem:[%s14801_s15 + $0x128] sm:$0xff] }
 0x449   :  { %3293 = vmatpush.bf16.msra.mxu2 %v10727_v11  ;;  %v10781_v31 = vld [vmem:[%s14801_s15 + $0x1b0] sm:$0xff]  ;;  %v10772_v29 = vld [vmem:[%s14801_s15 + $0x168] sm:$0xff]  ;;  %v10803_v11 = vld [vmem:[%s14801_s15 + $0x260] sm:$0xff] }
 0x44a   :  { %v2993_v35 = vadd.f32 %v2989_v13, %v2985_v61  ;;  %v10789_v13 = vld [vmem:[%s14801_s15 + $0x1f0] sm:$0xff]  ;;  %v10780_v61 = vld [vmem:[%s14801_s15 + $0x1a8] sm:$0xff] }
 0x44b   :  { %3305 = vmatpush.bf16.msra.mxu0 %v10736_v0  ;;  %3473 = vmatpush.bf16.msrb.mxu1 %v10751_v47  ;;  %v10812_v0 = vld [vmem:[%s14801_s15 + $0x2a8] sm:$0xff]  ;;  %v10802_v47 = vld [vmem:[%s14801_s15 + $0x258] sm:$0xff] }
 0x44c   :  { %v2995_v6 = vmax.f32 %v2993_v35, 0.0  ;;  %v10788_v35 = vld [vmem:[%s14801_s15 + $0x1e8] sm:$0xff] }
 0x44d   :  { %v2886_v33 = vpop.f32.mrf.mxu3 }
 0x44e   :  { %3049 = vmatmul.f32.vlgmr.msra.gmra.mxu3 %v2995_v6  ;;  %v10763_v6 = vld [vmem:[%s14801_s15 + $0x120] sm:$0xff] }
 0x44f   :  { %3453 = vmatpush.bf16.msra.mxu3 %v10750_v7  ;;  %3306 = vmatpush.bf16.msra.mxu0 %v10735_v10  ;;  %v10771_v33 = vld [vmem:[%s14801_s15 + $0x160] sm:$0xff] }
 0x450   :  { %3788 = vmatpush.bf16.msra.mxu1 %v10790_v43  ;;  %v10775_v7 = vld [vmem:[%s14801_s15 + $0x180] sm:$0xff]  ;;  %v10817_v43 = vld [vmem:[%s14801_s15 + $0x2d0] sm:$0xff] }
 0x451   :  { %v10811_v10 = vld [vmem:[%s14801_s15 + $0x2a0] sm:$0xff] }
 0x453   :  { %3454 = vmatpush.bf16.msra.mxu3 %v10749_v48  ;;  %3627 = vmatpush.bf16.msrb.mxu0 %v10774_v30  ;;  %v3101_v48 = vperm.slane %v3098_v63, 1  ;;  %v10793_v30 = vld [vmem:[%s14801_s15 + $0x210] sm:$0xff] }
 0x454   :  { %3789 = vmatpush.bf16.msra.mxu1 %v10789_v13  ;;  %v10816_v13 = vld [vmem:[%s14801_s15 + $0x2c8] sm:$0xff]  ;;  %v10825_v63 = vld [vmem:[%s14801_s15 + $0x310] sm:$0xff] }
 0x457   :  { %3455 = vmatpush.bf16.msra.mxu3 %v10748_v5  ;;  %3628 = vmatpush.bf16.msrb.mxu0 %v10773_v59  ;;  %v10800_v59 = vld [vmem:[%s14801_s15 + $0x248] sm:$0xff] }
 0x458   :  { %3790 = vmatpush.bf16.msra.mxu1 %v10788_v35  ;;  %v10815_v35 = vld [vmem:[%s14801_s15 + $0x2c0] sm:$0xff] }
 0x45b   :  { %3456 = vmatpush.bf16.msra.mxu3 %v10747_v1  ;;  %3629 = vmatpush.bf16.msrb.mxu0 %v10772_v29  ;;  %v10799_v29 = vld [vmem:[%s14801_s15 + $0x240] sm:$0xff] }
 0x45f   :  { %3457 = vmatpush.bf16.msra.mxu3 %v10746_v3  ;;  %3630 = vmatpush.bf16.msrb.mxu0 %v10771_v33  ;;  %v10822_v3 = vld [vmem:[%s14801_s15 + $0x2f8] sm:$0xff] }
 0x460   :  { %v10838_v33 = vld [vmem:[%s14801_s15 + $0x378] sm:$0xff] }
 0x463   :  { %3458 = vmatpush.bf16.msra.mxu3 %v10745_v19  ;;  %v10821_v19 = vld [vmem:[%s14801_s15 + $0x2f0] sm:$0xff] }
 0x467   :  { %3459 = vmatpush.bf16.msra.mxu3 %v10744_v49  ;;  %v10820_v49 = vld [vmem:[%s14801_s15 + $0x2e8] sm:$0xff] }
 0x46b   :  { %3460 = vmatpush.bf16.msra.mxu3 %v10743_v52  ;;  %v10794_v52 = vld [vmem:[%s14801_s15 + $0x218] sm:$0xff] }
 0x475   :  { %v3086_v36 = vpop.permute.xlu0 %3085 }
 0x4c5   :  { %v3070_v27 = vpop.f32.mrf.mxu1 }
 0x4d1   :  { %v3050_v21 = vpop.f32.mrf.mxu3 }
 0x4d2   :  { %v3051_v54 = vadd.f32 %v11027_v38, %v3050_v21  ;;  %v10779_v38 = vld [vmem:[%s14801_s15 + $0x1a0] sm:$0xff] }
 0x4d3   :  { %v10787_v21 = vld [vmem:[%s14801_s15 + $0x1e0] sm:$0xff] }
 0x4d4   :  { %v13101_v9 = vadd.f32 %v3070_v27, %v3051_v54  ;;  %v10762_v54 = vld [vmem:[%s14801_s15 + $0x118] sm:$0xff]  ;;  %3791 = vmatpush.bf16.msra.mxu1 %v10787_v21 }
 0x4d5   :  { %v10770_v27 = vld [vmem:[%s14801_s15 + $0x158] sm:$0xff] }
 0x4d6   :  { %v3073_v18 = vmul.f32 0.5, %v13101_v9  ;;  %3077 = vst.msk [vmem:[#allocation7] sm:$0xf] %vm3076_vm6, %v13101_v9  ;;  %3631 = vmatpush.bf16.msrb.mxu0 %v10770_v27  ;;  %v10854_v21 = vld [vmem:[%s14801_s15 + $0x3f8] sm:$0xff]  ;;  %v10837_v27 = vld [vmem:[%s14801_s15 + $0x370] sm:$0xff] }
 0x4d8   :  { %v3074_v23 = vmul.f32 1.442695, %v3073_v18  ;;  %v10786_v18 = vld [vmem:[%s14801_s15 + $0x1d8] sm:$0xff] }
 0x4d9   :  { %3792 = vmatpush.bf16.msra.mxu1 %v10786_v18  ;;  %v10853_v18 = vld [vmem:[%s14801_s15 + $0x3f0] sm:$0xff] }
 0x4da   :  { %11052 = vpow2.f32 %v3074_v23  ;;  %v10761_v23 = vld [vmem:[%s14801_s15 + $0x110] sm:$0xff] }
 0x4e0   :  { %v11053_v14 = vpop.eup %11052 }
 0x4e1   :  { %v3088_v53 = vmul.f32 %v11053_v14, %v3086_v36  ;;  %3079 = vrot.lane.b32.xlu1 %v11053_v14, %s11108_s8  ;;  %v10769_v36 = vld [vmem:[%s14801_s15 + $0x150] sm:$0xff] }
 0x4e2   :  { %v10777_v14 = vld [vmem:[%s14801_s15 + $0x190] sm:$0xff]  ;;  %3632 = vmatpush.bf16.msrb.mxu0 %v10769_v36  ;;  %v10836_v36 = vld [vmem:[%s14801_s15 + $0x368] sm:$0xff] }
 0x4e3   :  { %3090 = vrot.lane.b32.xlu0 %v3088_v53, %s11108_s8  ;;  %v10785_v53 = vld [vmem:[%s14801_s15 + $0x1d0] sm:$0xff] }
 0x4e4   :  { %3793 = vmatpush.bf16.msra.mxu1 %v10785_v53  ;;  %v10852_v53 = vld [vmem:[%s14801_s15 + $0x3e8] sm:$0xff] }
 0x4e6   :  { %3633 = vmatpush.bf16.msrb.mxu0 %v10768_v55  ;;  %v10835_v55 = vld [vmem:[%s14801_s15 + $0x360] sm:$0xff] }
 0x4e8   :  { %3794 = vmatpush.bf16.msra.mxu1 %v10784_v32  ;;  %v10851_v32 = vld [vmem:[%s14801_s15 + $0x3e0] sm:$0xff] }
 0x4ea   :  { %3634 = vmatpush.bf16.msrb.mxu0 %v10767_v58  ;;  %v10834_v58 = vld [vmem:[%s14801_s15 + $0x358] sm:$0xff] }
 0x4ec   :  { %3795 = vmatpush.bf16.msra.mxu1 %v10783_v45  ;;  %v10850_v45 = vld [vmem:[%s14801_s15 + $0x3d8] sm:$0xff] }
 0x553   :  { %v3080_v39 = vpop.permute.xlu1 %3079 }
 0x554   :  { %3082 = vst.msk [vmem:[#allocation9] sm:$0xf] %vm3076_vm6, %v3080_v39  ;;  %v10819_v39 = vld [vmem:[%s14801_s15 + $0x2e0] sm:$0xff] }
 0x555   :  { %v3091_v44 = vpop.permute.xlu0 %3090 }
 0x556   :  { %v3093_v2 = vadd.f32 %v3091_v44, %v13101_v9  ;;  %v10778_v9 = vld [vmem:[%s14801_s15 + $0x198] sm:$0xff] }
 0x557   :  { %v10810_v44 = vld [vmem:[%s14801_s15 + $0x298] sm:$0xff] }
 0x558   :  { %8659 = vmatmul.msk.f32.vlgmr.msrb.gmra.mxu2 %vm439_vm2, %v3093_v2  ;;  %8660 = vmatmul.msk.f32.vlgmr.msrb.gmra.mxu3 %vm439_vm2, %v3093_v2  ;;  %v10801_v2 = vld [vmem:[%s14801_s15 + $0x250] sm:$0xff] }
 0x559   :  { %3614 = vmatpush.bf16.msrb.mxu2 %v10766_v26  ;;  %3775 = vmatpush.bf16.msrb.mxu3 %v10782_v24  ;;  %v10818_v26 = vld [vmem:[%s14801_s15 + $0x2d8] sm:$0xff]  ;;  %v10809_v24 = vld [vmem:[%s14801_s15 + $0x290] sm:$0xff] }
 0x55d   :  { %3615 = vmatpush.bf16.msrb.mxu2 %v10765_v37  ;;  %3776 = vmatpush.bf16.msrb.mxu3 %v10781_v31  ;;  %v10792_v37 = vld [vmem:[%s14801_s15 + $0x208] sm:$0xff] }
 0x55e   :  { %v10808_v31 = vld [vmem:[%s14801_s15 + $0x288] sm:$0xff] }
 0x561   :  { %3616 = vmatpush.bf16.msrb.mxu2 %v10764_v46  ;;  %3777 = vmatpush.bf16.msrb.mxu3 %v10780_v61  ;;  %v10791_v46 = vld [vmem:[%s14801_s15 + $0x200] sm:$0xff] }
 0x562   :  { %v10807_v61 = vld [vmem:[%s14801_s15 + $0x280] sm:$0xff] }
 0x565   :  { %3617 = vmatpush.bf16.msrb.mxu2 %v10763_v6  ;;  %3778 = vmatpush.bf16.msrb.mxu3 %v10779_v38  ;;  %v10830_v6 = vld [vmem:[%s14801_s15 + $0x338] sm:$0xff] }
 0x566   :  { %v10846_v38 = vld [vmem:[%s14801_s15 + $0x3b8] sm:$0xff] }
 0x569   :  { %3618 = vmatpush.bf16.msrb.mxu2 %v10762_v54  ;;  %3779 = vmatpush.bf16.msrb.mxu3 %v10778_v9  ;;  %v10829_v54 = vld [vmem:[%s14801_s15 + $0x330] sm:$0xff] }
 0x56a   :  { %v10845_v9 = vld [vmem:[%s14801_s15 + $0x3b0] sm:$0xff] }
 0x56d   :  { %3619 = vmatpush.bf16.msrb.mxu2 %v10761_v23  ;;  %3780 = vmatpush.bf16.msrb.mxu3 %v10777_v14  ;;  %v10828_v23 = vld [vmem:[%s14801_s15 + $0x328] sm:$0xff] }
 0x56e   :  { %v10844_v14 = vld [vmem:[%s14801_s15 + $0x3a8] sm:$0xff] }
 0x571   :  { %3620 = vmatpush.bf16.msrb.mxu2 %v10760_v15  ;;  %3781 = vmatpush.bf16.msrb.mxu3 %v10776_v8  ;;  %v10827_v15 = vld [vmem:[%s14801_s15 + $0x320] sm:$0xff] }
 0x572   :  { %v10843_v8 = vld [vmem:[%s14801_s15 + $0x3a0] sm:$0xff] }
 0x575   :  { %3621 = vmatpush.bf16.msrb.mxu2 %v10759_v28  ;;  %3782 = vmatpush.bf16.msrb.mxu3 %v10775_v7  ;;  %v10826_v28 = vld [vmem:[%s14801_s15 + $0x318] sm:$0xff] }
 0x576   :  { %v10842_v7 = vld [vmem:[%s14801_s15 + $0x398] sm:$0xff] }
 0x5db   :  { %v3124_v17 = vpop.f32.mrf.mxu2  ;;  %v3144_v20 = vpop.f32.mrf.mxu3 }
 0x5dc   :  { %v3125_v60 = vadd.f32 %v3124_v17, %v3100_v22  ;;  %v3145_v5 = vadd.f32 %v3144_v20, %v3101_v48  ;;  %v10833_v22 = vld [vmem:[%s14801_s15 + $0x350] sm:$0xff]  ;;  %v10824_v20 = vld [vmem:[%s14801_s15 + $0x308] sm:$0xff] }
 0x5dd   :  { %v10841_v48 = vld [vmem:[%s14801_s15 + $0x390] sm:$0xff] }
 0x5de   :  { %v3147_v57 = vmax.f32 %v3125_v60, 0.0  ;;  %v3148_v62 = vmax.f32 %v3145_v5, 0.0  ;;  %v10849_v17 = vld [vmem:[%s14801_s15 + $0x3d0] sm:$0xff]  ;;  %v10832_v60 = vld [vmem:[%s14801_s15 + $0x348] sm:$0xff] }
 0x5df   :  { %v10840_v5 = vld [vmem:[%s14801_s15 + $0x388] sm:$0xff] }
 0x5e0   :  { %v13317_v40 = vpack.c.bf16 %v3147_v57, %v3147_v57  ;;  %v13319_v1 = vpack.c.bf16 %v3148_v62, %v3148_v62  ;;  %v10848_v57 = vld [vmem:[%s14801_s15 + $0x3c8] sm:$0xff]  ;;  %v10823_v62 = vld [vmem:[%s14801_s15 + $0x300] sm:$0xff] }
 0x5e2   :  { %3294 = vmatmul.bf16.vlgmr.msra.gmra.mxu2 %v13317_v40  ;;  %3307 = vmatmul.bf16.vlgmr.msra.gmra.mxu0 %v13319_v1 }
 0x5e3   :  { %3461 = vmatmul.bf16.vlgmr.msra.gmra.mxu3 %v13317_v40  ;;  %3474 = vmatmul.bf16.vlgmr.msrb.gmra.mxu1 %v13319_v1 }
 0x5e4   :  { %3936 = vmatpush.bf16.msra.mxu2 %v10798_v34  ;;  %3949 = vmatpush.bf16.msra.mxu0 %v10806_v4  ;;  %v10831_v34 = vld [vmem:[%s14801_s15 + $0x340] sm:$0xff] }
 0x5e5   :  { %4097 = vmatpush.bf16.msra.mxu3 %v10814_v41  ;;  %4110 = vmatpush.bf16.msrb.mxu1 %v10822_v3  ;;  %v10839_v4 = vld [vmem:[%s14801_s15 + $0x380] sm:$0xff]  ;;  %v10862_v3 = vld [vmem:[%s14801_s15 + $0x438] sm:$0xff] }
 0x5e6   :  { %v10847_v41 = vld [vmem:[%s14801_s15 + $0x3c0] sm:$0xff] }
 0x5e8   :  { %3937 = vmatpush.bf16.msra.mxu2 %v10797_v42  ;;  %3950 = vmatpush.bf16.msra.mxu0 %v10805_v50  ;;  %v10870_v42 = vld [vmem:[%s14801_s15 + $0x478] sm:$0xff] }
 0x5e9   :  { %4098 = vmatpush.bf16.msra.mxu3 %v10813_v51  ;;  %4111 = vmatpush.bf16.msrb.mxu1 %v10821_v19  ;;  %v10878_v50 = vld [vmem:[%s14801_s15 + $0x4b8] sm:$0xff]  ;;  %v10861_v19 = vld [vmem:[%s14801_s15 + $0x430] sm:$0xff] }
 0x5ea   :  { %v10886_v51 = vld [vmem:[%s14801_s15 + $0x4f8] sm:$0xff] }
 0x5ec   :  { %3938 = vmatpush.bf16.msra.mxu2 %v10796_v12  ;;  %3951 = vmatpush.bf16.msra.mxu0 %v10804_v56  ;;  %v10869_v12 = vld [vmem:[%s14801_s15 + $0x470] sm:$0xff] }
 0x5ed   :  { %4099 = vmatpush.bf16.msra.mxu3 %v10812_v0  ;;  %4112 = vmatpush.bf16.msrb.mxu1 %v10820_v49  ;;  %v10877_v56 = vld [vmem:[%s14801_s15 + $0x4b0] sm:$0xff]  ;;  %v10860_v49 = vld [vmem:[%s14801_s15 + $0x428] sm:$0xff] }
 0x5ee   :  { %v10885_v0 = vld [vmem:[%s14801_s15 + $0x4f0] sm:$0xff] }
 0x5f0   :  { %3939 = vmatpush.bf16.msra.mxu2 %v10795_v25  ;;  %3952 = vmatpush.bf16.msra.mxu0 %v10803_v11  ;;  %v10868_v25 = vld [vmem:[%s14801_s15 + $0x468] sm:$0xff] }
 0x5f1   :  { %4100 = vmatpush.bf16.msra.mxu3 %v10811_v10  ;;  %4113 = vmatpush.bf16.msrb.mxu1 %v10819_v39  ;;  %v10876_v11 = vld [vmem:[%s14801_s15 + $0x4a8] sm:$0xff]  ;;  %v10859_v39 = vld [vmem:[%s14801_s15 + $0x420] sm:$0xff] }
 0x5f2   :  { %3622 = vmatmul.bf16.vlgmr.msrb.gmra.mxu2 %v13317_v40  ;;  %3635 = vmatmul.bf16.vlgmr.msrb.gmra.mxu0 %v13319_v1  ;;  %v10884_v10 = vld [vmem:[%s14801_s15 + $0x4e8] sm:$0xff] }
 0x5f3   :  { %3783 = vmatmul.bf16.vlgmr.msrb.gmra.mxu3 %v13317_v40  ;;  %3796 = vmatmul.bf16.vlgmr.msra.gmra.mxu1 %v13319_v1 }
 0x5f4   :  { %3940 = vmatpush.bf16.msra.mxu2 %v10794_v52  ;;  %3953 = vmatpush.bf16.msra.mxu0 %v10802_v47  ;;  %v10867_v52 = vld [vmem:[%s14801_s15 + $0x460] sm:$0xff] }
 0x5f5   :  { %4101 = vmatpush.bf16.msra.mxu3 %v10810_v44  ;;  %4114 = vmatpush.bf16.msrb.mxu1 %v10818_v26  ;;  %v10875_v47 = vld [vmem:[%s14801_s15 + $0x4a0] sm:$0xff]  ;;  %v10858_v26 = vld [vmem:[%s14801_s15 + $0x418] sm:$0xff] }
 0x5f6   :  { %v10883_v44 = vld [vmem:[%s14801_s15 + $0x4e0] sm:$0xff] }
 0x5f8   :  { %3941 = vmatpush.bf16.msra.mxu2 %v10793_v30  ;;  %3954 = vmatpush.bf16.msra.mxu0 %v10801_v2  ;;  %v10866_v30 = vld [vmem:[%s14801_s15 + $0x458] sm:$0xff] }
 0x5f9   :  { %4102 = vmatpush.bf16.msra.mxu3 %v10809_v24  ;;  %4115 = vmatpush.bf16.msrb.mxu1 %v10817_v43  ;;  %v10874_v2 = vld [vmem:[%s14801_s15 + $0x498] sm:$0xff]  ;;  %v10857_v43 = vld [vmem:[%s14801_s15 + $0x410] sm:$0xff] }
 0x5fa   :  { %v10882_v24 = vld [vmem:[%s14801_s15 + $0x4d8] sm:$0xff] }
 0x5fc   :  { %3942 = vmatpush.bf16.msra.mxu2 %v10792_v37  ;;  %3955 = vmatpush.bf16.msra.mxu0 %v10800_v59  ;;  %v10865_v37 = vld [vmem:[%s14801_s15 + $0x450] sm:$0xff] }
 0x5fd   :  { %4103 = vmatpush.bf16.msra.mxu3 %v10808_v31  ;;  %4116 = vmatpush.bf16.msrb.mxu1 %v10816_v13  ;;  %v10873_v59 = vld [vmem:[%s14801_s15 + $0x490] sm:$0xff]  ;;  %v10856_v13 = vld [vmem:[%s14801_s15 + $0x408] sm:$0xff] }
 0x5fe   :  { %v10881_v31 = vld [vmem:[%s14801_s15 + $0x4d0] sm:$0xff] }
 0x600   :  { %3943 = vmatpush.bf16.msra.mxu2 %v10791_v46  ;;  %3956 = vmatpush.bf16.msra.mxu0 %v10799_v29  ;;  %v10864_v46 = vld [vmem:[%s14801_s15 + $0x448] sm:$0xff] }
 0x601   :  { %4104 = vmatpush.bf16.msra.mxu3 %v10807_v61  ;;  %4117 = vmatpush.bf16.msrb.mxu1 %v10815_v35  ;;  %v10872_v29 = vld [vmem:[%s14801_s15 + $0x488] sm:$0xff]  ;;  %v10855_v35 = vld [vmem:[%s14801_s15 + $0x400] sm:$0xff] }
 0x602   :  { %v10880_v61 = vld [vmem:[%s14801_s15 + $0x4c8] sm:$0xff] }
 0x603   :  { %3944 = vmatmul.bf16.vlgmr.msra.gmra.mxu2 %v13317_v40  ;;  %3957 = vmatmul.bf16.vlgmr.msra.gmra.mxu0 %v13319_v1 }
 0x604   :  { %4258 = vmatpush.bf16.msrb.mxu2 %v10830_v6  ;;  %4271 = vmatpush.bf16.msrb.mxu0 %v10838_v33  ;;  %v10863_v6 = vld [vmem:[%s14801_s15 + $0x440] sm:$0xff] }
 0x605   :  { %4419 = vmatpush.bf16.msrb.mxu3 %v10846_v38  ;;  %4432 = vmatpush.bf16.msra.mxu1 %v10854_v21  ;;  %v10871_v33 = vld [vmem:[%s14801_s15 + $0x480] sm:$0xff]  ;;  %v10894_v21 = vld [vmem:[%s14801_s15 + $0x538] sm:$0xff] }
 0x606   :  { %4105 = vmatmul.bf16.vlgmr.msra.gmra.mxu3 %v13317_v40  ;;  %4118 = vmatmul.bf16.vlgmr.msrb.gmra.mxu1 %v13319_v1  ;;  %v10879_v38 = vld [vmem:[%s14801_s15 + $0x4c0] sm:$0xff] }
 0x608   :  { %4259 = vmatpush.bf16.msrb.mxu2 %v10829_v54  ;;  %4272 = vmatpush.bf16.msrb.mxu0 %v10837_v27  ;;  %v10902_v54 = vld [vmem:[%s14801_s15 + $0x578] sm:$0xff] }
 0x609   :  { %4420 = vmatpush.bf16.msrb.mxu3 %v10845_v9  ;;  %4433 = vmatpush.bf16.msra.mxu1 %v10853_v18  ;;  %v10910_v27 = vld [vmem:[%s14801_s15 + $0x5b8] sm:$0xff]  ;;  %v10893_v18 = vld [vmem:[%s14801_s15 + $0x530] sm:$0xff] }
 0x60a   :  { %v10918_v9 = vld [vmem:[%s14801_s15 + $0x5f8] sm:$0xff] }
 0x60c   :  { %4260 = vmatpush.bf16.msrb.mxu2 %v10828_v23  ;;  %4273 = vmatpush.bf16.msrb.mxu0 %v10836_v36  ;;  %v10901_v23 = vld [vmem:[%s14801_s15 + $0x570] sm:$0xff] }
 0x60d   :  { %4421 = vmatpush.bf16.msrb.mxu3 %v10844_v14  ;;  %4434 = vmatpush.bf16.msra.mxu1 %v10852_v53  ;;  %v10909_v36 = vld [vmem:[%s14801_s15 + $0x5b0] sm:$0xff]  ;;  %v10892_v53 = vld [vmem:[%s14801_s15 + $0x528] sm:$0xff] }
 0x60e   :  { %v10917_v14 = vld [vmem:[%s14801_s15 + $0x5f0] sm:$0xff] }
 0x610   :  { %4261 = vmatpush.bf16.msrb.mxu2 %v10827_v15  ;;  %4274 = vmatpush.bf16.msrb.mxu0 %v10835_v55  ;;  %v10900_v15 = vld [vmem:[%s14801_s15 + $0x568] sm:$0xff] }
 0x611   :  { %4422 = vmatpush.bf16.msrb.mxu3 %v10843_v8  ;;  %4435 = vmatpush.bf16.msra.mxu1 %v10851_v32  ;;  %v10908_v55 = vld [vmem:[%s14801_s15 + $0x5a8] sm:$0xff]  ;;  %v10891_v32 = vld [vmem:[%s14801_s15 + $0x520] sm:$0xff] }
 0x612   :  { %v10916_v8 = vld [vmem:[%s14801_s15 + $0x5e8] sm:$0xff] }
 0x614   :  { %4262 = vmatpush.bf16.msrb.mxu2 %v10826_v28  ;;  %4275 = vmatpush.bf16.msrb.mxu0 %v10834_v58  ;;  %v10899_v28 = vld [vmem:[%s14801_s15 + $0x560] sm:$0xff] }
 0x615   :  { %4423 = vmatpush.bf16.msrb.mxu3 %v10842_v7  ;;  %4436 = vmatpush.bf16.msra.mxu1 %v10850_v45  ;;  %v10907_v58 = vld [vmem:[%s14801_s15 + $0x5a0] sm:$0xff]  ;;  %v10890_v45 = vld [vmem:[%s14801_s15 + $0x518] sm:$0xff] }
 0x616   :  { %v10915_v7 = vld [vmem:[%s14801_s15 + $0x5e0] sm:$0xff] }
 0x618   :  { %4263 = vmatpush.bf16.msrb.mxu2 %v10825_v63  ;;  %4276 = vmatpush.bf16.msrb.mxu0 %v10833_v22  ;;  %v10898_v63 = vld [vmem:[%s14801_s15 + $0x558] sm:$0xff] }
 0x619   :  { %4424 = vmatpush.bf16.msrb.mxu3 %v10841_v48  ;;  %4437 = vmatpush.bf16.msra.mxu1 %v10849_v17  ;;  %v10906_v22 = vld [vmem:[%s14801_s15 + $0x598] sm:$0xff]  ;;  %v10889_v17 = vld [vmem:[%s14801_s15 + $0x510] sm:$0xff] }
 0x61a   :  { %v10914_v48 = vld [vmem:[%s14801_s15 + $0x5d8] sm:$0xff] }
 0x61c   :  { %4264 = vmatpush.bf16.msrb.mxu2 %v10824_v20  ;;  %4277 = vmatpush.bf16.msrb.mxu0 %v10832_v60  ;;  %v10897_v20 = vld [vmem:[%s14801_s15 + $0x550] sm:$0xff] }
 0x61d   :  { %4425 = vmatpush.bf16.msrb.mxu3 %v10840_v5  ;;  %4438 = vmatpush.bf16.msra.mxu1 %v10848_v57  ;;  %v10905_v60 = vld [vmem:[%s14801_s15 + $0x590] sm:$0xff]  ;;  %v10888_v57 = vld [vmem:[%s14801_s15 + $0x508] sm:$0xff] }
 0x61e   :  { %v10913_v5 = vld [vmem:[%s14801_s15 + $0x5d0] sm:$0xff] }
 0x620   :  { %4265 = vmatpush.bf16.msrb.mxu2 %v10823_v62  ;;  %4278 = vmatpush.bf16.msrb.mxu0 %v10831_v34  ;;  %v10896_v62 = vld [vmem:[%s14801_s15 + $0x548] sm:$0xff] }
 0x621   :  { %4426 = vmatpush.bf16.msrb.mxu3 %v10839_v4  ;;  %4439 = vmatpush.bf16.msra.mxu1 %v10847_v41  ;;  %v10904_v34 = vld [vmem:[%s14801_s15 + $0x588] sm:$0xff]  ;;  %v10887_v41 = vld [vmem:[%s14801_s15 + $0x500] sm:$0xff] }
 0x622   :  { %v10912_v4 = vld [vmem:[%s14801_s15 + $0x5c8] sm:$0xff] }
 0x623   :  { %4266 = vmatmul.bf16.vlgmr.msrb.gmra.mxu2 %v13317_v40  ;;  %4279 = vmatmul.bf16.vlgmr.msrb.gmra.mxu0 %v13319_v1 }
 0x624   :  { %4580 = vmatpush.bf16.msra.mxu2 %v10862_v3  ;;  %4593 = vmatpush.bf16.msra.mxu0 %v10870_v42  ;;  %v10895_v3 = vld [vmem:[%s14801_s15 + $0x540] sm:$0xff] }
 0x625   :  { %4741 = vmatpush.bf16.msra.mxu3 %v10878_v50  ;;  %4754 = vmatpush.bf16.msrb.mxu1 %v10886_v51  ;;  %v10903_v42 = vld [vmem:[%s14801_s15 + $0x580] sm:$0xff]  ;;  %v10926_v51 = vld [vmem:[%s14801_s15 + $0x638] sm:$0xff] }
 0x626   :  { %4427 = vmatmul.bf16.vlgmr.msrb.gmra.mxu3 %v13317_v40  ;;  %4440 = vmatmul.bf16.vlgmr.msra.gmra.mxu1 %v13319_v1  ;;  %v10911_v50 = vld [vmem:[%s14801_s15 + $0x5c0] sm:$0xff] }
 0x628   :  { %4581 = vmatpush.bf16.msra.mxu2 %v10861_v19  ;;  %4594 = vmatpush.bf16.msra.mxu0 %v10869_v12  ;;  %v10934_v19 = vld [vmem:[%s14801_s15 + $0x678] sm:$0xff] }
 0x629   :  { %4742 = vmatpush.bf16.msra.mxu3 %v10877_v56  ;;  %4755 = vmatpush.bf16.msrb.mxu1 %v10885_v0  ;;  %v10942_v12 = vld [vmem:[%s14801_s15 + $0x6b8] sm:$0xff]  ;;  %v10925_v0 = vld [vmem:[%s14801_s15 + $0x630] sm:$0xff] }
 0x62a   :  { %v10950_v56 = vld [vmem:[%s14801_s15 + $0x6f8] sm:$0xff] }
 0x62c   :  { %4582 = vmatpush.bf16.msra.mxu2 %v10860_v49  ;;  %4595 = vmatpush.bf16.msra.mxu0 %v10868_v25  ;;  %v10933_v49 = vld [vmem:[%s14801_s15 + $0x670] sm:$0xff] }
 0x62d   :  { %4743 = vmatpush.bf16.msra.mxu3 %v10876_v11  ;;  %4756 = vmatpush.bf16.msrb.mxu1 %v10884_v10  ;;  %v10941_v25 = vld [vmem:[%s14801_s15 + $0x6b0] sm:$0xff] }
 0x62e   :  { %v10949_v11 = vld [vmem:[%s14801_s15 + $0x6f0] sm:$0xff] }
 0x630   :  { %4583 = vmatpush.bf16.msra.mxu2 %v10859_v39  ;;  %4596 = vmatpush.bf16.msra.mxu0 %v10867_v52  ;;  %v10924_v39 = vld [vmem:[%s14801_s15 + $0x628] sm:$0xff] }
 0x631   :  { %4744 = vmatpush.bf16.msra.mxu3 %v10875_v47  ;;  %4757 = vmatpush.bf16.msrb.mxu1 %v10883_v44  ;;  %v10932_v52 = vld [vmem:[%s14801_s15 + $0x668] sm:$0xff] }
 0x632   :  { %v10940_v44 = vld [vmem:[%s14801_s15 + $0x6a8] sm:$0xff] }
 0x634   :  { %4584 = vmatpush.bf16.msra.mxu2 %v10858_v26  ;;  %4597 = vmatpush.bf16.msra.mxu0 %v10866_v30  ;;  %v10948_v26 = vld [vmem:[%s14801_s15 + $0x6e8] sm:$0xff]  ;;  %v11028_v30 = vld [vmem:[%s14802_s16] ss:$0 sm:$0xff] }
 0x635   :  { %4745 = vmatpush.bf16.msra.mxu3 %v10874_v2  ;;  %4758 = vmatpush.bf16.msrb.mxu1 %v10882_v24  ;;  %v11031_v2 = vld [vmem:[%s14802_s16 + $0x1] ss:$0 sm:$0xff] }
 0x636   :  { %v10923_v24 = vld [vmem:[%s14801_s15 + $0x620] sm:$0xff] }
 0x638   :  { %4585 = vmatpush.bf16.msra.mxu2 %v10857_v43  ;;  %4598 = vmatpush.bf16.msra.mxu0 %v10865_v37  ;;  %v10931_v43 = vld [vmem:[%s14801_s15 + $0x660] sm:$0xff] }
 0x639   :  { %4746 = vmatpush.bf16.msra.mxu3 %v10873_v59  ;;  %4759 = vmatpush.bf16.msrb.mxu1 %v10881_v31  ;;  %v10939_v37 = vld [vmem:[%s14801_s15 + $0x6a0] sm:$0xff] }
 0x63a   :  { %v10947_v59 = vld [vmem:[%s14801_s15 + $0x6e0] sm:$0xff] }
 0x63c   :  { %4586 = vmatpush.bf16.msra.mxu2 %v10856_v13  ;;  %4599 = vmatpush.bf16.msra.mxu0 %v10864_v46  ;;  %v13790_v46 = vld [vmem:[%s14803_s17] ss:$0 sm:$0xff] }
 0x63d   :  { %4747 = vmatpush.bf16.msra.mxu3 %v10872_v29  ;;  %4760 = vmatpush.bf16.msrb.mxu1 %v10880_v61 }
 0x640   :  { %4587 = vmatpush.bf16.msra.mxu2 %v10855_v35  ;;  %4600 = vmatpush.bf16.msra.mxu0 %v10863_v6 }
 0x641   :  { %4748 = vmatpush.bf16.msra.mxu3 %v10871_v33  ;;  %4761 = vmatpush.bf16.msrb.mxu1 %v10879_v38  ;;  %v13795_v33 = vld [vmem:[%s14804_s18] ss:$0 sm:$0xff]  ;;  %v10922_v38 = vld [vmem:[%s14801_s15 + $0x618] sm:$0xff] }
 0x643   :  { %4588 = vmatmul.bf16.vlgmr.msra.gmra.mxu2 %v13317_v40  ;;  %4601 = vmatmul.bf16.vlgmr.msra.gmra.mxu0 %v13319_v1 }
 0x644   :  { %4902 = vmatpush.bf16.msrb.mxu2 %v10894_v21  ;;  %4915 = vmatpush.bf16.msrb.mxu0 %v10902_v54  ;;  %v10930_v21 = vld [vmem:[%s14801_s15 + $0x658] sm:$0xff] }
 0x645   :  { %5063 = vmatpush.bf16.msrb.mxu3 %v10910_v27  ;;  %5076 = vmatpush.bf16.msra.mxu1 %v10918_v9  ;;  %v10938_v9 = vld [vmem:[%s14801_s15 + $0x698] sm:$0xff] }
 0x646   :  { %4749 = vmatmul.bf16.vlgmr.msra.gmra.mxu3 %v13317_v40  ;;  %4762 = vmatmul.bf16.vlgmr.msrb.gmra.mxu1 %v13319_v1 }
 0x648   :  { %4903 = vmatpush.bf16.msrb.mxu2 %v10893_v18  ;;  %4916 = vmatpush.bf16.msrb.mxu0 %v10901_v23  ;;  %v10946_v18 = vld [vmem:[%s14801_s15 + $0x6d8] sm:$0xff] }
 0x649   :  { %5064 = vmatpush.bf16.msrb.mxu3 %v10909_v36  ;;  %5077 = vmatpush.bf16.msra.mxu1 %v10917_v14 }
 0x64c   :  { %4904 = vmatpush.bf16.msrb.mxu2 %v10892_v53  ;;  %4917 = vmatpush.bf16.msrb.mxu0 %v10900_v15  ;;  %v10921_v53 = vld [vmem:[%s14801_s15 + $0x610] sm:$0xff] }
 0x64d   :  { %5065 = vmatpush.bf16.msrb.mxu3 %v10908_v55  ;;  %5078 = vmatpush.bf16.msra.mxu1 %v10916_v8  ;;  %v10929_v15 = vld [vmem:[%s14801_s15 + $0x650] sm:$0xff] }
 0x64e   :  { %v10937_v8 = vld [vmem:[%s14801_s15 + $0x690] sm:$0xff] }
 0x650   :  { %4905 = vmatpush.bf16.msrb.mxu2 %v10891_v32  ;;  %4918 = vmatpush.bf16.msrb.mxu0 %v10899_v28  ;;  %v10945_v32 = vld [vmem:[%s14801_s15 + $0x6d0] sm:$0xff] }
 0x651   :  { %5066 = vmatpush.bf16.msrb.mxu3 %v10907_v58  ;;  %5079 = vmatpush.bf16.msra.mxu1 %v10915_v7 }
 0x654   :  { %4906 = vmatpush.bf16.msrb.mxu2 %v10890_v45  ;;  %4919 = vmatpush.bf16.msrb.mxu0 %v10898_v63 }
 0x655   :  { %5067 = vmatpush.bf16.msrb.mxu3 %v10906_v22  ;;  %5080 = vmatpush.bf16.msra.mxu1 %v10914_v48  ;;  %v10920_v22 = vld [vmem:[%s14801_s15 + $0x608] sm:$0xff] }
 0x656   :  { %v10928_v48 = vld [vmem:[%s14801_s15 + $0x648] sm:$0xff] }
 0x658   :  { %4907 = vmatpush.bf16.msrb.mxu2 %v10889_v17  ;;  %4920 = vmatpush.bf16.msrb.mxu0 %v10897_v20  ;;  %v10936_v20 = vld [vmem:[%s14801_s15 + $0x688] sm:$0xff] }
 0x659   :  { %5068 = vmatpush.bf16.msrb.mxu3 %v10905_v60  ;;  %5081 = vmatpush.bf16.msra.mxu1 %v10913_v5  ;;  %v10944_v60 = vld [vmem:[%s14801_s15 + $0x6c8] sm:$0xff]  ;;  %v11032_v5 = vld [vmem:[%s14802_s16 + $0x2] ss:$0 sm:$0xff] }
 0x65c   :  { %4908 = vmatpush.bf16.msrb.mxu2 %v10888_v57  ;;  %4921 = vmatpush.bf16.msrb.mxu0 %v10896_v62  ;;  %v11033_v57 = vld [vmem:[%s14802_s16 + $0x3] ss:$0 sm:$0xff] }
 0x65d   :  { %5069 = vmatpush.bf16.msrb.mxu3 %v10904_v34  ;;  %5082 = vmatpush.bf16.msra.mxu1 %v10912_v4  ;;  %v10919_v62 = vld [vmem:[%s14801_s15 + $0x600] sm:$0xff] }
 0x65e   :  { %v10927_v34 = vld [vmem:[%s14801_s15 + $0x640] sm:$0xff] }
 0x65f   :  { %v3308_v10 = vpop.f32.mrf.mxu0  ;;  %v10935_v4 = vld [vmem:[%s14801_s15 + $0x680] sm:$0xff] }
 0x660   :  { %4909 = vmatpush.bf16.msrb.mxu2 %v10887_v41  ;;  %4922 = vmatpush.bf16.msrb.mxu0 %v10895_v3  ;;  %v3475_v47 = vpop.f32.mrf.mxu1  ;;  %v10943_v41 = vld [vmem:[%s14801_s15 + $0x6c0] sm:$0xff] }
 0x661   :  { %5070 = vmatpush.bf16.msrb.mxu3 %v10903_v42  ;;  %5083 = vmatpush.bf16.msra.mxu1 %v10911_v50  ;;  %v10958_v42 = vld [vmem:[%s14801_s15 + $0x738] sm:$0xff] }
 0x662   :  { %v10966_v50 = vld [vmem:[%s14801_s15 + $0x778] sm:$0xff] }
 0x663   :  { %4910 = vmatmul.bf16.vlgmr.msrb.gmra.mxu2 %v13317_v40  ;;  %4923 = vmatmul.bf16.vlgmr.msrb.gmra.mxu0 %v13319_v1 }
 0x664   :  { %5224 = vmatpush.bf16.msra.mxu2 %v10926_v51  ;;  %5237 = vmatpush.bf16.msra.mxu0 %v10934_v19 }
 0x665   :  { %5385 = vmatpush.bf16.msra.mxu3 %v10942_v12  ;;  %5398 = vmatpush.bf16.msrb.mxu1 %v10950_v56  ;;  %v3295_v31 = vpop.f32.mrf.mxu2  ;;  %v10974_v12 = vld [vmem:[%s14801_s15 + $0x7b8] sm:$0xff] }
 0x666   :  { %5071 = vmatmul.bf16.vlgmr.msrb.gmra.mxu3 %v13317_v40  ;;  %5084 = vmatmul.bf16.vlgmr.msra.gmra.mxu1 %v13319_v1  ;;  %v3296_v13 = vadd.f32 %v11028_v30, %v3295_v31  ;;  %v3462_v29 = vpop.f32.mrf.mxu3  ;;  %v10982_v56 = vld [vmem:[%s14801_s15 + $0x7f8] sm:$0xff]  ;;  %v10981_v30 = vld [vmem:[%s14801_s15 + $0x7f0] sm:$0xff]  ;;  %v10964_v31 = vld [vmem:[%s14801_s15 + $0x768] sm:$0xff] }
 0x667   :  { %v3463_v61 = vadd.f32 %v11031_v2, %v3462_v29  ;;  %v3310_v35 = vpop.f32.mrf.mxu0 }
 0x668   :  { %5225 = vmatpush.bf16.msra.mxu2 %v10925_v0  ;;  %5238 = vmatpush.bf16.msra.mxu0 %v10933_v49  ;;  %v3309_v6 = vadd.f32 %v3308_v10, %v3296_v13  ;;  %v3477_v54 = vpop.f32.mrf.mxu1  ;;  %v10980_v35 = vld [vmem:[%s14801_s15 + $0x7e8] sm:$0xff] }
 0x669   :  { %5386 = vmatpush.bf16.msra.mxu3 %v10941_v25  ;;  %5399 = vmatpush.bf16.msrb.mxu1 %v10949_v11  ;;  %v3476_v27 = vadd.f32 %v3475_v47, %v3463_v61  ;;  %v10965_v47 = vld [vmem:[%s14801_s15 + $0x770] sm:$0xff]  ;;  %v10972_v61 = vld [vmem:[%s14801_s15 + $0x7a8] sm:$0xff]  ;;  %v10963_v54 = vld [vmem:[%s14801_s15 + $0x760] sm:$0xff] }
 0x66a   :  { %v3315_v23 = vmul.f32 %v13790_v46, %v3309_v6 }
 0x66b   :  { %v3479_v36 = vmul.f32 %v13790_v46, %v3476_v27  ;;  %v10971_v27 = vld [vmem:[%s14801_s15 + $0x7a0] sm:$0xff] }
 0x66c   :  { %5226 = vmatpush.bf16.msra.mxu2 %v10924_v39  ;;  %5239 = vmatpush.bf16.msra.mxu0 %v10932_v52  ;;  %v3319_v14 = vadd.f32 %v13795_v33, %v3315_v23  ;;  %v10957_v52 = vld [vmem:[%s14801_s15 + $0x730] sm:$0xff]  ;;  %v11035_v23 = vld [vmem:[%s14802_s16 + $0x5] ss:$0 sm:$0xff] }
 0x66d   :  { %5387 = vmatpush.bf16.msra.mxu3 %v10940_v44  ;;  %5400 = vmatpush.bf16.msrb.mxu1 %v10948_v26  ;;  %v3480_v55 = vadd.f32 %v13795_v33, %v3479_v36  ;;  %v3297_v28 = vpop.f32.mrf.mxu2  ;;  %v10973_v26 = vld [vmem:[%s14801_s15 + $0x7b0] sm:$0xff]  ;;  %v10954_v36 = vld [vmem:[%s14801_s15 + $0x718] sm:$0xff] }
 0x66e   :  { %v3320_v58 = vmax.f32 %v3319_v14, 0.0  ;;  %v3464_v7 = vpop.f32.mrf.mxu3  ;;  %v10962_v14 = vld [vmem:[%s14801_s15 + $0x758] sm:$0xff] }
 0x66f   :  { %v3481_v45 = vmax.f32 %v3480_v55, 0.0  ;;  %v3636_v63 = vpop.f32.mrf.mxu0 }
 0x670   :  { %5227 = vmatpush.bf16.msra.mxu2 %v10923_v24  ;;  %5240 = vmatpush.bf16.msra.mxu0 %v10931_v43  ;;  %3321 = vst.msk [vmem:[#allocation2 + $0x4] sm:$0xf] %vm3153_vm7, %v3320_v58  ;;  %v3797_v17 = vpop.f32.mrf.mxu1 }
 0x671   :  { %5388 = vmatpush.bf16.msra.mxu3 %v10939_v37  ;;  %5401 = vmatpush.bf16.msrb.mxu1 %v10947_v59  ;;  %3482 = vst.msk [vmem:[#allocation2 + $0x8] sm:$0xf] %vm3153_vm7, %v3481_v45  ;;  %v10956_v59 = vld [vmem:[%s14801_s15 + $0x728] sm:$0xff] }
 0x674   :  { %5228 = vmatpush.bf16.msra.mxu2 %v10922_v38  ;;  %5241 = vmatpush.bf16.msra.mxu0 %v10930_v21  ;;  %v10955_v21 = vld [vmem:[%s14801_s15 + $0x720] sm:$0xff] }
 0x675   :  { %5389 = vmatpush.bf16.msra.mxu3 %v10938_v9  ;;  %5402 = vmatpush.bf16.msrb.mxu1 %v10946_v18  ;;  %v3623_v3 = vpop.f32.mrf.mxu2  ;;  %v10979_v9 = vld [vmem:[%s14801_s15 + $0x7e0] sm:$0xff] }
 0x676   :  { %v3624_v51 = vadd.f32 %v11032_v5, %v3623_v3  ;;  %v3784_v19 = vpop.f32.mrf.mxu3  ;;  %v11034_v18 = vld [vmem:[%s14802_s16 + $0x4] ss:$0 sm:$0xff]  ;;  %v10976_v3 = vld [vmem:[%s14801_s15 + $0x7c8] sm:$0xff] }
 0x677   :  { %v3785_v0 = vadd.f32 %v11033_v57, %v3784_v19  ;;  %v3638_v49 = vpop.f32.mrf.mxu0 }
 0x678   :  { %5229 = vmatpush.bf16.msra.mxu2 %v10921_v53  ;;  %5242 = vmatpush.bf16.msra.mxu0 %v10929_v15  ;;  %v3637_v25 = vadd.f32 %v3636_v63, %v3624_v51  ;;  %v3799_v11 = vpop.f32.mrf.mxu1  ;;  %v10970_v53 = vld [vmem:[%s14801_s15 + $0x798] sm:$0xff]  ;;  %v10953_v63 = vld [vmem:[%s14801_s15 + $0x710] sm:$0xff]  ;;  %v10975_v49 = vld [vmem:[%s14801_s15 + $0x7c0] sm:$0xff] }
 0x679   :  { %5390 = vmatpush.bf16.msra.mxu3 %v10937_v8  ;;  %5403 = vmatpush.bf16.msrb.mxu1 %v10945_v32  ;;  %v3798_v10 = vadd.f32 %v3797_v17, %v3785_v0  ;;  %v10978_v15 = vld [vmem:[%s14801_s15 + $0x7d8] sm:$0xff]  ;;  %v10969_v17 = vld [vmem:[%s14801_s15 + $0x790] sm:$0xff]  ;;  %v10967_v0 = vld [vmem:[%s14801_s15 + $0x780] sm:$0xff] }
 0x67a   :  { %v3640_v39 = vmul.f32 %v13790_v46, %v3637_v25  ;;  %v10990_v25 = vld [vmem:[%s14801_s15 + $0x838] sm:$0xff] }
 0x67b   :  { %v3801_v44 = vmul.f32 %v13790_v46, %v3798_v10  ;;  %v10998_v11 = vld [vmem:[%s14801_s15 + $0x878] sm:$0xff] }
 0x67c   :  { %5230 = vmatpush.bf16.msra.mxu2 %v10920_v22  ;;  %5243 = vmatpush.bf16.msra.mxu0 %v10928_v48  ;;  %v3641_v2 = vadd.f32 %v13795_v33, %v3640_v39  ;;  %v10961_v22 = vld [vmem:[%s14801_s15 + $0x750] sm:$0xff]  ;;  %v11006_v10 = vld [vmem:[%s14801_s15 + $0x8b8] sm:$0xff] }
 0x67d   :  { %5391 = vmatpush.bf16.msra.mxu3 %v10936_v20  ;;  %5404 = vmatpush.bf16.msrb.mxu1 %v10944_v60  ;;  %v3802_v24 = vadd.f32 %v13795_v33, %v3801_v44  ;;  %v3625_v43 = vpop.f32.mrf.mxu2  ;;  %v10977_v20 = vld [vmem:[%s14801_s15 + $0x7d0] sm:$0xff]  ;;  %v11014_v39 = vld [vmem:[%s14801_s15 + $0x8f8] sm:$0xff] }
 0x67e   :  { %v3642_v37 = vmax.f32 %v3641_v2, 0.0  ;;  %v3786_v13 = vpop.f32.mrf.mxu3  ;;  %v11005_v44 = vld [vmem:[%s14801_s15 + $0x8b0] sm:$0xff]  ;;  %v10996_v2 = vld [vmem:[%s14801_s15 + $0x868] sm:$0xff] }
 0x67f   :  { %v3803_v29 = vmax.f32 %v3802_v24, 0.0  ;;  %v11004_v24 = vld [vmem:[%s14801_s15 + $0x8a8] sm:$0xff]  ;;  %v10995_v13 = vld [vmem:[%s14801_s15 + $0x860] sm:$0xff] }
 0x680   :  { %5231 = vmatpush.bf16.msra.mxu2 %v10919_v62  ;;  %5244 = vmatpush.bf16.msra.mxu0 %v10927_v34  ;;  %3643 = vst.msk [vmem:[#allocation2 + $0xc] sm:$0xf] %vm3153_vm7, %v3642_v37  ;;  %v3958_v6 = vpop.f32.mrf.mxu0  ;;  %v10952_v62 = vld [vmem:[%s14801_s15 + $0x708] sm:$0xff] }
 0x681   :  { %5392 = vmatpush.bf16.msra.mxu3 %v10935_v4  ;;  %5405 = vmatpush.bf16.msrb.mxu1 %v10943_v41  ;;  %3804 = vst.msk [vmem:[#allocation2 + $0x10] sm:$0xf] %vm3153_vm7, %v3803_v29  ;;  %v10960_v34 = vld [vmem:[%s14801_s15 + $0x748] sm:$0xff]  ;;  %v11003_v29 = vld [vmem:[%s14801_s15 + $0x8a0] sm:$0xff] }
 0x682   :  { %v10968_v41 = vld [vmem:[%s14801_s15 + $0x788] sm:$0xff] }
 0x683   :  { %5232 = vmatmul.bf16.vlgmr.msra.gmra.mxu2 %v13317_v40  ;;  %5245 = vmatmul.bf16.vlgmr.msra.gmra.mxu0 %v13319_v1  ;;  %v4119_v38 = vpop.f32.mrf.mxu1  ;;  %v11012_v43 = vld [vmem:[%s14801_s15 + $0x8e8] sm:$0xff] }
 0x684   :  { %5546 = vmatpush.bf16.msrb.mxu2 %v10958_v42  ;;  %5559 = vmatpush.bf16.msrb.mxu0 %v10966_v50 }
 0x685   :  { %5707 = vmatpush.bf16.msrb.mxu3 %v10974_v12  ;;  %5720 = vmatpush.bf16.msra.mxu1 %v10982_v56  ;;  %v10951_v12 = vld [vmem:[%s14801_s15 + $0x700] sm:$0xff] }
 0x686   :  { %5393 = vmatmul.bf16.vlgmr.msra.gmra.mxu3 %v13317_v40  ;;  %5406 = vmatmul.bf16.vlgmr.msrb.gmra.mxu1 %v13319_v1  ;;  %v3945_v55 = vpop.f32.mrf.mxu2  ;;  %v10959_v56 = vld [vmem:[%s14801_s15 + $0x740] sm:$0xff] }
 0x687   :  { %v3946_v8 = vadd.f32 %v11034_v18, %v3945_v55  ;;  %v10985_v55 = vld [vmem:[%s14801_s15 + $0x810] sm:$0xff] }
 0x688   :  { %5547 = vmatpush.bf16.msrb.mxu2 %v10957_v52  ;;  %5560 = vmatpush.bf16.msrb.mxu0 %v10965_v47  ;;  %v3960_v58 = vpop.f32.mrf.mxu0  ;;  %v10989_v52 = vld [vmem:[%s14801_s15 + $0x830] sm:$0xff] }
 0x689   :  { %5708 = vmatpush.bf16.msrb.mxu3 %v10973_v26  ;;  %5721 = vmatpush.bf16.msra.mxu1 %v10981_v30  ;;  %v4106_v32 = vpop.f32.mrf.mxu3  ;;  %v3959_v7 = vadd.f32 %v3958_v6, %v3946_v8  ;;  %v10997_v47 = vld [vmem:[%s14801_s15 + $0x870] sm:$0xff]  ;;  %v10988_v30 = vld [vmem:[%s14801_s15 + $0x828] sm:$0xff]  ;;  %v11037_v6 = vld [vmem:[%s14802_s16 + $0x7] ss:$0 sm:$0xff] }
 0x68a   :  { %v4107_v28 = vadd.f32 %v11035_v23, %v4106_v32  ;;  %v11013_v26 = vld [vmem:[%s14801_s15 + $0x8f0] sm:$0xff] }
 0x68b   :  { %v4121_v45 = vpop.f32.mrf.mxu1  ;;  %v3962_v60 = vmul.f32 %v13790_v46, %v3959_v7  ;;  %v10993_v8 = vld [vmem:[%s14801_s15 + $0x850] sm:$0xff] }
 0x68c   :  { %5548 = vmatpush.bf16.msrb.mxu2 %v10956_v59  ;;  %5561 = vmatpush.bf16.msrb.mxu0 %v10964_v31  ;;  %v4120_v48 = vadd.f32 %v4119_v38, %v4107_v28  ;;  %v10987_v31 = vld [vmem:[%s14801_s15 + $0x820] sm:$0xff]  ;;  %v10986_v38 = vld [vmem:[%s14801_s15 + $0x818] sm:$0xff]  ;;  %v11001_v28 = vld [vmem:[%s14801_s15 + $0x890] sm:$0xff] }
 0x68d   :  { %5709 = vmatpush.bf16.msrb.mxu3 %v10972_v61  ;;  %5722 = vmatpush.bf16.msra.mxu1 %v10980_v35  ;;  %v3963_v57 = vadd.f32 %v13795_v33, %v3962_v60  ;;  %v11011_v61 = vld [vmem:[%s14801_s15 + $0x8e0] sm:$0xff]  ;;  %v11009_v58 = vld [vmem:[%s14801_s15 + $0x8d0] sm:$0xff]  ;;  %v11008_v60 = vld [vmem:[%s14801_s15 + $0x8c8] sm:$0xff] }
 0x68e   :  { %v4123_v5 = vmul.f32 %v13790_v46, %v4120_v48  ;;  %v3947_v42 = vpop.f32.mrf.mxu2  ;;  %v11036_v35 = vld [vmem:[%s14802_s16 + $0x6] ss:$0 sm:$0xff]  ;;  %v10992_v48 = vld [vmem:[%s14801_s15 + $0x848] sm:$0xff] }
 0x68f   :  { %v3964_v50 = vmax.f32 %v3963_v57, 0.0  ;;  %v11007_v42 = vld [vmem:[%s14801_s15 + $0x8c0] sm:$0xff] }
 0x690   :  { %5549 = vmatpush.bf16.msrb.mxu2 %v10955_v21  ;;  %5562 = vmatpush.bf16.msrb.mxu0 %v10963_v54  ;;  %v4124_v4 = vadd.f32 %v13795_v33, %v4123_v5  ;;  %v10994_v21 = vld [vmem:[%s14801_s15 + $0x858] sm:$0xff] }
 0x691   :  { %5710 = vmatpush.bf16.msrb.mxu3 %v10971_v27  ;;  %5723 = vmatpush.bf16.msra.mxu1 %v10979_v9  ;;  %v4108_v51 = vpop.f32.mrf.mxu3  ;;  %3965 = vst.msk [vmem:[#allocation2 + $0x14] sm:$0xf] %vm3153_vm7, %v3964_v50  ;;  %v11002_v54 = vld [vmem:[%s14801_s15 + $0x898] sm:$0xff] }
 0x692   :  { %v4125_v19 = vmax.f32 %v4124_v4, 0.0  ;;  %v11010_v27 = vld [vmem:[%s14801_s15 + $0x8d8] sm:$0xff]  ;;  %v10983_v4 = vld [vmem:[%s14801_s15 + $0x800] sm:$0xff] }
 0x693   :  { %v10364_v50 = vld [vmem:[%s14805_s19 + $0xb8] sm:$0xff] }
 0x694   :  { %5550 = vmatpush.bf16.msrb.mxu2 %v10954_v36  ;;  %5563 = vmatpush.bf16.msrb.mxu0 %v10962_v14  ;;  %4126 = vst.msk [vmem:[#allocation2 + $0x18] sm:$0xf] %vm3153_vm7, %v4125_v19  ;;  %v6088_v51 = vld [vmem:[%s14805_s19 + $0x38] sm:$0xff] }
 0x695   :  { %5711 = vmatpush.bf16.msrb.mxu3 %v10970_v53  ;;  %5724 = vmatpush.bf16.msra.mxu1 %v10978_v15  ;;  %v10400_v19 = vld [vmem:[%s14805_s19 + $0xf8] sm:$0xff] }
 0x698   :  { %5551 = vmatpush.bf16.msrb.mxu2 %v10953_v63  ;;  %5564 = vmatpush.bf16.msrb.mxu0 %v10961_v22  ;;  %v10984_v22 = vld [vmem:[%s14801_s15 + $0x808] sm:$0xff] }
 0x699   :  { %5712 = vmatpush.bf16.msrb.mxu3 %v10969_v17  ;;  %5725 = vmatpush.bf16.msra.mxu1 %v10977_v20  ;;  %v11000_v20 = vld [vmem:[%s14801_s15 + $0x888] sm:$0xff] }
 0x69c   :  { %5552 = vmatpush.bf16.msrb.mxu2 %v10952_v62  ;;  %5565 = vmatpush.bf16.msrb.mxu0 %v10960_v34 }
 0x69d   :  { %5713 = vmatpush.bf16.msrb.mxu3 %v10968_v41  ;;  %5726 = vmatpush.bf16.msra.mxu1 %v10976_v3  ;;  %v10991_v41 = vld [vmem:[%s14801_s15 + $0x840] sm:$0xff] }
 0x69e   :  { %v10999_v3 = vld [vmem:[%s14801_s15 + $0x880] sm:$0xff] }
 0x6a0   :  { %5553 = vmatpush.bf16.msrb.mxu2 %v10951_v12  ;;  %5566 = vmatpush.bf16.msrb.mxu0 %v10959_v56  ;;  %v4280_v37 = vpop.f32.mrf.mxu0  ;;  %v10392_v12 = vld [vmem:[%s14805_s19 + $0x78] sm:$0xff]  ;;  %v10363_v56 = vld [vmem:[%s14805_s19 + $0xb0] sm:$0xff] }
 0x6a1   :  { %5714 = vmatpush.bf16.msrb.mxu3 %v10967_v0  ;;  %5727 = vmatpush.bf16.msra.mxu1 %v10975_v49  ;;  %v6087_v0 = vld [vmem:[%s14805_s19 + $0x30] sm:$0xff] }
 0x6a2   :  { %v10399_v49 = vld [vmem:[%s14805_s19 + $0xf0] sm:$0xff] }
 0x6a3   :  { %5554 = vmatmul.bf16.vlgmr.msrb.gmra.mxu2 %v13317_v40  ;;  %5567 = vmatmul.bf16.vlgmr.msrb.gmra.mxu0 %v13319_v1  ;;  %v4441_v59 = vpop.f32.mrf.mxu1 }
 0x6a4   :  { %5868 = vmatpush.bf16.msra.mxu2 %v10990_v25  ;;  %5881 = vmatpush.bf16.msra.mxu0 %v10998_v11  ;;  %v10391_v25 = vld [vmem:[%s14805_s19 + $0x70] sm:$0xff]  ;;  %v10362_v11 = vld [vmem:[%s14805_s19 + $0xa8] sm:$0xff] }
 0x6a5   :  { %6029 = vmatpush.bf16.msra.mxu3 %v11006_v10  ;;  %6042 = vmatpush.bf16.msrb.mxu1 %v11014_v39  ;;  %v10390_v10 = vld [vmem:[%s14805_s19 + $0x68] sm:$0xff]  ;;  %v10361_v39 = vld [vmem:[%s14805_s19 + $0xa0] sm:$0xff] }
 0x6a6   :  { %5715 = vmatmul.bf16.vlgmr.msrb.gmra.mxu3 %v13317_v40  ;;  %5728 = vmatmul.bf16.vlgmr.msra.gmra.mxu1 %v13319_v1  ;;  %v4267_v9 = vpop.f32.mrf.mxu2 }
 0x6a7   :  { %v4268_v18 = vadd.f32 %v11036_v35, %v4267_v9  ;;  %v10358_v35 = vld [vmem:[%s14805_s19 + $0x88] sm:$0xff]  ;;  %v10357_v9 = vld [vmem:[%s14805_s19 + $0x80] sm:$0xff] }
 0x6a8   :  { %5869 = vmatpush.bf16.msra.mxu2 %v10989_v52  ;;  %5882 = vmatpush.bf16.msra.mxu0 %v10997_v47  ;;  %v4282_v14 = vpop.f32.mrf.mxu0  ;;  %v6085_v52 = vld [vmem:[%s14805_s19 + $0x20] sm:$0xff] }
 0x6a9   :  { %6030 = vmatpush.bf16.msra.mxu3 %v11005_v44  ;;  %6043 = vmatpush.bf16.msrb.mxu1 %v11013_v26  ;;  %v4428_v23 = vpop.f32.mrf.mxu3  ;;  %v4281_v53 = vadd.f32 %v4280_v37, %v4268_v18  ;;  %v10397_v47 = vld [vmem:[%s14805_s19 + $0xe0] sm:$0xff]  ;;  %v10388_v37 = vld [vmem:[%s14805_s19 + $0x58] sm:$0xff] }
 0x6aa   :  { %v4429_v36 = vadd.f32 %v11037_v6, %v4428_v23  ;;  %v10389_v44 = vld [vmem:[%s14805_s19 + $0x60] sm:$0xff]  ;;  %v6082_v6 = vld [vmem:[%s14805_s19 + $0x8] sm:$0xff] }
 0x6ab   :  { %v4443_v15 = vpop.f32.mrf.mxu1  ;;  %v4284_v7 = vmul.f32 %v13790_v46, %v4281_v53  ;;  %v6081_v18 = vld [vmem:[%s14805_s19] sm:$0xff] }
 0x6ac   :  { %5870 = vmatpush.bf16.msra.mxu2 %v10988_v30  ;;  %5883 = vmatpush.bf16.msra.mxu0 %v10996_v2  ;;  %v4442_v32 = vadd.f32 %v4441_v59, %v4429_v36  ;;  %v10360_v30 = vld [vmem:[%s14805_s19 + $0x98] sm:$0xff]  ;;  %v10359_v59 = vld [vmem:[%s14805_s19 + $0x90] sm:$0xff]  ;;  %v10393_v14 = vld [vmem:[%s14805_s19 + $0xc0] sm:$0xff] }
 0x6ad   :  { %6031 = vmatpush.bf16.msra.mxu3 %v11004_v24  ;;  %6044 = vmatpush.bf16.msrb.mxu1 %v11012_v43  ;;  %v4285_v63 = vadd.f32 %v13795_v33, %v4284_v7  ;;  %v6084_v2 = vld [vmem:[%s14805_s19 + $0x18] sm:$0xff]  ;;  %v10385_v53 = vld [vmem:[%s14805_s19 + $0x40] sm:$0xff] }
 0x6ae   :  { %v4445_v45 = vmul.f32 %v13790_v46, %v4442_v32  ;;  %v4269_v5 = vpop.f32.mrf.mxu2  ;;  %v10396_v43 = vld [vmem:[%s14805_s19 + $0xd8] sm:$0xff]  ;;  %v6059_v7 = vld [vmem:[#allocation2 + $0x4] sm:$0xff] }
 0x6af   :  { %v4286_v57 = vmax.f32 %v4285_v63, 0.0 }
 0x6b0   :  { %5871 = vmatpush.bf16.msra.mxu2 %v10987_v31  ;;  %5884 = vmatpush.bf16.msra.mxu0 %v10995_v13  ;;  %v4446_v17 = vadd.f32 %v13795_v33, %v4445_v45  ;;  %v6083_v31 = vld [vmem:[%s14805_s19 + $0x10] sm:$0xff] }
 0x6b1   :  { %6032 = vmatpush.bf16.msra.mxu3 %v11003_v29  ;;  %6045 = vmatpush.bf16.msrb.mxu1 %v11011_v61  ;;  %v4430_v62 = vpop.f32.mrf.mxu3  ;;  %4287 = vst.msk [vmem:[#allocation2 + $0x1c] sm:$0xf] %vm3153_vm7, %v4286_v57  ;;  %v10395_v13 = vld [vmem:[%s14805_s19 + $0xd0] sm:$0xff]  ;;  %v11038_v61 = vld [vmem:[%s14802_s16 + $0x8] ss:$0 sm:$0xff] }
 0x6b2   :  { %v4447_v34 = vmax.f32 %v4446_v17, 0.0  ;;  %v10387_v29 = vld [vmem:[%s14805_s19 + $0x50] sm:$0xff]  ;;  %v6070_v57 = vld [vmem:[#allocation2 + $0x8] sm:$0xff] }
 0x6b3   :  { %v6060_v62 = vld [vmem:[#allocation2 + $0xc] sm:$0xff] }
 0x6b4   :  { %5872 = vmatpush.bf16.msra.mxu2 %v10986_v38  ;;  %5885 = vmatpush.bf16.msra.mxu0 %v10994_v21  ;;  %4448 = vst.msk [vmem:[#allocation2 + $0x20] sm:$0xf] %vm3153_vm7, %v4447_v34  ;;  %v11039_v38 = vld [vmem:[%s14802_s16 + $0x9] ss:$0 sm:$0xff]  ;;  %v6071_v34 = vld [vmem:[#allocation2 + $0x10] sm:$0xff] }
 0x6b5   :  { %6033 = vmatpush.bf16.msra.mxu3 %v11002_v54  ;;  %6046 = vmatpush.bf16.msrb.mxu1 %v11010_v27  ;;  %v10394_v21 = vld [vmem:[%s14805_s19 + $0xc8] sm:$0xff] }
 0x6b6   :  { %v10386_v54 = vld [vmem:[%s14805_s19 + $0x48] sm:$0xff] }
 0x6b8   :  { %5873 = vmatpush.bf16.msra.mxu2 %v10985_v55  ;;  %5886 = vmatpush.bf16.msra.mxu0 %v10993_v8 }
 0x6b9   :  { %6034 = vmatpush.bf16.msra.mxu3 %v11001_v28  ;;  %6047 = vmatpush.bf16.msrb.mxu1 %v11009_v58  ;;  %v6069_v58 = vld [vmem:[#allocation2] sm:$0xff] }
 0x6bc   :  { %5874 = vmatpush.bf16.msra.mxu2 %v10984_v22  ;;  %5887 = vmatpush.bf16.msra.mxu0 %v10992_v48 }
 0x6bd   :  { %6035 = vmatpush.bf16.msra.mxu3 %v11000_v20  ;;  %6048 = vmatpush.bf16.msrb.mxu1 %v11008_v60 }
 0x6c0   :  { %5875 = vmatpush.bf16.msra.mxu2 %v10983_v4  ;;  %5888 = vmatpush.bf16.msra.mxu0 %v10991_v41  ;;  %v4602_v26 = vpop.f32.mrf.mxu0  ;;  %v6061_v4 = vld [vmem:[#allocation2 + $0x14] sm:$0xff] }
 0x6c1   :  { %6036 = vmatpush.bf16.msra.mxu3 %v10999_v3  ;;  %6049 = vmatpush.bf16.msrb.mxu1 %v11007_v42  ;;  %v11040_v42 = vld [vmem:[%s14802_s16 + $0xa] ss:$0 sm:$0xff] }
 0x6c3   :  { %5876 = vmatmul.bf16.vlgmr.msra.gmra.mxu2 %v13317_v40  ;;  %5889 = vmatmul.bf16.vlgmr.msra.gmra.mxu0 %v13319_v1  ;;  %v4763_v24 = vpop.f32.mrf.mxu1 }
 0x6c4   :  { %6136 = vmatpush.msrb.mxu2 %v10364_v50  ;;  %6213 = vmatpush.msrb.mxu0 %v6088_v51  ;;  %v6072_v50 = vld [vmem:[#allocation2 + $0x18] sm:$0xff] }
 0x6c5   :  { %6037 = vmatmul.bf16.vlgmr.msra.gmra.mxu3 %v13317_v40  ;;  %6050 = vmatmul.bf16.vlgmr.msrb.gmra.mxu1 %v13319_v1  ;;  %v6086_v40 = vld [vmem:[%s14805_s19 + $0x28] sm:$0xff]  ;;  %v6062_v51 = vld [vmem:[#allocation2 + $0x1c] sm:$0xff] }
 0x6c6   :  { %6314 = vmatpush.msrb.mxu3 %v10400_v19  ;;  %6361 = vmatpush.msra.mxu1 %v10392_v12  ;;  %v10398_v1 = vld [vmem:[%s14805_s19 + $0xe8] sm:$0xff]  ;;  %v4589_v27 = vpop.f32.mrf.mxu2 }
 0x6c7   :  { %6137 = vmatpush.msrb.mxu2 %v10363_v56  ;;  %6214 = vmatpush.msrb.mxu0 %v6087_v0  ;;  %v4590_v23 = vadd.f32 %v11038_v61, %v4589_v27  ;;  %v11041_v19 = vld [vmem:[%s14802_s16 + $0xb] ss:$0 sm:$0xff]  ;;  %v11043_v61 = vld [vmem:[%s14802_s16 + $0xd] ss:$0 sm:$0xff] }
 0x6c8   :  { %6315 = vmatpush.msrb.mxu3 %v10399_v49  ;;  %6362 = vmatpush.msra.mxu1 %v10391_v25  ;;  %v4604_v55 = vpop.f32.mrf.mxu0 }
 0x6c9   :  { %6138 = vmatpush.msrb.mxu2 %v10362_v11  ;;  %6215 = vmatpush.msrb.mxu0 %v6086_v40  ;;  %v4750_v36 = vpop.f32.mrf.mxu3  ;;  %v4603_v8 = vadd.f32 %v4602_v26, %v4590_v23 }
 0x6ca   :  { %6316 = vmatpush.msrb.mxu3 %v10398_v1  ;;  %6363 = vmatpush.msra.mxu1 %v10390_v10  ;;  %v4751_v15 = vadd.f32 %v11039_v38, %v4750_v36 }
 0x6cb   :  { %6139 = vmatpush.msrb.mxu2 %v10361_v39  ;;  %6216 = vmatpush.msrb.mxu0 %v6085_v52  ;;  %v4765_v32 = vpop.f32.mrf.mxu1  ;;  %v4606_v45 = vmul.f32 %v13790_v46, %v4603_v8 }
 0x6cc   :  { %6317 = vmatpush.msrb.mxu3 %v10397_v47  ;;  %6364 = vmatpush.msra.mxu1 %v10389_v44  ;;  %v4764_v28 = vadd.f32 %v4763_v24, %v4751_v15 }
 0x6cd   :  { %6140 = vmatpush.msrb.mxu2 %v10360_v30  ;;  %6217 = vmatpush.msrb.mxu0 %v6084_v2  ;;  %v4607_v22 = vadd.f32 %v13795_v33, %v4606_v45 }
 0x6ce   :  { %6318 = vmatpush.msrb.mxu3 %v10396_v43  ;;  %6365 = vmatpush.msra.mxu1 %v10388_v37  ;;  %v4767_v63 = vmul.f32 %v13790_v46, %v4764_v28  ;;  %v4591_v17 = vpop.f32.mrf.mxu2 }
 0x6cf   :  { %6141 = vmatpush.msrb.mxu2 %v10359_v59  ;;  %6218 = vmatpush.msrb.mxu0 %v6083_v31  ;;  %v4608_v20 = vmax.f32 %v4607_v22, 0.0  ;;  %v11045_v22 = vld [vmem:[%s14802_s16 + $0xf] ss:$0 sm:$0xff] }
 0x6d0   :  { %6319 = vmatpush.msrb.mxu3 %v10395_v13  ;;  %6366 = vmatpush.msra.mxu1 %v10387_v29  ;;  %v4768_v48 = vadd.f32 %v13795_v33, %v4767_v63  ;;  %v11042_v29 = vld [vmem:[%s14802_s16 + $0xc] ss:$0 sm:$0xff]  ;;  %v11044_v63 = vld [vmem:[%s14802_s16 + $0xe] ss:$0 sm:$0xff] }
 0x6d1   :  { %6142 = vmatpush.msrb.mxu2 %v10358_v35  ;;  %6219 = vmatpush.msrb.mxu0 %v6082_v6  ;;  %v4752_v60 = vpop.f32.mrf.mxu3  ;;  %4609 = vst.msk [vmem:[#allocation2 + $0x24] sm:$0xf] %vm3153_vm7, %v4608_v20 }
 0x6d2   :  { %6320 = vmatpush.msrb.mxu3 %v10394_v21  ;;  %6367 = vmatpush.msra.mxu1 %v10386_v54  ;;  %v4769_v5 = vmax.f32 %v4768_v48, 0.0 }
 0x6d3   :  { %6143 = vmatpush.msrb.mxu2 %v10357_v9  ;;  %6220 = vmatpush.msrb.mxu0 %v6081_v18 }
 0x6d4   :  { %6321 = vmatpush.msrb.mxu3 %v10393_v14  ;;  %6368 = vmatpush.msra.mxu1 %v10385_v53  ;;  %4770 = vst.msk [vmem:[#allocation2 + $0x28] sm:$0xf] %vm3153_vm7, %v4769_v5 }
 0x6d5   :  { %10365 = vmatmul.msk.f32.vlgmr.msrb.gmra.mxu2 %vm1576_vm5, %v6069_v58  ;;  %10375 = vmatmul.msk.f32.vlgmr.msrb.gmra.mxu0 %vm1576_vm5, %v6059_v7 }
 0x6d6   :  { %10401 = vmatmul.msk.f32.vlgmr.msrb.gmra.mxu3 %vm1576_vm5, %v6069_v58  ;;  %10411 = vmatmul.msk.f32.vlgmr.msra.gmra.mxu1 %vm1576_vm5, %v6059_v7 }
 0x6d8   :  { %v6073_v52 = vld [vmem:[#allocation2 + $0x20] sm:$0xff] }
 0x6db   :  { %v6063_v47 = vld [vmem:[#allocation2 + $0x24] sm:$0xff] }
 0x6dd   :  { %10366 = vmatmul.msk.f32.gmra.mxu2 %vm1576_vm5, %v6070_v57  ;;  %10376 = vmatmul.msk.f32.gmra.mxu0 %vm1576_vm5, %v6060_v62 }
 0x6de   :  { %10402 = vmatmul.msk.f32.gmra.mxu3 %vm1576_vm5, %v6070_v57  ;;  %10412 = vmatmul.msk.f32.gmra.mxu1 %vm1576_vm5, %v6060_v62 }
 0x6e0   :  { %v4924_v41 = vpop.f32.mrf.mxu0 }
 0x6e3   :  { %v5085_v3 = vpop.f32.mrf.mxu1 }
 0x6e5   :  { %10367 = vmatmul.msk.f32.gmra.mxu2 %vm1576_vm5, %v6071_v34  ;;  %10377 = vmatmul.msk.f32.gmra.mxu0 %vm1576_vm5, %v6061_v4 }
 0x6e6   :  { %10403 = vmatmul.msk.f32.gmra.mxu3 %vm1576_vm5, %v6071_v34  ;;  %10413 = vmatmul.msk.f32.gmra.mxu1 %vm1576_vm5, %v6061_v4  ;;  %v4911_v12 = vpop.f32.mrf.mxu2 }
 0x6e7   :  { %v4912_v56 = vadd.f32 %v11040_v42, %v4911_v12 }
 0x6e8   :  { %v4926_v25 = vpop.f32.mrf.mxu0 }
 0x6e9   :  { %v5072_v0 = vpop.f32.mrf.mxu3  ;;  %v4925_v11 = vadd.f32 %v4924_v41, %v4912_v56 }
 0x6ea   :  { %v5073_v49 = vadd.f32 %v11041_v19, %v5072_v0 }
 0x6eb   :  { %v5087_v40 = vpop.f32.mrf.mxu1  ;;  %v4928_v10 = vmul.f32 %v13790_v46, %v4925_v11  ;;  %v10424_v11 = vld [vmem:[%s14808_s22 + $0x58] sm:$0xff] }
 0x6ec   :  { %v5086_v1 = vadd.f32 %v5085_v3, %v5073_v49  ;;  %v11046_v40 = vld [vmem:[%s14802_s16 + $0x10] ss:$0 sm:$0xff]  ;;  %6525 = vmatpush.msra.mxu2 %v10424_v11 }
 0x6ed   :  { %10368 = vmatmul.msk.f32.gmra.mxu2 %vm1576_vm5, %v6072_v50  ;;  %10378 = vmatmul.msk.f32.gmra.mxu0 %vm1576_vm5, %v6062_v51  ;;  %v4929_v44 = vadd.f32 %v13795_v33, %v4928_v10  ;;  %v10452_v10 = vld [vmem:[%s14808_s22 + $0x78] sm:$0xff] }
 0x6ee   :  { %10404 = vmatmul.msk.f32.gmra.mxu3 %vm1576_vm5, %v6072_v50  ;;  %10414 = vmatmul.msk.f32.gmra.mxu1 %vm1576_vm5, %v6062_v51  ;;  %v5089_v39 = vmul.f32 %v13790_v46, %v5086_v1  ;;  %v4913_v30 = vpop.f32.mrf.mxu2  ;;  %v6477_v1 = vld [vmem:[%s14808_s22 + $0x18] sm:$0xff] }
 0x6ef   :  { %v4930_v2 = vmax.f32 %v4929_v44, 0.0  ;;  %6602 = vmatpush.msra.mxu0 %v6477_v1  ;;  %6682 = vmatpush.msra.mxu3 %v10452_v10  ;;  %v10451_v44 = vld [vmem:[%s14808_s22 + $0x70] sm:$0xff] }
 0x6f0   :  { %v5090_v26 = vadd.f32 %v13795_v33, %v5089_v39  ;;  %v10448_v39 = vld [vmem:[%s14808_s22 + $0x38] sm:$0xff]  ;;  %6526 = vmatpush.msra.mxu2 %v10423_v16  ;;  %v10447_v30 = vld [vmem:[%s14808_s22 + $0x30] sm:$0xff] }
 0x6f1   :  { %v5074_v24 = vpop.f32.mrf.mxu3  ;;  %4931 = vst.msk [vmem:[#allocation2 + $0x2c] sm:$0xf] %vm3153_vm7, %v4930_v2  ;;  %6729 = vmatpush.msrb.mxu1 %v10448_v39  ;;  %6683 = vmatpush.msra.mxu3 %v10451_v44 }
 0x6f2   :  { %v5091_v43 = vmax.f32 %v5090_v26, 0.0 }
 0x6f3   :  { %6730 = vmatpush.msrb.mxu1 %v10447_v30 }
 0x6f4   :  { %5092 = vst.msk [vmem:[#allocation2 + $0x30] sm:$0xf] %vm3153_vm7, %v5091_v43  ;;  %v10422_v43 = vld [vmem:[%s14808_s22 + $0x48] sm:$0xff] }
 0x6f5   :  { %10369 = vmatmul.msk.f32.gmra.mxu2 %vm1576_vm5, %v6073_v52  ;;  %10379 = vmatmul.msk.f32.gmra.mxu0 %vm1576_vm5, %v6063_v47 }
 0x6f6   :  { %10405 = vmatmul.msk.f32.gmra.mxu3 %vm1576_vm5, %v6073_v52  ;;  %10415 = vmatmul.msk.f32.gmra.mxu1 %vm1576_vm5, %v6063_v47  ;;  %v11047_v52 = vld [vmem:[%s14802_s16 + $0x11] ss:$0 sm:$0xff]  ;;  %s11110_s16 = smov [#allocation9]  }
 0x6f7   :  { %v6476_v47 = vld [vmem:[%s14808_s22 + $0x10] sm:$0xff]  ;;  %6527 = vmatpush.msra.mxu2 %v10422_v43  ;;  %s7718_s8 = sshll.u32 %s11110_s16, 4  ;;  %s7719_s8 = int_to_ptr.vmem [resolvable:$true] %s7718_s8 }
 0x6f8   :  { %v6074_v37 = vld [vmem:[#allocation2 + $0x28] sm:$0xff]  ;;  %6603 = vmatpush.msra.mxu0 %v6476_v47  ;;  %7723 = dma.vmem_to_hbm [thread:$0]  %s7719_s8, 64, %s7721_s6, [#allocation10]  }
 0x6fb   :  { %v6064_v59 = vld [vmem:[#allocation2 + $0x2c] sm:$0xff] }
 0x6fd   :  { %10370 = vmatmul.msk.f32.gmra.mxu2 %vm1576_vm5, %v6074_v37  ;;  %10380 = vmatmul.msk.f32.gmra.mxu0 %vm1576_vm5, %v6064_v59 }
 0x6fe   :  { %10406 = vmatmul.msk.f32.gmra.mxu3 %vm1576_vm5, %v6074_v37  ;;  %10416 = vmatmul.msk.f32.gmra.mxu1 %vm1576_vm5, %v6064_v59  ;;  %v6475_v37 = vld [vmem:[%s14808_s22 + $0x8] sm:$0xff] }
 0x6ff   :  { %v10450_v59 = vld [vmem:[%s14808_s22 + $0x68] sm:$0xff]  ;;  %6604 = vmatpush.msra.mxu0 %v6475_v37 }
 0x700   :  { %v5246_v31 = vpop.f32.mrf.mxu0  ;;  %6684 = vmatpush.msra.mxu3 %v10450_v59 }
 0x703   :  { %v5407_v13 = vpop.f32.mrf.mxu1 }
 0x706   :  { %v5233_v35 = vpop.f32.mrf.mxu2 }
 0x707   :  { %v5234_v6 = vadd.f32 %v11042_v29, %v5233_v35  ;;  %v10446_v29 = vld [vmem:[%s14808_s22 + $0x28] sm:$0xff] }
 0x708   :  { %v5248_v54 = vpop.f32.mrf.mxu0  ;;  %6731 = vmatpush.msrb.mxu1 %v10446_v29 }
 0x709   :  { %v5394_v38 = vpop.f32.mrf.mxu3  ;;  %v5247_v27 = vadd.f32 %v5246_v31, %v5234_v6  ;;  %v10421_v6 = vld [vmem:[%s14808_s22 + $0x40] sm:$0xff] }
 0x70a   :  { %v5395_v21 = vadd.f32 %v11043_v61, %v5394_v38  ;;  %v6474_v38 = vld [vmem:[%s14808_s22] sm:$0xff]  ;;  %6528 = vmatpush.msra.mxu2 %v10421_v6 }
 0x70b   :  { %v5409_v9 = vpop.f32.mrf.mxu1  ;;  %v5250_v23 = vmul.f32 %v13790_v46, %v5247_v27  ;;  %6605 = vmatpush.msra.mxu0 %v6474_v38  ;;  %v10445_v27 = vld [vmem:[%s14808_s22 + $0x20] sm:$0xff] }
 0x70c   :  { %v5408_v18 = vadd.f32 %v5407_v13, %v5395_v21  ;;  %v10449_v21 = vld [vmem:[%s14808_s22 + $0x60] sm:$0xff]  ;;  %6732 = vmatpush.msrb.mxu1 %v10445_v27  ;;  %6846 = vmatpush.msrb.mxu2 %v10424_v11 }
 0x70d   :  { %v5251_v14 = vadd.f32 %v13795_v33, %v5250_v23  ;;  %6685 = vmatpush.msra.mxu3 %v10449_v21  ;;  %6923 = vmatpush.msrb.mxu0 %v6477_v1 }
 0x70e   :  { %v5411_v36 = vmul.f32 %v13790_v46, %v5408_v18  ;;  %v5235_v15 = vpop.f32.mrf.mxu2  ;;  %7037 = vmatpush.msra.mxu1 %v10448_v39  ;;  %6847 = vmatpush.msrb.mxu2 %v10423_v16 }
 0x70f   :  { %v5252_v55 = vmax.f32 %v5251_v14, 0.0  ;;  %6990 = vmatpush.msrb.mxu3 %v10452_v10  ;;  %6924 = vmatpush.msrb.mxu0 %v6476_v47 }
 0x710   :  { %v5412_v53 = vadd.f32 %v13795_v33, %v5411_v36  ;;  %7038 = vmatpush.msra.mxu1 %v10447_v30  ;;  %6848 = vmatpush.msrb.mxu2 %v10422_v43 }
 0x711   :  { %v5396_v8 = vpop.f32.mrf.mxu3  ;;  %5253 = vst.msk [vmem:[#allocation2 + $0x34] sm:$0xf] %vm3153_vm7, %v5252_v55  ;;  %6991 = vmatpush.msrb.mxu3 %v10451_v44  ;;  %6925 = vmatpush.msrb.mxu0 %v6475_v37 }
 0x712   :  { %v5413_v32 = vmax.f32 %v5412_v53, 0.0  ;;  %7039 = vmatpush.msra.mxu1 %v10446_v29  ;;  %6849 = vmatpush.msrb.mxu2 %v10421_v6 }
 0x713   :  { %6992 = vmatpush.msrb.mxu3 %v10450_v59  ;;  %6926 = vmatpush.msrb.mxu0 %v6474_v38 }
 0x714   :  { %5414 = vst.msk [vmem:[#allocation2 + $0x38] sm:$0xf] %vm3153_vm7, %v5413_v32  ;;  %7040 = vmatpush.msra.mxu1 %v10445_v27 }
 0x715   :  { %6993 = vmatpush.msrb.mxu3 %v10449_v21 }
 0x718   :  { %v6075_v28 = vld [vmem:[#allocation2 + $0x30] sm:$0xff] }
 0x719   :  { %10371 = vmatmul.msk.f32.gmra.mxu2 %vm1576_vm5, %v6075_v28  ;;  %10407 = vmatmul.msk.f32.gmra.mxu3 %vm1576_vm5, %v6075_v28 }
 0x71b   :  { %v6065_v58 = vld [vmem:[#allocation2 + $0x34] sm:$0xff] }
 0x71c   :  { %10381 = vmatmul.msk.f32.gmra.mxu0 %vm1576_vm5, %v6065_v58  ;;  %10417 = vmatmul.msk.f32.gmra.mxu1 %vm1576_vm5, %v6065_v58  ;;  %v14339_v58 = vld [vmem:[%s14807_s21] ss:$0 sm:$0xff] }
 0x720   :  { %v5568_v7 = vpop.f32.mrf.mxu0 }
 0x723   :  { %v5729_v45 = vpop.f32.mrf.mxu1 }
 0x726   :  { %v5555_v48 = vpop.f32.mrf.mxu2 }
 0x727   :  { %v5556_v17 = vadd.f32 %v11044_v63, %v5555_v48 }
 0x728   :  { %v5570_v5 = vpop.f32.mrf.mxu0 }
 0x729   :  { %v5716_v20 = vpop.f32.mrf.mxu3  ;;  %v5569_v57 = vadd.f32 %v5568_v7, %v5556_v17 }
 0x72a   :  { %v5717_v60 = vadd.f32 %v11045_v22, %v5716_v20 }
 0x72b   :  { %v5731_v62 = vpop.f32.mrf.mxu1  ;;  %v5572_v4 = vmul.f32 %v13790_v46, %v5569_v57 }
 0x72c   :  { %v5730_v34 = vadd.f32 %v5729_v45, %v5717_v60 }
 0x72d   :  { %v5573_v3 = vadd.f32 %v13795_v33, %v5572_v4 }
 0x72e   :  { %v5733_v41 = vmul.f32 %v13790_v46, %v5730_v34  ;;  %v5557_v50 = vpop.f32.mrf.mxu2 }
 0x72f   :  { %v5574_v51 = vmax.f32 %v5573_v3, 0.0 }
 0x730   :  { %v5734_v42 = vadd.f32 %v13795_v33, %v5733_v41  ;;  %v6068_v41 = vld [vmem:[#allocation2 + $0x4c] sm:$0xf] }
 0x731   :  { %v5718_v19 = vpop.f32.mrf.mxu3  ;;  %5575 = vst.msk [vmem:[#allocation2 + $0x3c] sm:$0xf] %vm3153_vm7, %v5574_v51 }
 0x732   :  { %v5735_v12 = vmax.f32 %v5734_v42, 0.0 }
 0x734   :  { %5736 = vst.msk [vmem:[#allocation2 + $0x40] sm:$0xf] %vm3153_vm7, %v5735_v12 }
 0x738   :  { %v6076_v56 = vld [vmem:[#allocation2 + $0x38] sm:$0xff] }
 0x739   :  { %10372 = vmatmul.msk.f32.gmra.mxu2 %vm1576_vm5, %v6076_v56  ;;  %10408 = vmatmul.msk.f32.gmra.mxu3 %vm1576_vm5, %v6076_v56 }
 0x73b   :  { %v6066_v0 = vld [vmem:[#allocation2 + $0x3c] sm:$0xff] }
 0x73c   :  { %10382 = vmatmul.msk.f32.gmra.mxu0 %vm1576_vm5, %v6066_v0  ;;  %10418 = vmatmul.msk.f32.gmra.mxu1 %vm1576_vm5, %v6066_v0 }
 0x740   :  { %v5890_v49 = vpop.f32.mrf.mxu0 }
 0x742   :  { %v6051_v25 = vpop.f32.mrf.mxu1 }
 0x746   :  { %v5877_v26 = vpop.f32.mrf.mxu2 }
 0x747   :  { %v5878_v2 = vadd.f32 %v11046_v40, %v5877_v26 }
 0x748   :  { %v6038_v24 = vpop.f32.mrf.mxu3  ;;  %v5892_v13 = vpop.f32.mrf.mxu0 }
 0x749   :  { %v6039_v31 = vadd.f32 %v11047_v52, %v6038_v24  ;;  %v5891_v61 = vadd.f32 %v5890_v49, %v5878_v2 }
 0x74a   :  { %v6053_v35 = vpop.f32.mrf.mxu1 }
 0x74b   :  { %v6052_v54 = vadd.f32 %v6051_v25, %v6039_v31  ;;  %v5894_v9 = vmul.f32 %v13790_v46, %v5891_v61 }
 0x74d   :  { %v6055_v18 = vmul.f32 %v13790_v46, %v6052_v54  ;;  %v5895_v23 = vadd.f32 %v13795_v33, %v5894_v9 }
 0x74e   :  { %v5879_v14 = vpop.f32.mrf.mxu2 }
 0x74f   :  { %v6056_v36 = vadd.f32 %v13795_v33, %v6055_v18  ;;  %v5896_v53 = vmax.f32 %v5895_v23, 0.0  ;;  %v14334_v33 = vld [vmem:[%s14806_s20] ss:$0 sm:$0xff] }
 0x750   :  { %v6040_v15 = vpop.f32.mrf.mxu3 }
 0x751   :  { %v6057_v55 = vmax.f32 %v6056_v36, 0.0  ;;  %5897 = vst.msk [vmem:[#allocation2 + $0x44] sm:$0xf] %vm3153_vm7, %v5896_v53 }
 0x752   :  { %v6222_v46 = vpop.f32.mrf.mxu0 }
 0x753   :  { %6058 = vst.msk [vmem:[#allocation2 + $0x48] sm:$0xf] %vm3153_vm7, %v6057_v55  ;;  %v6370_v8 = vpop.f32.mrf.mxu1 }
 0x758   :  { %v6145_v32 = vpop.f32.mrf.mxu2  ;;  %v6077_v45 = vld [vmem:[#allocation2 + $0x40] sm:$0xff] }
 0x759   :  { %v6223_v28 = vadd.f32 %v6222_v46, %v6145_v32  ;;  %v6323_v7 = vpop.f32.mrf.mxu3  ;;  %10373 = vmatmul.msk.f32.gmra.mxu2 %vm1576_vm5, %v6077_v45  ;;  %10409 = vmatmul.msk.f32.gmra.mxu3 %vm1576_vm5, %v6077_v45 }
 0x75a   :  { %v6371_v63 = vadd.f32 %v6370_v8, %v6323_v7  ;;  %v6225_v22 = vpop.f32.mrf.mxu0  ;;  %v6067_v48 = vld [vmem:[#allocation2 + $0x44] sm:$0xff] }
 0x75b   :  { %v6255_v17 = vmul.f32 %v14334_v33, %v6223_v28  ;;  %v6373_v20 = vpop.f32.mrf.mxu1  ;;  %10383 = vmatmul.msk.f32.gmra.mxu0 %vm1576_vm5, %v6067_v48  ;;  %10419 = vmatmul.msk.f32.gmra.mxu1 %vm1576_vm5, %v6067_v48  ;;  %v6078_v50 = vld [vmem:[#allocation2 + $0x48] sm:$0xf] }
 0x75c   :  { %v6400_v60 = vmul.f32 %v14334_v33, %v6371_v63 }
 0x75d   :  { %v6268_v5 = vadd.f32 %v14339_v58, %v6255_v17 }
 0x75e   :  { %v6410_v57 = vadd.f32 %v14339_v58, %v6400_v60 }
 0x75f   :  { %v6278_v62 = vmax.f32 %v6268_v5, 0.0 }
 0x760   :  { %v6420_v34 = vmax.f32 %v6410_v57, 0.0  ;;  %v6148_v4 = vpop.f32.mrf.mxu2 }
 0x761   :  { %6430 = vst.msk [vmem:[#allocation3] sm:$0xff] %vm1136_vm4, %v6278_v62  ;;  %v6226_v3 = vadd.f32 %v6225_v22, %v6148_v4  ;;  %v6326_v42 = vpop.f32.mrf.mxu3  ;;  %10374 = vmatmul.msk.f32.gmra.mxu2 %vm1576_vm5, %v6078_v50  ;;  %10410 = vmatmul.msk.f32.gmra.mxu3 %vm1576_vm5, %v6078_v50 }
 0x762   :  { %6443 = vst.msk [vmem:[#allocation4 + $0x4] sm:$0xff] %vm1136_vm4, %v6420_v34  ;;  %v6374_v51 = vadd.f32 %v6373_v20, %v6326_v42  ;;  %v6228_v56 = vpop.f32.mrf.mxu0 }
 0x763   :  { %v6256_v19 = vmul.f32 %v14334_v33, %v6226_v3  ;;  %10384 = vmatmul.msk.f32.gmra.mxu0 %vm1576_vm5, %v6068_v41  ;;  %10420 = vmatmul.msk.f32.gmra.mxu1 %vm1576_vm5, %v6068_v41  ;;  %v6376_v49 = vpop.f32.mrf.mxu1 }
 0x764   :  { %v6401_v12 = vmul.f32 %v14334_v33, %v6374_v51 }
 0x765   :  { %v6269_v0 = vadd.f32 %v14339_v58, %v6256_v19 }
 0x766   :  { %v6411_v25 = vadd.f32 %v14339_v58, %v6401_v12 }
 0x767   :  { %v6279_v11 = vmax.f32 %v6269_v0, 0.0 }
 0x768   :  { %v6421_v40 = vmax.f32 %v6411_v25, 0.0  ;;  %v6151_v1 = vpop.f32.mrf.mxu2  ;;  %v14362_v47 = vld [vmem:[#allocation3] sm:$0xff] }
 0x769   :  { %6431 = vst.msk [vmem:[#allocation3 + $0x8] sm:$0xff] %vm1136_vm4, %v6279_v11  ;;  %v6229_v10 = vadd.f32 %v6228_v56, %v6151_v1  ;;  %v6329_v39 = vpop.f32.mrf.mxu3  ;;  %v6463_v52 = vld [vmem:[#allocation4] sm:$0xff] }
 0x76a   :  { %6444 = vst.msk [vmem:[#allocation4 + $0xc] sm:$0xff] %vm1136_vm4, %v6421_v40  ;;  %v6377_v16 = vadd.f32 %v6376_v49, %v6329_v39  ;;  %10425 = vmatmul.msk.f32.vlgmr.msra.gmra.mxu2 %vm1136_vm4, %v6463_v52  ;;  %10453 = vmatmul.msk.f32.vlgmr.msra.gmra.mxu3 %vm1136_vm4, %v6463_v52  ;;  %v6231_v24 = vpop.f32.mrf.mxu0 }
 0x76b   :  { %v6257_v44 = vmul.f32 %v14334_v33, %v6229_v10  ;;  %10435 = vmatmul.msk.f32.vlgmr.msra.gmra.mxu0 %vm1136_vm4, %v14362_v47  ;;  %10463 = vmatmul.msk.f32.vlgmr.msrb.gmra.mxu1 %vm1136_vm4, %v14362_v47  ;;  %v6379_v37 = vpop.f32.mrf.mxu1 }
 0x76c   :  { %v6402_v26 = vmul.f32 %v14334_v33, %v6377_v16 }
 0x76d   :  { %v6270_v30 = vadd.f32 %v14339_v58, %v6257_v44 }
 0x76e   :  { %v6412_v2 = vadd.f32 %v14339_v58, %v6402_v26 }
 0x76f   :  { %v6280_v43 = vmax.f32 %v6270_v30, 0.0 }
 0x770   :  { %v6422_v59 = vmax.f32 %v6412_v2, 0.0  ;;  %v6154_v31 = vpop.f32.mrf.mxu2  ;;  %v14376_v6 = vld [vmem:[#allocation3 + $0x8] sm:$0xff] }
 0x771   :  { %6432 = vst.msk [vmem:[#allocation3 + $0x10] sm:$0xff] %vm1136_vm4, %v6280_v43  ;;  %v6232_v13 = vadd.f32 %v6231_v24, %v6154_v31  ;;  %v6332_v29 = vpop.f32.mrf.mxu3  ;;  %v6464_v61 = vld [vmem:[#allocation4 + $0x8] sm:$0xff] }
 0x772   :  { %6445 = vst.msk [vmem:[#allocation4 + $0x14] sm:$0xff] %vm1136_vm4, %v6422_v59  ;;  %v6380_v35 = vadd.f32 %v6379_v37, %v6332_v29  ;;  %10426 = vmatmul.msk.f32.gmra.mxu2 %vm1136_vm4, %v6464_v61  ;;  %10454 = vmatmul.msk.f32.gmra.mxu3 %vm1136_vm4, %v6464_v61  ;;  %v6234_v23 = vpop.f32.mrf.mxu0 }
 0x773   :  { %v6258_v38 = vmul.f32 %v14334_v33, %v6232_v13  ;;  %10436 = vmatmul.msk.f32.gmra.mxu0 %vm1136_vm4, %v14376_v6  ;;  %10464 = vmatmul.msk.f32.gmra.mxu1 %vm1136_vm4, %v14376_v6  ;;  %v6382_v14 = vpop.f32.mrf.mxu1 }
 0x774   :  { %v6403_v21 = vmul.f32 %v14334_v33, %v6380_v35 }
 0x775   :  { %v6271_v54 = vadd.f32 %v14339_v58, %v6258_v38 }
 0x776   :  { %v6413_v27 = vadd.f32 %v14339_v58, %v6403_v21 }
 0x777   :  { %v6281_v9 = vmax.f32 %v6271_v54, 0.0 }
 0x778   :  { %v6423_v18 = vmax.f32 %v6413_v27, 0.0  ;;  %v6157_v36 = vpop.f32.mrf.mxu2  ;;  %v14390_v8 = vld [vmem:[#allocation3 + $0x10] sm:$0xff] }
 0x779   :  { %6433 = vst.msk [vmem:[#allocation3 + $0x18] sm:$0xff] %vm1136_vm4, %v6281_v9  ;;  %v6235_v53 = vadd.f32 %v6234_v23, %v6157_v36  ;;  %v6335_v15 = vpop.f32.mrf.mxu3  ;;  %v6465_v55 = vld [vmem:[#allocation4 + $0x10] sm:$0xff] }
 0x77a   :  { %6446 = vst.msk [vmem:[#allocation4 + $0x1c] sm:$0xff] %vm1136_vm4, %v6423_v18  ;;  %v6383_v46 = vadd.f32 %v6382_v14, %v6335_v15  ;;  %10427 = vmatmul.msk.f32.gmra.mxu2 %vm1136_vm4, %v6465_v55  ;;  %10455 = vmatmul.msk.f32.gmra.mxu3 %vm1136_vm4, %v6465_v55  ;;  %v6237_v20 = vpop.f32.mrf.mxu0 }
 0x77b   :  { %v6259_v32 = vmul.f32 %v14334_v33, %v6235_v53  ;;  %10437 = vmatmul.msk.f32.gmra.mxu0 %vm1136_vm4, %v14390_v8  ;;  %10465 = vmatmul.msk.f32.gmra.mxu1 %vm1136_vm4, %v14390_v8  ;;  %v6385_v60 = vpop.f32.mrf.mxu1 }
 0x77c   :  { %v6404_v28 = vmul.f32 %v14334_v33, %v6383_v46 }
 0x77d   :  { %v6272_v7 = vadd.f32 %v14339_v58, %v6259_v32 }
 0x77e   :  { %v6414_v45 = vadd.f32 %v14339_v58, %v6404_v28 }
 0x77f   :  { %v6282_v63 = vmax.f32 %v6272_v7, 0.0 }
 0x780   :  { %v6424_v22 = vmax.f32 %v6414_v45, 0.0  ;;  %v14404_v17 = vld [vmem:[#allocation3 + $0x18] sm:$0xff]  ;;  %v6160_v5 = vpop.f32.mrf.mxu2  ;;  %v10514_v45 = vld [vmem:[%s14810_s24 + $0x18] sm:$0xff] }
 0x781   :  { %6434 = vst.msk [vmem:[#allocation3 + $0x20] sm:$0xff] %vm1136_vm4, %v6282_v63  ;;  %v6466_v48 = vld [vmem:[#allocation4 + $0x18] sm:$0xff]  ;;  %v6338_v57 = vpop.f32.mrf.mxu3  ;;  %v6238_v62 = vadd.f32 %v6237_v20, %v6160_v5  ;;  %7165 = vmatpush.msra.mxu2 %v10514_v45 }
 0x782   :  { %6447 = vst.msk [vmem:[#allocation4 + $0x24] sm:$0xff] %vm1136_vm4, %v6424_v22  ;;  %10428 = vmatmul.msk.f32.gmra.mxu2 %vm1136_vm4, %v6466_v48  ;;  %10456 = vmatmul.msk.f32.gmra.mxu3 %vm1136_vm4, %v6466_v48  ;;  %v6386_v34 = vadd.f32 %v6385_v60, %v6338_v57 }
 0x783   :  { %10438 = vmatmul.msk.f32.gmra.mxu0 %vm1136_vm4, %v14404_v17  ;;  %10466 = vmatmul.msk.f32.gmra.mxu1 %vm1136_vm4, %v14404_v17  ;;  %v6260_v4 = vmul.f32 %v14334_v33, %v6238_v62 }
 0x784   :  { %v6405_v41 = vmul.f32 %v14334_v33, %v6386_v34 }
 0x785   :  { %v6273_v3 = vadd.f32 %v14339_v58, %v6260_v4 }
 0x786   :  { %v6415_v42 = vadd.f32 %v14339_v58, %v6405_v41 }
 0x787   :  { %v6283_v19 = vmax.f32 %v6273_v3, 0.0 }
 0x788   :  { %v14416_v51 = vld [vmem:[#allocation3 + $0x20] sm:$0xff]  ;;  %v6425_v12 = vmax.f32 %v6415_v42, 0.0  ;;  %v7117_v42 = vld [vmem:[%s14810_s24 + $0x8] sm:$0xff] }
 0x789   :  { %v6467_v50 = vld [vmem:[#allocation4 + $0x20] sm:$0xff]  ;;  %6435 = vst.msk [vmem:[#allocation3 + $0x28] sm:$0xff] %vm1136_vm4, %v6283_v19  ;;  %7242 = vmatpush.msra.mxu0 %v7117_v42 }
 0x78a   :  { %10429 = vmatmul.msk.f32.gmra.mxu2 %vm1136_vm4, %v6467_v50  ;;  %10457 = vmatmul.msk.f32.gmra.mxu3 %vm1136_vm4, %v6467_v50  ;;  %6448 = vst.msk [vmem:[#allocation4 + $0x2c] sm:$0xff] %vm1136_vm4, %v6425_v12 }
 0x78b   :  { %10439 = vmatmul.msk.f32.gmra.mxu0 %vm1136_vm4, %v14416_v51  ;;  %10467 = vmatmul.msk.f32.gmra.mxu1 %vm1136_vm4, %v14416_v51 }
 0x790   :  { %v14425_v56 = vld [vmem:[#allocation3 + $0x28] sm:$0xff] }
 0x791   :  { %v6468_v0 = vld [vmem:[#allocation4 + $0x28] sm:$0xff] }
 0x792   :  { %10430 = vmatmul.msk.f32.gmra.mxu2 %vm1136_vm4, %v6468_v0  ;;  %10458 = vmatmul.msk.f32.gmra.mxu3 %vm1136_vm4, %v6468_v0 }
 0x793   :  { %10440 = vmatmul.msk.f32.gmra.mxu0 %vm1136_vm4, %v14425_v56  ;;  %10468 = vmatmul.msk.f32.gmra.mxu1 %vm1136_vm4, %v14425_v56 }
 0x799   :  { %v6240_v49 = vpop.f32.mrf.mxu0  ;;  %v6388_v25 = vpop.f32.mrf.mxu1 }
 0x79c   :  { %v6163_v11 = vpop.f32.mrf.mxu2  ;;  %v6341_v40 = vpop.f32.mrf.mxu3 }
 0x79d   :  { %v6241_v1 = vadd.f32 %v6240_v49, %v6163_v11  ;;  %v6389_v10 = vadd.f32 %v6388_v25, %v6341_v40  ;;  %v6784_v49 = vld [vmem:[#allocation4 + $0x4] sm:$0xff]  ;;  %v6785_v25 = vld [vmem:[#allocation4 + $0xc] sm:$0xff]  ;;  %v6786_v40 = vld [vmem:[#allocation4 + $0x14] sm:$0xff] }
 0x79e   :  { %v10513_v11 = vld [vmem:[%s14810_s24 + $0x10] sm:$0xff] }
 0x79f   :  { %v6261_v39 = vmul.f32 %v14334_v33, %v6241_v1  ;;  %v6406_v52 = vmul.f32 %v14334_v33, %v6389_v10  ;;  %7166 = vmatpush.msra.mxu2 %v10513_v11  ;;  %v6788_v1 = vld [vmem:[#allocation4 + $0x24] sm:$0xff]  ;;  %v10547_v11 = vld [vmem:[%s14810_s24 + $0x30] sm:$0xff] }
 0x7a1   :  { %v6274_v16 = vadd.f32 %v14339_v58, %v6261_v39  ;;  %v6416_v44 = vadd.f32 %v14339_v58, %v6406_v52  ;;  %v6789_v39 = vld [vmem:[#allocation4 + $0x2c] sm:$0xff] }
 0x7a3   :  { %v6284_v26 = vmax.f32 %v6274_v16, 0.0  ;;  %v6426_v30 = vmax.f32 %v6416_v44, 0.0 }
 0x7a5   :  { %6436 = vst.msk [vmem:[#allocation3 + $0x30] sm:$0xff] %vm1136_vm4, %v6284_v26 }
 0x7a6   :  { %6449 = vst.msk [vmem:[#allocation4 + $0x34] sm:$0xff] %vm1136_vm4, %v6426_v30  ;;  %v10548_v30 = vld [vmem:[%s14810_s24 + $0x38] sm:$0xff] }
 0x7a7   :  { %7432 = vmatpush.msrb.mxu1 %v10548_v30 }
 0x7a9   :  { %7433 = vmatpush.msrb.mxu1 %v10547_v11 }
 0x7ac   :  { %v14439_v2 = vld [vmem:[#allocation3 + $0x30] sm:$0xff] }
 0x7ad   :  { %v6469_v24 = vld [vmem:[#allocation4 + $0x30] sm:$0xff]  ;;  %10441 = vmatmul.msk.f32.gmra.mxu0 %vm1136_vm4, %v14439_v2  ;;  %10469 = vmatmul.msk.f32.gmra.mxu1 %vm1136_vm4, %v14439_v2 }
 0x7ae   :  { %10431 = vmatmul.msk.f32.gmra.mxu2 %vm1136_vm4, %v6469_v24  ;;  %10459 = vmatmul.msk.f32.gmra.mxu3 %vm1136_vm4, %v6469_v24  ;;  %v6790_v26 = vld [vmem:[#allocation4 + $0x34] sm:$0xff] }
 0x7b9   :  { %v6243_v43 = vpop.f32.mrf.mxu0  ;;  %v6391_v37 = vpop.f32.mrf.mxu1 }
 0x7bc   :  { %v6166_v59 = vpop.f32.mrf.mxu2  ;;  %v6344_v31 = vpop.f32.mrf.mxu3 }
 0x7bd   :  { %v6244_v13 = vadd.f32 %v6243_v43, %v6166_v59  ;;  %v6392_v29 = vadd.f32 %v6391_v37, %v6344_v31 }
 0x7bf   :  { %v6262_v61 = vmul.f32 %v14334_v33, %v6244_v13  ;;  %v6407_v35 = vmul.f32 %v14334_v33, %v6392_v29 }
 0x7c1   :  { %v6275_v38 = vadd.f32 %v14339_v58, %v6262_v61  ;;  %v6417_v21 = vadd.f32 %v14339_v58, %v6407_v35 }
 0x7c3   :  { %v6285_v54 = vmax.f32 %v6275_v38, 0.0  ;;  %v6427_v27 = vmax.f32 %v6417_v21, 0.0 }
 0x7c5   :  { %6437 = vst.msk [vmem:[#allocation3 + $0x38] sm:$0xff] %vm1136_vm4, %v6285_v54  ;;  %v14566_v54 = vld [vmem:[%s14809_s23] ss:$0 sm:$0xff] }
 0x7c6   :  { %6450 = vst.msk [vmem:[#allocation4 + $0x3c] sm:$0xff] %vm1136_vm4, %v6427_v27 }
 0x7cc   :  { %v14453_v9 = vld [vmem:[#allocation3 + $0x38] sm:$0xff] }
 0x7cd   :  { %v6470_v18 = vld [vmem:[#allocation4 + $0x38] sm:$0xff]  ;;  %10442 = vmatmul.msk.f32.gmra.mxu0 %vm1136_vm4, %v14453_v9  ;;  %10470 = vmatmul.msk.f32.gmra.mxu1 %vm1136_vm4, %v14453_v9 }
 0x7ce   :  { %10432 = vmatmul.msk.f32.gmra.mxu2 %vm1136_vm4, %v6470_v18  ;;  %10460 = vmatmul.msk.f32.gmra.mxu3 %vm1136_vm4, %v6470_v18  ;;  %v6791_v37 = vld [vmem:[#allocation4 + $0x3c] sm:$0xff] }
 0x7d8   :  { %v6246_v23 = vpop.f32.mrf.mxu0  ;;  %v6394_v36 = vpop.f32.mrf.mxu1 }
 0x7dc   :  { %v6169_v14 = vpop.f32.mrf.mxu2  ;;  %v6347_v53 = vpop.f32.mrf.mxu3 }
 0x7dd   :  { %v6247_v15 = vadd.f32 %v6246_v23, %v6169_v14  ;;  %v6395_v55 = vadd.f32 %v6394_v36, %v6347_v53 }
 0x7df   :  { %v6263_v46 = vmul.f32 %v14334_v33, %v6247_v15  ;;  %v6408_v32 = vmul.f32 %v14334_v33, %v6395_v55 }
 0x7e0   :  { %v6249_v48 = vpop.f32.mrf.mxu0  ;;  %v6397_v20 = vpop.f32.mrf.mxu1 }
 0x7e1   :  { %v6276_v28 = vadd.f32 %v14339_v58, %v6263_v46  ;;  %v6418_v7 = vadd.f32 %v14339_v58, %v6408_v32 }
 0x7e3   :  { %v6286_v63 = vmax.f32 %v6276_v28, 0.0  ;;  %v6428_v22 = vmax.f32 %v6418_v7, 0.0 }
 0x7e4   :  { %v6172_v60 = vpop.f32.mrf.mxu2  ;;  %v6350_v5 = vpop.f32.mrf.mxu3 }
 0x7e5   :  { %6438 = vst.msk [vmem:[#allocation3 + $0x40] sm:$0xff] %vm1136_vm4, %v6286_v63  ;;  %v6250_v57 = vadd.f32 %v6249_v48, %v6172_v60  ;;  %v6398_v62 = vadd.f32 %v6397_v20, %v6350_v5 }
 0x7e6   :  { %6451 = vst.msk [vmem:[#allocation4 + $0x44] sm:$0xff] %vm1136_vm4, %v6428_v22 }
 0x7e7   :  { %v6264_v34 = vmul.f32 %v14334_v33, %v6250_v57  ;;  %v6409_v4 = vmul.f32 %v14334_v33, %v6398_v62 }
 0x7e8   :  { %v6734_v10 = vpop.f32.mrf.mxu1 }
 0x7e9   :  { %v6277_v41 = vadd.f32 %v14339_v58, %v6264_v34  ;;  %v6419_v3 = vadd.f32 %v14339_v58, %v6409_v4  ;;  %v10535_v4 = vld [vmem:[%s14810_s24 + $0x20] sm:$0xff] }
 0x7eb   :  { %v6287_v50 = vmax.f32 %v6277_v41, 0.0  ;;  %v6429_v19 = vmax.f32 %v6419_v3, 0.0  ;;  %v10559_v41 = vld [vmem:[%s14810_s24 + $0x40] sm:$0xff] }
 0x7ec   :  { %v14477_v12 = vld [vmem:[#allocation3 + $0x40] sm:$0xff] }
 0x7ed   :  { %6440 = vst.msk [vmem:[#allocation3 + $0x48] sm:$0xf] %vm6439_vm8, %v6287_v50  ;;  %v6471_v0 = vld [vmem:[#allocation4 + $0x40] sm:$0xff]  ;;  %10443 = vmatmul.msk.f32.gmra.mxu0 %vm1136_vm4, %v14477_v12  ;;  %10471 = vmatmul.msk.f32.gmra.mxu1 %vm1136_vm4, %v14477_v12  ;;  %v6530_v52 = vpop.f32.mrf.mxu2 }
 0x7ee   :  { %6452 = vst.msk [vmem:[#allocation4 + $0x4c] sm:$0xf] %vm6439_vm8, %v6429_v19  ;;  %10433 = vmatmul.msk.f32.gmra.mxu2 %vm1136_vm4, %v6471_v0  ;;  %10461 = vmatmul.msk.f32.gmra.mxu3 %vm1136_vm4, %v6471_v0  ;;  %v6792_v13 = vld [vmem:[#allocation4 + $0x44] sm:$0xff] }
 0x7f0   :  { %v6737_v44 = vpop.f32.mrf.mxu1 }
 0x7f4   :  { %v6462_v33 = vld [vmem:[#allocation3 + $0x48] sm:$0xff] }
 0x7f5   :  { %v6472_v58 = vld [vmem:[#allocation4 + $0x48] sm:$0xff]  ;;  %10444 = vmatmul.msk.f32.gmra.mxu0 %vm1136_vm4, %v6462_v33  ;;  %10472 = vmatmul.msk.f32.gmra.mxu1 %vm1136_vm4, %v6462_v33  ;;  %v6533_v24 = vpop.f32.mrf.mxu2  ;;  %v6803_v18 = vld [vmem:[#allocation3 + $0x48] sm:$0xf] }
 0x7f6   :  { %10434 = vmatmul.msk.f32.gmra.mxu2 %vm1136_vm4, %v6472_v58  ;;  %10462 = vmatmul.msk.f32.gmra.mxu3 %vm1136_vm4, %v6472_v58 }
 0x7f8   :  { %v6740_v31 = vpop.f32.mrf.mxu1 }
 0x7fd   :  { %10483 = vmatmul.msk.f32.vlgmr.msrb.gmra.mxu0 %vm1136_vm4, %v6784_v49  ;;  %10503 = vmatmul.msk.f32.vlgmr.msra.gmra.mxu1 %vm1136_vm4, %v6784_v49  ;;  %v6536_v29 = vpop.f32.mrf.mxu2 }
 0x7fe   :  { %10473 = vmatmul.msk.f32.vlgmr.msrb.gmra.mxu2 %vm1136_vm4, %v14362_v47  ;;  %10493 = vmatmul.msk.f32.vlgmr.msrb.gmra.mxu3 %vm1136_vm4, %v14362_v47  ;;  %v7116_v47 = vld [vmem:[%s14810_s24] sm:$0xff] }
 0x7ff   :  { %7243 = vmatpush.msra.mxu0 %v7116_v47 }
 0x800   :  { %v6743_v38 = vpop.f32.mrf.mxu1 }
 0x805   :  { %10484 = vmatmul.msk.f32.gmra.mxu0 %vm1136_vm4, %v6785_v25  ;;  %10504 = vmatmul.msk.f32.gmra.mxu1 %vm1136_vm4, %v6785_v25  ;;  %v6539_v36 = vpop.f32.mrf.mxu2 }
 0x806   :  { %10474 = vmatmul.msk.f32.gmra.mxu2 %vm1136_vm4, %v14376_v6  ;;  %10494 = vmatmul.msk.f32.gmra.mxu3 %vm1136_vm4, %v14376_v6  ;;  %v6787_v6 = vld [vmem:[#allocation4 + $0x1c] sm:$0xff] }
 0x808   :  { %v6746_v55 = vpop.f32.mrf.mxu1 }
 0x80d   :  { %10485 = vmatmul.msk.f32.gmra.mxu0 %vm1136_vm4, %v6786_v40  ;;  %10505 = vmatmul.msk.f32.gmra.mxu1 %vm1136_vm4, %v6786_v40  ;;  %v6542_v22 = vpop.f32.mrf.mxu2  ;;  %v10571_v40 = vld [vmem:[%s14810_s24 + $0x50] sm:$0xff] }
 0x80e   :  { %10475 = vmatmul.msk.f32.gmra.mxu2 %vm1136_vm4, %v14390_v8  ;;  %10495 = vmatmul.msk.f32.gmra.mxu3 %vm1136_vm4, %v14390_v8  ;;  %v6607_v8 = vpop.f32.mrf.mxu0 }
 0x80f   :  { %v6608_v21 = vadd.f32 %v6607_v8, %v6530_v52 }
 0x810   :  { %v6749_v60 = vpop.f32.mrf.mxu1 }
 0x811   :  { %v6640_v23 = vadd.f32 %v14566_v54, %v6608_v21 }
 0x813   :  { %v6650_v46 = vmax.f32 %v6640_v23, 0.0 }
 0x815   :  { %10486 = vmatmul.msk.f32.gmra.mxu0 %vm1136_vm4, %v6787_v6  ;;  %10506 = vmatmul.msk.f32.gmra.mxu1 %vm1136_vm4, %v6787_v6  ;;  %v6545_v50 = vpop.f32.mrf.mxu2 }
 0x816   :  { %10476 = vmatmul.msk.f32.gmra.mxu2 %vm1136_vm4, %v14404_v17  ;;  %10496 = vmatmul.msk.f32.gmra.mxu3 %vm1136_vm4, %v14404_v17  ;;  %v10536_v17 = vld [vmem:[%s14810_s24 + $0x28] sm:$0xff]  ;;  %v6610_v16 = vpop.f32.mrf.mxu0 }
 0x817   :  { %7332 = vmatpush.msra.mxu3 %v10536_v17  ;;  %v6611_v32 = vadd.f32 %v6610_v16, %v6533_v24 }
 0x819   :  { %v6641_v45 = vadd.f32 %v14566_v54, %v6611_v32  ;;  %7333 = vmatpush.msra.mxu3 %v10535_v4 }
 0x81b   :  { %v6651_v5 = vmax.f32 %v6641_v45, 0.0 }
 0x81d   :  { %10487 = vmatmul.msk.f32.gmra.mxu0 %vm1136_vm4, %v6788_v1  ;;  %10507 = vmatmul.msk.f32.gmra.mxu1 %vm1136_vm4, %v6788_v1 }
 0x81e   :  { %10477 = vmatmul.msk.f32.gmra.mxu2 %vm1136_vm4, %v14416_v51  ;;  %10497 = vmatmul.msk.f32.gmra.mxu3 %vm1136_vm4, %v14416_v51  ;;  %v6687_v51 = vpop.f32.mrf.mxu3  ;;  %v6613_v59 = vpop.f32.mrf.mxu0 }
 0x81f   :  { %v6735_v27 = vadd.f32 %v6734_v10, %v6687_v51  ;;  %v6614_v57 = vadd.f32 %v6613_v59, %v6536_v29 }
 0x821   :  { %v6764_v53 = vadd.f32 %v14566_v54, %v6735_v27  ;;  %v6642_v3 = vadd.f32 %v14566_v54, %v6614_v57 }
 0x823   :  { %v6774_v28 = vmax.f32 %v6764_v53, 0.0  ;;  %v6652_v33 = vmax.f32 %v6642_v3, 0.0 }
 0x825   :  { %10488 = vmatmul.msk.f32.gmra.mxu0 %vm1136_vm4, %v6789_v39  ;;  %10508 = vmatmul.msk.f32.gmra.mxu1 %vm1136_vm4, %v6789_v39 }
 0x826   :  { %10478 = vmatmul.msk.f32.gmra.mxu2 %vm1136_vm4, %v14425_v56  ;;  %10498 = vmatmul.msk.f32.gmra.mxu3 %vm1136_vm4, %v14425_v56  ;;  %v10560_v56 = vld [vmem:[%s14810_s24 + $0x48] sm:$0xff]  ;;  %v6690_v43 = vpop.f32.mrf.mxu3  ;;  %v6616_v35 = vpop.f32.mrf.mxu0 }
 0x827   :  { %7532 = vmatpush.msrb.mxu2 %v10560_v56  ;;  %v6738_v7 = vadd.f32 %v6737_v44, %v6690_v43  ;;  %v6617_v58 = vadd.f32 %v6616_v35, %v6539_v36 }
 0x829   :  { %v6765_v63 = vadd.f32 %v14566_v54, %v6738_v7  ;;  %7533 = vmatpush.msrb.mxu2 %v10559_v41  ;;  %v6643_v47 = vadd.f32 %v14566_v54, %v6617_v58 }
 0x82a   :  { %v6752_v0 = vpop.f32.mrf.mxu1 }
 0x82b   :  { %v6775_v62 = vmax.f32 %v6765_v63, 0.0  ;;  %v6653_v17 = vmax.f32 %v6643_v47, 0.0 }
 0x82d   :  { %10489 = vmatmul.msk.f32.gmra.mxu0 %vm1136_vm4, %v6790_v26  ;;  %10509 = vmatmul.msk.f32.gmra.mxu1 %vm1136_vm4, %v6790_v26 }
 0x82e   :  { %10479 = vmatmul.msk.f32.gmra.mxu2 %vm1136_vm4, %v14439_v2  ;;  %10499 = vmatmul.msk.f32.gmra.mxu3 %vm1136_vm4, %v14439_v2  ;;  %v10572_v2 = vld [vmem:[%s14810_s24 + $0x58] sm:$0xff]  ;;  %v6693_v61 = vpop.f32.mrf.mxu3  ;;  %v6619_v15 = vpop.f32.mrf.mxu0  ;;  %s11109_s24 = smov [#allocation7]  }
 0x82f   :  { %7632 = vmatpush.msrb.mxu0 %v10572_v2  ;;  %v6741_v34 = vadd.f32 %v6740_v31, %v6693_v61  ;;  %v6620_v52 = vadd.f32 %v6619_v15, %v6542_v22  ;;  %s7707_s20 = sshll.u32 %s11109_s24, 4  ;;  %s7708_s20 = int_to_ptr.vmem [resolvable:$true] %s7707_s20 }
 0x830   :  { %7712 = dma.vmem_to_hbm [thread:$0]  %s7708_s20, 64, %s7710_s14, [#allocation8]  }
 0x831   :  { %v6766_v42 = vadd.f32 %v14566_v54, %v6741_v34  ;;  %7633 = vmatpush.msrb.mxu0 %v10571_v40  ;;  %v6548_v1 = vpop.f32.mrf.mxu2  ;;  %v6644_v44 = vadd.f32 %v14566_v54, %v6620_v52 }
 0x833   :  { %v6776_v49 = vmax.f32 %v6766_v42, 0.0 }
 0x835   :  { %10490 = vmatmul.msk.f32.gmra.mxu0 %vm1136_vm4, %v6791_v37  ;;  %10510 = vmatmul.msk.f32.gmra.mxu1 %vm1136_vm4, %v6791_v37  ;;  %v6654_v37 = vmax.f32 %v6644_v44, 0.0 }
 0x836   :  { %10480 = vmatmul.msk.f32.gmra.mxu2 %vm1136_vm4, %v14453_v9  ;;  %10500 = vmatmul.msk.f32.gmra.mxu3 %vm1136_vm4, %v14453_v9  ;;  %v6793_v9 = vld [vmem:[#allocation4 + $0x4c] sm:$0xf]  ;;  %v6696_v14 = vpop.f32.mrf.mxu3  ;;  %v6622_v20 = vpop.f32.mrf.mxu0 }
 0x837   :  { %v6744_v25 = vadd.f32 %v6743_v38, %v6696_v14  ;;  %v6623_v59 = vadd.f32 %v6622_v20, %v6545_v50 }
 0x839   :  { %v6767_v6 = vadd.f32 %v14566_v54, %v6744_v25 }
 0x83b   :  { %v6777_v51 = vmax.f32 %v6767_v6, 0.0 }
 0x83d   :  { %10491 = vmatmul.msk.f32.gmra.mxu0 %vm1136_vm4, %v6792_v13  ;;  %10511 = vmatmul.msk.f32.gmra.mxu1 %vm1136_vm4, %v6792_v13  ;;  %v6645_v13 = vadd.f32 %v14566_v54, %v6623_v59 }
 0x83e   :  { %10481 = vmatmul.msk.f32.gmra.mxu2 %vm1136_vm4, %v14477_v12  ;;  %10501 = vmatmul.msk.f32.gmra.mxu3 %vm1136_vm4, %v14477_v12  ;;  %v6699_v48 = vpop.f32.mrf.mxu3  ;;  %v6625_v12 = vpop.f32.mrf.mxu0 }
 0x83f   :  { %v6747_v16 = vadd.f32 %v6746_v55, %v6699_v48  ;;  %v6655_v27 = vmax.f32 %v6645_v13, 0.0 }
 0x841   :  { %v6768_v26 = vadd.f32 %v14566_v54, %v6747_v16 }
 0x843   :  { %v6778_v31 = vmax.f32 %v6768_v26, 0.0 }
 0x845   :  { %10492 = vmatmul.msk.f32.gmra.mxu0 %vm1136_vm4, %v6793_v9  ;;  %10512 = vmatmul.msk.f32.gmra.mxu1 %vm1136_vm4, %v6793_v9  ;;  %v6626_v9 = vadd.f32 %v6625_v12, %v6548_v1 }
 0x846   :  { %10482 = vmatmul.msk.f32.gmra.mxu2 %vm1136_vm4, %v6803_v18  ;;  %10502 = vmatmul.msk.f32.gmra.mxu3 %vm1136_vm4, %v6803_v18  ;;  %v6702_v19 = vpop.f32.mrf.mxu3 }
 0x847   :  { %v6750_v2 = vadd.f32 %v6749_v60, %v6702_v19  ;;  %v6646_v36 = vadd.f32 %v14566_v54, %v6626_v9 }
 0x849   :  { %v6769_v29 = vadd.f32 %v14566_v54, %v6750_v2  ;;  %v6656_v32 = vmax.f32 %v6646_v36, 0.0 }
 0x84a   :  { %v6628_v10 = vpop.f32.mrf.mxu0  ;;  %v6755_v39 = vpop.f32.mrf.mxu1 }
 0x84b   :  { %v6779_v18 = vmax.f32 %v6769_v29, 0.0 }
 0x84d   :  { %10525 = vmatmul.msk.f32.vlgmr.msra.gmra.mxu0 %vm439_vm2, %v6650_v46 }
 0x84e   :  { %10515 = vmatmul.msk.f32.vlgmr.msra.gmra.mxu2 %vm439_vm2, %v6774_v28  ;;  %v6705_v8 = vpop.f32.mrf.mxu3 }
 0x84f   :  { %v6753_v23 = vadd.f32 %v6752_v0, %v6705_v8 }
 0x851   :  { %v6551_v56 = vpop.f32.mrf.mxu2  ;;  %v6770_v14 = vadd.f32 %v14566_v54, %v6753_v23 }
 0x852   :  { %v6629_v28 = vadd.f32 %v6628_v10, %v6551_v56 }
 0x853   :  { %v6780_v7 = vmax.f32 %v6770_v14, 0.0 }
 0x854   :  { %v6647_v63 = vadd.f32 %v14566_v54, %v6629_v28 }
 0x855   :  { %10526 = vmatmul.msk.f32.gmra.mxu0 %vm439_vm2, %v6651_v5 }
 0x856   :  { %10516 = vmatmul.msk.f32.gmra.mxu2 %vm439_vm2, %v6775_v62  ;;  %v6708_v30 = vpop.f32.mrf.mxu3  ;;  %v6657_v34 = vmax.f32 %v6647_v63, 0.0 }
 0x857   :  { %v6756_v45 = vadd.f32 %v6755_v39, %v6708_v30 }
 0x859   :  { %v6771_v22 = vadd.f32 %v14566_v54, %v6756_v45 }
 0x85b   :  { %v6781_v41 = vmax.f32 %v6771_v22, 0.0 }
 0x85d   :  { %10527 = vmatmul.msk.f32.gmra.mxu0 %vm439_vm2, %v6652_v33 }
 0x85e   :  { %10517 = vmatmul.msk.f32.gmra.mxu2 %vm439_vm2, %v6776_v49 }
 0x865   :  { %10528 = vmatmul.msk.f32.gmra.mxu0 %vm439_vm2, %v6653_v17 }
 0x866   :  { %10518 = vmatmul.msk.f32.gmra.mxu2 %vm439_vm2, %v6777_v51 }
 0x86a   :  { %v6631_v24 = vpop.f32.mrf.mxu0  ;;  %v6758_v43 = vpop.f32.mrf.mxu1 }
 0x86d   :  { %10529 = vmatmul.msk.f32.gmra.mxu0 %vm439_vm2, %v6654_v37 }
 0x86e   :  { %10519 = vmatmul.msk.f32.gmra.mxu2 %vm439_vm2, %v6778_v31 }
 0x871   :  { %v6554_v61 = vpop.f32.mrf.mxu2  ;;  %v6711_v35 = vpop.f32.mrf.mxu3 }
 0x872   :  { %v6634_v38 = vpop.f32.mrf.mxu0  ;;  %v6761_v21 = vpop.f32.mrf.mxu1  ;;  %v6632_v4 = vadd.f32 %v6631_v24, %v6554_v61  ;;  %v6759_v3 = vadd.f32 %v6758_v43, %v6711_v35 }
 0x874   :  { %v6648_v0 = vadd.f32 %v14566_v54, %v6632_v4  ;;  %v6772_v33 = vadd.f32 %v14566_v54, %v6759_v3 }
 0x875   :  { %10530 = vmatmul.msk.f32.gmra.mxu0 %vm439_vm2, %v6655_v27 }
 0x876   :  { %10520 = vmatmul.msk.f32.gmra.mxu2 %vm439_vm2, %v6779_v18  ;;  %v6658_v6 = vmax.f32 %v6648_v0, 0.0  ;;  %v6782_v8 = vmax.f32 %v6772_v33, 0.0 }
 0x879   :  { %v6557_v53 = vpop.f32.mrf.mxu2  ;;  %v6714_v15 = vpop.f32.mrf.mxu3 }
 0x87a   :  { %v6928_v55 = vpop.f32.mrf.mxu0  ;;  %v7042_v46 = vpop.f32.mrf.mxu1  ;;  %v6635_v1 = vadd.f32 %v6634_v38, %v6557_v53  ;;  %v6762_v10 = vadd.f32 %v6761_v21, %v6714_v15 }
 0x87c   :  { %v6649_v16 = vadd.f32 %v14566_v54, %v6635_v1  ;;  %v6773_v26 = vadd.f32 %v14566_v54, %v6762_v10 }
 0x87d   :  { %10531 = vmatmul.msk.f32.gmra.mxu0 %vm439_vm2, %v6656_v32 }
 0x87e   :  { %10521 = vmatmul.msk.f32.gmra.mxu2 %vm439_vm2, %v6780_v7  ;;  %v6659_v2 = vmax.f32 %v6649_v16, 0.0  ;;  %v6783_v13 = vmax.f32 %v6773_v26, 0.0 }
 0x881   :  { %v6851_v48 = vpop.f32.mrf.mxu2  ;;  %v6995_v20 = vpop.f32.mrf.mxu3 }
 0x882   :  { %v6929_v60 = vadd.f32 %v6928_v55, %v6851_v48  ;;  %v7043_v5 = vadd.f32 %v7042_v46, %v6995_v20  ;;  %v6931_v57 = vpop.f32.mrf.mxu0  ;;  %v7045_v62 = vpop.f32.mrf.mxu1 }
 0x884   :  { %v6958_v42 = vadd.f32 %v14566_v54, %v6929_v60  ;;  %v7072_v50 = vadd.f32 %v14566_v54, %v7043_v5 }
 0x885   :  { %10532 = vmatmul.msk.f32.gmra.mxu0 %vm439_vm2, %v6657_v34 }
 0x886   :  { %v6968_v19 = vmax.f32 %v6958_v42, 0.0  ;;  %v7082_v12 = vmax.f32 %v7072_v50, 0.0  ;;  %10522 = vmatmul.msk.f32.gmra.mxu2 %vm439_vm2, %v6781_v41 }
 0x888   :  { %7093 = vst.msk [vmem:[#allocation5 + $0x4] sm:$0xff] %vm439_vm2, %v6968_v19 }
 0x889   :  { %7105 = vst.msk [vmem:[#allocation6 + $0x4] sm:$0xff] %vm439_vm2, %v7082_v12  ;;  %v6854_v58 = vpop.f32.mrf.mxu2  ;;  %v6998_v49 = vpop.f32.mrf.mxu3 }
 0x88a   :  { %v6932_v25 = vadd.f32 %v6931_v57, %v6854_v58  ;;  %v7046_v11 = vadd.f32 %v7045_v62, %v6998_v49  ;;  %v6934_v40 = vpop.f32.mrf.mxu0  ;;  %v7048_v47 = vpop.f32.mrf.mxu1 }
 0x88c   :  { %v6959_v39 = vadd.f32 %v14566_v54, %v6932_v25  ;;  %v7073_v17 = vadd.f32 %v14566_v54, %v7046_v11 }
 0x88d   :  { %10533 = vmatmul.msk.f32.gmra.mxu0 %vm439_vm2, %v6658_v6 }
 0x88e   :  { %v6969_v52 = vmax.f32 %v6959_v39, 0.0  ;;  %v7083_v51 = vmax.f32 %v7073_v17, 0.0  ;;  %10523 = vmatmul.msk.f32.gmra.mxu2 %vm439_vm2, %v6782_v8 }
 0x88f   :  { %v7275_v44 = vld [vmem:[#allocation5 + $0x4] sm:$0xff] }
 0x890   :  { %7094 = vst.msk [vmem:[#allocation5 + $0xc] sm:$0xff] %vm439_vm2, %v6969_v52  ;;  %10537 = vmatmul.msk.f32.vlgmr.msra.gmra.mxu3 %vm439_vm2, %v7275_v44  ;;  %v7375_v56 = vld [vmem:[#allocation6 + $0x4] sm:$0xff] }
 0x891   :  { %7106 = vst.msk [vmem:[#allocation6 + $0xc] sm:$0xff] %vm439_vm2, %v7083_v51  ;;  %10549 = vmatmul.msk.f32.vlgmr.msrb.gmra.mxu1 %vm439_vm2, %v7375_v56  ;;  %v6857_v30 = vpop.f32.mrf.mxu2  ;;  %v7001_v24 = vpop.f32.mrf.mxu3  ;;  %v7575_v46 = vld [vmem:[#allocation5] sm:$0xff]  ;;  %v7475_v32 = vld [vmem:[#allocation6] sm:$0xff] }
 0x892   :  { %v6935_v43 = vadd.f32 %v6934_v40, %v6857_v30  ;;  %v7049_v37 = vadd.f32 %v7048_v47, %v7001_v24  ;;  %v6937_v59 = vpop.f32.mrf.mxu0  ;;  %v7051_v31 = vpop.f32.mrf.mxu1 }
 0x894   :  { %v6960_v29 = vadd.f32 %v14566_v54, %v6935_v43  ;;  %v7074_v61 = vadd.f32 %v14566_v54, %v7049_v37 }
 0x895   :  { %10534 = vmatmul.msk.f32.gmra.mxu0 %vm439_vm2, %v6659_v2 }
 0x896   :  { %v6970_v35 = vmax.f32 %v6960_v29, 0.0  ;;  %v7084_v38 = vmax.f32 %v7074_v61, 0.0  ;;  %10524 = vmatmul.msk.f32.gmra.mxu2 %vm439_vm2, %v6783_v13 }
 0x897   :  { %v7276_v21 = vld [vmem:[#allocation5 + $0xc] sm:$0xff] }
 0x898   :  { %7095 = vst.msk [vmem:[#allocation5 + $0x14] sm:$0xff] %vm439_vm2, %v6970_v35  ;;  %10538 = vmatmul.msk.f32.gmra.mxu3 %vm439_vm2, %v7276_v21  ;;  %v7376_v27 = vld [vmem:[#allocation6 + $0xc] sm:$0xff] }
 0x899   :  { %7107 = vst.msk [vmem:[#allocation6 + $0x14] sm:$0xff] %vm439_vm2, %v7084_v38  ;;  %10550 = vmatmul.msk.f32.gmra.mxu1 %vm439_vm2, %v7376_v27  ;;  %v6860_v9 = vpop.f32.mrf.mxu2  ;;  %v7004_v18 = vpop.f32.mrf.mxu3  ;;  %v7576_v4 = vld [vmem:[#allocation5 + $0x8] sm:$0xff]  ;;  %v7476_v41 = vld [vmem:[#allocation6 + $0x8] sm:$0xff] }
 0x89a   :  { %v6938_v23 = vadd.f32 %v6937_v59, %v6860_v9  ;;  %v7052_v36 = vadd.f32 %v7051_v31, %v7004_v18  ;;  %v6940_v14 = vpop.f32.mrf.mxu0  ;;  %v7054_v53 = vpop.f32.mrf.mxu1 }
 0x89c   :  { %v6961_v15 = vadd.f32 %v14566_v54, %v6938_v23  ;;  %v7075_v55 = vadd.f32 %v14566_v54, %v7052_v36 }
 0x89d   :  { %10573 = vmatmul.msk.f32.vlgmr.msrb.gmra.mxu0 %vm439_vm2, %v7575_v46 }
 0x89e   :  { %v6971_v28 = vmax.f32 %v6961_v15, 0.0  ;;  %v7085_v7 = vmax.f32 %v7075_v55, 0.0  ;;  %10561 = vmatmul.msk.f32.vlgmr.msrb.gmra.mxu2 %vm439_vm2, %v7475_v32 }
 0x89f   :  { %v7277_v45 = vld [vmem:[#allocation5 + $0x14] sm:$0xff] }
 0x8a0   :  { %7096 = vst.msk [vmem:[#allocation5 + $0x1c] sm:$0xff] %vm439_vm2, %v6971_v28  ;;  %10539 = vmatmul.msk.f32.gmra.mxu3 %vm439_vm2, %v7277_v45  ;;  %v7377_v63 = vld [vmem:[#allocation6 + $0x14] sm:$0xff] }
 0x8a1   :  { %7108 = vst.msk [vmem:[#allocation6 + $0x1c] sm:$0xff] %vm439_vm2, %v7085_v7  ;;  %10551 = vmatmul.msk.f32.gmra.mxu1 %vm439_vm2, %v7377_v63  ;;  %v6863_v22 = vpop.f32.mrf.mxu2  ;;  %v7007_v48 = vpop.f32.mrf.mxu3  ;;  %v7577_v47 = vld [vmem:[#allocation5 + $0x10] sm:$0xff]  ;;  %v7477_v6 = vld [vmem:[#allocation6 + $0x10] sm:$0xff] }
 0x8a2   :  { %v6941_v20 = vadd.f32 %v6940_v14, %v6863_v22  ;;  %v7055_v60 = vadd.f32 %v7054_v53, %v7007_v48  ;;  %v6943_v5 = vpop.f32.mrf.mxu0  ;;  %v7057_v57 = vpop.f32.mrf.mxu1 }
 0x8a4   :  { %v6962_v62 = vadd.f32 %v14566_v54, %v6941_v20  ;;  %v7076_v34 = vadd.f32 %v14566_v54, %v7055_v60 }
 0x8a5   :  { %10574 = vmatmul.msk.f32.gmra.mxu0 %vm439_vm2, %v7576_v4 }
 0x8a6   :  { %v6972_v3 = vmax.f32 %v6962_v62, 0.0  ;;  %v7086_v42 = vmax.f32 %v7076_v34, 0.0  ;;  %10562 = vmatmul.msk.f32.gmra.mxu2 %vm439_vm2, %v7476_v41 }
 0x8a7   :  { %v7278_v50 = vld [vmem:[#allocation5 + $0x1c] sm:$0xff] }
 0x8a8   :  { %7097 = vst.msk [vmem:[#allocation5 + $0x24] sm:$0xff] %vm439_vm2, %v6972_v3  ;;  %10540 = vmatmul.msk.f32.gmra.mxu3 %vm439_vm2, %v7278_v50  ;;  %v7378_v19 = vld [vmem:[#allocation6 + $0x1c] sm:$0xff] }
 0x8a9   :  { %7109 = vst.msk [vmem:[#allocation6 + $0x24] sm:$0xff] %vm439_vm2, %v7086_v42  ;;  %10552 = vmatmul.msk.f32.gmra.mxu1 %vm439_vm2, %v7378_v19  ;;  %v6866_v12 = vpop.f32.mrf.mxu2  ;;  %v7010_v0 = vpop.f32.mrf.mxu3  ;;  %v7578_v24 = vld [vmem:[#allocation5 + $0x18] sm:$0xff]  ;;  %v7478_v43 = vld [vmem:[#allocation6 + $0x18] sm:$0xff] }
 0x8aa   :  { %v6944_v33 = vadd.f32 %v6943_v5, %v6866_v12  ;;  %v7058_v58 = vadd.f32 %v7057_v57, %v7010_v0  ;;  %v6946_v49 = vpop.f32.mrf.mxu0  ;;  %v7060_v25 = vpop.f32.mrf.mxu1 }
 0x8ac   :  { %v6963_v11 = vadd.f32 %v14566_v54, %v6944_v33  ;;  %v7077_v40 = vadd.f32 %v14566_v54, %v7058_v58 }
 0x8ad   :  { %10575 = vmatmul.msk.f32.gmra.mxu0 %vm439_vm2, %v7577_v47 }
 0x8ae   :  { %v6973_v1 = vmax.f32 %v6963_v11, 0.0  ;;  %v7087_v8 = vmax.f32 %v7077_v40, 0.0  ;;  %10563 = vmatmul.msk.f32.gmra.mxu2 %vm439_vm2, %v7477_v6 }
 0x8af   :  { %v7279_v10 = vld [vmem:[#allocation5 + $0x24] sm:$0xff] }
 0x8b0   :  { %7098 = vst.msk [vmem:[#allocation5 + $0x2c] sm:$0xff] %vm439_vm2, %v6973_v1  ;;  %10541 = vmatmul.msk.f32.gmra.mxu3 %vm439_vm2, %v7279_v10  ;;  %v7379_v39 = vld [vmem:[#allocation6 + $0x24] sm:$0xff] }
 0x8b1   :  { %7110 = vst.msk [vmem:[#allocation6 + $0x2c] sm:$0xff] %vm439_vm2, %v7087_v8  ;;  %10553 = vmatmul.msk.f32.gmra.mxu1 %vm439_vm2, %v7379_v39  ;;  %v6869_v17 = vpop.f32.mrf.mxu2  ;;  %v7013_v52 = vpop.f32.mrf.mxu3  ;;  %v7579_v9 = vld [vmem:[#allocation5 + $0x20] sm:$0xff]  ;;  %v7479_v18 = vld [vmem:[#allocation6 + $0x20] sm:$0xff] }
 0x8b2   :  { %v6947_v51 = vadd.f32 %v6946_v49, %v6869_v17  ;;  %v7061_v16 = vadd.f32 %v7060_v25, %v7013_v52  ;;  %v6949_v44 = vpop.f32.mrf.mxu0  ;;  %v7063_v30 = vpop.f32.mrf.mxu1 }
 0x8b4   :  { %v6964_v26 = vadd.f32 %v14566_v54, %v6947_v51  ;;  %v7078_v56 = vadd.f32 %v14566_v54, %v7061_v16 }
 0x8b5   :  { %10576 = vmatmul.msk.f32.gmra.mxu0 %vm439_vm2, %v7578_v24 }
 0x8b6   :  { %v6974_v37 = vmax.f32 %v6964_v26, 0.0  ;;  %v7088_v59 = vmax.f32 %v7078_v56, 0.0  ;;  %10564 = vmatmul.msk.f32.gmra.mxu2 %vm439_vm2, %v7478_v43 }
 0x8b7   :  { %v7280_v31 = vld [vmem:[#allocation5 + $0x2c] sm:$0xff] }
 0x8b8   :  { %7099 = vst.msk [vmem:[#allocation5 + $0x34] sm:$0xff] %vm439_vm2, %v6974_v37  ;;  %10542 = vmatmul.msk.f32.gmra.mxu3 %vm439_vm2, %v7280_v31  ;;  %v7380_v2 = vld [vmem:[#allocation6 + $0x2c] sm:$0xff] }
 0x8b9   :  { %7111 = vst.msk [vmem:[#allocation6 + $0x34] sm:$0xff] %vm439_vm2, %v7088_v59  ;;  %10554 = vmatmul.msk.f32.gmra.mxu1 %vm439_vm2, %v7380_v2  ;;  %v6872_v13 = vpop.f32.mrf.mxu2  ;;  %v7016_v29 = vpop.f32.mrf.mxu3  ;;  %v7580_v22 = vld [vmem:[#allocation5 + $0x28] sm:$0xff]  ;;  %v7480_v48 = vld [vmem:[#allocation6 + $0x28] sm:$0xff] }
 0x8ba   :  { %v6950_v61 = vadd.f32 %v6949_v44, %v6872_v13  ;;  %v7064_v35 = vadd.f32 %v7063_v30, %v7016_v29  ;;  %v6952_v38 = vpop.f32.mrf.mxu0  ;;  %v7066_v14 = vpop.f32.mrf.mxu1 }
 0x8bc   :  { %v6965_v21 = vadd.f32 %v14566_v54, %v6950_v61  ;;  %v7079_v27 = vadd.f32 %v14566_v54, %v7064_v35 }
 0x8bd   :  { %10577 = vmatmul.msk.f32.gmra.mxu0 %vm439_vm2, %v7579_v9 }
 0x8be   :  { %v6975_v23 = vmax.f32 %v6965_v21, 0.0  ;;  %v7089_v36 = vmax.f32 %v7079_v27, 0.0  ;;  %10565 = vmatmul.msk.f32.gmra.mxu2 %vm439_vm2, %v7479_v18 }
 0x8bf   :  { %v7281_v53 = vld [vmem:[#allocation5 + $0x34] sm:$0xff] }
 0x8c0   :  { %7100 = vst.msk [vmem:[#allocation5 + $0x3c] sm:$0xff] %vm439_vm2, %v6975_v23  ;;  %10543 = vmatmul.msk.f32.gmra.mxu3 %vm439_vm2, %v7281_v53  ;;  %v7381_v15 = vld [vmem:[#allocation6 + $0x34] sm:$0xff] }
 0x8c1   :  { %7112 = vst.msk [vmem:[#allocation6 + $0x3c] sm:$0xff] %vm439_vm2, %v7089_v36  ;;  %10555 = vmatmul.msk.f32.gmra.mxu1 %vm439_vm2, %v7381_v15  ;;  %v6875_v55 = vpop.f32.mrf.mxu2  ;;  %v7019_v46 = vpop.f32.mrf.mxu3  ;;  %v7581_v12 = vld [vmem:[#allocation5 + $0x30] sm:$0xff]  ;;  %v7481_v0 = vld [vmem:[#allocation6 + $0x30] sm:$0xff] }
 0x8c2   :  { %v6953_v32 = vadd.f32 %v6952_v38, %v6875_v55  ;;  %v7067_v28 = vadd.f32 %v7066_v14, %v7019_v46  ;;  %v6955_v7 = vpop.f32.mrf.mxu0  ;;  %v7069_v57 = vpop.f32.mrf.mxu1 }
 0x8c4   :  { %v6966_v45 = vadd.f32 %v14566_v54, %v6953_v32  ;;  %v7080_v63 = vadd.f32 %v14566_v54, %v7067_v28 }
 0x8c5   :  { %10578 = vmatmul.msk.f32.gmra.mxu0 %vm439_vm2, %v7580_v22 }
 0x8c6   :  { %v6976_v20 = vmax.f32 %v6966_v45, 0.0  ;;  %v7090_v60 = vmax.f32 %v7080_v63, 0.0  ;;  %10566 = vmatmul.msk.f32.gmra.mxu2 %vm439_vm2, %v7480_v48 }
 0x8c7   :  { %v7282_v5 = vld [vmem:[#allocation5 + $0x3c] sm:$0xff] }
 0x8c8   :  { %7101 = vst.msk [vmem:[#allocation5 + $0x44] sm:$0xff] %vm439_vm2, %v6976_v20  ;;  %10544 = vmatmul.msk.f32.gmra.mxu3 %vm439_vm2, %v7282_v5  ;;  %v7382_v62 = vld [vmem:[#allocation6 + $0x3c] sm:$0xff] }
 0x8c9   :  { %7113 = vst.msk [vmem:[#allocation6 + $0x44] sm:$0xff] %vm439_vm2, %v7090_v60  ;;  %10556 = vmatmul.msk.f32.gmra.mxu1 %vm439_vm2, %v7382_v62  ;;  %v6878_v34 = vpop.f32.mrf.mxu2  ;;  %v7022_v4 = vpop.f32.mrf.mxu3  ;;  %v7582_v47 = vld [vmem:[#allocation5 + $0x38] sm:$0xff]  ;;  %v7482_v6 = vld [vmem:[#allocation6 + $0x38] sm:$0xff] }
 0x8ca   :  { %v6956_v41 = vadd.f32 %v6955_v7, %v6878_v34  ;;  %v7070_v3 = vadd.f32 %v7069_v57, %v7022_v4  ;;  %v7245_v42 = vpop.f32.mrf.mxu0  ;;  %v14727_v60 = vld [vmem:[%s14811_s25] ss:$0 sm:$0xff] }
 0x8cc   :  { %v6967_v50 = vadd.f32 %v14566_v54, %v6956_v41  ;;  %v7081_v19 = vadd.f32 %v14566_v54, %v7070_v3 }
 0x8cd   :  { %10579 = vmatmul.msk.f32.gmra.mxu0 %vm439_vm2, %v7581_v12 }
 0x8ce   :  { %v6977_v33 = vmax.f32 %v6967_v50, 0.0  ;;  %v7091_v58 = vmax.f32 %v7081_v19, 0.0  ;;  %10567 = vmatmul.msk.f32.gmra.mxu2 %vm439_vm2, %v7481_v0 }
 0x8cf   :  { %v7283_v49 = vld [vmem:[#allocation5 + $0x44] sm:$0xff] }
 0x8d0   :  { %7102 = vst.msk [vmem:[#allocation5 + $0x4c] sm:$0xf] %vm3076_vm6, %v6977_v33  ;;  %10545 = vmatmul.msk.f32.gmra.mxu3 %vm439_vm2, %v7283_v49  ;;  %v7383_v25 = vld [vmem:[#allocation6 + $0x44] sm:$0xff] }
 0x8d1   :  { %7114 = vst.msk [vmem:[#allocation6 + $0x4c] sm:$0xf] %vm3076_vm6, %v7091_v58  ;;  %10557 = vmatmul.msk.f32.gmra.mxu1 %vm439_vm2, %v7383_v25  ;;  %v7168_v11 = vpop.f32.mrf.mxu2  ;;  %v7583_v52 = vld [vmem:[#allocation5 + $0x40] sm:$0xff]  ;;  %v7483_v51 = vld [vmem:[#allocation6 + $0x40] sm:$0xff] }
 0x8d2   :  { %v7246_v54 = vadd.f32 %v7245_v42, %v7168_v11  ;;  %v7248_v40 = vpop.f32.mrf.mxu0 }
 0x8d5   :  { %10580 = vmatmul.msk.f32.gmra.mxu0 %vm439_vm2, %v7582_v47 }
 0x8d6   :  { %10568 = vmatmul.msk.f32.gmra.mxu2 %vm439_vm2, %v7482_v6 }
 0x8d7   :  { %v7284_v1 = vld [vmem:[#allocation5 + $0x4c] sm:$0xff] }
 0x8d8   :  { %10546 = vmatmul.msk.f32.gmra.mxu3 %vm439_vm2, %v7284_v1  ;;  %v7384_v8 = vld [vmem:[#allocation6 + $0x4c] sm:$0xff] }
 0x8d9   :  { %10558 = vmatmul.msk.f32.gmra.mxu1 %vm439_vm2, %v7384_v8  ;;  %v7171_v10 = vpop.f32.mrf.mxu2  ;;  %v7584_v56 = vld [vmem:[#allocation5 + $0x48] sm:$0xff]  ;;  %v7484_v30 = vld [vmem:[#allocation6 + $0x48] sm:$0xff] }
 0x8da   :  { %v7249_v39 = vadd.f32 %v7248_v40, %v7171_v10  ;;  %v7251_v17 = vpop.f32.mrf.mxu0 }
 0x8dd   :  { %10581 = vmatmul.msk.f32.gmra.mxu0 %vm439_vm2, %v7583_v52 }
 0x8de   :  { %10569 = vmatmul.msk.f32.gmra.mxu2 %vm439_vm2, %v7483_v51 }
 0x8e1   :  { %v7174_v16 = vpop.f32.mrf.mxu2 }
 0x8e2   :  { %v7252_v44 = vadd.f32 %v7251_v17, %v7174_v16  ;;  %v7254_v26 = vpop.f32.mrf.mxu0 }
 0x8e5   :  { %10582 = vmatmul.msk.f32.gmra.mxu0 %vm439_vm2, %v7584_v56 }
 0x8e6   :  { %10570 = vmatmul.msk.f32.gmra.mxu2 %vm439_vm2, %v7484_v30 }
 0x8e9   :  { %v7177_v24 = vpop.f32.mrf.mxu2 }
 0x8ea   :  { %v14704_v43 = vadd.f32 %v7254_v26, %v7177_v24  ;;  %v7257_v37 = vpop.f32.mrf.mxu0 }
 0x8f1   :  { %v7180_v59 = vpop.f32.mrf.mxu2 }
 0x8f2   :  { %v14709_v31 = vadd.f32 %v7257_v37, %v7180_v59  ;;  %v7260_v2 = vpop.f32.mrf.mxu0 }
 0x8f9   :  { %v7183_v13 = vpop.f32.mrf.mxu2 }
 0x8fa   :  { %v14714_v29 = vadd.f32 %v7260_v2, %v7183_v13  ;;  %v7263_v61 = vpop.f32.mrf.mxu0 }
 0x901   :  { %v7186_v35 = vpop.f32.mrf.mxu2 }
 0x902   :  { %v14716_v38 = vadd.f32 %v7263_v61, %v7186_v35  ;;  %v7266_v21 = vpop.f32.mrf.mxu0 }
 0x909   :  { %v7189_v27 = vpop.f32.mrf.mxu2 }
 0x90a   :  { %v14718_v9 = vadd.f32 %v7266_v21, %v7189_v27  ;;  %v7269_v18 = vpop.f32.mrf.mxu0 }
 0x90e   :  { %v7435_v23 = vpop.f32.mrf.mxu1 }
 0x911   :  { %v7192_v36 = vpop.f32.mrf.mxu2 }
 0x912   :  { %v14720_v14 = vadd.f32 %v7269_v18, %v7192_v36  ;;  %v7272_v53 = vpop.f32.mrf.mxu0 }
 0x913   :  { %v7335_v15 = vpop.f32.mrf.mxu3 }
 0x914   :  { %v7365_v45 = vadd.f32 %v7335_v15, %v7246_v54 }
 0x916   :  { %v7438_v55 = vpop.f32.mrf.mxu1  ;;  %v7465_v63 = vadd.f32 %v7435_v23, %v7365_v45 }
 0x919   :  { %v7195_v46 = vpop.f32.mrf.mxu2 }
 0x91a   :  { %v14722_v32 = vadd.f32 %v7272_v53, %v7195_v46  ;;  %v7635_v28 = vpop.f32.mrf.mxu0 }
 0x91b   :  { %v7338_v7 = vpop.f32.mrf.mxu3 }
 0x91c   :  { %v7366_v62 = vadd.f32 %v7338_v7, %v7249_v39 }
 0x91e   :  { %v7441_v22 = vpop.f32.mrf.mxu1  ;;  %v7466_v41 = vadd.f32 %v7438_v55, %v7366_v62 }
 0x921   :  { %v7535_v48 = vpop.f32.mrf.mxu2 }
 0x922   :  { %v7565_v20 = vadd.f32 %v7535_v48, %v7465_v63  ;;  %v7638_v5 = vpop.f32.mrf.mxu0 }
 0x923   :  { %v7341_v57 = vpop.f32.mrf.mxu3 }
 0x924   :  { %v7665_v34 = vadd.f32 %v7635_v28, %v7565_v20  ;;  %v7367_v0 = vadd.f32 %v7341_v57, %v7252_v44 }
 0x926   :  { %v7679_v4 = vadd.f32 %v14727_v60, %v7665_v34  ;;  %v7444_v19 = vpop.f32.mrf.mxu1  ;;  %v7467_v49 = vadd.f32 %v7441_v22, %v7367_v0 }
 0x928   :  { %7690 = vst.msk [vmem:[%s14812_s26] sm:$0xff] %vm7689_vm9, %v7679_v4 }
 0x929   :  { %v7538_v3 = vpop.f32.mrf.mxu2 }
 0x92a   :  { %v7566_v42 = vadd.f32 %v7538_v3, %v7466_v41  ;;  %v7641_v50 = vpop.f32.mrf.mxu0 }
 0x92b   :  { %v7344_v12 = vpop.f32.mrf.mxu3 }
 0x92c   :  { %v7666_v33 = vadd.f32 %v7638_v5, %v7566_v42  ;;  %v7368_v47 = vadd.f32 %v7344_v12, %v14704_v43 }
 0x92e   :  { %v7680_v58 = vadd.f32 %v14727_v60, %v7666_v33  ;;  %v7447_v1 = vpop.f32.mrf.mxu1  ;;  %v7468_v10 = vadd.f32 %v7444_v19, %v7368_v47 }
 0x930   :  { %7691 = vst.msk [vmem:[%s14812_s26 + $0x8] sm:$0xff] %vm7689_vm9, %v7680_v58 }
 0x931   :  { %v7541_v25 = vpop.f32.mrf.mxu2 }
 0x932   :  { %v7567_v11 = vadd.f32 %v7541_v25, %v7467_v49  ;;  %v7644_v54 = vpop.f32.mrf.mxu0 }
 0x933   :  { %v7347_v40 = vpop.f32.mrf.mxu3 }
 0x934   :  { %v7667_v6 = vadd.f32 %v7641_v50, %v7567_v11  ;;  %v7369_v16 = vadd.f32 %v7347_v40, %v14709_v31 }
 0x936   :  { %v7681_v8 = vadd.f32 %v14727_v60, %v7667_v6  ;;  %v7450_v56 = vpop.f32.mrf.mxu1  ;;  %v7469_v30 = vadd.f32 %v7447_v1, %v7369_v16 }
 0x938   :  { %7692 = vst.msk [vmem:[%s14812_s26 + $0x10] sm:$0xff] %vm7689_vm9, %v7681_v8 }
 0x939   :  { %v7544_v39 = vpop.f32.mrf.mxu2 }
 0x93a   :  { %v7568_v17 = vadd.f32 %v7544_v39, %v7468_v10  ;;  %v7647_v52 = vpop.f32.mrf.mxu0 }
 0x93b   :  { %v7350_v51 = vpop.f32.mrf.mxu3 }
 0x93c   :  { %v7668_v44 = vadd.f32 %v7644_v54, %v7568_v17  ;;  %v7370_v2 = vadd.f32 %v7350_v51, %v14714_v29 }
 0x93e   :  { %v7682_v26 = vadd.f32 %v14727_v60, %v7668_v44  ;;  %v7470_v31 = vadd.f32 %v7450_v56, %v7370_v2  ;;  %v7453_v35 = vpop.f32.mrf.mxu1 }
 0x940   :  { %7693 = vst.msk [vmem:[%s14812_s26 + $0x18] sm:$0xff] %vm7689_vm9, %v7682_v26 }
 0x941   :  { %v7547_v24 = vpop.f32.mrf.mxu2 }
 0x942   :  { %v7569_v43 = vadd.f32 %v7547_v24, %v7469_v30  ;;  %v7650_v37 = vpop.f32.mrf.mxu0 }
 0x943   :  { %v7353_v59 = vpop.f32.mrf.mxu3 }
 0x944   :  { %v7669_v13 = vadd.f32 %v7647_v52, %v7569_v43  ;;  %v7371_v18 = vadd.f32 %v7353_v59, %v14716_v38 }
 0x946   :  { %v7683_v61 = vadd.f32 %v14727_v60, %v7669_v13  ;;  %v7471_v29 = vadd.f32 %v7453_v35, %v7371_v18  ;;  %v7456_v28 = vpop.f32.mrf.mxu1 }
 0x948   :  { %7694 = vst.msk [vmem:[%s14812_s26 + $0x20] sm:$0xff] %vm7689_vm9, %v7683_v61 }
 0x949   :  { %v7550_v21 = vpop.f32.mrf.mxu2 }
 0x94a   :  { %v7570_v27 = vadd.f32 %v7550_v21, %v7470_v31  ;;  %v7653_v36 = vpop.f32.mrf.mxu0 }
 0x94b   :  { %v7356_v53 = vpop.f32.mrf.mxu3 }
 0x94c   :  { %v7670_v23 = vadd.f32 %v7650_v37, %v7570_v27  ;;  %v7372_v7 = vadd.f32 %v7356_v53, %v14718_v9 }
 0x94e   :  { %v7684_v15 = vadd.f32 %v14727_v60, %v7670_v23  ;;  %v7472_v48 = vadd.f32 %v7456_v28, %v7372_v7  ;;  %v7459_v34 = vpop.f32.mrf.mxu1 }
 0x950   :  { %7695 = vst.msk [vmem:[%s14812_s26 + $0x28] sm:$0xff] %vm7689_vm9, %v7684_v15 }
 0x951   :  { %v7553_v55 = vpop.f32.mrf.mxu2 }
 0x952   :  { %v7571_v46 = vadd.f32 %v7553_v55, %v7471_v29  ;;  %v7656_v38 = vpop.f32.mrf.mxu0 }
 0x953   :  { %v7359_v22 = vpop.f32.mrf.mxu3 }
 0x954   :  { %v7671_v45 = vadd.f32 %v7653_v36, %v7571_v46  ;;  %v7373_v57 = vadd.f32 %v7359_v22, %v14720_v14 }
 0x956   :  { %v7685_v63 = vadd.f32 %v14727_v60, %v7671_v45  ;;  %v7473_v41 = vadd.f32 %v7459_v34, %v7373_v57  ;;  %v7462_v14 = vpop.f32.mrf.mxu1 }
 0x958   :  { %7696 = vst.msk [vmem:[%s14812_s26 + $0x30] sm:$0xff] %vm7689_vm9, %v7685_v63 }
 0x959   :  { %v7556_v20 = vpop.f32.mrf.mxu2 }
 0x95a   :  { %v7572_v5 = vadd.f32 %v7556_v20, %v7472_v48  ;;  %v7659_v9 = vpop.f32.mrf.mxu0 }
 0x95b   :  { %v7362_v3 = vpop.f32.mrf.mxu3 }
 0x95c   :  { %v7672_v62 = vadd.f32 %v7656_v38, %v7572_v5  ;;  %v7374_v19 = vadd.f32 %v7362_v3, %v14722_v32 }
 0x95e   :  { %v7686_v4 = vadd.f32 %v14727_v60, %v7672_v62  ;;  %v7474_v33 = vadd.f32 %v7462_v14, %v7374_v19 }
 0x960   :  { %7697 = vst.msk [vmem:[%s14812_s26 + $0x38] sm:$0xff] %vm7689_vm9, %v7686_v4 }
 0x961   :  { %v7559_v42 = vpop.f32.mrf.mxu2 }
 0x962   :  { %v7573_v50 = vadd.f32 %v7559_v42, %v7473_v41  ;;  %v7662_v25 = vpop.f32.mrf.mxu0 }
 0x964   :  { %v7673_v12 = vadd.f32 %v7659_v9, %v7573_v50 }
 0x966   :  { %v7687_v0 = vadd.f32 %v14727_v60, %v7673_v12 }
 0x968   :  { %7698 = vst.msk [vmem:[%s14812_s26 + $0x40] sm:$0xff] %vm7689_vm9, %v7687_v0 }
 0x969   :  { %v7562_v58 = vpop.f32.mrf.mxu2 }
 0x96a   :  { %v7574_v49 = vadd.f32 %v7562_v58, %v7474_v33 }
 0x96c   :  { %v7674_v11 = vadd.f32 %v7662_v25, %v7574_v49 }
 0x96e   :  { %v7688_v54 = vadd.f32 %v14727_v60, %v7674_v11 }
 0x970   :  { %7699 = vst.msk [vmem:[%s14812_s26 + $0x48] sm:$0xff] %vm7689_vm9, %v7688_v54 }
 0x971   :  { %11102 = dma.done.wait [#allocation8], 64  }
 0x972   :  { %11103 = vsyncadd [#allocation8], 4294967232 }
 0x973   :  { %11104 = dma.done.wait [#allocation10], 64  }
 0x974   :  { %11105 = vsyncadd [#allocation10], 4294967232 }
 0x975   :  { %7734 = vsyncpa [#allocation8], 1 }
 0x976   :  { %7735 = vsyncpa [#allocation10], 1 }

</bundles_post_ra>
